<compile_context>
chip_gen: v5e
topology: v5e:2x2
jax: 0.10.0
libtpu: 0.0.40
codegen_flags: <defaults>
</compile_context>

<pallas_src>
import functools

import numpy as np
import jax
import jax.numpy as jnp
from jax.experimental import pallas as pl
from jax.experimental.pallas import tpu as pltpu

C_IN = 3
C_HID = 32
N_BLOCKS = 4


def _disc_kernel(x_ref, wpre_ref, bpre_ref, wblk_ref, bblk_ref, wpost_ref,
                 bpost_ref, out_ref, pad_ref, pool1_ref, pool2_ref,
                 *, H, W, TB):
    f32 = jnp.float32
    off = W + 8                       # sublane-aligned interior offset

    # Top halo rows [0, off) are only ever read (as zeros) by the dy=-1 conv
    # taps and are never written afterwards -> zero them once per grid step.
    pad_ref[0:off, :] = jnp.zeros((off, 3 * C_HID), f32)

    for t in range(TB):
        # ---- preprocess: 1x1 conv (3 -> 32) as a single K=3 MXU dot --------
        x = x_ref[t]                                               # (H*W, 3)
        feat = jnp.maximum(
            jnp.dot(x, wpre_ref[...], preferred_element_type=f32)
            + bpre_ref[...], 0.0)                                  # (H*W, 32)

        h, w = H, W
        for blk in range(N_BLOCKS):
            n = h * w

            # ---- stage [dx=-1 | dx=0 | dx=+1] views side by side in lanes --
            col = jax.lax.broadcasted_iota(jnp.int32, (n, 1), 0) & (w - 1)
            left_keep = (col != (w - 1)).astype(f32)    # valid source of dx=-1
            right_keep = (col != 0).astype(f32)         # valid source of dx=+1
            zrow = jnp.zeros((1, C_HID), f32)
            # row q of left_grp  holds feat[q-1] (masked at row wrap), etc.
            left_grp = jnp.concatenate(
                [zrow, (feat * left_keep)[:n - 1, :]], axis=0)
            right_grp = jnp.concatenate(
                [(feat * right_keep)[1:, :], zrow], axis=0)
            staged = jnp.concatenate([left_grp, feat, right_grp], axis=1)

            # bottom halo must read zeros for the dy=+1 taps (stale rows from
            # the previous, larger block live there otherwise).
            pad_ref[off + n:off + n + w, :] = jnp.zeros((w, 3 * C_HID), f32)
            pad_ref[off:off + n, :] = staged

            # ---- 3x3 conv (pad=1) as 3 fused K=96 MXU matmuls --------------
            acc = jnp.zeros((n, C_HID), f32)
            for dy_idx, dy in enumerate((-1, 0, 1)):
                start = off + dy * w
                slab = pad_ref[start:start + n, :]                 # (n, 96)
                acc = acc + jnp.dot(slab, wblk_ref[blk, dy_idx],
                                    preferred_element_type=f32)
            feat = jnp.maximum(acc + bblk_ref[blk:blk + 1, :], 0.0)  # (n, 32)

            # ---- 2x2 max pool, stride 2 (strided reads + elementwise max) --
            hh, wh = h // 2, w // 2
            pool1_ref[0:n, :] = feat
            even = pool1_ref[pl.ds(0, n // 2, stride=2), :]   # x-even columns
            odd = pool1_ref[pl.ds(1, n // 2, stride=2), :]    # x-odd columns
            colmax = jnp.maximum(even, odd)                   # (h*wh, 32)
            for i2 in range(hh):                              # y direction
                top = colmax[(2 * i2) * wh:(2 * i2 + 1) * wh, :]
                bot = colmax[(2 * i2 + 1) * wh:(2 * i2 + 2) * wh, :]
                pool2_ref[i2 * wh:(i2 + 1) * wh, :] = jnp.maximum(top, bot)
            feat = pool2_ref[0:hh * wh, :]
            h, w = hh, wh

        # ---- adaptive_avg_pool2d(1) + Linear(32 -> 1) -----------------------
        avg = jnp.sum(feat, axis=0, keepdims=True) * (1.0 / (h * w))  # (1, 32)
        res = (jnp.sum(avg * wpost_ref[...], axis=1, keepdims=True)
               + bpost_ref[...])                                      # (1, 1)
        out_ref[0:1, t:t + 1] = res


def discriminator_forward(x_nchw, params):
    w_pre, b_pre, w_blk, b_blk, w_post, b_post = params
    B, cin, H, W = x_nchw.shape
    assert cin == C_IN and H == W
    assert H >= 16 and (H & (H - 1)) == 0, "spatial side must be a power of two >= 16"

    # batch several images per grid step to amortize per-step overhead
    TB = 1
    for cand in (8, 4, 2, 1):
        if B % cand == 0:
            TB = cand
            break

    # NCHW -> NHWC -> (B, H*W, C)  (glue in plain JAX)
    x_flat = jnp.transpose(x_nchw, (0, 2, 3, 1)).reshape(B, H * W, C_IN)
    x_flat = x_flat.astype(jnp.float32)

    hw = H * W
    pad_rows = hw + 2 * W + 8          # interior + top/bottom halos

    kernel = functools.partial(_disc_kernel, H=H, W=W, TB=TB)
    out = pl.pallas_call(
        kernel,
        out_shape=jax.ShapeDtypeStruct((B // TB, TB), jnp.float32),
        grid_spec=pltpu.PrefetchScalarGridSpec(
            num_scalar_prefetch=0,
            grid=(B // TB,),
            in_specs=[
                pl.BlockSpec((TB, hw, C_IN), lambda g: (g, 0, 0)),
                pl.BlockSpec((C_IN, C_HID), lambda g: (0, 0)),
                pl.BlockSpec((1, C_HID), lambda g: (0, 0)),
                pl.BlockSpec((N_BLOCKS, 3, 3 * C_HID, C_HID),
                             lambda g: (0, 0, 0, 0)),
                pl.BlockSpec((N_BLOCKS, C_HID), lambda g: (0, 0)),
                pl.BlockSpec((1, C_HID), lambda g: (0, 0)),
                pl.BlockSpec((1, 1), lambda g: (0, 0)),
            ],
            out_specs=pl.BlockSpec((1, TB), lambda g: (g, 0)),
            scratch_shapes=[
                pltpu.VMEM((pad_rows, 3 * C_HID), jnp.float32),   # conv staging
                pltpu.VMEM((hw, C_HID), jnp.float32),             # pool stage 1
                pltpu.VMEM((hw // 4, C_HID), jnp.float32),        # pool stage 2
            ],
        ),
        compiler_params=pltpu.CompilerParams(dimension_semantics=("parallel",)),
    )(x_flat, w_pre, b_pre, w_blk, b_blk, w_post, b_post)
    return out.reshape(B, 1)


def _reference(x, torch_params):
    """Pure-JAX re-implementation of the PyTorch forward (for validation)."""
    w_pre_t, b_pre_t, w_blk_t, b_blk_t, w_post_t, b_post_t = torch_params
    dn = ("NCHW", "OIHW", "NCHW")
    out = jax.lax.conv_general_dilated(x, w_pre_t, (1, 1), "VALID",
                                       dimension_numbers=dn)
    out = jax.nn.relu(out + b_pre_t.reshape(1, -1, 1, 1))
    for i in range(N_BLOCKS):
        out = jax.lax.conv_general_dilated(out, w_blk_t[i], (1, 1),
                                           ((1, 1), (1, 1)),
                                           dimension_numbers=dn)
        out = jax.nn.relu(out + b_blk_t[i].reshape(1, -1, 1, 1))
        out = jax.lax.reduce_window(out, -jnp.inf, jax.lax.max,
                                    (1, 1, 2, 2), (1, 1, 2, 2), "VALID")
    avg = out.mean(axis=(2, 3))
    return avg @ w_post_t.T + b_post_t


if __name__ == "__main__":
    key = jax.random.PRNGKey(0)
    ks = jax.random.split(key, 7)
    B, H, W = 2, 16, 16
    x = jax.random.normal(ks[0], (B, C_IN, H, W), jnp.float32)

    # deterministic synthetic parameters (PyTorch layouts)
    w_pre_t = jax.random.normal(ks[1], (C_HID, C_IN, 1, 1), jnp.float32) * 0.2
    b_pre_t = jax.random.normal(ks[2], (C_HID,), jnp.float32) * 0.1
    w_blk_t = jax.random.normal(ks[3], (N_BLOCKS, C_HID, C_HID, 3, 3), jnp.float32) * 0.05
    b_blk_t = jax.random.normal(ks[4], (N_BLOCKS, C_HID), jnp.float32) * 0.1
    w_post_t = jax.random.normal(ks[5], (1, C_HID), jnp.float32) * 0.1
    b_post_t = jax.random.normal(ks[6], (1,), jnp.float32) * 0.1

    # kernel-layout parameters derived from the torch-layout ones
    w_pre = jnp.transpose(w_pre_t[:, :, 0, 0], (1, 0))                  # (3, 32)
    b_pre = b_pre_t.reshape(1, C_HID)                                   # (1, 32)
    # (blk, cout, cin, kh, kw) -> (blk, kh, kw, cin, cout) -> (blk, kh, kw*cin, cout)
    w_blk = jnp.transpose(w_blk_t, (0, 3, 4, 2, 1)).reshape(
        N_BLOCKS, 3, 3 * C_HID, C_HID)
    b_blk = b_blk_t                                                     # (4, 32)
    w_post = w_post_t                                                   # (1, 32)
    b_post = b_post_t.reshape(1, 1)                                     # (1, 1)

    params = (w_pre, b_pre, w_blk, b_blk, w_post, b_post)
    out = jax.jit(discriminator_forward)(x, params)
    out = jax.block_until_ready(out)

    ref = jax.block_until_ready(
        _reference(x, (w_pre_t, b_pre_t, w_blk_t, b_blk_t, w_post_t, b_post_t)))

    if not np.allclose(np.asarray(out), np.asarray(ref), rtol=1e-2, atol=1e-2):
        raise AssertionError(f"kernel/reference mismatch:\n{out}\nvs\n{ref}")
    print("KERNEL_OK")
</pallas_src>

<mosaic_0001>
module attributes {stable_mosaic.version = 11 : i64} {
  func.func @_disc_kernel(%arg0: i32, %arg1: memref<2x256x3xf32, #tpu.memory_space<vmem>>, %arg2: memref<3x32xf32, #tpu.memory_space<vmem>>, %arg3: memref<1x32xf32, #tpu.memory_space<vmem>>, %arg4: memref<4x3x96x32xf32, #tpu.memory_space<vmem>>, %arg5: memref<4x32xf32, #tpu.memory_space<vmem>>, %arg6: memref<1x32xf32, #tpu.memory_space<vmem>>, %arg7: memref<1x1xf32, #tpu.memory_space<vmem>>, %arg8: memref<1x2xf32, #tpu.memory_space<vmem>>, %arg9: memref<296x96xf32, #tpu.memory_space<vmem>>, %arg10: memref<256x32xf32, #tpu.memory_space<vmem>>, %arg11: memref<64x32xf32, #tpu.memory_space<vmem>>) attributes {dimension_semantics = [#tpu.dimension_semantics<parallel>], iteration_bounds = array<i64: 1>, scalar_prefetch = 0 : i64, scratch_operands = 3 : i64, tpu.core_type = #tpu.core_type<tc>, window_params = [{transform_indices = @transform_0, window_bounds = array<i64: 2, 256, 3>}, {pipeline_mode = #tpu.pipeline_mode<synchronous>, transform_indices = @transform_1, window_bounds = array<i64: 3, 32>}, {pipeline_mode = #tpu.pipeline_mode<synchronous>, transform_indices = @transform_2, window_bounds = array<i64: 1, 32>}, {pipeline_mode = #tpu.pipeline_mode<synchronous>, transform_indices = @transform_3, window_bounds = array<i64: 4, 3, 96, 32>}, {pipeline_mode = #tpu.pipeline_mode<synchronous>, transform_indices = @transform_4, window_bounds = array<i64: 4, 32>}, {pipeline_mode = #tpu.pipeline_mode<synchronous>, transform_indices = @transform_5, window_bounds = array<i64: 1, 32>}, {pipeline_mode = #tpu.pipeline_mode<synchronous>, transform_indices = @transform_6, window_bounds = array<i64: 1, 1>}, {transform_indices = @transform_7, window_bounds = array<i64: 1, 2>}]} {
    %cst = arith.constant 0.000000e+00 : f32
    %0 = vector.broadcast %cst : f32 to vector<24x96xf32>
    %c0 = arith.constant 0 : index
    %c0_0 = arith.constant 0 : index
    %1 = vector.load %arg9[%c0, %c0_0] : memref<296x96xf32, #tpu.memory_space<vmem>>, vector<24x96xf32>
    tpu.vector_store %arg9[%c0, %c0_0], %0 {strides = array<i32>} : memref<296x96xf32, #tpu.memory_space<vmem>>, vector<24x96xf32>,
    %c0_1 = arith.constant 0 : index
    %c0_2 = arith.constant 0 : index
    %c0_3 = arith.constant 0 : index
    %2 = vector.load %arg1[%c0_1, %c0_2, %c0_3] : memref<2x256x3xf32, #tpu.memory_space<vmem>>, vector<1x256x3xf32>
    %3 = vector.shape_cast %2 : vector<1x256x3xf32> to vector<256x3xf32>
    %c0_4 = arith.constant 0 : index
    %c0_5 = arith.constant 0 : index
    %4 = vector.load %arg2[%c0_4, %c0_5] : memref<3x32xf32, #tpu.memory_space<vmem>>, vector<3x32xf32>
    %cst_6 = arith.constant dense<0.000000e+00> : vector<256x32xf32>
    %5 = tpu.matmul %3, %4, %cst_6 {dimension_numbers = #tpu.dot_dimension_numbers<[1], [0], [0], [1], [0, 0, 1, 1], [], []>} : vector<256x3xf32>, vector<3x32xf32>, vector<256x32xf32> -> vector<256x32xf32>
    %c0_7 = arith.constant 0 : index
    %c0_8 = arith.constant 0 : index
    %6 = vector.load %arg3[%c0_7, %c0_8] : memref<1x32xf32, #tpu.memory_space<vmem>>, vector<1x32xf32>
    %7 = vector.broadcast %6 : vector<1x32xf32> to vector<256x32xf32>
    %8 = arith.addf %5, %7 : vector<256x32xf32>
    %cst_9 = arith.constant 0.000000e+00 : f32
    %9 = vector.broadcast %cst_9 : f32 to vector<256x32xf32>
    %10 = arith.maximumf %8, %9 : vector<256x32xf32>
    %11 = tpu.iota {dimensions = array<i32: 0>} : vector<256x1xi32>
    %c15_i32 = arith.constant 15 : i32
    %12 = vector.broadcast %c15_i32 : i32 to vector<256x1xi32>
    %13 = arith.andi %11, %12 : vector<256x1xi32>
    %c15_i32_10 = arith.constant 15 : i32
    %14 = vector.broadcast %c15_i32_10 : i32 to vector<256x1xi32>
    %15 = arith.cmpi ne, %13, %14 : vector<256x1xi32>
    %16 = arith.extui %15 : vector<256x1xi1> to vector<256x1xi32>
    %17 = arith.sitofp %16 : vector<256x1xi32> to vector<256x1xf32>
    %c0_i32 = arith.constant 0 : i32
    %18 = vector.broadcast %c0_i32 : i32 to vector<256x1xi32>
    %19 = arith.cmpi ne, %13, %18 : vector<256x1xi32>
    %20 = arith.extui %19 : vector<256x1xi1> to vector<256x1xi32>
    %21 = arith.sitofp %20 : vector<256x1xi32> to vector<256x1xf32>
    %cst_11 = arith.constant 0.000000e+00 : f32
    %22 = vector.broadcast %cst_11 : f32 to vector<1x32xf32>
    %23 = vector.broadcast %17 : vector<256x1xf32> to vector<256x32xf32>
    %24 = arith.mulf %10, %23 : vector<256x32xf32>
    %25 = vector.extract_strided_slice %24 {offsets = [0, 0], sizes = [255, 32], strides = [1, 1]} : vector<256x32xf32> to vector<255x32xf32>
    %26 = tpu.concatenate %22, %25 in 0 : vector<1x32xf32>, vector<255x32xf32> -> vector<256x32xf32>
    %27 = vector.broadcast %21 : vector<256x1xf32> to vector<256x32xf32>
    %28 = arith.mulf %10, %27 : vector<256x32xf32>
    %29 = vector.extract_strided_slice %28 {offsets = [1, 0], sizes = [255, 32], strides = [1, 1]} : vector<256x32xf32> to vector<255x32xf32>
    %30 = tpu.concatenate %29, %22 in 0 : vector<255x32xf32>, vector<1x32xf32> -> vector<256x32xf32>
    %31 = tpu.concatenate %26, %10, %30 in 1 : vector<256x32xf32>, vector<256x32xf32>, vector<256x32xf32> -> vector<256x96xf32>
    %cst_12 = arith.constant 0.000000e+00 : f32
    %32 = vector.broadcast %cst_12 : f32 to vector<16x96xf32>
    %c280 = arith.constant 280 : index
    %c0_13 = arith.constant 0 : index
    %33 = vector.load %arg9[%c280, %c0_13] : memref<296x96xf32, #tpu.memory_space<vmem>>, vector<16x96xf32>
    tpu.vector_store %arg9[%c280, %c0_13], %32 {strides = array<i32>} : memref<296x96xf32, #tpu.memory_space<vmem>>, vector<16x96xf32>,
    %c24 = arith.constant 24 : index
    %c0_14 = arith.constant 0 : index
    %34 = vector.load %arg9[%c24, %c0_14] : memref<296x96xf32, #tpu.memory_space<vmem>>, vector<256x96xf32>
    tpu.vector_store %arg9[%c24, %c0_14], %31 {strides = array<i32>} : memref<296x96xf32, #tpu.memory_space<vmem>>, vector<256x96xf32>,
    %cst_15 = arith.constant 0.000000e+00 : f32
    %35 = vector.broadcast %cst_15 : f32 to vector<256x32xf32>
    %c8 = arith.constant 8 : index
    %c0_16 = arith.constant 0 : index
    %36 = vector.load %arg9[%c8, %c0_16] : memref<296x96xf32, #tpu.memory_space<vmem>>, vector<256x96xf32>
    %c0_17 = arith.constant 0 : index
    %c0_18 = arith.constant 0 : index
    %c0_19 = arith.constant 0 : index
    %c0_20 = arith.constant 0 : index
    %37 = vector.load %arg4[%c0_17, %c0_18, %c0_19, %c0_20] : memref<4x3x96x32xf32, #tpu.memory_space<vmem>>, vector<1x1x96x32xf32>
    %38 = vector.shape_cast %37 : vector<1x1x96x32xf32> to vector<96x32xf32>
    %cst_21 = arith.constant dense<0.000000e+00> : vector<256x32xf32>
    %39 = tpu.matmul %36, %38, %cst_21 {dimension_numbers = #tpu.dot_dimension_numbers<[1], [0], [0], [1], [0, 0, 1, 1], [], []>} : vector<256x96xf32>, vector<96x32xf32>, vector<256x32xf32> -> vector<256x32xf32>
    %40 = arith.addf %35, %39 : vector<256x32xf32>
    %c24_22 = arith.constant 24 : index
    %c0_23 = arith.constant 0 : index
    %41 = vector.load %arg9[%c24_22, %c0_23] : memref<296x96xf32, #tpu.memory_space<vmem>>, vector<256x96xf32>
    %c0_24 = arith.constant 0 : index
    %c1 = arith.constant 1 : index
    %c0_25 = arith.constant 0 : index
    %c0_26 = arith.constant 0 : index
    %42 = vector.load %arg4[%c0_24, %c1, %c0_25, %c0_26] : memref<4x3x96x32xf32, #tpu.memory_space<vmem>>, vector<1x1x96x32xf32>
    %43 = vector.shape_cast %42 : vector<1x1x96x32xf32> to vector<96x32xf32>
    %cst_27 = arith.constant dense<0.000000e+00> : vector<256x32xf32>
    %44 = tpu.matmul %41, %43, %cst_27 {dimension_numbers = #tpu.dot_dimension_numbers<[1], [0], [0], [1], [0, 0, 1, 1], [], []>} : vector<256x96xf32>, vector<96x32xf32>, vector<256x32xf32> -> vector<256x32xf32>
    %45 = arith.addf %40, %44 : vector<256x32xf32>
    %c40 = arith.constant 40 : index
    %c0_28 = arith.constant 0 : index
    %46 = vector.load %arg9[%c40, %c0_28] : memref<296x96xf32, #tpu.memory_space<vmem>>, vector<256x96xf32>
    %c0_29 = arith.constant 0 : index
    %c2 = arith.constant 2 : index
    %c0_30 = arith.constant 0 : index
    %c0_31 = arith.constant 0 : index
    %47 = vector.load %arg4[%c0_29, %c2, %c0_30, %c0_31] : memref<4x3x96x32xf32, #tpu.memory_space<vmem>>, vector<1x1x96x32xf32>
    %48 = vector.shape_cast %47 : vector<1x1x96x32xf32> to vector<96x32xf32>
    %cst_32 = arith.constant dense<0.000000e+00> : vector<256x32xf32>
    %49 = tpu.matmul %46, %48, %cst_32 {dimension_numbers = #tpu.dot_dimension_numbers<[1], [0], [0], [1], [0, 0, 1, 1], [], []>} : vector<256x96xf32>, vector<96x32xf32>, vector<256x32xf32> -> vector<256x32xf32>
    %50 = arith.addf %45, %49 : vector<256x32xf32>
    %c0_33 = arith.constant 0 : index
    %c0_34 = arith.constant 0 : index
    %51 = vector.load %arg5[%c0_33, %c0_34] : memref<4x32xf32, #tpu.memory_space<vmem>>, vector<1x32xf32>
    %52 = vector.broadcast %51 : vector<1x32xf32> to vector<256x32xf32>
    %53 = arith.addf %50, %52 : vector<256x32xf32>
    %cst_35 = arith.constant 0.000000e+00 : f32
    %54 = vector.broadcast %cst_35 : f32 to vector<256x32xf32>
    %55 = arith.maximumf %53, %54 : vector<256x32xf32>
    %c0_36 = arith.constant 0 : index
    %c0_37 = arith.constant 0 : index
    %56 = vector.load %arg10[%c0_36, %c0_37] : memref<256x32xf32, #tpu.memory_space<vmem>>, vector<256x32xf32>
    tpu.vector_store %arg10[%c0_36, %c0_37], %55 {strides = array<i32>} : memref<256x32xf32, #tpu.memory_space<vmem>>, vector<256x32xf32>,
    %c0_38 = arith.constant 0 : index
    %c0_39 = arith.constant 0 : index
    %57 = tpu.strided_load %arg10[%c0_38, %c0_39] {strides = array<i32: 2, 1>} : memref<256x32xf32, #tpu.memory_space<vmem>>, vector<128x32xf32>
    %c1_40 = arith.constant 1 : index
    %c0_41 = arith.constant 0 : index
    %58 = tpu.strided_load %arg10[%c1_40, %c0_41] {strides = array<i32: 2, 1>} : memref<256x32xf32, #tpu.memory_space<vmem>>, vector<128x32xf32>
    %59 = arith.maximumf %57, %58 : vector<128x32xf32>
    %60 = vector.extract_strided_slice %59 {offsets = [0, 0], sizes = [8, 32], strides = [1, 1]} : vector<128x32xf32> to vector<8x32xf32>
    %61 = vector.extract_strided_slice %59 {offsets = [8, 0], sizes = [8, 32], strides = [1, 1]} : vector<128x32xf32> to vector<8x32xf32>
    %62 = arith.maximumf %60, %61 : vector<8x32xf32>
    %c0_42 = arith.constant 0 : index
    %c0_43 = arith.constant 0 : index
    %63 = vector.load %arg11[%c0_42, %c0_43] : memref<64x32xf32, #tpu.memory_space<vmem>>, vector<8x32xf32>
    tpu.vector_store %arg11[%c0_42, %c0_43], %62 {strides = array<i32>} : memref<64x32xf32, #tpu.memory_space<vmem>>, vector<8x32xf32>,
    %64 = vector.extract_strided_slice %59 {offsets = [16, 0], sizes = [8, 32], strides = [1, 1]} : vector<128x32xf32> to vector<8x32xf32>
    %65 = vector.extract_strided_slice %59 {offsets = [24, 0], sizes = [8, 32], strides = [1, 1]} : vector<128x32xf32> to vector<8x32xf32>
    %66 = arith.maximumf %64, %65 : vector<8x32xf32>
    %c8_44 = arith.constant 8 : index
    %c0_45 = arith.constant 0 : index
    %67 = vector.load %arg11[%c8_44, %c0_45] : memref<64x32xf32, #tpu.memory_space<vmem>>, vector<8x32xf32>
    tpu.vector_store %arg11[%c8_44, %c0_45], %66 {strides = array<i32>} : memref<64x32xf32, #tpu.memory_space<vmem>>, vector<8x32xf32>,
    %68 = vector.extract_strided_slice %59 {offsets = [32, 0], sizes = [8, 32], strides = [1, 1]} : vector<128x32xf32> to vector<8x32xf32>
    %69 = vector.extract_strided_slice %59 {offsets = [40, 0], sizes = [8, 32], strides = [1, 1]} : vector<128x32xf32> to vector<8x32xf32>
    %70 = arith.maximumf %68, %69 : vector<8x32xf32>
    %c16 = arith.constant 16 : index
    %c0_46 = arith.constant 0 : index
    %71 = vector.load %arg11[%c16, %c0_46] : memref<64x32xf32, #tpu.memory_space<vmem>>, vector<8x32xf32>
    tpu.vector_store %arg11[%c16, %c0_46], %70 {strides = array<i32>} : memref<64x32xf32, #tpu.memory_space<vmem>>, vector<8x32xf32>,
    %72 = vector.extract_strided_slice %59 {offsets = [48, 0], sizes = [8, 32], strides = [1, 1]} : vector<128x32xf32> to vector<8x32xf32>
    %73 = vector.extract_strided_slice %59 {offsets = [56, 0], sizes = [8, 32], strides = [1, 1]} : vector<128x32xf32> to vector<8x32xf32>
    %74 = arith.maximumf %72, %73 : vector<8x32xf32>
    %c24_47 = arith.constant 24 : index
    %c0_48 = arith.constant 0 : index
    %75 = vector.load %arg11[%c24_47, %c0_48] : memref<64x32xf32, #tpu.memory_space<vmem>>, vector<8x32xf32>
    tpu.vector_store %arg11[%c24_47, %c0_48], %74 {strides = array<i32>} : memref<64x32xf32, #tpu.memory_space<vmem>>, vector<8x32xf32>,
    %76 = vector.extract_strided_slice %59 {offsets = [64, 0], sizes = [8, 32], strides = [1, 1]} : vector<128x32xf32> to vector<8x32xf32>
    %77 = vector.extract_strided_slice %59 {offsets = [72, 0], sizes = [8, 32], strides = [1, 1]} : vector<128x32xf32> to vector<8x32xf32>
    %78 = arith.maximumf %76, %77 : vector<8x32xf32>
    %c32 = arith.constant 32 : index
    %c0_49 = arith.constant 0 : index
    %79 = vector.load %arg11[%c32, %c0_49] : memref<64x32xf32, #tpu.memory_space<vmem>>, vector<8x32xf32>
    tpu.vector_store %arg11[%c32, %c0_49], %78 {strides = array<i32>} : memref<64x32xf32, #tpu.memory_space<vmem>>, vector<8x32xf32>,
    %80 = vector.extract_strided_slice %59 {offsets = [80, 0], sizes = [8, 32], strides = [1, 1]} : vector<128x32xf32> to vector<8x32xf32>
    %81 = vector.extract_strided_slice %59 {offsets = [88, 0], sizes = [8, 32], strides = [1, 1]} : vector<128x32xf32> to vector<8x32xf32>
    %82 = arith.maximumf %80, %81 : vector<8x32xf32>
    %c40_50 = arith.constant 40 : index
    %c0_51 = arith.constant 0 : index
    %83 = vector.load %arg11[%c40_50, %c0_51] : memref<64x32xf32, #tpu.memory_space<vmem>>, vector<8x32xf32>
    tpu.vector_store %arg11[%c40_50, %c0_51], %82 {strides = array<i32>} : memref<64x32xf32, #tpu.memory_space<vmem>>, vector<8x32xf32>,
    %84 = vector.extract_strided_slice %59 {offsets = [96, 0], sizes = [8, 32], strides = [1, 1]} : vector<128x32xf32> to vector<8x32xf32>
    %85 = vector.extract_strided_slice %59 {offsets = [104, 0], sizes = [8, 32], strides = [1, 1]} : vector<128x32xf32> to vector<8x32xf32>
    %86 = arith.maximumf %84, %85 : vector<8x32xf32>
    %c48 = arith.constant 48 : index
    %c0_52 = arith.constant 0 : index
    %87 = vector.load %arg11[%c48, %c0_52] : memref<64x32xf32, #tpu.memory_space<vmem>>, vector<8x32xf32>
    tpu.vector_store %arg11[%c48, %c0_52], %86 {strides = array<i32>} : memref<64x32xf32, #tpu.memory_space<vmem>>, vector<8x32xf32>,
    %88 = vector.extract_strided_slice %59 {offsets = [112, 0], sizes = [8, 32], strides = [1, 1]} : vector<128x32xf32> to vector<8x32xf32>
    %89 = vector.extract_strided_slice %59 {offsets = [120, 0], sizes = [8, 32], strides = [1, 1]} : vector<128x32xf32> to vector<8x32xf32>
    %90 = arith.maximumf %88, %89 : vector<8x32xf32>
    %c56 = arith.constant 56 : index
    %c0_53 = arith.constant 0 : index
    %91 = vector.load %arg11[%c56, %c0_53] : memref<64x32xf32, #tpu.memory_space<vmem>>, vector<8x32xf32>
    tpu.vector_store %arg11[%c56, %c0_53], %90 {strides = array<i32>} : memref<64x32xf32, #tpu.memory_space<vmem>>, vector<8x32xf32>,
    %c0_54 = arith.constant 0 : index
    %c0_55 = arith.constant 0 : index
    %92 = vector.load %arg11[%c0_54, %c0_55] : memref<64x32xf32, #tpu.memory_space<vmem>>, vector<64x32xf32>
    %93 = tpu.iota {dimensions = array<i32: 0>} : vector<64x1xi32>
    %c7_i32 = arith.constant 7 : i32
    %94 = vector.broadcast %c7_i32 : i32 to vector<64x1xi32>
    %95 = arith.andi %93, %94 : vector<64x1xi32>
    %c7_i32_56 = arith.constant 7 : i32
    %96 = vector.broadcast %c7_i32_56 : i32 to vector<64x1xi32>
    %97 = arith.cmpi ne, %95, %96 : vector<64x1xi32>
    %98 = arith.extui %97 : vector<64x1xi1> to vector<64x1xi32>
    %99 = arith.sitofp %98 : vector<64x1xi32> to vector<64x1xf32>
    %c0_i32_57 = arith.constant 0 : i32
    %100 = vector.broadcast %c0_i32_57 : i32 to vector<64x1xi32>
    %101 = arith.cmpi ne, %95, %100 : vector<64x1xi32>
    %102 = arith.extui %101 : vector<64x1xi1> to vector<64x1xi32>
    %103 = arith.sitofp %102 : vector<64x1xi32> to vector<64x1xf32>
    %cst_58 = arith.constant 0.000000e+00 : f32
    %104 = vector.broadcast %cst_58 : f32 to vector<1x32xf32>
    %105 = vector.broadcast %99 : vector<64x1xf32> to vector<64x32xf32>
    %106 = arith.mulf %92, %105 : vector<64x32xf32>
    %107 = vector.extract_strided_slice %106 {offsets = [0, 0], sizes = [63, 32], strides = [1, 1]} : vector<64x32xf32> to vector<63x32xf32>
    %108 = tpu.concatenate %104, %107 in 0 : vector<1x32xf32>, vector<63x32xf32> -> vector<64x32xf32>
    %109 = vector.broadcast %103 : vector<64x1xf32> to vector<64x32xf32>
    %110 = arith.mulf %92, %109 : vector<64x32xf32>
    %111 = vector.extract_strided_slice %110 {offsets = [1, 0], sizes = [63, 32], strides = [1, 1]} : vector<64x32xf32> to vector<63x32xf32>
    %112 = tpu.concatenate %111, %104 in 0 : vector<63x32xf32>, vector<1x32xf32> -> vector<64x32xf32>
    %113 = tpu.concatenate %108, %92, %112 in 1 : vector<64x32xf32>, vector<64x32xf32>, vector<64x32xf32> -> vector<64x96xf32>
    %cst_59 = arith.constant 0.000000e+00 : f32
    %114 = vector.broadcast %cst_59 : f32 to vector<8x96xf32>
    %c88 = arith.constant 88 : index
    %c0_60 = arith.constant 0 : index
    %115 = vector.load %arg9[%c88, %c0_60] : memref<296x96xf32, #tpu.memory_space<vmem>>, vector<8x96xf32>
    tpu.vector_store %arg9[%c88, %c0_60], %114 {strides = array<i32>} : memref<296x96xf32, #tpu.memory_space<vmem>>, vector<8x96xf32>,
    %c24_61 = arith.constant 24 : index
    %c0_62 = arith.constant 0 : index
    %116 = vector.load %arg9[%c24_61, %c0_62] : memref<296x96xf32, #tpu.memory_space<vmem>>, vector<64x96xf32>
    tpu.vector_store %arg9[%c24_61, %c0_62], %113 {strides = array<i32>} : memref<296x96xf32, #tpu.memory_space<vmem>>, vector<64x96xf32>,
    %cst_63 = arith.constant 0.000000e+00 : f32
    %117 = vector.broadcast %cst_63 : f32 to vector<64x32xf32>
    %c16_64 = arith.constant 16 : index
    %c0_65 = arith.constant 0 : index
    %118 = vector.load %arg9[%c16_64, %c0_65] : memref<296x96xf32, #tpu.memory_space<vmem>>, vector<64x96xf32>
    %c1_66 = arith.constant 1 : index
    %c0_67 = arith.constant 0 : index
    %c0_68 = arith.constant 0 : index
    %c0_69 = arith.constant 0 : index
    %119 = vector.load %arg4[%c1_66, %c0_67, %c0_68, %c0_69] : memref<4x3x96x32xf32, #tpu.memory_space<vmem>>, vector<1x1x96x32xf32>
    %120 = vector.shape_cast %119 : vector<1x1x96x32xf32> to vector<96x32xf32>
    %cst_70 = arith.constant dense<0.000000e+00> : vector<64x32xf32>
    %121 = tpu.matmul %118, %120, %cst_70 {dimension_numbers = #tpu.dot_dimension_numbers<[1], [0], [0], [1], [0, 0, 1, 1], [], []>} : vector<64x96xf32>, vector<96x32xf32>, vector<64x32xf32> -> vector<64x32xf32>
    %122 = arith.addf %117, %121 : vector<64x32xf32>
    %c24_71 = arith.constant 24 : index
    %c0_72 = arith.constant 0 : index
    %123 = vector.load %arg9[%c24_71, %c0_72] : memref<296x96xf32, #tpu.memory_space<vmem>>, vector<64x96xf32>
    %c1_73 = arith.constant 1 : index
    %c1_74 = arith.constant 1 : index
    %c0_75 = arith.constant 0 : index
    %c0_76 = arith.constant 0 : index
    %124 = vector.load %arg4[%c1_73, %c1_74, %c0_75, %c0_76] : memref<4x3x96x32xf32, #tpu.memory_space<vmem>>, vector<1x1x96x32xf32>
    %125 = vector.shape_cast %124 : vector<1x1x96x32xf32> to vector<96x32xf32>
    %cst_77 = arith.constant dense<0.000000e+00> : vector<64x32xf32>
    %126 = tpu.matmul %123, %125, %cst_77 {dimension_numbers = #tpu.dot_dimension_numbers<[1], [0], [0], [1], [0, 0, 1, 1], [], []>} : vector<64x96xf32>, vector<96x32xf32>, vector<64x32xf32> -> vector<64x32xf32>
    %127 = arith.addf %122, %126 : vector<64x32xf32>
    %c32_78 = arith.constant 32 : index
    %c0_79 = arith.constant 0 : index
    %128 = vector.load %arg9[%c32_78, %c0_79] : memref<296x96xf32, #tpu.memory_space<vmem>>, vector<64x96xf32>
    %c1_80 = arith.constant 1 : index
    %c2_81 = arith.constant 2 : index
    %c0_82 = arith.constant 0 : index
    %c0_83 = arith.constant 0 : index
    %129 = vector.load %arg4[%c1_80, %c2_81, %c0_82, %c0_83] : memref<4x3x96x32xf32, #tpu.memory_space<vmem>>, vector<1x1x96x32xf32>
    %130 = vector.shape_cast %129 : vector<1x1x96x32xf32> to vector<96x32xf32>
    %cst_84 = arith.constant dense<0.000000e+00> : vector<64x32xf32>
    %131 = tpu.matmul %128, %130, %cst_84 {dimension_numbers = #tpu.dot_dimension_numbers<[1], [0], [0], [1], [0, 0, 1, 1], [], []>} : vector<64x96xf32>, vector<96x32xf32>, vector<64x32xf32> -> vector<64x32xf32>
    %132 = arith.addf %127, %131 : vector<64x32xf32>
    %c1_85 = arith.constant 1 : index
    %c0_86 = arith.constant 0 : index
    %133 = vector.load %arg5[%c1_85, %c0_86] : memref<4x32xf32, #tpu.memory_space<vmem>>, vector<1x32xf32>
    %134 = vector.broadcast %133 : vector<1x32xf32> to vector<64x32xf32>
    %135 = arith.addf %132, %134 : vector<64x32xf32>
    %cst_87 = arith.constant 0.000000e+00 : f32
    %136 = vector.broadcast %cst_87 : f32 to vector<64x32xf32>
    %137 = arith.maximumf %135, %136 : vector<64x32xf32>
    %c0_88 = arith.constant 0 : index
    %c0_89 = arith.constant 0 : index
    %138 = vector.load %arg10[%c0_88, %c0_89] : memref<256x32xf32, #tpu.memory_space<vmem>>, vector<64x32xf32>
    tpu.vector_store %arg10[%c0_88, %c0_89], %137 {strides = array<i32>} : memref<256x32xf32, #tpu.memory_space<vmem>>, vector<64x32xf32>,
    %c0_90 = arith.constant 0 : index
    %c0_91 = arith.constant 0 : index
    %139 = tpu.strided_load %arg10[%c0_90, %c0_91] {strides = array<i32: 2, 1>} : memref<256x32xf32, #tpu.memory_space<vmem>>, vector<32x32xf32>
    %c1_92 = arith.constant 1 : index
    %c0_93 = arith.constant 0 : index
    %140 = tpu.strided_load %arg10[%c1_92, %c0_93] {strides = array<i32: 2, 1>} : memref<256x32xf32, #tpu.memory_space<vmem>>, vector<32x32xf32>
    %141 = arith.maximumf %139, %140 : vector<32x32xf32>
    %142 = vector.extract_strided_slice %141 {offsets = [0, 0], sizes = [4, 32], strides = [1, 1]} : vector<32x32xf32> to vector<4x32xf32>
    %143 = vector.extract_strided_slice %141 {offsets = [4, 0], sizes = [4, 32], strides = [1, 1]} : vector<32x32xf32> to vector<4x32xf32>
    %144 = arith.maximumf %142, %143 : vector<4x32xf32>
    %c0_94 = arith.constant 0 : index
    %c0_95 = arith.constant 0 : index
    %145 = vector.load %arg11[%c0_94, %c0_95] : memref<64x32xf32, #tpu.memory_space<vmem>>, vector<4x32xf32>
    tpu.vector_store %arg11[%c0_94, %c0_95], %144 {strides = array<i32>} : memref<64x32xf32, #tpu.memory_space<vmem>>, vector<4x32xf32>,
    %146 = vector.extract_strided_slice %141 {offsets = [8, 0], sizes = [4, 32], strides = [1, 1]} : vector<32x32xf32> to vector<4x32xf32>
    %147 = vector.extract_strided_slice %141 {offsets = [12, 0], sizes = [4, 32], strides = [1, 1]} : vector<32x32xf32> to vector<4x32xf32>
    %148 = arith.maximumf %146, %147 : vector<4x32xf32>
    %c4 = arith.constant 4 : index
    %c0_96 = arith.constant 0 : index
    %149 = vector.load %arg11[%c4, %c0_96] : memref<64x32xf32, #tpu.memory_space<vmem>>, vector<4x32xf32>
    tpu.vector_store %arg11[%c4, %c0_96], %148 {strides = array<i32>} : memref<64x32xf32, #tpu.memory_space<vmem>>, vector<4x32xf32>,
    %150 = vector.extract_strided_slice %141 {offsets = [16, 0], sizes = [4, 32], strides = [1, 1]} : vector<32x32xf32> to vector<4x32xf32>
    %151 = vector.extract_strided_slice %141 {offsets = [20, 0], sizes = [4, 32], strides = [1, 1]} : vector<32x32xf32> to vector<4x32xf32>
    %152 = arith.maximumf %150, %151 : vector<4x32xf32>
    %c8_97 = arith.constant 8 : index
    %c0_98 = arith.constant 0 : index
    %153 = vector.load %arg11[%c8_97, %c0_98] : memref<64x32xf32, #tpu.memory_space<vmem>>, vector<4x32xf32>
    tpu.vector_store %arg11[%c8_97, %c0_98], %152 {strides = array<i32>} : memref<64x32xf32, #tpu.memory_space<vmem>>, vector<4x32xf32>,
    %154 = vector.extract_strided_slice %141 {offsets = [24, 0], sizes = [4, 32], strides = [1, 1]} : vector<32x32xf32> to vector<4x32xf32>
    %155 = vector.extract_strided_slice %141 {offsets = [28, 0], sizes = [4, 32], strides = [1, 1]} : vector<32x32xf32> to vector<4x32xf32>
    %156 = arith.maximumf %154, %155 : vector<4x32xf32>
    %c12 = arith.constant 12 : index
    %c0_99 = arith.constant 0 : index
    %157 = vector.load %arg11[%c12, %c0_99] : memref<64x32xf32, #tpu.memory_space<vmem>>, vector<4x32xf32>
    tpu.vector_store %arg11[%c12, %c0_99], %156 {strides = array<i32>} : memref<64x32xf32, #tpu.memory_space<vmem>>, vector<4x32xf32>,
    %c0_100 = arith.constant 0 : index
    %c0_101 = arith.constant 0 : index
    %158 = vector.load %arg11[%c0_100, %c0_101] : memref<64x32xf32, #tpu.memory_space<vmem>>, vector<16x32xf32>
    %159 = tpu.iota {dimensions = array<i32: 0>} : vector<16x1xi32>
    %c3_i32 = arith.constant 3 : i32
    %160 = vector.broadcast %c3_i32 : i32 to vector<16x1xi32>
    %161 = arith.andi %159, %160 : vector<16x1xi32>
    %c3_i32_102 = arith.constant 3 : i32
    %162 = vector.broadcast %c3_i32_102 : i32 to vector<16x1xi32>
    %163 = arith.cmpi ne, %161, %162 : vector<16x1xi32>
    %164 = arith.extui %163 : vector<16x1xi1> to vector<16x1xi32>
    %165 = arith.sitofp %164 : vector<16x1xi32> to vector<16x1xf32>
    %c0_i32_103 = arith.constant 0 : i32
    %166 = vector.broadcast %c0_i32_103 : i32 to vector<16x1xi32>
    %167 = arith.cmpi ne, %161, %166 : vector<16x1xi32>
    %168 = arith.extui %167 : vector<16x1xi1> to vector<16x1xi32>
    %169 = arith.sitofp %168 : vector<16x1xi32> to vector<16x1xf32>
    %cst_104 = arith.constant 0.000000e+00 : f32
    %170 = vector.broadcast %cst_104 : f32 to vector<1x32xf32>
    %171 = vector.broadcast %165 : vector<16x1xf32> to vector<16x32xf32>
    %172 = arith.mulf %158, %171 : vector<16x32xf32>
    %173 = vector.extract_strided_slice %172 {offsets = [0, 0], sizes = [15, 32], strides = [1, 1]} : vector<16x32xf32> to vector<15x32xf32>
    %174 = tpu.concatenate %170, %173 in 0 : vector<1x32xf32>, vector<15x32xf32> -> vector<16x32xf32>
    %175 = vector.broadcast %169 : vector<16x1xf32> to vector<16x32xf32>
    %176 = arith.mulf %158, %175 : vector<16x32xf32>
    %177 = vector.extract_strided_slice %176 {offsets = [1, 0], sizes = [15, 32], strides = [1, 1]} : vector<16x32xf32> to vector<15x32xf32>
    %178 = tpu.concatenate %177, %170 in 0 : vector<15x32xf32>, vector<1x32xf32> -> vector<16x32xf32>
    %179 = tpu.concatenate %174, %158, %178 in 1 : vector<16x32xf32>, vector<16x32xf32>, vector<16x32xf32> -> vector<16x96xf32>
    %cst_105 = arith.constant 0.000000e+00 : f32
    %180 = vector.broadcast %cst_105 : f32 to vector<4x96xf32>
    %c40_106 = arith.constant 40 : index
    %c0_107 = arith.constant 0 : index
    %181 = vector.load %arg9[%c40_106, %c0_107] : memref<296x96xf32, #tpu.memory_space<vmem>>, vector<4x96xf32>
    tpu.vector_store %arg9[%c40_106, %c0_107], %180 {strides = array<i32>} : memref<296x96xf32, #tpu.memory_space<vmem>>, vector<4x96xf32>,
    %c24_108 = arith.constant 24 : index
    %c0_109 = arith.constant 0 : index
    %182 = vector.load %arg9[%c24_108, %c0_109] : memref<296x96xf32, #tpu.memory_space<vmem>>, vector<16x96xf32>
    tpu.vector_store %arg9[%c24_108, %c0_109], %179 {strides = array<i32>} : memref<296x96xf32, #tpu.memory_space<vmem>>, vector<16x96xf32>,
    %cst_110 = arith.constant 0.000000e+00 : f32
    %183 = vector.broadcast %cst_110 : f32 to vector<16x32xf32>
    %c20 = arith.constant 20 : index
    %c0_111 = arith.constant 0 : index
    %184 = vector.load %arg9[%c20, %c0_111] : memref<296x96xf32, #tpu.memory_space<vmem>>, vector<16x96xf32>
    %c2_112 = arith.constant 2 : index
    %c0_113 = arith.constant 0 : index
    %c0_114 = arith.constant 0 : index
    %c0_115 = arith.constant 0 : index
    %185 = vector.load %arg4[%c2_112, %c0_113, %c0_114, %c0_115] : memref<4x3x96x32xf32, #tpu.memory_space<vmem>>, vector<1x1x96x32xf32>
    %186 = vector.shape_cast %185 : vector<1x1x96x32xf32> to vector<96x32xf32>
    %cst_116 = arith.constant dense<0.000000e+00> : vector<16x32xf32>
    %187 = tpu.matmul %184, %186, %cst_116 {dimension_numbers = #tpu.dot_dimension_numbers<[1], [0], [0], [1], [0, 0, 1, 1], [], []>} : vector<16x96xf32>, vector<96x32xf32>, vector<16x32xf32> -> vector<16x32xf32>
    %188 = arith.addf %183, %187 : vector<16x32xf32>
    %c24_117 = arith.constant 24 : index
    %c0_118 = arith.constant 0 : index
    %189 = vector.load %arg9[%c24_117, %c0_118] : memref<296x96xf32, #tpu.memory_space<vmem>>, vector<16x96xf32>
    %c2_119 = arith.constant 2 : index
    %c1_120 = arith.constant 1 : index
    %c0_121 = arith.constant 0 : index
    %c0_122 = arith.constant 0 : index
    %190 = vector.load %arg4[%c2_119, %c1_120, %c0_121, %c0_122] : memref<4x3x96x32xf32, #tpu.memory_space<vmem>>, vector<1x1x96x32xf32>
    %191 = vector.shape_cast %190 : vector<1x1x96x32xf32> to vector<96x32xf32>
    %cst_123 = arith.constant dense<0.000000e+00> : vector<16x32xf32>
    %192 = tpu.matmul %189, %191, %cst_123 {dimension_numbers = #tpu.dot_dimension_numbers<[1], [0], [0], [1], [0, 0, 1, 1], [], []>} : vector<16x96xf32>, vector<96x32xf32>, vector<16x32xf32> -> vector<16x32xf32>
    %193 = arith.addf %188, %192 : vector<16x32xf32>
    %c28 = arith.constant 28 : index
    %c0_124 = arith.constant 0 : index
    %194 = vector.load %arg9[%c28, %c0_124] : memref<296x96xf32, #tpu.memory_space<vmem>>, vector<16x96xf32>
    %c2_125 = arith.constant 2 : index
    %c2_126 = arith.constant 2 : index
    %c0_127 = arith.constant 0 : index
    %c0_128 = arith.constant 0 : index
    %195 = vector.load %arg4[%c2_125, %c2_126, %c0_127, %c0_128] : memref<4x3x96x32xf32, #tpu.memory_space<vmem>>, vector<1x1x96x32xf32>
    %196 = vector.shape_cast %195 : vector<1x1x96x32xf32> to vector<96x32xf32>
    %cst_129 = arith.constant dense<0.000000e+00> : vector<16x32xf32>
    %197 = tpu.matmul %194, %196, %cst_129 {dimension_numbers = #tpu.dot_dimension_numbers<[1], [0], [0], [1], [0, 0, 1, 1], [], []>} : vector<16x96xf32>, vector<96x32xf32>, vector<16x32xf32> -> vector<16x32xf32>
    %198 = arith.addf %193, %197 : vector<16x32xf32>
    %c2_130 = arith.constant 2 : index
    %c0_131 = arith.constant 0 : index
    %199 = vector.load %arg5[%c2_130, %c0_131] : memref<4x32xf32, #tpu.memory_space<vmem>>, vector<1x32xf32>
    %200 = vector.broadcast %199 : vector<1x32xf32> to vector<16x32xf32>
    %201 = arith.addf %198, %200 : vector<16x32xf32>
    %cst_132 = arith.constant 0.000000e+00 : f32
    %202 = vector.broadcast %cst_132 : f32 to vector<16x32xf32>
    %203 = arith.maximumf %201, %202 : vector<16x32xf32>
    %c0_133 = arith.constant 0 : index
    %c0_134 = arith.constant 0 : index
    %204 = vector.load %arg10[%c0_133, %c0_134] : memref<256x32xf32, #tpu.memory_space<vmem>>, vector<16x32xf32>
    tpu.vector_store %arg10[%c0_133, %c0_134], %203 {strides = array<i32>} : memref<256x32xf32, #tpu.memory_space<vmem>>, vector<16x32xf32>,
    %c0_135 = arith.constant 0 : index
    %c0_136 = arith.constant 0 : index
    %205 = tpu.strided_load %arg10[%c0_135, %c0_136] {strides = array<i32: 2, 1>} : memref<256x32xf32, #tpu.memory_space<vmem>>, vector<8x32xf32>
    %c1_137 = arith.constant 1 : index
    %c0_138 = arith.constant 0 : index
    %206 = tpu.strided_load %arg10[%c1_137, %c0_138] {strides = array<i32: 2, 1>} : memref<256x32xf32, #tpu.memory_space<vmem>>, vector<8x32xf32>
    %207 = arith.maximumf %205, %206 : vector<8x32xf32>
    %208 = vector.extract_strided_slice %207 {offsets = [0, 0], sizes = [2, 32], strides = [1, 1]} : vector<8x32xf32> to vector<2x32xf32>
    %209 = vector.extract_strided_slice %207 {offsets = [2, 0], sizes = [2, 32], strides = [1, 1]} : vector<8x32xf32> to vector<2x32xf32>
    %210 = arith.maximumf %208, %209 : vector<2x32xf32>
    %c0_139 = arith.constant 0 : index
    %c0_140 = arith.constant 0 : index
    %211 = vector.load %arg11[%c0_139, %c0_140] : memref<64x32xf32, #tpu.memory_space<vmem>>, vector<2x32xf32>
    tpu.vector_store %arg11[%c0_139, %c0_140], %210 {strides = array<i32>} : memref<64x32xf32, #tpu.memory_space<vmem>>, vector<2x32xf32>,
    %212 = vector.extract_strided_slice %207 {offsets = [4, 0], sizes = [2, 32], strides = [1, 1]} : vector<8x32xf32> to vector<2x32xf32>
    %213 = vector.extract_strided_slice %207 {offsets = [6, 0], sizes = [2, 32], strides = [1, 1]} : vector<8x32xf32> to vector<2x32xf32>
    %214 = arith.maximumf %212, %213 : vector<2x32xf32>
    %c2_141 = arith.constant 2 : index
    %c0_142 = arith.constant 0 : index
    %215 = vector.load %arg11[%c2_141, %c0_142] : memref<64x32xf32, #tpu.memory_space<vmem>>, vector<2x32xf32>
    tpu.vector_store %arg11[%c2_141, %c0_142], %214 {strides = array<i32>} : memref<64x32xf32, #tpu.memory_space<vmem>>, vector<2x32xf32>,
    %c0_143 = arith.constant 0 : index
    %c0_144 = arith.constant 0 : index
    %216 = vector.load %arg11[%c0_143, %c0_144] : memref<64x32xf32, #tpu.memory_space<vmem>>, vector<4x32xf32>
    %217 = tpu.iota {dimensions = array<i32: 0>} : vector<4x1xi32>
    %c1_i32 = arith.constant 1 : i32
    %218 = vector.broadcast %c1_i32 : i32 to vector<4x1xi32>
    %219 = arith.andi %217, %218 : vector<4x1xi32>
    %c1_i32_145 = arith.constant 1 : i32
    %220 = vector.broadcast %c1_i32_145 : i32 to vector<4x1xi32>
    %221 = arith.cmpi ne, %219, %220 : vector<4x1xi32>
    %222 = arith.extui %221 : vector<4x1xi1> to vector<4x1xi32>
    %223 = arith.sitofp %222 : vector<4x1xi32> to vector<4x1xf32>
    %c0_i32_146 = arith.constant 0 : i32
    %224 = vector.broadcast %c0_i32_146 : i32 to vector<4x1xi32>
    %225 = arith.cmpi ne, %219, %224 : vector<4x1xi32>
    %226 = arith.extui %225 : vector<4x1xi1> to vector<4x1xi32>
    %227 = arith.sitofp %226 : vector<4x1xi32> to vector<4x1xf32>
    %cst_147 = arith.constant 0.000000e+00 : f32
    %228 = vector.broadcast %cst_147 : f32 to vector<1x32xf32>
    %229 = vector.broadcast %223 : vector<4x1xf32> to vector<4x32xf32>
    %230 = arith.mulf %216, %229 : vector<4x32xf32>
    %231 = vector.extract_strided_slice %230 {offsets = [0, 0], sizes = [3, 32], strides = [1, 1]} : vector<4x32xf32> to vector<3x32xf32>
    %232 = tpu.concatenate %228, %231 in 0 : vector<1x32xf32>, vector<3x32xf32> -> vector<4x32xf32>
    %233 = vector.broadcast %227 : vector<4x1xf32> to vector<4x32xf32>
    %234 = arith.mulf %216, %233 : vector<4x32xf32>
    %235 = vector.extract_strided_slice %234 {offsets = [1, 0], sizes = [3, 32], strides = [1, 1]} : vector<4x32xf32> to vector<3x32xf32>
    %236 = tpu.concatenate %235, %228 in 0 : vector<3x32xf32>, vector<1x32xf32> -> vector<4x32xf32>
    %237 = tpu.concatenate %232, %216, %236 in 1 : vector<4x32xf32>, vector<4x32xf32>, vector<4x32xf32> -> vector<4x96xf32>
    %cst_148 = arith.constant 0.000000e+00 : f32
    %238 = vector.broadcast %cst_148 : f32 to vector<2x96xf32>
    %c28_149 = arith.constant 28 : index
    %c0_150 = arith.constant 0 : index
    %239 = vector.load %arg9[%c28_149, %c0_150] : memref<296x96xf32, #tpu.memory_space<vmem>>, vector<2x96xf32>
    tpu.vector_store %arg9[%c28_149, %c0_150], %238 {strides = array<i32>} : memref<296x96xf32, #tpu.memory_space<vmem>>, vector<2x96xf32>,
    %c24_151 = arith.constant 24 : index
    %c0_152 = arith.constant 0 : index
    %240 = vector.load %arg9[%c24_151, %c0_152] : memref<296x96xf32, #tpu.memory_space<vmem>>, vector<4x96xf32>
    tpu.vector_store %arg9[%c24_151, %c0_152], %237 {strides = array<i32>} : memref<296x96xf32, #tpu.memory_space<vmem>>, vector<4x96xf32>,
    %cst_153 = arith.constant 0.000000e+00 : f32
    %241 = vector.broadcast %cst_153 : f32 to vector<4x32xf32>
    %c22 = arith.constant 22 : index
    %c0_154 = arith.constant 0 : index
    %242 = vector.load %arg9[%c22, %c0_154] : memref<296x96xf32, #tpu.memory_space<vmem>>, vector<4x96xf32>
    %c3 = arith.constant 3 : index
    %c0_155 = arith.constant 0 : index
    %c0_156 = arith.constant 0 : index
    %c0_157 = arith.constant 0 : index
    %243 = vector.load %arg4[%c3, %c0_155, %c0_156, %c0_157] : memref<4x3x96x32xf32, #tpu.memory_space<vmem>>, vector<1x1x96x32xf32>
    %244 = vector.shape_cast %243 : vector<1x1x96x32xf32> to vector<96x32xf32>
    %cst_158 = arith.constant dense<0.000000e+00> : vector<4x32xf32>
    %245 = tpu.matmul %242, %244, %cst_158 {dimension_numbers = #tpu.dot_dimension_numbers<[1], [0], [0], [1], [0, 0, 1, 1], [], []>} : vector<4x96xf32>, vector<96x32xf32>, vector<4x32xf32> -> vector<4x32xf32>
    %246 = arith.addf %241, %245 : vector<4x32xf32>
    %c24_159 = arith.constant 24 : index
    %c0_160 = arith.constant 0 : index
    %247 = vector.load %arg9[%c24_159, %c0_160] : memref<296x96xf32, #tpu.memory_space<vmem>>, vector<4x96xf32>
    %c3_161 = arith.constant 3 : index
    %c1_162 = arith.constant 1 : index
    %c0_163 = arith.constant 0 : index
    %c0_164 = arith.constant 0 : index
    %248 = vector.load %arg4[%c3_161, %c1_162, %c0_163, %c0_164] : memref<4x3x96x32xf32, #tpu.memory_space<vmem>>, vector<1x1x96x32xf32>
    %249 = vector.shape_cast %248 : vector<1x1x96x32xf32> to vector<96x32xf32>
    %cst_165 = arith.constant dense<0.000000e+00> : vector<4x32xf32>
    %250 = tpu.matmul %247, %249, %cst_165 {dimension_numbers = #tpu.dot_dimension_numbers<[1], [0], [0], [1], [0, 0, 1, 1], [], []>} : vector<4x96xf32>, vector<96x32xf32>, vector<4x32xf32> -> vector<4x32xf32>
    %251 = arith.addf %246, %250 : vector<4x32xf32>
    %c26 = arith.constant 26 : index
    %c0_166 = arith.constant 0 : index
    %252 = vector.load %arg9[%c26, %c0_166] : memref<296x96xf32, #tpu.memory_space<vmem>>, vector<4x96xf32>
    %c3_167 = arith.constant 3 : index
    %c2_168 = arith.constant 2 : index
    %c0_169 = arith.constant 0 : index
    %c0_170 = arith.constant 0 : index
    %253 = vector.load %arg4[%c3_167, %c2_168, %c0_169, %c0_170] : memref<4x3x96x32xf32, #tpu.memory_space<vmem>>, vector<1x1x96x32xf32>
    %254 = vector.shape_cast %253 : vector<1x1x96x32xf32> to vector<96x32xf32>
    %cst_171 = arith.constant dense<0.000000e+00> : vector<4x32xf32>
    %255 = tpu.matmul %252, %254, %cst_171 {dimension_numbers = #tpu.dot_dimension_numbers<[1], [0], [0], [1], [0, 0, 1, 1], [], []>} : vector<4x96xf32>, vector<96x32xf32>, vector<4x32xf32> -> vector<4x32xf32>
    %256 = arith.addf %251, %255 : vector<4x32xf32>
    %c3_172 = arith.constant 3 : index
    %c0_173 = arith.constant 0 : index
    %257 = vector.load %arg5[%c3_172, %c0_173] : memref<4x32xf32, #tpu.memory_space<vmem>>, vector<1x32xf32>
    %258 = vector.broadcast %257 : vector<1x32xf32> to vector<4x32xf32>
    %259 = arith.addf %256, %258 : vector<4x32xf32>
    %cst_174 = arith.constant 0.000000e+00 : f32
    %260 = vector.broadcast %cst_174 : f32 to vector<4x32xf32>
    %261 = arith.maximumf %259, %260 : vector<4x32xf32>
    %c0_175 = arith.constant 0 : index
    %c0_176 = arith.constant 0 : index
    %262 = vector.load %arg10[%c0_175, %c0_176] : memref<256x32xf32, #tpu.memory_space<vmem>>, vector<4x32xf32>
    tpu.vector_store %arg10[%c0_175, %c0_176], %261 {strides = array<i32>} : memref<256x32xf32, #tpu.memory_space<vmem>>, vector<4x32xf32>,
    %c0_177 = arith.constant 0 : index
    %c0_178 = arith.constant 0 : index
    %263 = tpu.strided_load %arg10[%c0_177, %c0_178] {strides = array<i32: 2, 1>} : memref<256x32xf32, #tpu.memory_space<vmem>>, vector<2x32xf32>
    %c1_179 = arith.constant 1 : index
    %c0_180 = arith.constant 0 : index
    %264 = tpu.strided_load %arg10[%c1_179, %c0_180] {strides = array<i32: 2, 1>} : memref<256x32xf32, #tpu.memory_space<vmem>>, vector<2x32xf32>
    %265 = arith.maximumf %263, %264 : vector<2x32xf32>
    %266 = vector.extract_strided_slice %265 {offsets = [0, 0], sizes = [1, 32], strides = [1, 1]} : vector<2x32xf32> to vector<1x32xf32>
    %267 = vector.extract_strided_slice %265 {offsets = [1, 0], sizes = [1, 32], strides = [1, 1]} : vector<2x32xf32> to vector<1x32xf32>
    %268 = arith.maximumf %266, %267 : vector<1x32xf32>
    %c0_181 = arith.constant 0 : index
    %c0_182 = arith.constant 0 : index
    %269 = vector.load %arg11[%c0_181, %c0_182] : memref<64x32xf32, #tpu.memory_space<vmem>>, vector<1x32xf32>
    tpu.vector_store %arg11[%c0_181, %c0_182], %268 {strides = array<i32>} : memref<64x32xf32, #tpu.memory_space<vmem>>, vector<1x32xf32>,
    %c0_183 = arith.constant 0 : index
    %c0_184 = arith.constant 0 : index
    %270 = vector.load %arg11[%c0_183, %c0_184] : memref<64x32xf32, #tpu.memory_space<vmem>>, vector<1x32xf32>
    %cst_185 = arith.constant dense<0.000000e+00> : vector<32xf32>
    %271 = vector.multi_reduction <add>, %270, %cst_185 [0] : vector<1x32xf32> to vector<32xf32>
    %272 = vector.shape_cast %271 : vector<32xf32> to vector<1x32xf32>
    %cst_186 = arith.constant 1.000000e+00 : f32
    %273 = vector.broadcast %cst_186 : f32 to vector<1x32xf32>
    %274 = arith.mulf %272, %273 : vector<1x32xf32>
    %c0_187 = arith.constant 0 : index
    %c0_188 = arith.constant 0 : index
    %275 = vector.load %arg6[%c0_187, %c0_188] : memref<1x32xf32, #tpu.memory_space<vmem>>, vector<1x32xf32>
    %276 = arith.mulf %274, %275 : vector<1x32xf32>
    %cst_189 = arith.constant dense<0.000000e+00> : vector<1xf32>
    %277 = vector.multi_reduction <add>, %276, %cst_189 [1] : vector<1x32xf32> to vector<1xf32>
    %278 = vector.shape_cast %277 : vector<1xf32> to vector<1x1xf32>
    %c0_190 = arith.constant 0 : index
    %c0_191 = arith.constant 0 : index
    %279 = vector.load %arg7[%c0_190, %c0_191] : memref<1x1xf32, #tpu.memory_space<vmem>>, vector<1x1xf32>
    %280 = arith.addf %278, %279 : vector<1x1xf32>
    %c0_192 = arith.constant 0 : index
    %c0_193 = arith.constant 0 : index
    %281 = vector.load %arg8[%c0_192, %c0_193] : memref<1x2xf32, #tpu.memory_space<vmem>>, vector<1x1xf32>
    tpu.vector_store %arg8[%c0_192, %c0_193], %280 {strides = array<i32>} : memref<1x2xf32, #tpu.memory_space<vmem>>, vector<1x1xf32>,
    %c1_194 = arith.constant 1 : index
    %c0_195 = arith.constant 0 : index
    %c0_196 = arith.constant 0 : index
    %282 = vector.load %arg1[%c1_194, %c0_195, %c0_196] : memref<2x256x3xf32, #tpu.memory_space<vmem>>, vector<1x256x3xf32>
    %283 = vector.shape_cast %282 : vector<1x256x3xf32> to vector<256x3xf32>
    %c0_197 = arith.constant 0 : index
    %c0_198 = arith.constant 0 : index
    %284 = vector.load %arg2[%c0_197, %c0_198] : memref<3x32xf32, #tpu.memory_space<vmem>>, vector<3x32xf32>
    %cst_199 = arith.constant dense<0.000000e+00> : vector<256x32xf32>
    %285 = tpu.matmul %283, %284, %cst_199 {dimension_numbers = #tpu.dot_dimension_numbers<[1], [0], [0], [1], [0, 0, 1, 1], [], []>} : vector<256x3xf32>, vector<3x32xf32>, vector<256x32xf32> -> vector<256x32xf32>
    %c0_200 = arith.constant 0 : index
    %c0_201 = arith.constant 0 : index
    %286 = vector.load %arg3[%c0_200, %c0_201] : memref<1x32xf32, #tpu.memory_space<vmem>>, vector<1x32xf32>
    %287 = vector.broadcast %286 : vector<1x32xf32> to vector<256x32xf32>
    %288 = arith.addf %285, %287 : vector<256x32xf32>
    %cst_202 = arith.constant 0.000000e+00 : f32
    %289 = vector.broadcast %cst_202 : f32 to vector<256x32xf32>
    %290 = arith.maximumf %288, %289 : vector<256x32xf32>
    %291 = tpu.iota {dimensions = array<i32: 0>} : vector<256x1xi32>
    %c15_i32_203 = arith.constant 15 : i32
    %292 = vector.broadcast %c15_i32_203 : i32 to vector<256x1xi32>
    %293 = arith.andi %291, %292 : vector<256x1xi32>
    %c15_i32_204 = arith.constant 15 : i32
    %294 = vector.broadcast %c15_i32_204 : i32 to vector<256x1xi32>
    %295 = arith.cmpi ne, %293, %294 : vector<256x1xi32>
    %296 = arith.extui %295 : vector<256x1xi1> to vector<256x1xi32>
    %297 = arith.sitofp %296 : vector<256x1xi32> to vector<256x1xf32>
    %c0_i32_205 = arith.constant 0 : i32
    %298 = vector.broadcast %c0_i32_205 : i32 to vector<256x1xi32>
    %299 = arith.cmpi ne, %293, %298 : vector<256x1xi32>
    %300 = arith.extui %299 : vector<256x1xi1> to vector<256x1xi32>
    %301 = arith.sitofp %300 : vector<256x1xi32> to vector<256x1xf32>
    %cst_206 = arith.constant 0.000000e+00 : f32
    %302 = vector.broadcast %cst_206 : f32 to vector<1x32xf32>
    %303 = vector.broadcast %297 : vector<256x1xf32> to vector<256x32xf32>
    %304 = arith.mulf %290, %303 : vector<256x32xf32>
    %305 = vector.extract_strided_slice %304 {offsets = [0, 0], sizes = [255, 32], strides = [1, 1]} : vector<256x32xf32> to vector<255x32xf32>
    %306 = tpu.concatenate %302, %305 in 0 : vector<1x32xf32>, vector<255x32xf32> -> vector<256x32xf32>
    %307 = vector.broadcast %301 : vector<256x1xf32> to vector<256x32xf32>
    %308 = arith.mulf %290, %307 : vector<256x32xf32>
    %309 = vector.extract_strided_slice %308 {offsets = [1, 0], sizes = [255, 32], strides = [1, 1]} : vector<256x32xf32> to vector<255x32xf32>
    %310 = tpu.concatenate %309, %302 in 0 : vector<255x32xf32>, vector<1x32xf32> -> vector<256x32xf32>
    %311 = tpu.concatenate %306, %290, %310 in 1 : vector<256x32xf32>, vector<256x32xf32>, vector<256x32xf32> -> vector<256x96xf32>
    %cst_207 = arith.constant 0.000000e+00 : f32
    %312 = vector.broadcast %cst_207 : f32 to vector<16x96xf32>
    %c280_208 = arith.constant 280 : index
    %c0_209 = arith.constant 0 : index
    %313 = vector.load %arg9[%c280_208, %c0_209] : memref<296x96xf32, #tpu.memory_space<vmem>>, vector<16x96xf32>
    tpu.vector_store %arg9[%c280_208, %c0_209], %312 {strides = array<i32>} : memref<296x96xf32, #tpu.memory_space<vmem>>, vector<16x96xf32>,
    %c24_210 = arith.constant 24 : index
    %c0_211 = arith.constant 0 : index
    %314 = vector.load %arg9[%c24_210, %c0_211] : memref<296x96xf32, #tpu.memory_space<vmem>>, vector<256x96xf32>
    tpu.vector_store %arg9[%c24_210, %c0_211], %311 {strides = array<i32>} : memref<296x96xf32, #tpu.memory_space<vmem>>, vector<256x96xf32>,
    %cst_212 = arith.constant 0.000000e+00 : f32
    %315 = vector.broadcast %cst_212 : f32 to vector<256x32xf32>
    %c8_213 = arith.constant 8 : index
    %c0_214 = arith.constant 0 : index
    %316 = vector.load %arg9[%c8_213, %c0_214] : memref<296x96xf32, #tpu.memory_space<vmem>>, vector<256x96xf32>
    %c0_215 = arith.constant 0 : index
    %c0_216 = arith.constant 0 : index
    %c0_217 = arith.constant 0 : index
    %c0_218 = arith.constant 0 : index
    %317 = vector.load %arg4[%c0_215, %c0_216, %c0_217, %c0_218] : memref<4x3x96x32xf32, #tpu.memory_space<vmem>>, vector<1x1x96x32xf32>
    %318 = vector.shape_cast %317 : vector<1x1x96x32xf32> to vector<96x32xf32>
    %cst_219 = arith.constant dense<0.000000e+00> : vector<256x32xf32>
    %319 = tpu.matmul %316, %318, %cst_219 {dimension_numbers = #tpu.dot_dimension_numbers<[1], [0], [0], [1], [0, 0, 1, 1], [], []>} : vector<256x96xf32>, vector<96x32xf32>, vector<256x32xf32> -> vector<256x32xf32>
    %320 = arith.addf %315, %319 : vector<256x32xf32>
    %c24_220 = arith.constant 24 : index
    %c0_221 = arith.constant 0 : index
    %321 = vector.load %arg9[%c24_220, %c0_221] : memref<296x96xf32, #tpu.memory_space<vmem>>, vector<256x96xf32>
    %c0_222 = arith.constant 0 : index
    %c1_223 = arith.constant 1 : index
    %c0_224 = arith.constant 0 : index
    %c0_225 = arith.constant 0 : index
    %322 = vector.load %arg4[%c0_222, %c1_223, %c0_224, %c0_225] : memref<4x3x96x32xf32, #tpu.memory_space<vmem>>, vector<1x1x96x32xf32>
    %323 = vector.shape_cast %322 : vector<1x1x96x32xf32> to vector<96x32xf32>
    %cst_226 = arith.constant dense<0.000000e+00> : vector<256x32xf32>
    %324 = tpu.matmul %321, %323, %cst_226 {dimension_numbers = #tpu.dot_dimension_numbers<[1], [0], [0], [1], [0, 0, 1, 1], [], []>} : vector<256x96xf32>, vector<96x32xf32>, vector<256x32xf32> -> vector<256x32xf32>
    %325 = arith.addf %320, %324 : vector<256x32xf32>
    %c40_227 = arith.constant 40 : index
    %c0_228 = arith.constant 0 : index
    %326 = vector.load %arg9[%c40_227, %c0_228] : memref<296x96xf32, #tpu.memory_space<vmem>>, vector<256x96xf32>
    %c0_229 = arith.constant 0 : index
    %c2_230 = arith.constant 2 : index
    %c0_231 = arith.constant 0 : index
    %c0_232 = arith.constant 0 : index
    %327 = vector.load %arg4[%c0_229, %c2_230, %c0_231, %c0_232] : memref<4x3x96x32xf32, #tpu.memory_space<vmem>>, vector<1x1x96x32xf32>
    %328 = vector.shape_cast %327 : vector<1x1x96x32xf32> to vector<96x32xf32>
    %cst_233 = arith.constant dense<0.000000e+00> : vector<256x32xf32>
    %329 = tpu.matmul %326, %328, %cst_233 {dimension_numbers = #tpu.dot_dimension_numbers<[1], [0], [0], [1], [0, 0, 1, 1], [], []>} : vector<256x96xf32>, vector<96x32xf32>, vector<256x32xf32> -> vector<256x32xf32>
    %330 = arith.addf %325, %329 : vector<256x32xf32>
    %c0_234 = arith.constant 0 : index
    %c0_235 = arith.constant 0 : index
    %331 = vector.load %arg5[%c0_234, %c0_235] : memref<4x32xf32, #tpu.memory_space<vmem>>, vector<1x32xf32>
    %332 = vector.broadcast %331 : vector<1x32xf32> to vector<256x32xf32>
    %333 = arith.addf %330, %332 : vector<256x32xf32>
    %cst_236 = arith.constant 0.000000e+00 : f32
    %334 = vector.broadcast %cst_236 : f32 to vector<256x32xf32>
    %335 = arith.maximumf %333, %334 : vector<256x32xf32>
    %c0_237 = arith.constant 0 : index
    %c0_238 = arith.constant 0 : index
    %336 = vector.load %arg10[%c0_237, %c0_238] : memref<256x32xf32, #tpu.memory_space<vmem>>, vector<256x32xf32>
    tpu.vector_store %arg10[%c0_237, %c0_238], %335 {strides = array<i32>} : memref<256x32xf32, #tpu.memory_space<vmem>>, vector<256x32xf32>,
    %c0_239 = arith.constant 0 : index
    %c0_240 = arith.constant 0 : index
    %337 = tpu.strided_load %arg10[%c0_239, %c0_240] {strides = array<i32: 2, 1>} : memref<256x32xf32, #tpu.memory_space<vmem>>, vector<128x32xf32>
    %c1_241 = arith.constant 1 : index
    %c0_242 = arith.constant 0 : index
    %338 = tpu.strided_load %arg10[%c1_241, %c0_242] {strides = array<i32: 2, 1>} : memref<256x32xf32, #tpu.memory_space<vmem>>, vector<128x32xf32>
    %339 = arith.maximumf %337, %338 : vector<128x32xf32>
    %340 = vector.extract_strided_slice %339 {offsets = [0, 0], sizes = [8, 32], strides = [1, 1]} : vector<128x32xf32> to vector<8x32xf32>
    %341 = vector.extract_strided_slice %339 {offsets = [8, 0], sizes = [8, 32], strides = [1, 1]} : vector<128x32xf32> to vector<8x32xf32>
    %342 = arith.maximumf %340, %341 : vector<8x32xf32>
    %c0_243 = arith.constant 0 : index
    %c0_244 = arith.constant 0 : index
    %343 = vector.load %arg11[%c0_243, %c0_244] : memref<64x32xf32, #tpu.memory_space<vmem>>, vector<8x32xf32>
    tpu.vector_store %arg11[%c0_243, %c0_244], %342 {strides = array<i32>} : memref<64x32xf32, #tpu.memory_space<vmem>>, vector<8x32xf32>,
    %344 = vector.extract_strided_slice %339 {offsets = [16, 0], sizes = [8, 32], strides = [1, 1]} : vector<128x32xf32> to vector<8x32xf32>
    %345 = vector.extract_strided_slice %339 {offsets = [24, 0], sizes = [8, 32], strides = [1, 1]} : vector<128x32xf32> to vector<8x32xf32>
    %346 = arith.maximumf %344, %345 : vector<8x32xf32>
    %c8_245 = arith.constant 8 : index
    %c0_246 = arith.constant 0 : index
    %347 = vector.load %arg11[%c8_245, %c0_246] : memref<64x32xf32, #tpu.memory_space<vmem>>, vector<8x32xf32>
    tpu.vector_store %arg11[%c8_245, %c0_246], %346 {strides = array<i32>} : memref<64x32xf32, #tpu.memory_space<vmem>>, vector<8x32xf32>,
    %348 = vector.extract_strided_slice %339 {offsets = [32, 0], sizes = [8, 32], strides = [1, 1]} : vector<128x32xf32> to vector<8x32xf32>
    %349 = vector.extract_strided_slice %339 {offsets = [40, 0], sizes = [8, 32], strides = [1, 1]} : vector<128x32xf32> to vector<8x32xf32>
    %350 = arith.maximumf %348, %349 : vector<8x32xf32>
    %c16_247 = arith.constant 16 : index
    %c0_248 = arith.constant 0 : index
    %351 = vector.load %arg11[%c16_247, %c0_248] : memref<64x32xf32, #tpu.memory_space<vmem>>, vector<8x32xf32>
    tpu.vector_store %arg11[%c16_247, %c0_248], %350 {strides = array<i32>} : memref<64x32xf32, #tpu.memory_space<vmem>>, vector<8x32xf32>,
    %352 = vector.extract_strided_slice %339 {offsets = [48, 0], sizes = [8, 32], strides = [1, 1]} : vector<128x32xf32> to vector<8x32xf32>
    %353 = vector.extract_strided_slice %339 {offsets = [56, 0], sizes = [8, 32], strides = [1, 1]} : vector<128x32xf32> to vector<8x32xf32>
    %354 = arith.maximumf %352, %353 : vector<8x32xf32>
    %c24_249 = arith.constant 24 : index
    %c0_250 = arith.constant 0 : index
    %355 = vector.load %arg11[%c24_249, %c0_250] : memref<64x32xf32, #tpu.memory_space<vmem>>, vector<8x32xf32>
    tpu.vector_store %arg11[%c24_249, %c0_250], %354 {strides = array<i32>} : memref<64x32xf32, #tpu.memory_space<vmem>>, vector<8x32xf32>,
    %356 = vector.extract_strided_slice %339 {offsets = [64, 0], sizes = [8, 32], strides = [1, 1]} : vector<128x32xf32> to vector<8x32xf32>
    %357 = vector.extract_strided_slice %339 {offsets = [72, 0], sizes = [8, 32], strides = [1, 1]} : vector<128x32xf32> to vector<8x32xf32>
    %358 = arith.maximumf %356, %357 : vector<8x32xf32>
    %c32_251 = arith.constant 32 : index
    %c0_252 = arith.constant 0 : index
    %359 = vector.load %arg11[%c32_251, %c0_252] : memref<64x32xf32, #tpu.memory_space<vmem>>, vector<8x32xf32>
    tpu.vector_store %arg11[%c32_251, %c0_252], %358 {strides = array<i32>} : memref<64x32xf32, #tpu.memory_space<vmem>>, vector<8x32xf32>,
    %360 = vector.extract_strided_slice %339 {offsets = [80, 0], sizes = [8, 32], strides = [1, 1]} : vector<128x32xf32> to vector<8x32xf32>
    %361 = vector.extract_strided_slice %339 {offsets = [88, 0], sizes = [8, 32], strides = [1, 1]} : vector<128x32xf32> to vector<8x32xf32>
    %362 = arith.maximumf %360, %361 : vector<8x32xf32>
    %c40_253 = arith.constant 40 : index
    %c0_254 = arith.constant 0 : index
    %363 = vector.load %arg11[%c40_253, %c0_254] : memref<64x32xf32, #tpu.memory_space<vmem>>, vector<8x32xf32>
    tpu.vector_store %arg11[%c40_253, %c0_254], %362 {strides = array<i32>} : memref<64x32xf32, #tpu.memory_space<vmem>>, vector<8x32xf32>,
    %364 = vector.extract_strided_slice %339 {offsets = [96, 0], sizes = [8, 32], strides = [1, 1]} : vector<128x32xf32> to vector<8x32xf32>
    %365 = vector.extract_strided_slice %339 {offsets = [104, 0], sizes = [8, 32], strides = [1, 1]} : vector<128x32xf32> to vector<8x32xf32>
    %366 = arith.maximumf %364, %365 : vector<8x32xf32>
    %c48_255 = arith.constant 48 : index
    %c0_256 = arith.constant 0 : index
    %367 = vector.load %arg11[%c48_255, %c0_256] : memref<64x32xf32, #tpu.memory_space<vmem>>, vector<8x32xf32>
    tpu.vector_store %arg11[%c48_255, %c0_256], %366 {strides = array<i32>} : memref<64x32xf32, #tpu.memory_space<vmem>>, vector<8x32xf32>,
    %368 = vector.extract_strided_slice %339 {offsets = [112, 0], sizes = [8, 32], strides = [1, 1]} : vector<128x32xf32> to vector<8x32xf32>
    %369 = vector.extract_strided_slice %339 {offsets = [120, 0], sizes = [8, 32], strides = [1, 1]} : vector<128x32xf32> to vector<8x32xf32>
    %370 = arith.maximumf %368, %369 : vector<8x32xf32>
    %c56_257 = arith.constant 56 : index
    %c0_258 = arith.constant 0 : index
    %371 = vector.load %arg11[%c56_257, %c0_258] : memref<64x32xf32, #tpu.memory_space<vmem>>, vector<8x32xf32>
    tpu.vector_store %arg11[%c56_257, %c0_258], %370 {strides = array<i32>} : memref<64x32xf32, #tpu.memory_space<vmem>>, vector<8x32xf32>,
    %c0_259 = arith.constant 0 : index
    %c0_260 = arith.constant 0 : index
    %372 = vector.load %arg11[%c0_259, %c0_260] : memref<64x32xf32, #tpu.memory_space<vmem>>, vector<64x32xf32>
    %373 = tpu.iota {dimensions = array<i32: 0>} : vector<64x1xi32>
    %c7_i32_261 = arith.constant 7 : i32
    %374 = vector.broadcast %c7_i32_261 : i32 to vector<64x1xi32>
    %375 = arith.andi %373, %374 : vector<64x1xi32>
    %c7_i32_262 = arith.constant 7 : i32
    %376 = vector.broadcast %c7_i32_262 : i32 to vector<64x1xi32>
    %377 = arith.cmpi ne, %375, %376 : vector<64x1xi32>
    %378 = arith.extui %377 : vector<64x1xi1> to vector<64x1xi32>
    %379 = arith.sitofp %378 : vector<64x1xi32> to vector<64x1xf32>
    %c0_i32_263 = arith.constant 0 : i32
    %380 = vector.broadcast %c0_i32_263 : i32 to vector<64x1xi32>
    %381 = arith.cmpi ne, %375, %380 : vector<64x1xi32>
    %382 = arith.extui %381 : vector<64x1xi1> to vector<64x1xi32>
    %383 = arith.sitofp %382 : vector<64x1xi32> to vector<64x1xf32>
    %cst_264 = arith.constant 0.000000e+00 : f32
    %384 = vector.broadcast %cst_264 : f32 to vector<1x32xf32>
    %385 = vector.broadcast %379 : vector<64x1xf32> to vector<64x32xf32>
    %386 = arith.mulf %372, %385 : vector<64x32xf32>
    %387 = vector.extract_strided_slice %386 {offsets = [0, 0], sizes = [63, 32], strides = [1, 1]} : vector<64x32xf32> to vector<63x32xf32>
    %388 = tpu.concatenate %384, %387 in 0 : vector<1x32xf32>, vector<63x32xf32> -> vector<64x32xf32>
    %389 = vector.broadcast %383 : vector<64x1xf32> to vector<64x32xf32>
    %390 = arith.mulf %372, %389 : vector<64x32xf32>
    %391 = vector.extract_strided_slice %390 {offsets = [1, 0], sizes = [63, 32], strides = [1, 1]} : vector<64x32xf32> to vector<63x32xf32>
    %392 = tpu.concatenate %391, %384 in 0 : vector<63x32xf32>, vector<1x32xf32> -> vector<64x32xf32>
    %393 = tpu.concatenate %388, %372, %392 in 1 : vector<64x32xf32>, vector<64x32xf32>, vector<64x32xf32> -> vector<64x96xf32>
    %cst_265 = arith.constant 0.000000e+00 : f32
    %394 = vector.broadcast %cst_265 : f32 to vector<8x96xf32>
    %c88_266 = arith.constant 88 : index
    %c0_267 = arith.constant 0 : index
    %395 = vector.load %arg9[%c88_266, %c0_267] : memref<296x96xf32, #tpu.memory_space<vmem>>, vector<8x96xf32>
    tpu.vector_store %arg9[%c88_266, %c0_267], %394 {strides = array<i32>} : memref<296x96xf32, #tpu.memory_space<vmem>>, vector<8x96xf32>,
    %c24_268 = arith.constant 24 : index
    %c0_269 = arith.constant 0 : index
    %396 = vector.load %arg9[%c24_268, %c0_269] : memref<296x96xf32, #tpu.memory_space<vmem>>, vector<64x96xf32>
    tpu.vector_store %arg9[%c24_268, %c0_269], %393 {strides = array<i32>} : memref<296x96xf32, #tpu.memory_space<vmem>>, vector<64x96xf32>,
    %cst_270 = arith.constant 0.000000e+00 : f32
    %397 = vector.broadcast %cst_270 : f32 to vector<64x32xf32>
    %c16_271 = arith.constant 16 : index
    %c0_272 = arith.constant 0 : index
    %398 = vector.load %arg9[%c16_271, %c0_272] : memref<296x96xf32, #tpu.memory_space<vmem>>, vector<64x96xf32>
    %c1_273 = arith.constant 1 : index
    %c0_274 = arith.constant 0 : index
    %c0_275 = arith.constant 0 : index
    %c0_276 = arith.constant 0 : index
    %399 = vector.load %arg4[%c1_273, %c0_274, %c0_275, %c0_276] : memref<4x3x96x32xf32, #tpu.memory_space<vmem>>, vector<1x1x96x32xf32>
    %400 = vector.shape_cast %399 : vector<1x1x96x32xf32> to vector<96x32xf32>
    %cst_277 = arith.constant dense<0.000000e+00> : vector<64x32xf32>
    %401 = tpu.matmul %398, %400, %cst_277 {dimension_numbers = #tpu.dot_dimension_numbers<[1], [0], [0], [1], [0, 0, 1, 1], [], []>} : vector<64x96xf32>, vector<96x32xf32>, vector<64x32xf32> -> vector<64x32xf32>
    %402 = arith.addf %397, %401 : vector<64x32xf32>
    %c24_278 = arith.constant 24 : index
    %c0_279 = arith.constant 0 : index
    %403 = vector.load %arg9[%c24_278, %c0_279] : memref<296x96xf32, #tpu.memory_space<vmem>>, vector<64x96xf32>
    %c1_280 = arith.constant 1 : index
    %c1_281 = arith.constant 1 : index
    %c0_282 = arith.constant 0 : index
    %c0_283 = arith.constant 0 : index
    %404 = vector.load %arg4[%c1_280, %c1_281, %c0_282, %c0_283] : memref<4x3x96x32xf32, #tpu.memory_space<vmem>>, vector<1x1x96x32xf32>
    %405 = vector.shape_cast %404 : vector<1x1x96x32xf32> to vector<96x32xf32>
    %cst_284 = arith.constant dense<0.000000e+00> : vector<64x32xf32>
    %406 = tpu.matmul %403, %405, %cst_284 {dimension_numbers = #tpu.dot_dimension_numbers<[1], [0], [0], [1], [0, 0, 1, 1], [], []>} : vector<64x96xf32>, vector<96x32xf32>, vector<64x32xf32> -> vector<64x32xf32>
    %407 = arith.addf %402, %406 : vector<64x32xf32>
    %c32_285 = arith.constant 32 : index
    %c0_286 = arith.constant 0 : index
    %408 = vector.load %arg9[%c32_285, %c0_286] : memref<296x96xf32, #tpu.memory_space<vmem>>, vector<64x96xf32>
    %c1_287 = arith.constant 1 : index
    %c2_288 = arith.constant 2 : index
    %c0_289 = arith.constant 0 : index
    %c0_290 = arith.constant 0 : index
    %409 = vector.load %arg4[%c1_287, %c2_288, %c0_289, %c0_290] : memref<4x3x96x32xf32, #tpu.memory_space<vmem>>, vector<1x1x96x32xf32>
    %410 = vector.shape_cast %409 : vector<1x1x96x32xf32> to vector<96x32xf32>
    %cst_291 = arith.constant dense<0.000000e+00> : vector<64x32xf32>
    %411 = tpu.matmul %408, %410, %cst_291 {dimension_numbers = #tpu.dot_dimension_numbers<[1], [0], [0], [1], [0, 0, 1, 1], [], []>} : vector<64x96xf32>, vector<96x32xf32>, vector<64x32xf32> -> vector<64x32xf32>
    %412 = arith.addf %407, %411 : vector<64x32xf32>
    %c1_292 = arith.constant 1 : index
    %c0_293 = arith.constant 0 : index
    %413 = vector.load %arg5[%c1_292, %c0_293] : memref<4x32xf32, #tpu.memory_space<vmem>>, vector<1x32xf32>
    %414 = vector.broadcast %413 : vector<1x32xf32> to vector<64x32xf32>
    %415 = arith.addf %412, %414 : vector<64x32xf32>
    %cst_294 = arith.constant 0.000000e+00 : f32
    %416 = vector.broadcast %cst_294 : f32 to vector<64x32xf32>
    %417 = arith.maximumf %415, %416 : vector<64x32xf32>
    %c0_295 = arith.constant 0 : index
    %c0_296 = arith.constant 0 : index
    %418 = vector.load %arg10[%c0_295, %c0_296] : memref<256x32xf32, #tpu.memory_space<vmem>>, vector<64x32xf32>
    tpu.vector_store %arg10[%c0_295, %c0_296], %417 {strides = array<i32>} : memref<256x32xf32, #tpu.memory_space<vmem>>, vector<64x32xf32>,
    %c0_297 = arith.constant 0 : index
    %c0_298 = arith.constant 0 : index
    %419 = tpu.strided_load %arg10[%c0_297, %c0_298] {strides = array<i32: 2, 1>} : memref<256x32xf32, #tpu.memory_space<vmem>>, vector<32x32xf32>
    %c1_299 = arith.constant 1 : index
    %c0_300 = arith.constant 0 : index
    %420 = tpu.strided_load %arg10[%c1_299, %c0_300] {strides = array<i32: 2, 1>} : memref<256x32xf32, #tpu.memory_space<vmem>>, vector<32x32xf32>
    %421 = arith.maximumf %419, %420 : vector<32x32xf32>
    %422 = vector.extract_strided_slice %421 {offsets = [0, 0], sizes = [4, 32], strides = [1, 1]} : vector<32x32xf32> to vector<4x32xf32>
    %423 = vector.extract_strided_slice %421 {offsets = [4, 0], sizes = [4, 32], strides = [1, 1]} : vector<32x32xf32> to vector<4x32xf32>
    %424 = arith.maximumf %422, %423 : vector<4x32xf32>
    %c0_301 = arith.constant 0 : index
    %c0_302 = arith.constant 0 : index
    %425 = vector.load %arg11[%c0_301, %c0_302] : memref<64x32xf32, #tpu.memory_space<vmem>>, vector<4x32xf32>
    tpu.vector_store %arg11[%c0_301, %c0_302], %424 {strides = array<i32>} : memref<64x32xf32, #tpu.memory_space<vmem>>, vector<4x32xf32>,
    %426 = vector.extract_strided_slice %421 {offsets = [8, 0], sizes = [4, 32], strides = [1, 1]} : vector<32x32xf32> to vector<4x32xf32>
    %427 = vector.extract_strided_slice %421 {offsets = [12, 0], sizes = [4, 32], strides = [1, 1]} : vector<32x32xf32> to vector<4x32xf32>
    %428 = arith.maximumf %426, %427 : vector<4x32xf32>
    %c4_303 = arith.constant 4 : index
    %c0_304 = arith.constant 0 : index
    %429 = vector.load %arg11[%c4_303, %c0_304] : memref<64x32xf32, #tpu.memory_space<vmem>>, vector<4x32xf32>
    tpu.vector_store %arg11[%c4_303, %c0_304], %428 {strides = array<i32>} : memref<64x32xf32, #tpu.memory_space<vmem>>, vector<4x32xf32>,
    %430 = vector.extract_strided_slice %421 {offsets = [16, 0], sizes = [4, 32], strides = [1, 1]} : vector<32x32xf32> to vector<4x32xf32>
    %431 = vector.extract_strided_slice %421 {offsets = [20, 0], sizes = [4, 32], strides = [1, 1]} : vector<32x32xf32> to vector<4x32xf32>
    %432 = arith.maximumf %430, %431 : vector<4x32xf32>
    %c8_305 = arith.constant 8 : index
    %c0_306 = arith.constant 0 : index
    %433 = vector.load %arg11[%c8_305, %c0_306] : memref<64x32xf32, #tpu.memory_space<vmem>>, vector<4x32xf32>
    tpu.vector_store %arg11[%c8_305, %c0_306], %432 {strides = array<i32>} : memref<64x32xf32, #tpu.memory_space<vmem>>, vector<4x32xf32>,
    %434 = vector.extract_strided_slice %421 {offsets = [24, 0], sizes = [4, 32], strides = [1, 1]} : vector<32x32xf32> to vector<4x32xf32>
    %435 = vector.extract_strided_slice %421 {offsets = [28, 0], sizes = [4, 32], strides = [1, 1]} : vector<32x32xf32> to vector<4x32xf32>
    %436 = arith.maximumf %434, %435 : vector<4x32xf32>
    %c12_307 = arith.constant 12 : index
    %c0_308 = arith.constant 0 : index
    %437 = vector.load %arg11[%c12_307, %c0_308] : memref<64x32xf32, #tpu.memory_space<vmem>>, vector<4x32xf32>
    tpu.vector_store %arg11[%c12_307, %c0_308], %436 {strides = array<i32>} : memref<64x32xf32, #tpu.memory_space<vmem>>, vector<4x32xf32>,
    %c0_309 = arith.constant 0 : index
    %c0_310 = arith.constant 0 : index
    %438 = vector.load %arg11[%c0_309, %c0_310] : memref<64x32xf32, #tpu.memory_space<vmem>>, vector<16x32xf32>
    %439 = tpu.iota {dimensions = array<i32: 0>} : vector<16x1xi32>
    %c3_i32_311 = arith.constant 3 : i32
    %440 = vector.broadcast %c3_i32_311 : i32 to vector<16x1xi32>
    %441 = arith.andi %439, %440 : vector<16x1xi32>
    %c3_i32_312 = arith.constant 3 : i32
    %442 = vector.broadcast %c3_i32_312 : i32 to vector<16x1xi32>
    %443 = arith.cmpi ne, %441, %442 : vector<16x1xi32>
    %444 = arith.extui %443 : vector<16x1xi1> to vector<16x1xi32>
    %445 = arith.sitofp %444 : vector<16x1xi32> to vector<16x1xf32>
    %c0_i32_313 = arith.constant 0 : i32
    %446 = vector.broadcast %c0_i32_313 : i32 to vector<16x1xi32>
    %447 = arith.cmpi ne, %441, %446 : vector<16x1xi32>
    %448 = arith.extui %447 : vector<16x1xi1> to vector<16x1xi32>
    %449 = arith.sitofp %448 : vector<16x1xi32> to vector<16x1xf32>
    %cst_314 = arith.constant 0.000000e+00 : f32
    %450 = vector.broadcast %cst_314 : f32 to vector<1x32xf32>
    %451 = vector.broadcast %445 : vector<16x1xf32> to vector<16x32xf32>
    %452 = arith.mulf %438, %451 : vector<16x32xf32>
    %453 = vector.extract_strided_slice %452 {offsets = [0, 0], sizes = [15, 32], strides = [1, 1]} : vector<16x32xf32> to vector<15x32xf32>
    %454 = tpu.concatenate %450, %453 in 0 : vector<1x32xf32>, vector<15x32xf32> -> vector<16x32xf32>
    %455 = vector.broadcast %449 : vector<16x1xf32> to vector<16x32xf32>
    %456 = arith.mulf %438, %455 : vector<16x32xf32>
    %457 = vector.extract_strided_slice %456 {offsets = [1, 0], sizes = [15, 32], strides = [1, 1]} : vector<16x32xf32> to vector<15x32xf32>
    %458 = tpu.concatenate %457, %450 in 0 : vector<15x32xf32>, vector<1x32xf32> -> vector<16x32xf32>
    %459 = tpu.concatenate %454, %438, %458 in 1 : vector<16x32xf32>, vector<16x32xf32>, vector<16x32xf32> -> vector<16x96xf32>
    %cst_315 = arith.constant 0.000000e+00 : f32
    %460 = vector.broadcast %cst_315 : f32 to vector<4x96xf32>
    %c40_316 = arith.constant 40 : index
    %c0_317 = arith.constant 0 : index
    %461 = vector.load %arg9[%c40_316, %c0_317] : memref<296x96xf32, #tpu.memory_space<vmem>>, vector<4x96xf32>
    tpu.vector_store %arg9[%c40_316, %c0_317], %460 {strides = array<i32>} : memref<296x96xf32, #tpu.memory_space<vmem>>, vector<4x96xf32>,
    %c24_318 = arith.constant 24 : index
    %c0_319 = arith.constant 0 : index
    %462 = vector.load %arg9[%c24_318, %c0_319] : memref<296x96xf32, #tpu.memory_space<vmem>>, vector<16x96xf32>
    tpu.vector_store %arg9[%c24_318, %c0_319], %459 {strides = array<i32>} : memref<296x96xf32, #tpu.memory_space<vmem>>, vector<16x96xf32>,
    %cst_320 = arith.constant 0.000000e+00 : f32
    %463 = vector.broadcast %cst_320 : f32 to vector<16x32xf32>
    %c20_321 = arith.constant 20 : index
    %c0_322 = arith.constant 0 : index
    %464 = vector.load %arg9[%c20_321, %c0_322] : memref<296x96xf32, #tpu.memory_space<vmem>>, vector<16x96xf32>
    %c2_323 = arith.constant 2 : index
    %c0_324 = arith.constant 0 : index
    %c0_325 = arith.constant 0 : index
    %c0_326 = arith.constant 0 : index
    %465 = vector.load %arg4[%c2_323, %c0_324, %c0_325, %c0_326] : memref<4x3x96x32xf32, #tpu.memory_space<vmem>>, vector<1x1x96x32xf32>
    %466 = vector.shape_cast %465 : vector<1x1x96x32xf32> to vector<96x32xf32>
    %cst_327 = arith.constant dense<0.000000e+00> : vector<16x32xf32>
    %467 = tpu.matmul %464, %466, %cst_327 {dimension_numbers = #tpu.dot_dimension_numbers<[1], [0], [0], [1], [0, 0, 1, 1], [], []>} : vector<16x96xf32>, vector<96x32xf32>, vector<16x32xf32> -> vector<16x32xf32>
    %468 = arith.addf %463, %467 : vector<16x32xf32>
    %c24_328 = arith.constant 24 : index
    %c0_329 = arith.constant 0 : index
    %469 = vector.load %arg9[%c24_328, %c0_329] : memref<296x96xf32, #tpu.memory_space<vmem>>, vector<16x96xf32>
    %c2_330 = arith.constant 2 : index
    %c1_331 = arith.constant 1 : index
    %c0_332 = arith.constant 0 : index
    %c0_333 = arith.constant 0 : index
    %470 = vector.load %arg4[%c2_330, %c1_331, %c0_332, %c0_333] : memref<4x3x96x32xf32, #tpu.memory_space<vmem>>, vector<1x1x96x32xf32>
    %471 = vector.shape_cast %470 : vector<1x1x96x32xf32> to vector<96x32xf32>
    %cst_334 = arith.constant dense<0.000000e+00> : vector<16x32xf32>
    %472 = tpu.matmul %469, %471, %cst_334 {dimension_numbers = #tpu.dot_dimension_numbers<[1], [0], [0], [1], [0, 0, 1, 1], [], []>} : vector<16x96xf32>, vector<96x32xf32>, vector<16x32xf32> -> vector<16x32xf32>
    %473 = arith.addf %468, %472 : vector<16x32xf32>
    %c28_335 = arith.constant 28 : index
    %c0_336 = arith.constant 0 : index
    %474 = vector.load %arg9[%c28_335, %c0_336] : memref<296x96xf32, #tpu.memory_space<vmem>>, vector<16x96xf32>
    %c2_337 = arith.constant 2 : index
    %c2_338 = arith.constant 2 : index
    %c0_339 = arith.constant 0 : index
    %c0_340 = arith.constant 0 : index
    %475 = vector.load %arg4[%c2_337, %c2_338, %c0_339, %c0_340] : memref<4x3x96x32xf32, #tpu.memory_space<vmem>>, vector<1x1x96x32xf32>
    %476 = vector.shape_cast %475 : vector<1x1x96x32xf32> to vector<96x32xf32>
    %cst_341 = arith.constant dense<0.000000e+00> : vector<16x32xf32>
    %477 = tpu.matmul %474, %476, %cst_341 {dimension_numbers = #tpu.dot_dimension_numbers<[1], [0], [0], [1], [0, 0, 1, 1], [], []>} : vector<16x96xf32>, vector<96x32xf32>, vector<16x32xf32> -> vector<16x32xf32>
    %478 = arith.addf %473, %477 : vector<16x32xf32>
    %c2_342 = arith.constant 2 : index
    %c0_343 = arith.constant 0 : index
    %479 = vector.load %arg5[%c2_342, %c0_343] : memref<4x32xf32, #tpu.memory_space<vmem>>, vector<1x32xf32>
    %480 = vector.broadcast %479 : vector<1x32xf32> to vector<16x32xf32>
    %481 = arith.addf %478, %480 : vector<16x32xf32>
    %cst_344 = arith.constant 0.000000e+00 : f32
    %482 = vector.broadcast %cst_344 : f32 to vector<16x32xf32>
    %483 = arith.maximumf %481, %482 : vector<16x32xf32>
    %c0_345 = arith.constant 0 : index
    %c0_346 = arith.constant 0 : index
    %484 = vector.load %arg10[%c0_345, %c0_346] : memref<256x32xf32, #tpu.memory_space<vmem>>, vector<16x32xf32>
    tpu.vector_store %arg10[%c0_345, %c0_346], %483 {strides = array<i32>} : memref<256x32xf32, #tpu.memory_space<vmem>>, vector<16x32xf32>,
    %c0_347 = arith.constant 0 : index
    %c0_348 = arith.constant 0 : index
    %485 = tpu.strided_load %arg10[%c0_347, %c0_348] {strides = array<i32: 2, 1>} : memref<256x32xf32, #tpu.memory_space<vmem>>, vector<8x32xf32>
    %c1_349 = arith.constant 1 : index
    %c0_350 = arith.constant 0 : index
    %486 = tpu.strided_load %arg10[%c1_349, %c0_350] {strides = array<i32: 2, 1>} : memref<256x32xf32, #tpu.memory_space<vmem>>, vector<8x32xf32>
    %487 = arith.maximumf %485, %486 : vector<8x32xf32>
    %488 = vector.extract_strided_slice %487 {offsets = [0, 0], sizes = [2, 32], strides = [1, 1]} : vector<8x32xf32> to vector<2x32xf32>
    %489 = vector.extract_strided_slice %487 {offsets = [2, 0], sizes = [2, 32], strides = [1, 1]} : vector<8x32xf32> to vector<2x32xf32>
    %490 = arith.maximumf %488, %489 : vector<2x32xf32>
    %c0_351 = arith.constant 0 : index
    %c0_352 = arith.constant 0 : index
    %491 = vector.load %arg11[%c0_351, %c0_352] : memref<64x32xf32, #tpu.memory_space<vmem>>, vector<2x32xf32>
    tpu.vector_store %arg11[%c0_351, %c0_352], %490 {strides = array<i32>} : memref<64x32xf32, #tpu.memory_space<vmem>>, vector<2x32xf32>,
    %492 = vector.extract_strided_slice %487 {offsets = [4, 0], sizes = [2, 32], strides = [1, 1]} : vector<8x32xf32> to vector<2x32xf32>
    %493 = vector.extract_strided_slice %487 {offsets = [6, 0], sizes = [2, 32], strides = [1, 1]} : vector<8x32xf32> to vector<2x32xf32>
    %494 = arith.maximumf %492, %493 : vector<2x32xf32>
    %c2_353 = arith.constant 2 : index
    %c0_354 = arith.constant 0 : index
    %495 = vector.load %arg11[%c2_353, %c0_354] : memref<64x32xf32, #tpu.memory_space<vmem>>, vector<2x32xf32>
    tpu.vector_store %arg11[%c2_353, %c0_354], %494 {strides = array<i32>} : memref<64x32xf32, #tpu.memory_space<vmem>>, vector<2x32xf32>,
    %c0_355 = arith.constant 0 : index
    %c0_356 = arith.constant 0 : index
    %496 = vector.load %arg11[%c0_355, %c0_356] : memref<64x32xf32, #tpu.memory_space<vmem>>, vector<4x32xf32>
    %497 = tpu.iota {dimensions = array<i32: 0>} : vector<4x1xi32>
    %c1_i32_357 = arith.constant 1 : i32
    %498 = vector.broadcast %c1_i32_357 : i32 to vector<4x1xi32>
    %499 = arith.andi %497, %498 : vector<4x1xi32>
    %c1_i32_358 = arith.constant 1 : i32
    %500 = vector.broadcast %c1_i32_358 : i32 to vector<4x1xi32>
    %501 = arith.cmpi ne, %499, %500 : vector<4x1xi32>
    %502 = arith.extui %501 : vector<4x1xi1> to vector<4x1xi32>
    %503 = arith.sitofp %502 : vector<4x1xi32> to vector<4x1xf32>
    %c0_i32_359 = arith.constant 0 : i32
    %504 = vector.broadcast %c0_i32_359 : i32 to vector<4x1xi32>
    %505 = arith.cmpi ne, %499, %504 : vector<4x1xi32>
    %506 = arith.extui %505 : vector<4x1xi1> to vector<4x1xi32>
    %507 = arith.sitofp %506 : vector<4x1xi32> to vector<4x1xf32>
    %cst_360 = arith.constant 0.000000e+00 : f32
    %508 = vector.broadcast %cst_360 : f32 to vector<1x32xf32>
    %509 = vector.broadcast %503 : vector<4x1xf32> to vector<4x32xf32>
    %510 = arith.mulf %496, %509 : vector<4x32xf32>
    %511 = vector.extract_strided_slice %510 {offsets = [0, 0], sizes = [3, 32], strides = [1, 1]} : vector<4x32xf32> to vector<3x32xf32>
    %512 = tpu.concatenate %508, %511 in 0 : vector<1x32xf32>, vector<3x32xf32> -> vector<4x32xf32>
    %513 = vector.broadcast %507 : vector<4x1xf32> to vector<4x32xf32>
    %514 = arith.mulf %496, %513 : vector<4x32xf32>
    %515 = vector.extract_strided_slice %514 {offsets = [1, 0], sizes = [3, 32], strides = [1, 1]} : vector<4x32xf32> to vector<3x32xf32>
    %516 = tpu.concatenate %515, %508 in 0 : vector<3x32xf32>, vector<1x32xf32> -> vector<4x32xf32>
    %517 = tpu.concatenate %512, %496, %516 in 1 : vector<4x32xf32>, vector<4x32xf32>, vector<4x32xf32> -> vector<4x96xf32>
    %cst_361 = arith.constant 0.000000e+00 : f32
    %518 = vector.broadcast %cst_361 : f32 to vector<2x96xf32>
    %c28_362 = arith.constant 28 : index
    %c0_363 = arith.constant 0 : index
    %519 = vector.load %arg9[%c28_362, %c0_363] : memref<296x96xf32, #tpu.memory_space<vmem>>, vector<2x96xf32>
    tpu.vector_store %arg9[%c28_362, %c0_363], %518 {strides = array<i32>} : memref<296x96xf32, #tpu.memory_space<vmem>>, vector<2x96xf32>,
    %c24_364 = arith.constant 24 : index
    %c0_365 = arith.constant 0 : index
    %520 = vector.load %arg9[%c24_364, %c0_365] : memref<296x96xf32, #tpu.memory_space<vmem>>, vector<4x96xf32>
    tpu.vector_store %arg9[%c24_364, %c0_365], %517 {strides = array<i32>} : memref<296x96xf32, #tpu.memory_space<vmem>>, vector<4x96xf32>,
    %cst_366 = arith.constant 0.000000e+00 : f32
    %521 = vector.broadcast %cst_366 : f32 to vector<4x32xf32>
    %c22_367 = arith.constant 22 : index
    %c0_368 = arith.constant 0 : index
    %522 = vector.load %arg9[%c22_367, %c0_368] : memref<296x96xf32, #tpu.memory_space<vmem>>, vector<4x96xf32>
    %c3_369 = arith.constant 3 : index
    %c0_370 = arith.constant 0 : index
    %c0_371 = arith.constant 0 : index
    %c0_372 = arith.constant 0 : index
    %523 = vector.load %arg4[%c3_369, %c0_370, %c0_371, %c0_372] : memref<4x3x96x32xf32, #tpu.memory_space<vmem>>, vector<1x1x96x32xf32>
    %524 = vector.shape_cast %523 : vector<1x1x96x32xf32> to vector<96x32xf32>
    %cst_373 = arith.constant dense<0.000000e+00> : vector<4x32xf32>
    %525 = tpu.matmul %522, %524, %cst_373 {dimension_numbers = #tpu.dot_dimension_numbers<[1], [0], [0], [1], [0, 0, 1, 1], [], []>} : vector<4x96xf32>, vector<96x32xf32>, vector<4x32xf32> -> vector<4x32xf32>
    %526 = arith.addf %521, %525 : vector<4x32xf32>
    %c24_374 = arith.constant 24 : index
    %c0_375 = arith.constant 0 : index
    %527 = vector.load %arg9[%c24_374, %c0_375] : memref<296x96xf32, #tpu.memory_space<vmem>>, vector<4x96xf32>
    %c3_376 = arith.constant 3 : index
    %c1_377 = arith.constant 1 : index
    %c0_378 = arith.constant 0 : index
    %c0_379 = arith.constant 0 : index
    %528 = vector.load %arg4[%c3_376, %c1_377, %c0_378, %c0_379] : memref<4x3x96x32xf32, #tpu.memory_space<vmem>>, vector<1x1x96x32xf32>
    %529 = vector.shape_cast %528 : vector<1x1x96x32xf32> to vector<96x32xf32>
    %cst_380 = arith.constant dense<0.000000e+00> : vector<4x32xf32>
    %530 = tpu.matmul %527, %529, %cst_380 {dimension_numbers = #tpu.dot_dimension_numbers<[1], [0], [0], [1], [0, 0, 1, 1], [], []>} : vector<4x96xf32>, vector<96x32xf32>, vector<4x32xf32> -> vector<4x32xf32>
    %531 = arith.addf %526, %530 : vector<4x32xf32>
    %c26_381 = arith.constant 26 : index
    %c0_382 = arith.constant 0 : index
    %532 = vector.load %arg9[%c26_381, %c0_382] : memref<296x96xf32, #tpu.memory_space<vmem>>, vector<4x96xf32>
    %c3_383 = arith.constant 3 : index
    %c2_384 = arith.constant 2 : index
    %c0_385 = arith.constant 0 : index
    %c0_386 = arith.constant 0 : index
    %533 = vector.load %arg4[%c3_383, %c2_384, %c0_385, %c0_386] : memref<4x3x96x32xf32, #tpu.memory_space<vmem>>, vector<1x1x96x32xf32>
    %534 = vector.shape_cast %533 : vector<1x1x96x32xf32> to vector<96x32xf32>
    %cst_387 = arith.constant dense<0.000000e+00> : vector<4x32xf32>
    %535 = tpu.matmul %532, %534, %cst_387 {dimension_numbers = #tpu.dot_dimension_numbers<[1], [0], [0], [1], [0, 0, 1, 1], [], []>} : vector<4x96xf32>, vector<96x32xf32>, vector<4x32xf32> -> vector<4x32xf32>
    %536 = arith.addf %531, %535 : vector<4x32xf32>
    %c3_388 = arith.constant 3 : index
    %c0_389 = arith.constant 0 : index
    %537 = vector.load %arg5[%c3_388, %c0_389] : memref<4x32xf32, #tpu.memory_space<vmem>>, vector<1x32xf32>
    %538 = vector.broadcast %537 : vector<1x32xf32> to vector<4x32xf32>
    %539 = arith.addf %536, %538 : vector<4x32xf32>
    %cst_390 = arith.constant 0.000000e+00 : f32
    %540 = vector.broadcast %cst_390 : f32 to vector<4x32xf32>
    %541 = arith.maximumf %539, %540 : vector<4x32xf32>
    %c0_391 = arith.constant 0 : index
    %c0_392 = arith.constant 0 : index
    %542 = vector.load %arg10[%c0_391, %c0_392] : memref<256x32xf32, #tpu.memory_space<vmem>>, vector<4x32xf32>
    tpu.vector_store %arg10[%c0_391, %c0_392], %541 {strides = array<i32>} : memref<256x32xf32, #tpu.memory_space<vmem>>, vector<4x32xf32>,
    %c0_393 = arith.constant 0 : index
    %c0_394 = arith.constant 0 : index
    %543 = tpu.strided_load %arg10[%c0_393, %c0_394] {strides = array<i32: 2, 1>} : memref<256x32xf32, #tpu.memory_space<vmem>>, vector<2x32xf32>
    %c1_395 = arith.constant 1 : index
    %c0_396 = arith.constant 0 : index
    %544 = tpu.strided_load %arg10[%c1_395, %c0_396] {strides = array<i32: 2, 1>} : memref<256x32xf32, #tpu.memory_space<vmem>>, vector<2x32xf32>
    %545 = arith.maximumf %543, %544 : vector<2x32xf32>
    %546 = vector.extract_strided_slice %545 {offsets = [0, 0], sizes = [1, 32], strides = [1, 1]} : vector<2x32xf32> to vector<1x32xf32>
    %547 = vector.extract_strided_slice %545 {offsets = [1, 0], sizes = [1, 32], strides = [1, 1]} : vector<2x32xf32> to vector<1x32xf32>
    %548 = arith.maximumf %546, %547 : vector<1x32xf32>
    %c0_397 = arith.constant 0 : index
    %c0_398 = arith.constant 0 : index
    %549 = vector.load %arg11[%c0_397, %c0_398] : memref<64x32xf32, #tpu.memory_space<vmem>>, vector<1x32xf32>
    tpu.vector_store %arg11[%c0_397, %c0_398], %548 {strides = array<i32>} : memref<64x32xf32, #tpu.memory_space<vmem>>, vector<1x32xf32>,
    %c0_399 = arith.constant 0 : index
    %c0_400 = arith.constant 0 : index
    %550 = vector.load %arg11[%c0_399, %c0_400] : memref<64x32xf32, #tpu.memory_space<vmem>>, vector<1x32xf32>
    %cst_401 = arith.constant dense<0.000000e+00> : vector<32xf32>
    %551 = vector.multi_reduction <add>, %550, %cst_401 [0] : vector<1x32xf32> to vector<32xf32>
    %552 = vector.shape_cast %551 : vector<32xf32> to vector<1x32xf32>
    %cst_402 = arith.constant 1.000000e+00 : f32
    %553 = vector.broadcast %cst_402 : f32 to vector<1x32xf32>
    %554 = arith.mulf %552, %553 : vector<1x32xf32>
    %c0_403 = arith.constant 0 : index
    %c0_404 = arith.constant 0 : index
    %555 = vector.load %arg6[%c0_403, %c0_404] : memref<1x32xf32, #tpu.memory_space<vmem>>, vector<1x32xf32>
    %556 = arith.mulf %554, %555 : vector<1x32xf32>
    %cst_405 = arith.constant dense<0.000000e+00> : vector<1xf32>
    %557 = vector.multi_reduction <add>, %556, %cst_405 [1] : vector<1x32xf32> to vector<1xf32>
    %558 = vector.shape_cast %557 : vector<1xf32> to vector<1x1xf32>
    %c0_406 = arith.constant 0 : index
    %c0_407 = arith.constant 0 : index
    %559 = vector.load %arg7[%c0_406, %c0_407] : memref<1x1xf32, #tpu.memory_space<vmem>>, vector<1x1xf32>
    %560 = arith.addf %558, %559 : vector<1x1xf32>
    %c0_408 = arith.constant 0 : index
    %c1_409 = arith.constant 1 : index
    %561 = vector.load %arg8[%c0_408, %c1_409] : memref<1x2xf32, #tpu.memory_space<vmem>>, vector<1x1xf32>
    tpu.vector_store %arg8[%c0_408, %c1_409], %560 {strides = array<i32>} : memref<1x2xf32, #tpu.memory_space<vmem>>, vector<1x1xf32>,
    return
  }
  func.func @transform_0(%arg0: i32) -> (i32, i32, i32) {
    %c0_i32 = arith.constant 0 : i32
    %c0_i32_0 = arith.constant 0 : i32
    %c0_i32_1 = arith.constant 0 : i32
    return %arg0, %c0_i32, %c0_i32_0 : i32, i32, i32
  }
  func.func @transform_1(%arg0: i32) -> (i32, i32) {
    %c0_i32 = arith.constant 0 : i32
    %c0_i32_0 = arith.constant 0 : i32
    %c0_i32_1 = arith.constant 0 : i32
    return %c0_i32, %c0_i32_0 : i32, i32
  }
  func.func @transform_2(%arg0: i32) -> (i32, i32) {
    %c0_i32 = arith.constant 0 : i32
    %c0_i32_0 = arith.constant 0 : i32
    %c0_i32_1 = arith.constant 0 : i32
    return %c0_i32, %c0_i32_0 : i32, i32
  }
  func.func @transform_3(%arg0: i32) -> (i32, i32, i32, i32) {
    %c0_i32 = arith.constant 0 : i32
    %c0_i32_0 = arith.constant 0 : i32
    %c0_i32_1 = arith.constant 0 : i32
    %c0_i32_2 = arith.constant 0 : i32
    %c0_i32_3 = arith.constant 0 : i32
    return %c0_i32, %c0_i32_0, %c0_i32_1, %c0_i32_2 : i32, i32, i32, i32
  }
  func.func @transform_4(%arg0: i32) -> (i32, i32) {
    %c0_i32 = arith.constant 0 : i32
    %c0_i32_0 = arith.constant 0 : i32
    %c0_i32_1 = arith.constant 0 : i32
    return %c0_i32, %c0_i32_0 : i32, i32
  }
  func.func @transform_5(%arg0: i32) -> (i32, i32) {
    %c0_i32 = arith.constant 0 : i32
    %c0_i32_0 = arith.constant 0 : i32
    %c0_i32_1 = arith.constant 0 : i32
    return %c0_i32, %c0_i32_0 : i32, i32
  }
  func.func @transform_6(%arg0: i32) -> (i32, i32) {
    %c0_i32 = arith.constant 0 : i32
    %c0_i32_0 = arith.constant 0 : i32
    %c0_i32_1 = arith.constant 0 : i32
    return %c0_i32, %c0_i32_0 : i32, i32
  }
  func.func @transform_7(%arg0: i32) -> (i32, i32) {
    %c0_i32 = arith.constant 0 : i32
    %c0_i32_0 = arith.constant 0 : i32
    return %arg0, %c0_i32 : i32, i32
  }
}

</mosaic_0001>

<bundles_post_ra>
// kernel: discriminator_forward.1
= control target key start
LH: loop header
LB: loop body
LE: loop exit
PB: predicated region body
PF: predicated region fallthrough
CT: control target
= control target key end

     0   :  { %s9409_s0 = inlined_call_operand.vmem [shape: f32[2,256,3], index: 0, kind: input, shape index: {}]   ;;  %s9410_s1 = inlined_call_operand.vmem [shape: f32[3,32], index: 1, kind: input, shape index: {}]   ;;  %s9411_s2 = inlined_call_operand.vmem [shape: f32[1,32], index: 2, kind: input, shape index: {}]   ;;  %s9412_s3 = inlined_call_operand.vmem [shape: f32[4,3,96,32], index: 3, kind: input, shape index: {}]   ;;  %s9413_s4 = inlined_call_operand.vmem [shape: f32[4,32], index: 4, kind: input, shape index: {}]   ;;  %s9414_s5 = inlined_call_operand.vmem [shape: f32[1,32], index: 5, kind: input, shape index: {}]   ;;  %s9415_s6 = inlined_call_operand.<no memory space> [shape: f32[1,1], index: 6, kind: input, shape index: {}]   ;;  %s9416_s7 = inlined_call_operand.hbm [shape: f32[1,2], index: 7, kind: output, shape index: {}]  }
   0x1   :  { %v12_v0 = vstv %s9415_s6 }
   0x2   :  { %13 = vst [vmem:[#allocation5] sm:$0x1] %v12_v0 }
   0x3   :  { %v65_v1 = vld [vmem:[%s9410_s1] sm:$0x7]  ;;  %vm167_vm0 = vcmask 1042432   ;;  %vm70_vm1 = vcmask 23552  }
   0x4   :  { %v33_v2 = vld [vmem:[%s9409_s0] sm:$0xff]  ;;  %5500 = vmatpush.msk.msra.mxu0 %vm167_vm0, %v65_v1 }
   0x5   :  { %5501 = vmatmul.msk.f32.vlgmr.msra.gmra.mxu0 %vm70_vm1, %v33_v2 }
   0x6   :  { %14 = vsyncpa [#allocation7], 0  ;;  %v34_v3 = vld [vmem:[%s9409_s0 + $0x8] sm:$0xff]  ;;  %v35_v4 = vld [vmem:[%s9409_s0 + $0x10] sm:$0xff]  ;;  %v316_v17 = vlaneseq  ;;  %s6219_s16 = smov 32   ;;  %v9426_v28 = vmov 0.0  }
   0x7   :  { %v36_v5 = vld [vmem:[%s9409_s0 + $0x18] sm:$0xff]  ;;  %v37_v6 = vld [vmem:[%s9409_s0 + $0x20] sm:$0xff]  ;;  %v38_v7 = vld [vmem:[%s9409_s0 + $0x28] sm:$0xff]  ;;  %vm798_vm4 = vcmask 1046528   ;;  %s6221_s19 = smov 64   ;;  %vm637_vm6 = vcmask 1040384  }
   0x8   :  { %v39_v8 = vld [vmem:[%s9409_s0 + $0x30] sm:$0xff]  ;;  %v40_v9 = vld [vmem:[%s9409_s0 + $0x38] sm:$0xff]  ;;  %v41_v10 = vld [vmem:[%s9409_s0 + $0x40] sm:$0xff]  ;;  %v6335_v19 = vshrl.u32 %v316_v17, 7  ;;  %vm29_vm15 = vcmask 785408   ;;  %s6223_s17 = smov [#allocation6]  }
   0x9   :  { %v42_v11 = vld [vmem:[%s9409_s0 + $0x48] sm:$0xff]  ;;  %v43_v12 = vld [vmem:[%s9409_s0 + $0x50] sm:$0xff]  ;;  %v44_v13 = vld [vmem:[%s9409_s0 + $0x58] sm:$0xff]  ;;  %31 = vst.msk [vmem:[#allocation2 + $0x8] sm:$0xff] %vm29_vm15, %v9426_v28  ;;  %s5489_s18 = sshll.u32 %s6223_s17, 4  ;;  %s5491_s21 = sshll.u32 %s9416_s7, 4  ;;  %s5490_s18 = int_to_ptr.vmem [resolvable:$true] %s5489_s18  ;;  %s5492_s21 = int_to_ptr.hbm [resolvable:$true] %s5491_s21 }
   0xa   :  { %v45_v14 = vld [vmem:[%s9409_s0 + $0x60] sm:$0xff]  ;;  %v46_v15 = vld [vmem:[%s9409_s0 + $0x68] sm:$0xff]  ;;  %v47_v16 = vld [vmem:[%s9409_s0 + $0x70] sm:$0xff]  ;;  %v6343_v21 = vadd.s32 8, %v6335_v19  ;;  %v349_v22 = vand.u32 15, %v6335_v19  ;;  %v6360_v30 = vadd.s32 16, %v6335_v19 }
   0xb   :  { %v48_v18 = vld [vmem:[%s9409_s0 + $0x78] sm:$0xff]  ;;  %v6340_v20 = vld [vmem:[%s9411_s2] ss:$0 sm:$0xff]  ;;  %v50_v32 = vld [vmem:[%s9409_s0 + $0x88] sm:$0xff]  ;;  %v6376_v43 = vadd.s32 24, %v6335_v19  ;;  %v6397_v55 = vadd.s32 32, %v6335_v19 }
   0xc   :  { %v49_v24 = vld [vmem:[%s9409_s0 + $0x80] sm:$0xff]  ;;  %v350_v27 = vand.u32 15, %v6343_v21  ;;  %vm477_vm2 = vcmp.ne.s32.totalorder %v349_v22, 0  ;;  %v351_v36 = vand.u32 15, %v6360_v30  ;;  %v51_v46 = vld [vmem:[%s9409_s0 + $0x90] sm:$0xff]  ;;  %v52_v58 = vld [vmem:[%s9409_s0 + $0x98] sm:$0xff] }
   0xd   :  { %5502 = vmatmul.msk.f32.gmra.mxu0 %vm70_vm1, %v34_v3  ;;  %v6357_v29 = vsel %vm477_vm2, 1.0, %v9426_v28  ;;  %v352_v51 = vand.u32 15, %v6376_v43  ;;  %v353_v63 = vand.u32 15, %v6397_v55  ;;  %32 = vst.msk [vmem:[#allocation2 + $0x10] sm:$0xff] %vm29_vm15, %v9426_v28 }
   0xe   :  { %vm382_vm3 = vcmp.ne.s32.totalorder %v350_v27, 15  ;;  %vm479_vm5 = vcmp.ne.s32.totalorder %v351_v36, 0  ;;  %v6455_v36 = vadd.s32 56, %v6335_v19  ;;  %1155 = vst.msk [vmem:[#allocation2 + $0x118] sm:$0xff] %vm29_vm15, %v9426_v28 }
   0xf   :  { %v6369_v35 = vsel %vm382_vm3, 1.0, %v9426_v28  ;;  %v6390_v49 = vsel %vm479_vm5, 1.0, %v9426_v28  ;;  %vm384_vm7 = vcmp.ne.s32.totalorder %v352_v51, 15  ;;  %vm481_vm8 = vcmp.ne.s32.totalorder %v353_v63, 0  ;;  %1156 = vst.msk [vmem:[#allocation2 + $0x120] sm:$0xff] %vm29_vm15, %v9426_v28 }
  0x10   :  { %v6408_v61 = vsel %vm384_vm7, 1.0, %v9426_v28  ;;  %v325_v51 = vadd.s32 64, %v6335_v19 }
  0x15   :  { %5503 = vmatmul.msk.f32.gmra.mxu0 %vm70_vm1, %v35_v4  ;;  %v6417_v4 = vadd.s32 40, %v6335_v19 }
  0x1d   :  { %5504 = vmatmul.msk.f32.gmra.mxu0 %vm70_vm1, %v36_v5 }
  0x25   :  { %5505 = vmatmul.msk.f32.gmra.mxu0 %vm70_vm1, %v37_v6  ;;  %v53_v6 = vld [vmem:[%s9409_s0 + $0xa0] sm:$0xff] }
  0x2d   :  { %5506 = vmatmul.msk.f32.gmra.mxu0 %vm70_vm1, %v38_v7 }
  0x35   :  { %5507 = vmatmul.msk.f32.gmra.mxu0 %vm70_vm1, %v39_v8 }
  0x3d   :  { %5508 = vmatmul.msk.f32.gmra.mxu0 %vm70_vm1, %v40_v9  ;;  %v6428_v9 = vsel %vm481_vm8, 1.0, %v9426_v28 }
  0x45   :  { %5509 = vmatmul.msk.f32.gmra.mxu0 %vm70_vm1, %v41_v10 }
  0x4d   :  { %5510 = vmatmul.msk.f32.gmra.mxu0 %vm70_vm1, %v42_v11  ;;  %v354_v11 = vand.u32 15, %v6417_v4 }
  0x4f   :  { %vm386_vm9 = vcmp.ne.s32.totalorder %v354_v11, 15 }
  0x55   :  { %5511 = vmatmul.msk.f32.gmra.mxu0 %vm70_vm1, %v43_v12 }
  0x5d   :  { %5512 = vmatmul.msk.f32.gmra.mxu0 %vm70_vm1, %v44_v13 }
  0x65   :  { %5513 = vmatmul.msk.f32.gmra.mxu0 %vm70_vm1, %v45_v14 }
  0x6d   :  { %5514 = vmatmul.msk.f32.gmra.mxu0 %vm70_vm1, %v46_v15  ;;  %v6434_v15 = vadd.s32 48, %v6335_v19 }
  0x6f   :  { %v355_v27 = vand.u32 15, %v6434_v15 }
  0x71   :  { %vm483_vm10 = vcmp.ne.s32.totalorder %v355_v27, 0 }
  0x75   :  { %5515 = vmatmul.msk.f32.gmra.mxu0 %vm70_vm1, %v47_v16 }
  0x7d   :  { %5516 = vmatmul.msk.f32.gmra.mxu0 %vm70_vm1, %v48_v18  ;;  %v54_v18 = vld [vmem:[%s9409_s0 + $0xa8] sm:$0xff] }
  0x82   :  { %v188_v23 = vpop.f32.mrf.mxu0 }
  0x83   :  { %v189_v25 = vadd.f32 %v6340_v20, %v188_v23 }
  0x85   :  { %v6350_v26 = vmax.f32 %v189_v25, 0.0  ;;  %5517 = vmatmul.msk.f32.gmra.mxu0 %vm70_vm1, %v49_v24  ;;  %v6446_v24 = vsel %vm386_vm9, 1.0, %v9426_v28  ;;  %vm1089_vm9 = vcmask 261120  }
  0x87   :  { %896 = vrot.lane.b32.xlu1 %v6350_v26, %s6219_s16  ;;  %v734_v34 = vmul.f32 %v6357_v29, %v6350_v26  ;;  %v638_v44 = vrot.slane %v6350_v26, 7 }
  0x89   :  { %v799_v39 = vrot.slane %v734_v34, 1 }
  0x8a   :  { %v191_v31 = vpop.f32.mrf.mxu0 }
  0x8b   :  { %v192_v33 = vadd.f32 %v6340_v20, %v191_v31 }
  0x8d   :  { %v285_v37 = vmax.f32 %v192_v33, 0.0  ;;  %5518 = vmatmul.msk.f32.gmra.mxu0 %vm70_vm1, %v50_v32 }
  0x8f   :  { %v574_v38 = vmul.f32 %v6369_v35, %v285_v37  ;;  %v800_v40 = vrot.slane %v285_v37, 1 }
  0x91   :  { %v639_v41 = vrot.slane %v574_v38, 7  ;;  %v801_v42 = vsel %vm798_vm4, %v799_v39, %v800_v40  ;;  %v55_v38 = vld [vmem:[%s9409_s0 + $0xb0] sm:$0xff] }
  0x92   :  { %v194_v45 = vpop.f32.mrf.mxu0  ;;  %993 = vrot.lane.b32.xlu1 %v801_v42, %s6221_s19 }
  0x93   :  { %v195_v47 = vadd.f32 %v6340_v20, %v194_v45  ;;  %v6387_v48 = vsel %vm637_vm6, %v638_v44, %v639_v41  ;;  %v356_v45 = vand.u32 15, %v6455_v36 }
  0x95   :  { %v286_v50 = vmax.f32 %v195_v47, 0.0  ;;  %5519 = vmatmul.msk.f32.gmra.mxu0 %vm70_vm1, %v51_v46  ;;  %vm388_vm11 = vcmp.ne.s32.totalorder %v356_v45, 15 }
  0x97   :  { %v641_v52 = vrot.slane %v286_v50, 7  ;;  %900 = vrot.lane.b32.xlu0 %v286_v50, %s6219_s16  ;;  %v736_v53 = vmul.f32 %v6390_v49, %v286_v50 }
  0x99   :  { %v802_v54 = vrot.slane %v736_v53, 1  ;;  %v6400_v56 = vsel %vm637_vm6, %v639_v41, %v641_v52  ;;  %v6467_v41 = vsel %vm483_vm10, 1.0, %v9426_v28 }
  0x9a   :  { %v197_v57 = vpop.f32.mrf.mxu0 }
  0x9b   :  { %v198_v59 = vadd.f32 %v6340_v20, %v197_v57  ;;  %v803_v60 = vsel %vm798_vm4, %v800_v40, %v802_v54 }
  0x9c   :  { %995 = vrot.lane.b32.xlu1 %v803_v60, %s6221_s19 }
  0x9d   :  { %v287_v62 = vmax.f32 %v198_v59, 0.0  ;;  %5520 = vmatmul.msk.f32.gmra.mxu0 %vm70_vm1, %v52_v58  ;;  %v6483_v59 = vsel %vm388_vm11, 1.0, %v9426_v28  ;;  %vm1122_vm11 = vcmask 523264  }
  0x9f   :  { %v576_v0 = vmul.f32 %v6408_v61, %v287_v62  ;;  %902 = vrot.lane.b32.xlu2 %v287_v62, %s6219_s16  ;;  %v804_v1 = vrot.slane %v287_v62, 1  ;;  %v357_v62 = vand.u32 15, %v325_v51  ;;  %v1227_v51 = vld [vmem:[%s9412_s3 + $0x30] sm:$0xff] }
  0xa1   :  { %v643_v2 = vrot.slane %v576_v0, 7  ;;  %v805_v3 = vsel %vm798_vm4, %v802_v54, %v804_v1  ;;  %v56_v54 = vld [vmem:[%s9409_s0 + $0xb8] sm:$0xff]  ;;  %vm485_vm12 = vcmp.ne.s32.totalorder %v357_v62, 0  ;;  %v1226_v62 = vld [vmem:[%s9412_s3 + $0x28] sm:$0xff] }
  0xa2   :  { %v200_v5 = vpop.f32.mrf.mxu0  ;;  %997 = vrot.lane.b32.xlu0 %v805_v3, %s6221_s19  ;;  %v326_v3 = vadd.s32 72, %v6335_v19  ;;  %v6500_v11 = vsel %vm485_vm12, 1.0, %v9426_v28 }
  0xa3   :  { %v201_v7 = vadd.f32 %v6340_v20, %v200_v5  ;;  %v6425_v8 = vsel %vm637_vm6, %v641_v52, %v643_v2 }
  0xa5   :  { %v288_v10 = vmax.f32 %v201_v7, 0.0  ;;  %5521 = vmatmul.msk.f32.gmra.mxu0 %vm70_vm1, %v53_v6  ;;  %v57_v6 = vld [vmem:[%s9409_s0 + $0xc0] sm:$0xff] }
  0xa7   :  { %v645_v12 = vrot.slane %v288_v10, 7  ;;  %v738_v13 = vmul.f32 %v6428_v9, %v288_v10 }
  0xa9   :  { %v806_v14 = vrot.slane %v738_v13, 1  ;;  %v6437_v16 = vsel %vm637_vm6, %v643_v2, %v645_v12  ;;  %v358_v13 = vand.u32 15, %v326_v3 }
  0xaa   :  { %v203_v17 = vpop.f32.mrf.mxu0  ;;  %898 = vrot.lane.b32.xlu0 %v285_v37, %s6219_s16 }
  0xab   :  { %v204_v22 = vadd.f32 %v6340_v20, %v203_v17  ;;  %v807_v23 = vsel %vm798_vm4, %v804_v1, %v806_v14  ;;  %vm390_vm13 = vcmp.ne.s32.totalorder %v358_v13, 15 }
  0xac   :  { %999 = vrot.lane.b32.xlu2 %v807_v23, %s6221_s19 }
  0xad   :  { %v289_v25 = vmax.f32 %v204_v22, 0.0  ;;  %5522 = vmatmul.msk.f32.gmra.mxu0 %vm70_vm1, %v54_v18  ;;  %v1231_v22 = vld [vmem:[%s9412_s3 + $0x50] sm:$0xff] }
  0xaf   :  { %v578_v31 = vmul.f32 %v6446_v24, %v289_v25  ;;  %906 = vrot.lane.b32.xlu1 %v289_v25, %s6219_s16  ;;  %v808_v32 = vrot.slane %v289_v25, 1  ;;  %v327_v25 = vadd.s32 80, %v6335_v19 }
  0xb1   :  { %v647_v33 = vrot.slane %v578_v31, 7  ;;  %v809_v34 = vsel %vm798_vm4, %v806_v14, %v808_v32  ;;  %v1232_v14 = vld [vmem:[%s9412_s3 + $0x58] sm:$0xff]  ;;  %v359_v45 = vand.u32 15, %v327_v25 }
  0xb2   :  { %v206_v37 = vpop.f32.mrf.mxu0  ;;  %1001 = vrot.lane.b32.xlu0 %v809_v34, %s6221_s19  ;;  %1467 = vmatpush.msra.mxu2 %v1232_v14  ;;  %v5575_v14 = vld [vmem:[%s9412_s3 + $0xb0] sm:$0xff] }
  0xb3   :  { %v207_v39 = vadd.f32 %v6340_v20, %v206_v37  ;;  %v6463_v40 = vsel %vm637_vm6, %v645_v12, %v647_v33  ;;  %vm487_vm14 = vcmp.ne.s32.totalorder %v359_v45, 0  ;;  %v5573_v45 = vld [vmem:[%s9412_s3 + $0xa0] sm:$0xff] }
  0xb4   :  { %904 = vrot.lane.b32.xlu2 %v288_v10, %s6219_s16  ;;  %1468 = vmatpush.msra.mxu2 %v1231_v22 }
  0xb5   :  { %v290_v42 = vmax.f32 %v207_v39, 0.0  ;;  %5523 = vmatmul.msk.f32.gmra.mxu0 %vm70_vm1, %v55_v38  ;;  %v6524_v38 = vsel %vm390_vm13, 1.0, %v9426_v28  ;;  %v1229_v39 = vld [vmem:[%s9412_s3 + $0x40] sm:$0xff] }
  0xb7   :  { %v649_v46 = vrot.slane %v290_v42, 7  ;;  %v740_v47 = vmul.f32 %v6467_v41, %v290_v42 }
  0xb9   :  { %v810_v50 = vrot.slane %v740_v47, 1  ;;  %v6474_v52 = vsel %vm637_vm6, %v647_v33, %v649_v46  ;;  %v1230_v33 = vld [vmem:[%s9412_s3 + $0x48] sm:$0xff] }
  0xba   :  { %v209_v53 = vpop.f32.mrf.mxu0  ;;  %908 = vrot.lane.b32.xlu0 %v290_v42, %s6219_s16  ;;  %1469 = vmatpush.msra.mxu2 %v1230_v33  ;;  %v5574_v33 = vld [vmem:[%s9412_s3 + $0xa8] sm:$0xff] }
  0xbb   :  { %v210_v57 = vadd.f32 %v6340_v20, %v209_v53  ;;  %v811_v58 = vsel %vm798_vm4, %v808_v32, %v810_v50  ;;  %v58_v32 = vld [vmem:[%s9409_s0 + $0xc8] sm:$0xff] }
  0xbc   :  { %1003 = vrot.lane.b32.xlu2 %v811_v58, %s6221_s19  ;;  %1470 = vmatpush.msra.mxu2 %v1229_v39 }
  0xbd   :  { %v291_v60 = vmax.f32 %v210_v57, 0.0  ;;  %5524 = vmatmul.msk.f32.gmra.mxu0 %vm70_vm1, %v56_v54  ;;  %v328_v57 = vadd.s32 88, %v6335_v19 }
  0xbf   :  { %v580_v63 = vmul.f32 %v6483_v59, %v291_v60  ;;  %v812_v0 = vrot.slane %v291_v60, 1 }
  0xc1   :  { %v651_v1 = vrot.slane %v580_v63, 7  ;;  %v813_v2 = vsel %vm798_vm4, %v810_v50, %v812_v0 }
  0xc2   :  { %v212_v5 = vpop.f32.mrf.mxu0  ;;  %1005 = vrot.lane.b32.xlu1 %v813_v2, %s6221_s19  ;;  %v1225_v2 = vld [vmem:[%s9412_s3 + $0x20] sm:$0xff] }
  0xc3   :  { %v213_v7 = vadd.f32 %v6340_v20, %v212_v5  ;;  %v6496_v10 = vsel %vm637_vm6, %v649_v46, %v651_v1  ;;  %v1228_v46 = vld [vmem:[%s9412_s3 + $0x38] sm:$0xff]  ;;  %v360_v5 = vand.u32 15, %v328_v57 }
  0xc4   :  { %910 = vrot.lane.b32.xlu2 %v291_v60, %s6219_s16  ;;  %1471 = vmatpush.msra.mxu2 %v1228_v46  ;;  %v59_v60 = vld [vmem:[%s9409_s0 + $0xd0] sm:$0xff]  ;;  %v1221_v46 = vld [vmem:[%s9412_s3] sm:$0xff] }
  0xc5   :  { %v292_v12 = vmax.f32 %v213_v7, 0.0  ;;  %5525 = vmatmul.msk.f32.gmra.mxu0 %vm70_vm1, %v57_v6  ;;  %v5576_v6 = vld [vmem:[%s9412_s3 + $0xb8] sm:$0xff]  ;;  %vm6576_vm2 = vcmp.ne.s32.totalorder %v360_v5, 15  ;;  %v5570_v5 = vld [vmem:[%s9412_s3 + $0x88] sm:$0xff] }
  0xc6   :  { %1472 = vmatpush.msra.mxu2 %v1227_v51  ;;  %v1224_v7 = vld [vmem:[%s9412_s3 + $0x18] sm:$0xff]  ;;  %1348 = vmatpush.msra.mxu1 %v5576_v6  ;;  %v1189_v51 = vld [vmem:[#allocation2 + $0x8] sm:$0xff] }
  0xc7   :  { %v653_v17 = vrot.slane %v292_v12, 7  ;;  %v742_v18 = vmul.f32 %v6500_v11, %v292_v12 }
  0xc8   :  { %1473 = vmatpush.msra.mxu2 %v1226_v62  ;;  %1349 = vmatpush.msra.mxu1 %v5575_v14  ;;  %v5569_v14 = vld [vmem:[%s9412_s3 + $0x80] sm:$0xff] }
  0xc9   :  { %v814_v23 = vrot.slane %v742_v18, 1  ;;  %v6512_v27 = vsel %vm637_vm6, %v651_v1, %v653_v17  ;;  %v6553_v1 = vsel %vm487_vm14, 1.0, %v9426_v28 }
  0xca   :  { %v215_v31 = vpop.f32.mrf.mxu0  ;;  %912 = vrot.lane.b32.xlu1 %v292_v12, %s6219_s16  ;;  %1474 = vmatpush.msra.mxu2 %v1225_v2 }
  0xcb   :  { %v216_v34 = vadd.f32 %v6340_v20, %v215_v31  ;;  %v815_v37 = vsel %vm798_vm4, %v812_v0, %v814_v23  ;;  %1350 = vmatpush.msra.mxu1 %v5574_v33  ;;  %v5567_v33 = vld [vmem:[%s9412_s3 + $0x70] sm:$0xff] }
  0xcc   :  { %1007 = vrot.lane.b32.xlu0 %v815_v37, %s6221_s19  ;;  %1475 = vmatpush.msra.mxu2 %v1224_v7 }
  0xcd   :  { %v293_v42 = vmax.f32 %v216_v34, 0.0  ;;  %5526 = vmatmul.msk.f32.gmra.mxu0 %vm70_vm1, %v58_v32  ;;  %v60_v32 = vld [vmem:[%s9409_s0 + $0xd8] sm:$0xff]  ;;  %v1222_v34 = vld [vmem:[%s9412_s3 + $0x8] sm:$0xff]  ;;  %1351 = vmatpush.msra.mxu1 %v5573_v45 }
  0xcf   :  { %v582_v47 = vmul.f32 %v6524_v38, %v293_v42  ;;  %v816_v50 = vrot.slane %v293_v42, 1 }
  0xd1   :  { %v655_v53 = vrot.slane %v582_v47, 7  ;;  %v817_v54 = vsel %vm798_vm4, %v814_v23, %v816_v50  ;;  %v329_v23 = vadd.s32 96, %v6335_v19 }
  0xd2   :  { %v218_v58 = vpop.f32.mrf.mxu0  ;;  %1009 = vrot.lane.b32.xlu2 %v817_v54, %s6221_s19 }
  0xd3   :  { %v219_v63 = vadd.f32 %v6340_v20, %v218_v58  ;;  %v6549_v0 = vsel %vm637_vm6, %v653_v17, %v655_v53  ;;  %v1223_v17 = vld [vmem:[%s9412_s3 + $0x10] sm:$0xff] }
  0xd4   :  { %914 = vrot.lane.b32.xlu0 %v293_v42, %s6219_s16  ;;  %1476 = vmatpush.msra.mxu2 %v1223_v17  ;;  %v6603_v42 = vsel %vm6576_vm2, 1.0, %v9426_v28  ;;  %v5571_v58 = vld [vmem:[%s9412_s3 + $0x90] sm:$0xff] }
  0xd5   :  { %v294_v3 = vmax.f32 %v219_v63, 0.0  ;;  %5527 = vmatmul.msk.f32.gmra.mxu0 %vm70_vm1, %v59_v60  ;;  %v330_v63 = vadd.s32 104, %v6335_v19 }
  0xd6   :  { %1477 = vmatpush.msra.mxu2 %v1222_v34  ;;  %v5651_v34 = vld [vmem:[%s9412_s3 + $0x110] sm:$0xff] }
  0xd7   :  { %v657_v12 = vrot.slane %v294_v3, 7  ;;  %v744_v13 = vmul.f32 %v6553_v1, %v294_v3  ;;  %v362_v18 = vand.u32 15, %v330_v63 }
  0xd8   :  { %1478 = vmatpush.msra.mxu2 %v1221_v46 }
  0xd9   :  { %v818_v22 = vrot.slane %v744_v13, 1  ;;  %v6584_v25 = vsel %vm637_vm6, %v655_v53, %v657_v12  ;;  %v5572_v53 = vld [vmem:[%s9412_s3 + $0x98] sm:$0xff]  ;;  %5609 = vmatmul.msk.f32.vlgmr.msra.gmra.mxu2 %vm29_vm15, %v1189_v51  ;;  %vm394_vm5 = vcmp.ne.s32.totalorder %v362_v18, 15  ;;  %v5650_v51 = vld [vmem:[%s9412_s3 + $0x108] sm:$0xff]  ;;  %v332_v18 = vadd.s32 120, %v6335_v19 }
  0xda   :  { %v221_v31 = vpop.f32.mrf.mxu0  ;;  %916 = vrot.lane.b32.xlu2 %v294_v3, %s6219_s16  ;;  %1352 = vmatpush.msra.mxu1 %v5572_v53  ;;  %v61_v3 = vld [vmem:[%s9409_s0 + $0xe0] sm:$0xff] }
  0xdb   :  { %v222_v37 = vadd.f32 %v6340_v20, %v221_v31  ;;  %v819_v39 = vsel %vm798_vm4, %v816_v50, %v818_v22  ;;  %v361_v50 = vand.u32 15, %v329_v23  ;;  %v5652_v23 = vld [vmem:[%s9412_s3 + $0x118] sm:$0xff] }
  0xdc   :  { %1011 = vrot.lane.b32.xlu1 %v819_v39, %s6221_s19  ;;  %1353 = vmatpush.msra.mxu1 %v5571_v58  ;;  %v331_v39 = vadd.s32 112, %v6335_v19  ;;  %v6673_v58 = vsel %vm394_vm5, 1.0, %v9426_v28 }
  0xdd   :  { %v295_v47 = vmax.f32 %v222_v37, 0.0  ;;  %5528 = vmatmul.msk.f32.gmra.mxu0 %vm70_vm1, %v60_v32  ;;  %vm489_vm3 = vcmp.ne.s32.totalorder %v361_v50, 0  ;;  %1721 = vmatpush.msra.mxu3 %v5652_v23  ;;  %v5566_v50 = vld [vmem:[%s9412_s3 + $0x68] sm:$0xff] }
  0xde   :  { %1354 = vmatpush.msra.mxu1 %v5570_v5  ;;  %v6636_v13 = vsel %vm489_vm3, 1.0, %v9426_v28  ;;  %v5646_v23 = vld [vmem:[%s9412_s3 + $0xe8] sm:$0xff] }
  0xdf   :  { %v584_v54 = vmul.f32 %v6603_v42, %v295_v47  ;;  %v820_v57 = vrot.slane %v295_v47, 1  ;;  %1722 = vmatpush.msra.mxu3 %v5651_v34 }
  0xe0   :  { %1355 = vmatpush.msra.mxu1 %v5569_v14 }
  0xe1   :  { %v659_v60 = vrot.slane %v584_v54, 7  ;;  %v821_v62 = vsel %vm798_vm4, %v818_v22, %v820_v57  ;;  %v1190_v22 = vld [vmem:[#allocation2 + $0x10] sm:$0xff]  ;;  %1723 = vmatpush.msra.mxu3 %v5650_v51 }
  0xe2   :  { %v224_v2 = vpop.f32.mrf.mxu0  ;;  %1013 = vrot.lane.b32.xlu0 %v821_v62, %s6221_s19  ;;  %5610 = vmatmul.msk.f32.gmra.mxu2 %vm29_vm15, %v1190_v22  ;;  %v5649_v62 = vld [vmem:[%s9412_s3 + $0x100] sm:$0xff]  ;;  %v5643_v51 = vld [vmem:[%s9412_s3 + $0xd0] sm:$0xff] }
  0xe3   :  { %v225_v6 = vadd.f32 %v6340_v20, %v224_v2  ;;  %v6632_v7 = vsel %vm637_vm6, %v657_v12, %v659_v60  ;;  %v5568_v12 = vld [vmem:[%s9412_s3 + $0x78] sm:$0xff]  ;;  %v363_v2 = vand.u32 15, %v331_v39  ;;  %1724 = vmatpush.msra.mxu3 %v5649_v62 }
  0xe4   :  { %918 = vrot.lane.b32.xlu1 %v295_v47, %s6219_s16  ;;  %1356 = vmatpush.msra.mxu1 %v5568_v12  ;;  %v62_v47 = vld [vmem:[%s9409_s0 + $0xe8] sm:$0xff]  ;;  %v63_v12 = vld [vmem:[%s9409_s0 + $0xf0] sm:$0xff] }
  0xe5   :  { %v296_v17 = vmax.f32 %v225_v6, 0.0  ;;  %5529 = vmatmul.msk.f32.gmra.mxu0 %vm70_vm1, %v61_v3  ;;  %v5647_v6 = vld [vmem:[%s9412_s3 + $0xf0] sm:$0xff]  ;;  %vm491_vm7 = vcmp.ne.s32.totalorder %v363_v2, 0  ;;  %v5642_v2 = vld [vmem:[%s9412_s3 + $0xc8] sm:$0xff] }
  0xe6   :  { %1357 = vmatpush.msra.mxu1 %v5567_v33  ;;  %v6705_v34 = vsel %vm491_vm7, 1.0, %v9426_v28 }
  0xe7   :  { %v661_v31 = vrot.slane %v296_v17, 7  ;;  %v746_v32 = vmul.f32 %v6636_v13, %v296_v17 }
  0xe8   :  { %1358 = vmatpush.msra.mxu1 %v5566_v50 }
  0xe9   :  { %v822_v37 = vrot.slane %v746_v32, 1  ;;  %v6658_v45 = vsel %vm637_vm6, %v659_v60, %v661_v31  ;;  %v5565_v60 = vld [vmem:[%s9412_s3 + $0x60] sm:$0xff] }
  0xea   :  { %v227_v46 = vpop.f32.mrf.mxu0  ;;  %920 = vrot.lane.b32.xlu0 %v296_v17, %s6219_s16  ;;  %1359 = vmatpush.msra.mxu1 %v5565_v60 }
  0xeb   :  { %v228_v53 = vadd.f32 %v6340_v20, %v227_v46  ;;  %v823_v54 = vsel %vm798_vm4, %v820_v57, %v822_v37  ;;  %v5648_v57 = vld [vmem:[%s9412_s3 + $0xf8] sm:$0xff]  ;;  %v364_v46 = vand.u32 15, %v332_v18 }
  0xec   :  { %1015 = vrot.lane.b32.xlu2 %v823_v54, %s6221_s19  ;;  %1725 = vmatpush.msra.mxu3 %v5648_v57  ;;  %v333_v54 = vadd.s32 128, %v6335_v19 }
  0xed   :  { %v297_v63 = vmax.f32 %v228_v53, 0.0  ;;  %5530 = vmatmul.msk.f32.gmra.mxu0 %vm70_vm1, %v62_v47  ;;  %vm396_vm8 = vcmp.ne.s32.totalorder %v364_v46, 15 }
  0xee   :  { %1726 = vmatpush.msra.mxu3 %v5647_v6 }
  0xef   :  { %v586_v3 = vmul.f32 %v6673_v58, %v297_v63  ;;  %v824_v5 = vrot.slane %v297_v63, 1 }
  0xf0   :  { %1727 = vmatpush.msra.mxu3 %v5646_v23 }
  0xf1   :  { %v663_v14 = vrot.slane %v586_v3, 7  ;;  %v825_v17 = vsel %vm798_vm4, %v822_v37, %v824_v5  ;;  %v5645_v37 = vld [vmem:[%s9412_s3 + $0xe0] sm:$0xff] }
  0xf2   :  { %v230_v22 = vpop.f32.mrf.mxu0  ;;  %1017 = vrot.lane.b32.xlu1 %v825_v17, %s6221_s19  ;;  %1728 = vmatpush.msra.mxu3 %v5645_v37  ;;  %v5641_v17 = vld [vmem:[%s9412_s3 + $0xc0] sm:$0xff] }
  0xf3   :  { %v231_v32 = vadd.f32 %v6340_v20, %v230_v22  ;;  %v6701_v33 = vsel %vm637_vm6, %v661_v31, %v663_v14  ;;  %v5644_v31 = vld [vmem:[%s9412_s3 + $0xd8] sm:$0xff]  ;;  %v365_v22 = vand.u32 15, %v333_v54 }
  0xf4   :  { %922 = vrot.lane.b32.xlu2 %v297_v63, %s6219_s16  ;;  %1729 = vmatpush.msra.mxu3 %v5644_v31  ;;  %v64_v63 = vld [vmem:[%s9409_s0 + $0xf8] sm:$0xff]  ;;  %v733_v31 = vsel %vm637_vm6, 0.0, %v638_v44 }
  0xf5   :  { %v298_v39 = vmax.f32 %v231_v32, 0.0  ;;  %5531 = vmatmul.msk.f32.gmra.mxu0 %vm70_vm1, %v63_v12  ;;  %vm493_vm10 = vcmp.ne.s32.totalorder %v365_v22, 0 }
  0xf6   :  { %1730 = vmatpush.msra.mxu3 %v5643_v51 }
  0xf7   :  { %v665_v47 = vrot.slane %v298_v39, 7  ;;  %v748_v50 = vmul.f32 %v6705_v34, %v298_v39 }
  0xf8   :  { %1731 = vmatpush.msra.mxu3 %v5642_v2 }
  0xf9   :  { %v826_v53 = vrot.slane %v748_v50, 1  ;;  %v6720_v60 = vsel %vm637_vm6, %v663_v14, %v665_v47  ;;  %v897_v6 = vpop.permute.xlu1 %896  ;;  %v6732_v14 = vsel %vm396_vm8, 1.0, %v9426_v28  ;;  %v903_v12 = vpop.permute.xlu2 %902 }
  0xfa   :  { %v233_v62 = vpop.f32.mrf.mxu0  ;;  %924 = vrot.lane.b32.xlu1 %v298_v39, %s6219_s16  ;;  %1732 = vmatpush.msra.mxu3 %v5641_v17  ;;  %v334_v39 = vadd.s32 136, %v6335_v19  ;;  %v1090_v54 = vsel %vm1089_vm9, %v733_v31, %v897_v6  ;;  %v1093_v26 = vsel %vm1089_vm9, %v6425_v8, %v903_v12 }
  0xfb   :  { %v234_v57 = vadd.f32 %v6340_v20, %v233_v62  ;;  %v827_v3 = vsel %vm798_vm4, %v824_v5, %v826_v53  ;;  %v6753_v62 = vsel %vm493_vm10, 1.0, %v9426_v28 }
  0xfc   :  { %1019 = vrot.lane.b32.xlu0 %v827_v3, %s6221_s19 }
  0xfd   :  { %v299_v18 = vmax.f32 %v234_v57, 0.0  ;;  %5532 = vmatmul.msk.f32.gmra.mxu0 %vm70_vm1, %v64_v63  ;;  %v366_v57 = vand.u32 15, %v334_v39 }
  0xff   :  { %v588_v23 = vmul.f32 %v6732_v14, %v299_v18  ;;  %v828_v5 = vrot.slane %v299_v18, 1  ;;  %vm398_vm12 = vcmp.ne.s32.totalorder %v366_v57, 15 }
 0x100   :  { %v6770_v39 = vsel %vm398_vm12, 1.0, %v9426_v28 }
 0x101   :  { %v667_v32 = vrot.slane %v588_v23, 7  ;;  %v829_v37 = vsel %vm798_vm4, %v826_v53, %v828_v5 }
 0x102   :  { %v236_v46 = vpop.f32.mrf.mxu0  ;;  %1021 = vrot.lane.b32.xlu2 %v829_v37, %s6221_s19 }
 0x103   :  { %v237_v50 = vadd.f32 %v6340_v20, %v236_v46  ;;  %v6748_v51 = vsel %vm637_vm6, %v665_v47, %v667_v32 }
 0x104   :  { %926 = vrot.lane.b32.xlu0 %v299_v18, %s6219_s16  ;;  %v994_v53 = vpop.permute.xlu1 %993  ;;  %v335_v18 = vadd.s32 144, %v6335_v19 }
 0x105   :  { %v300_v63 = vmax.f32 %v237_v50, 0.0  ;;  %v1123_v2 = vsel %vm1122_vm11, %v1090_v54, %v994_v53 }
 0x106   :  { %1157 = vst.msk [vmem:[#allocation2 + $0x18] sm:$0xff] %vm29_vm15, %v1123_v2  ;;  %v1000_v44 = vpop.permute.xlu2 %999  ;;  %v367_v50 = vand.u32 15, %v335_v18 }
 0x107   :  { %v669_v47 = vrot.slane %v300_v63, 7  ;;  %v1126_v3 = vsel %vm1122_vm11, %v1093_v26, %v1000_v44  ;;  %v750_v6 = vmul.f32 %v6753_v62, %v300_v63 }
 0x108   :  { %1160 = vst.msk [vmem:[#allocation2 + $0x30] sm:$0xff] %vm29_vm15, %v1126_v3  ;;  %vm495_vm13 = vcmp.ne.s32.totalorder %v367_v50, 0 }
 0x109   :  { %v830_v17 = vrot.slane %v750_v6, 1  ;;  %v6764_v22 = vsel %vm637_vm6, %v667_v32, %v669_v47  ;;  %v901_v37 = vpop.permute.xlu0 %900  ;;  %v6787_v6 = vsel %vm495_vm13, 1.0, %v9426_v28 }
 0x10a   :  { %v239_v23 = vpop.f32.mrf.mxu0  ;;  %928 = vrot.lane.b32.xlu2 %v300_v63, %s6219_s16  ;;  %v1092_v44 = vsel %vm1089_vm9, %v6400_v56, %v901_v37  ;;  %v337_v56 = vadd.s32 160, %v6335_v19 }
 0x10b   :  { %v240_v8 = vadd.f32 %v6340_v20, %v239_v23  ;;  %v831_v12 = vsel %vm798_vm4, %v828_v5, %v830_v17  ;;  %v336_v5 = vadd.s32 152, %v6335_v19 }
 0x10c   :  { %1023 = vrot.lane.b32.xlu1 %v831_v12, %s6221_s19 }
 0x10d   :  { %v301_v46 = vmax.f32 %v240_v8, 0.0  ;;  %v1191_v31 = vld [vmem:[#allocation2 + $0x18] sm:$0xff]  ;;  %v368_v23 = vand.u32 15, %v336_v5 }
 0x10e   :  { %5577 = vmatmul.msk.f32.vlgmr.msra.gmra.mxu1 %vm29_vm15, %v1191_v31  ;;  %5611 = vmatmul.msk.f32.gmra.mxu2 %vm29_vm15, %v1191_v31  ;;  %v996_v31 = vpop.permute.xlu1 %995 }
 0x10f   :  { %v590_v32 = vmul.f32 %v6770_v39, %v301_v46  ;;  %v832_v54 = vrot.slane %v301_v46, 1  ;;  %vm400_vm14 = vcmp.ne.s32.totalorder %v368_v23, 15 }
 0x110   :  { %v6800_v5 = vsel %vm400_vm14, 1.0, %v9426_v28 }
 0x111   :  { %v671_v53 = vrot.slane %v590_v32, 7  ;;  %v833_v63 = vsel %vm798_vm4, %v830_v17, %v832_v54  ;;  %9438 = vst [vmem:[#allocation9_spill] sm:$0xff] %v6800_v5 }
 0x112   :  { %v242_v2 = vpop.f32.mrf.mxu0  ;;  %1025 = vrot.lane.b32.xlu0 %v833_v63, %s6221_s19 }
 0x113   :  { %v243_v57 = vadd.f32 %v6340_v20, %v242_v2  ;;  %v6781_v26 = vsel %vm637_vm6, %v669_v47, %v671_v53  ;;  %v905_v47 = vpop.permute.xlu2 %904 }
 0x114   :  { %v998_v3 = vpop.permute.xlu0 %997  ;;  %930 = vrot.lane.b32.xlu1 %v301_v46, %s6219_s16 }
 0x115   :  { %v302_v17 = vmax.f32 %v243_v57, 0.0  ;;  %v1125_v18 = vsel %vm1122_vm11, %v1092_v44, %v998_v3 }
 0x116   :  { %1159 = vst.msk [vmem:[#allocation2 + $0x28] sm:$0xff] %vm29_vm15, %v1125_v18 }
 0x117   :  { %v673_v8 = vrot.slane %v302_v17, 7  ;;  %v752_v12 = vmul.f32 %v6787_v6, %v302_v17 }
 0x119   :  { %v834_v50 = vrot.slane %v752_v12, 1  ;;  %v6794_v37 = vsel %vm637_vm6, %v671_v53, %v673_v8  ;;  %v369_v53 = vand.u32 15, %v337_v56 }
 0x11a   :  { %v245_v46 = vpop.f32.mrf.mxu0  ;;  %932 = vrot.lane.b32.xlu0 %v302_v17, %s6219_s16 }
 0x11b   :  { %v246_v32 = vadd.f32 %v6340_v20, %v245_v46  ;;  %v835_v63 = vsel %vm798_vm4, %v832_v54, %v834_v50  ;;  %vm497_vm2 = vcmp.ne.s32.totalorder %v369_v53, 0 }
 0x11c   :  { %1027 = vrot.lane.b32.xlu2 %v835_v63, %s6221_s19  ;;  %v899_v2 = vpop.permute.xlu0 %898  ;;  %v1004_v63 = vpop.permute.xlu2 %1003 }
 0x11d   :  { %v303_v57 = vmax.f32 %v246_v32, 0.0  ;;  %v1091_v44 = vsel %vm1089_vm9, %v6387_v48, %v899_v2  ;;  %v1576_v3 = vld [vmem:[#allocation2 + $0x28] sm:$0xff]  ;;  %v338_v32 = vadd.s32 168, %v6335_v19 }
 0x11e   :  { %v1124_v18 = vsel %vm1122_vm11, %v1091_v44, %v996_v31  ;;  %5653 = vmatmul.msk.f32.vlgmr.msra.gmra.mxu3 %vm29_vm15, %v1576_v3 }
 0x11f   :  { %v592_v17 = vmul.f32 %v6800_v5, %v303_v57  ;;  %1158 = vst.msk [vmem:[#allocation2 + $0x20] sm:$0xff] %vm29_vm15, %v1124_v18  ;;  %v836_v54 = vrot.slane %v303_v57, 1 }
 0x121   :  { %v675_v23 = vrot.slane %v592_v17, 7  ;;  %v907_v12 = vpop.permute.xlu1 %906  ;;  %v837_v46 = vsel %vm798_vm4, %v834_v50, %v836_v54  ;;  %v1094_v50 = vsel %vm1089_vm9, %v6437_v16, %v905_v47 }
 0x122   :  { %v1095_v48 = vsel %vm1089_vm9, %v6463_v40, %v907_v12  ;;  %v248_v56 = vpop.f32.mrf.mxu0  ;;  %1029 = vrot.lane.b32.xlu1 %v837_v46, %s6221_s19  ;;  %v6824_v40 = vsel %vm497_vm2, 1.0, %v9426_v28  ;;  %v1577_v12 = vld [vmem:[#allocation2 + $0x30] sm:$0xff]  ;;  %v370_v46 = vand.u32 15, %v338_v32 }
 0x123   :  { %v1128_v31 = vsel %vm1122_vm11, %v1095_v48, %v1004_v63  ;;  %v249_v2 = vadd.f32 %v6340_v20, %v248_v56  ;;  %v6817_v44 = vsel %vm637_vm6, %v673_v8, %v675_v23  ;;  %9439 = vst [vmem:[#allocation10_spill] sm:$0xff] %v6824_v40 }
 0x124   :  { %1162 = vst.msk [vmem:[#allocation2 + $0x40] sm:$0xff] %vm29_vm15, %v1128_v31  ;;  %934 = vrot.lane.b32.xlu2 %v303_v57, %s6219_s16  ;;  %v1002_v53 = vpop.permute.xlu0 %1001  ;;  %vm402_vm3 = vcmp.ne.s32.totalorder %v370_v46, 15  ;;  %v339_v57 = vadd.s32 176, %v6335_v19 }
 0x125   :  { %v304_v18 = vmax.f32 %v249_v2, 0.0  ;;  %v1127_v17 = vsel %vm1122_vm11, %v1094_v50, %v1002_v53  ;;  %v6840_v2 = vsel %vm402_vm3, 1.0, %v9426_v28 }
 0x126   :  { %1161 = vst.msk [vmem:[#allocation2 + $0x38] sm:$0xff] %vm29_vm15, %v1127_v17  ;;  %5654 = vmatmul.msk.f32.gmra.mxu3 %vm29_vm15, %v1577_v12  ;;  %v1192_v8 = vld [vmem:[#allocation2 + $0x20] sm:$0xff]  ;;  %v371_v17 = vand.u32 15, %v339_v57 }
 0x127   :  { %v677_v63 = vrot.slane %v304_v18, 7  ;;  %5578 = vmatmul.msk.f32.gmra.mxu1 %vm29_vm15, %v1192_v8  ;;  %5612 = vmatmul.msk.f32.gmra.mxu2 %vm29_vm15, %v1192_v8  ;;  %v754_v16 = vmul.f32 %v6824_v40, %v304_v18  ;;  %9440 = vst [vmem:[#allocation11_spill] sm:$0xff] %v6840_v2 }
 0x128   :  { %vm499_vm5 = vcmp.ne.s32.totalorder %v371_v17, 0 }
 0x129   :  { %v838_v47 = vrot.slane %v754_v16, 1  ;;  %v6834_v48 = vsel %vm637_vm6, %v675_v23, %v677_v63  ;;  %v340_v16 = vadd.s32 184, %v6335_v19 }
 0x12a   :  { %v251_v32 = vpop.f32.mrf.mxu0  ;;  %936 = vrot.lane.b32.xlu1 %v304_v18, %s6219_s16 }
 0x12b   :  { %v252_v56 = vadd.f32 %v6340_v20, %v251_v32  ;;  %v839_v31 = vsel %vm798_vm4, %v836_v54, %v838_v47  ;;  %v1579_v40 = vld [vmem:[#allocation2 + $0x40] sm:$0xff] }
 0x12c   :  { %1031 = vrot.lane.b32.xlu0 %v839_v31, %s6221_s19  ;;  %v909_v8 = vpop.permute.xlu0 %908 }
 0x12d   :  { %v305_v50 = vmax.f32 %v252_v56, 0.0  ;;  %v1578_v53 = vld [vmem:[#allocation2 + $0x38] sm:$0xff]  ;;  %v1096_v31 = vsel %vm1089_vm9, %v6474_v52, %v909_v8  ;;  %v341_v8 = vadd.s32 192, %v6335_v19 }
 0x12e   :  { %5655 = vmatmul.msk.f32.gmra.mxu3 %vm29_vm15, %v1578_v53 }
 0x12f   :  { %v594_v23 = vmul.f32 %v6840_v2, %v305_v50  ;;  %5579 = vmatmul.msk.f32.gmra.mxu1 %vm29_vm15, %v1576_v3  ;;  %5613 = vmatmul.msk.f32.gmra.mxu2 %vm29_vm15, %v1576_v3  ;;  %v840_v18 = vrot.slane %v305_v50, 1 }
 0x131   :  { %v679_v46 = vrot.slane %v594_v23, 7  ;;  %v841_v54 = vsel %vm798_vm4, %v838_v47, %v840_v18  ;;  %v6858_v23 = vsel %vm499_vm5, 1.0, %v9426_v28  ;;  %v911_v47 = vpop.permute.xlu2 %910 }
 0x132   :  { %v254_v32 = vpop.f32.mrf.mxu0  ;;  %1033 = vrot.lane.b32.xlu2 %v841_v54, %s6221_s19  ;;  %9441 = vst [vmem:[#allocation12_spill] sm:$0xff] %v6858_v23  ;;  %v372_v54 = vand.u32 15, %v340_v16 }
 0x133   :  { %v255_v57 = vadd.f32 %v6340_v20, %v254_v32  ;;  %v6852_v56 = vsel %vm637_vm6, %v677_v63, %v679_v46 }
 0x134   :  { %938 = vrot.lane.b32.xlu0 %v305_v50, %s6219_s16  ;;  %v1006_v3 = vpop.permute.xlu1 %1005  ;;  %vm404_vm7 = vcmp.ne.s32.totalorder %v372_v54, 15 }
 0x135   :  { %v306_v2 = vmax.f32 %v255_v57, 0.0  ;;  %v1129_v17 = vsel %vm1122_vm11, %v1096_v31, %v1006_v3  ;;  %v6874_v3 = vsel %vm404_vm7, 1.0, %v9426_v28 }
 0x136   :  { %1163 = vst.msk [vmem:[#allocation2 + $0x48] sm:$0xff] %vm29_vm15, %v1129_v17  ;;  %5656 = vmatmul.msk.f32.gmra.mxu3 %vm29_vm15, %v1579_v40 }
 0x137   :  { %v681_v63 = vrot.slane %v306_v2, 7  ;;  %5580 = vmatmul.msk.f32.gmra.mxu1 %vm29_vm15, %v1577_v12  ;;  %5614 = vmatmul.msk.f32.gmra.mxu2 %vm29_vm15, %v1577_v12  ;;  %v756_v52 = vmul.f32 %v6858_v23, %v306_v2  ;;  %9442 = vst [vmem:[#allocation13_spill] sm:$0xff] %v6874_v3  ;;  %v373_v23 = vand.u32 15, %v341_v8 }
 0x139   :  { %v842_v50 = vrot.slane %v756_v52, 1  ;;  %v6868_v32 = vsel %vm637_vm6, %v679_v46, %v681_v63  ;;  %v1010_v17 = vpop.permute.xlu2 %1009  ;;  %vm501_vm8 = vcmp.ne.s32.totalorder %v373_v23, 0 }
 0x13a   :  { %v257_v57 = vpop.f32.mrf.mxu0  ;;  %940 = vrot.lane.b32.xlu2 %v306_v2, %s6219_s16  ;;  %v1097_v2 = vsel %vm1089_vm9, %v6496_v10, %v911_v47  ;;  %v342_v47 = vadd.s32 200, %v6335_v19 }
 0x13b   :  { %v258_v16 = vadd.f32 %v6340_v20, %v257_v57  ;;  %v843_v31 = vsel %vm798_vm4, %v840_v18, %v842_v50 }
 0x13c   :  { %1035 = vrot.lane.b32.xlu1 %v843_v31, %s6221_s19  ;;  %v913_v12 = vpop.permute.xlu1 %912  ;;  %v374_v23 = vand.u32 15, %v342_v47 }
 0x13d   :  { %v307_v54 = vmax.f32 %v258_v16, 0.0  ;;  %v1098_v52 = vsel %vm1089_vm9, %v6512_v27, %v913_v12  ;;  %v1580_v46 = vld [vmem:[#allocation2 + $0x48] sm:$0xff]  ;;  %v6895_v12 = vld [vmem:[%s9411_s2] ss:$0 sm:$0xff] }
 0x13e   :  { %v1131_v20 = vsel %vm1122_vm11, %v1098_v52, %v1010_v17  ;;  %v1008_v57 = vpop.permute.xlu0 %1007  ;;  %5657 = vmatmul.msk.f32.gmra.mxu3 %vm29_vm15, %v1580_v46  ;;  %vm406_vm10 = vcmp.ne.s32.totalorder %v374_v23, 15 }
 0x13f   :  { %v596_v18 = vmul.f32 %v6874_v3, %v307_v54  ;;  %1165 = vst.msk [vmem:[#allocation2 + $0x58] sm:$0xff] %vm29_vm15, %v1131_v20  ;;  %v1130_v31 = vsel %vm1122_vm11, %v1097_v2, %v1008_v57  ;;  %5581 = vmatmul.msk.f32.gmra.mxu1 %vm29_vm15, %v1578_v53  ;;  %5615 = vmatmul.msk.f32.gmra.mxu2 %vm29_vm15, %v1578_v53  ;;  %v844_v27 = vrot.slane %v307_v54, 1 }
 0x140   :  { %1164 = vst.msk [vmem:[#allocation2 + $0x50] sm:$0xff] %vm29_vm15, %v1130_v31 }
 0x141   :  { %v683_v8 = vrot.slane %v596_v18, 7  ;;  %v845_v10 = vsel %vm798_vm4, %v842_v50, %v844_v27  ;;  %v6903_v50 = vsel %vm501_vm8, 1.0, %v9426_v28  ;;  %v917_v3 = vpop.permute.xlu2 %916 }
 0x142   :  { %v260_v16 = vpop.f32.mrf.mxu0  ;;  %1037 = vrot.lane.b32.xlu0 %v845_v10, %s6221_s19  ;;  %9443 = vst [vmem:[#allocation14_spill] sm:$0xff] %v6903_v50 }
 0x143   :  { %v261_v17 = vadd.f32 %v6895_v12, %v260_v16  ;;  %v6899_v53 = vsel %vm637_vm6, %v681_v63, %v683_v8 }
 0x144   :  { %942 = vrot.lane.b32.xlu1 %v307_v54, %s6219_s16  ;;  %v343_v54 = vadd.s32 208, %v6335_v19 }
 0x145   :  { %v308_v52 = vmax.f32 %v261_v17, 0.0  ;;  %v6921_v17 = vsel %vm406_vm10, 1.0, %v9426_v28 }
 0x146   :  { %v6905_v2 = vld [vmem:[#allocation2 + $0x58] sm:$0xff]  ;;  %v915_v47 = vpop.permute.xlu0 %914 }
 0x147   :  { %v685_v20 = vrot.slane %v308_v52, 7  ;;  %5582 = vmatmul.msk.f32.gmra.mxu1 %vm29_vm15, %v1579_v40  ;;  %5616 = vmatmul.msk.f32.gmra.mxu2 %vm29_vm15, %v1579_v40  ;;  %v1581_v57 = vld [vmem:[#allocation2 + $0x50] sm:$0xff]  ;;  %v758_v18 = vmul.f32 %v6903_v50, %v308_v52  ;;  %2265 = vst.msk [vmem:[#allocation2 + $0x58] sm:$0xff] %vm29_vm15, %v9426_v28  ;;  %v1099_v50 = vsel %vm1089_vm9, %v6549_v0, %v915_v47  ;;  %v344_v0 = vadd.s32 216, %v6335_v19 }
 0x148   :  { %5658 = vmatmul.msk.f32.gmra.mxu3 %vm29_vm15, %v1581_v57 }
 0x149   :  { %v846_v63 = vrot.slane %v758_v18, 1  ;;  %v6915_v31 = vsel %vm637_vm6, %v683_v8, %v685_v20  ;;  %v375_v18 = vand.u32 15, %v343_v54 }
 0x14a   :  { %v263_v10 = vpop.f32.mrf.mxu0  ;;  %944 = vrot.lane.b32.xlu0 %v308_v52, %s6219_s16 }
 0x14b   :  { %v264_v40 = vadd.f32 %v6895_v12, %v263_v10  ;;  %v847_v16 = vsel %vm798_vm4, %v844_v27, %v846_v63  ;;  %vm503_vm12 = vcmp.ne.s32.totalorder %v375_v18, 0 }
 0x14c   :  { %1039 = vrot.lane.b32.xlu2 %v847_v16, %s6221_s19 }
 0x14d   :  { %v309_v23 = vmax.f32 %v264_v40, 0.0 }
 0x14e   :  { %v1012_v8 = vpop.permute.xlu1 %1011 }
 0x14f   :  { %v598_v5 = vmul.f32 %v6921_v17, %v309_v23  ;;  %v1132_v52 = vsel %vm1122_vm11, %v1099_v50, %v1012_v8  ;;  %5583 = vmatmul.msk.f32.gmra.mxu1 %vm29_vm15, %v1580_v46  ;;  %5617 = vmatmul.msk.f32.gmra.mxu2 %vm29_vm15, %v1580_v46  ;;  %v848_v27 = vrot.slane %v309_v23, 1  ;;  %v1100_v46 = vsel %vm1089_vm9, %v6584_v25, %v917_v3 }
 0x150   :  { %1166 = vst.msk [vmem:[#allocation2 + $0x60] sm:$0xff] %vm29_vm15, %v1132_v52  ;;  %5659 = vmatmul.msk.f32.gmra.mxu3 %vm29_vm15, %v6905_v2  ;;  %v376_v8 = vand.u32 15, %v344_v0 }
 0x151   :  { %v687_v54 = vrot.slane %v598_v5, 7  ;;  %v849_v10 = vsel %vm798_vm4, %v846_v63, %v848_v27  ;;  %v6944_v5 = vsel %vm503_vm12, 1.0, %v9426_v28 }
 0x152   :  { %v266_v47 = vpop.f32.mrf.mxu0  ;;  %1041 = vrot.lane.b32.xlu1 %v849_v10, %s6221_s19  ;;  %9444 = vst [vmem:[#allocation15_spill] sm:$0xff] %v6944_v5  ;;  %v1016_v10 = vpop.permute.xlu2 %1015  ;;  %vm408_vm13 = vcmp.ne.s32.totalorder %v376_v8, 15 }
 0x153   :  { %v267_v50 = vadd.f32 %v6895_v12, %v266_v47  ;;  %v6938_v40 = vsel %vm637_vm6, %v685_v20, %v687_v54 }
 0x154   :  { %946 = vrot.lane.b32.xlu2 %v309_v23, %s6219_s16  ;;  %v1014_v16 = vpop.permute.xlu0 %1013 }
 0x155   :  { %v310_v63 = vmax.f32 %v267_v50, 0.0  ;;  %v1133_v18 = vsel %vm1122_vm11, %v1100_v46, %v1014_v16  ;;  %v345_v50 = vadd.s32 224, %v6335_v19 }
 0x156   :  { %1167 = vst.msk [vmem:[#allocation2 + $0x68] sm:$0xff] %vm29_vm15, %v1133_v18  ;;  %v919_v52 = vpop.permute.xlu1 %918  ;;  %v6964_v18 = vsel %vm408_vm13, 1.0, %v9426_v28 }
 0x157   :  { %v689_v47 = vrot.slane %v310_v63, 7  ;;  %v1101_v20 = vsel %vm1089_vm9, %v6632_v7, %v919_v52  ;;  %5584 = vmatmul.msk.f32.gmra.mxu1 %vm29_vm15, %v1581_v57  ;;  %5618 = vmatmul.msk.f32.gmra.mxu2 %vm29_vm15, %v1581_v57  ;;  %v1583_v25 = vld [vmem:[#allocation2 + $0x60] sm:$0xff]  ;;  %v760_v3 = vmul.f32 %v6944_v5, %v310_v63  ;;  %9445 = vst [vmem:[#allocation16_spill] sm:$0xff] %v6964_v18  ;;  %v377_v8 = vand.u32 15, %v345_v50 }
 0x158   :  { %v1134_v23 = vsel %vm1122_vm11, %v1101_v20, %v1016_v10  ;;  %5660 = vmatmul.msk.f32.gmra.mxu3 %vm29_vm15, %v1583_v25 }
 0x159   :  { %1168 = vst.msk [vmem:[#allocation2 + $0x70] sm:$0xff] %vm29_vm15, %v1134_v23  ;;  %v850_v0 = vrot.slane %v760_v3, 1  ;;  %v6958_v46 = vsel %vm637_vm6, %v687_v54, %v689_v47  ;;  %v346_v23 = vadd.s32 232, %v6335_v19  ;;  %vm505_vm14 = vcmp.ne.s32.totalorder %v377_v8, 0 }
 0x15a   :  { %v269_v7 = vpop.f32.mrf.mxu0  ;;  %948 = vrot.lane.b32.xlu1 %v310_v63, %s6219_s16 }
 0x15b   :  { %v270_v57 = vadd.f32 %v6895_v12, %v269_v7  ;;  %v851_v16 = vsel %vm798_vm4, %v848_v27, %v850_v0  ;;  %v378_v5 = vand.u32 15, %v346_v23 }
 0x15c   :  { %1043 = vrot.lane.b32.xlu0 %v851_v16, %s6221_s19  ;;  %v921_v20 = vpop.permute.xlu0 %920 }
 0x15d   :  { %v311_v52 = vmax.f32 %v270_v57, 0.0  ;;  %v1584_v54 = vld [vmem:[#allocation2 + $0x68] sm:$0xff]  ;;  %vm410_vm2 = vcmp.ne.s32.totalorder %v378_v5, 15 }
 0x15f   :  { %v600_v10 = vmul.f32 %v6964_v18, %v311_v52  ;;  %5585 = vmatmul.msk.f32.gmra.mxu1 %vm29_vm15, %v6905_v2  ;;  %5619 = vmatmul.msk.f32.gmra.mxu2 %vm29_vm15, %v6905_v2  ;;  %v852_v63 = vrot.slane %v311_v52, 1  ;;  %v1102_v2 = vsel %vm1089_vm9, %v6658_v45, %v921_v20  ;;  %v347_v20 = vadd.s32 240, %v6335_v19 }
 0x160   :  { %5661 = vmatmul.msk.f32.gmra.mxu3 %vm29_vm15, %v1584_v54 }
 0x161   :  { %v691_v27 = vrot.slane %v600_v10, 7  ;;  %v853_v3 = vsel %vm798_vm4, %v850_v0, %v852_v63  ;;  %v6984_v10 = vsel %vm505_vm14, 1.0, %v9426_v28  ;;  %v923_v0 = vpop.permute.xlu2 %922 }
 0x162   :  { %v272_v50 = vpop.f32.mrf.mxu0  ;;  %1045 = vrot.lane.b32.xlu2 %v853_v3, %s6221_s19  ;;  %9446 = vst [vmem:[#allocation17_spill] sm:$0xff] %v6984_v10 }
 0x163   :  { %v273_v7 = vadd.f32 %v6895_v12, %v272_v50  ;;  %v6978_v57 = vsel %vm637_vm6, %v689_v47, %v691_v27  ;;  %v1585_v47 = vld [vmem:[#allocation2 + $0x70] sm:$0xff] }
 0x164   :  { %950 = vrot.lane.b32.xlu0 %v311_v52, %s6219_s16  ;;  %v1018_v16 = vpop.permute.xlu1 %1017 }
 0x165   :  { %v312_v18 = vmax.f32 %v273_v7, 0.0  ;;  %v1135_v8 = vsel %vm1122_vm11, %v1102_v2, %v1018_v16 }
 0x166   :  { %1169 = vst.msk [vmem:[#allocation2 + $0x78] sm:$0xff] %vm29_vm15, %v1135_v8 }
 0x167   :  { %v693_v3 = vrot.slane %v312_v18, 7  ;;  %5586 = vmatmul.msk.f32.gmra.mxu1 %vm29_vm15, %v1583_v25  ;;  %5620 = vmatmul.msk.f32.gmra.mxu2 %vm29_vm15, %v1583_v25  ;;  %v762_v45 = vmul.f32 %v6984_v10, %v312_v18  ;;  %v7000_v25 = vsel %vm410_vm2, 1.0, %v9426_v28  ;;  %v1103_v10 = vsel %vm1089_vm9, %v6701_v33, %v923_v0 }
 0x168   :  { %5662 = vmatmul.msk.f32.gmra.mxu3 %vm29_vm15, %v1585_v47  ;;  %v348_v0 = vadd.s32 248, %v6335_v19 }
 0x169   :  { %v854_v52 = vrot.slane %v762_v45, 1  ;;  %v6994_v50 = vsel %vm637_vm6, %v691_v27, %v693_v3  ;;  %v1022_v5 = vpop.permute.xlu2 %1021  ;;  %v379_v27 = vand.u32 15, %v347_v20 }
 0x16a   :  { %v275_v23 = vpop.f32.mrf.mxu0  ;;  %952 = vrot.lane.b32.xlu2 %v312_v18, %s6219_s16 }
 0x16b   :  { %v276_v7 = vadd.f32 %v6895_v12, %v275_v23  ;;  %v855_v2 = vsel %vm798_vm4, %v852_v63, %v854_v52  ;;  %vm507_vm3 = vcmp.ne.s32.totalorder %v379_v27, 0 }
 0x16c   :  { %1047 = vrot.lane.b32.xlu1 %v855_v2, %s6221_s19  ;;  %v925_v16 = vpop.permute.xlu1 %924 }
 0x16d   :  { %v313_v8 = vmax.f32 %v276_v7, 0.0  ;;  %v1104_v45 = vsel %vm1089_vm9, %v6720_v60, %v925_v16  ;;  %v1586_v7 = vld [vmem:[#allocation2 + $0x78] sm:$0xff] }
 0x16e   :  { %v1137_v18 = vsel %vm1122_vm11, %v1104_v45, %v1022_v5  ;;  %v1020_v23 = vpop.permute.xlu0 %1019  ;;  %v380_v45 = vand.u32 15, %v348_v0 }
 0x16f   :  { %v602_v63 = vmul.f32 %v7000_v25, %v313_v8  ;;  %1171 = vst.msk [vmem:[#allocation2 + $0x88] sm:$0xff] %vm29_vm15, %v1137_v18  ;;  %v1136_v28 = vsel %vm1122_vm11, %v1103_v10, %v1020_v23  ;;  %5587 = vmatmul.msk.f32.gmra.mxu1 %vm29_vm15, %v1584_v54  ;;  %5621 = vmatmul.msk.f32.gmra.mxu2 %vm29_vm15, %v1584_v54  ;;  %v856_v2 = vrot.slane %v313_v8, 1  ;;  %v9447_v54 = vmov 0.0  }
 0x170   :  { %1170 = vst.msk [vmem:[#allocation2 + $0x80] sm:$0xff] %vm29_vm15, %v1136_v28  ;;  %5663 = vmatmul.msk.f32.gmra.mxu3 %vm29_vm15, %v1586_v7  ;;  %v7024_v28 = vsel %vm507_vm3, 1.0, %v9447_v54  ;;  %vm412_vm5 = vcmp.ne.s32.totalorder %v380_v45, 15 }
 0x171   :  { %v695_v33 = vrot.slane %v602_v63, 7  ;;  %v857_v60 = vsel %vm798_vm4, %v854_v52, %v856_v2 }
 0x172   :  { %v278_v20 = vpop.f32.mrf.mxu0  ;;  %1049 = vrot.lane.b32.xlu0 %v857_v60, %s6221_s19 }
 0x173   :  { %v279_v10 = vadd.f32 %v6895_v12, %v278_v20  ;;  %v7020_v16 = vsel %vm637_vm6, %v693_v3, %v695_v33 }
 0x174   :  { %954 = vrot.lane.b32.xlu1 %v313_v8, %s6219_s16 }
 0x175   :  { %v314_v5 = vmax.f32 %v279_v10, 0.0 }
 0x176   :  { %v927_v63 = vpop.permute.xlu0 %926 }
 0x177   :  { %v697_v18 = vrot.slane %v314_v5, 7  ;;  %5588 = vmatmul.msk.f32.gmra.mxu1 %vm29_vm15, %v1585_v47  ;;  %5622 = vmatmul.msk.f32.gmra.mxu2 %vm29_vm15, %v1585_v47  ;;  %v1587_v52 = vld [vmem:[#allocation2 + $0x80] sm:$0xff]  ;;  %v764_v27 = vmul.f32 %v7024_v28, %v314_v5  ;;  %v7037_v47 = vsel %vm412_vm5, 1.0, %v9447_v54  ;;  %v1105_v10 = vsel %vm1089_vm9, %v6748_v51, %v927_v63 }
 0x178   :  { %5664 = vmatmul.msk.f32.gmra.mxu3 %vm29_vm15, %v1587_v52 }
 0x179   :  { %v858_v3 = vrot.slane %v764_v27, 1  ;;  %v7031_v23 = vsel %vm637_vm6, %v695_v33, %v697_v18  ;;  %v929_v33 = vpop.permute.xlu2 %928 }
 0x17a   :  { %v281_v8 = vpop.f32.mrf.mxu0  ;;  %956 = vrot.lane.b32.xlu0 %v314_v5, %s6219_s16 }
 0x17b   :  { %v282_v60 = vadd.f32 %v6895_v12, %v281_v8  ;;  %v859_v0 = vsel %vm798_vm4, %v856_v2, %v858_v3  ;;  %v1588_v12 = vld [vmem:[#allocation2 + $0x88] sm:$0xff] }
 0x17c   :  { %1051 = vrot.lane.b32.xlu2 %v859_v0, %s6221_s19 }
 0x17d   :  { %v315_v20 = vmax.f32 %v282_v60, 0.0 }
 0x17e   :  { %v1024_v45 = vpop.permute.xlu1 %1023 }
 0x17f   :  { %v604_v27 = vmul.f32 %v7037_v47, %v315_v20  ;;  %v1138_v5 = vsel %vm1122_vm11, %v1105_v10, %v1024_v45  ;;  %5589 = vmatmul.msk.f32.gmra.mxu1 %vm29_vm15, %v1586_v7  ;;  %5623 = vmatmul.msk.f32.gmra.mxu2 %vm29_vm15, %v1586_v7  ;;  %v860_v2 = vrot.slane %v315_v20, 1  ;;  %v1106_v7 = vsel %vm1089_vm9, %v6764_v22, %v929_v33  ;;  %v1480_v22 = vpop.f32.mrf.mxu2 }
 0x180   :  { %1172 = vst.msk [vmem:[#allocation2 + $0x90] sm:$0xff] %vm29_vm15, %v1138_v5  ;;  %5665 = vmatmul.msk.f32.gmra.mxu3 %vm29_vm15, %v1588_v12 }
 0x181   :  { %v699_v8 = vrot.slane %v604_v27, 7  ;;  %v863_v60 = vsel %vm798_vm4, %v860_v2, 0.0  ;;  %v861_v51 = vsel %vm798_vm4, %v858_v3, %v860_v2  ;;  %v1028_v27 = vpop.permute.xlu2 %1027 }
 0x182   :  { %1055 = vrot.lane.b32.xlu0 %v863_v60, %s6221_s19  ;;  %1053 = vrot.lane.b32.xlu1 %v861_v51, %s6221_s19 }
 0x183   :  { %v7053_v63 = vsel %vm637_vm6, %v697_v18, %v699_v8 }
 0x184   :  { %958 = vrot.lane.b32.xlu2 %v315_v20, %s6219_s16  ;;  %v1026_v0 = vpop.permute.xlu0 %1025 }
 0x185   :  { %v1139_v10 = vsel %vm1122_vm11, %v1106_v7, %v1026_v0 }
 0x186   :  { %1173 = vst.msk [vmem:[#allocation2 + $0x98] sm:$0xff] %vm29_vm15, %v1139_v10  ;;  %v931_v45 = vpop.permute.xlu1 %930 }
 0x187   :  { %v1107_v3 = vsel %vm1089_vm9, %v6781_v26, %v931_v45  ;;  %5590 = vmatmul.msk.f32.gmra.mxu1 %vm29_vm15, %v1587_v52  ;;  %5624 = vmatmul.msk.f32.gmra.mxu2 %vm29_vm15, %v1587_v52  ;;  %v1589_v18 = vld [vmem:[#allocation2 + $0x90] sm:$0xff]  ;;  %v1483_v51 = vpop.f32.mrf.mxu2 }
 0x188   :  { %v1140_v5 = vsel %vm1122_vm11, %v1107_v3, %v1028_v27  ;;  %5666 = vmatmul.msk.f32.gmra.mxu3 %vm29_vm15, %v1589_v18 }
 0x189   :  { %1174 = vst.msk [vmem:[#allocation2 + $0xa0] sm:$0xff] %vm29_vm15, %v1140_v5  ;;  %v935_v2 = vpop.permute.xlu2 %934 }
 0x18a   :  { %v1109_v10 = vsel %vm1089_vm9, %v6817_v44, %v935_v2  ;;  %v7091_v44 = vld [vmem:[%s9413_s4] ss:$0 sm:$0xff] }
 0x18c   :  { %v933_v26 = vpop.permute.xlu0 %932 }
 0x18d   :  { %v1590_v20 = vld [vmem:[#allocation2 + $0x98] sm:$0xff]  ;;  %v1108_v33 = vsel %vm1089_vm9, %v6794_v37, %v933_v26 }
 0x18f   :  { %5591 = vmatmul.msk.f32.gmra.mxu1 %vm29_vm15, %v1588_v12  ;;  %5625 = vmatmul.msk.f32.gmra.mxu2 %vm29_vm15, %v1588_v12  ;;  %v1361_v12 = vpop.f32.mrf.mxu1 }
 0x190   :  { %5667 = vmatmul.msk.f32.gmra.mxu3 %vm29_vm15, %v1590_v20  ;;  %v1591_v60 = vld [vmem:[#allocation2 + $0xa0] sm:$0xff]  ;;  %v1481_v5 = vadd.f32 %v1480_v22, %v1361_v12 }
 0x191   :  { %v1034_v0 = vpop.permute.xlu2 %1033  ;;  %v1486_v26 = vpop.f32.mrf.mxu2 }
 0x194   :  { %v1030_v52 = vpop.permute.xlu1 %1029 }
 0x195   :  { %v1141_v8 = vsel %vm1122_vm11, %v1108_v33, %v1030_v52 }
 0x196   :  { %1175 = vst.msk [vmem:[#allocation2 + $0xa8] sm:$0xff] %vm29_vm15, %v1141_v8 }
 0x197   :  { %5592 = vmatmul.msk.f32.gmra.mxu1 %vm29_vm15, %v1589_v18  ;;  %5626 = vmatmul.msk.f32.gmra.mxu2 %vm29_vm15, %v1589_v18 }
 0x198   :  { %5668 = vmatmul.msk.f32.gmra.mxu3 %vm29_vm15, %v1591_v60 }
 0x19c   :  { %v937_v7 = vpop.permute.xlu1 %936 }
 0x19d   :  { %v1110_v37 = vsel %vm1089_vm9, %v6834_v48, %v937_v7  ;;  %v1592_v18 = vld [vmem:[#allocation2 + $0xa8] sm:$0xff] }
 0x19e   :  { %v1143_v45 = vsel %vm1122_vm11, %v1110_v37, %v1034_v0  ;;  %v1032_v27 = vpop.permute.xlu0 %1031 }
 0x19f   :  { %1177 = vst.msk [vmem:[#allocation2 + $0xb8] sm:$0xff] %vm29_vm15, %v1143_v45  ;;  %v1142_v3 = vsel %vm1122_vm11, %v1109_v10, %v1032_v27  ;;  %5593 = vmatmul.msk.f32.gmra.mxu1 %vm29_vm15, %v1590_v20  ;;  %5627 = vmatmul.msk.f32.gmra.mxu2 %vm29_vm15, %v1590_v20 }
 0x1a0   :  { %1176 = vst.msk [vmem:[#allocation2 + $0xb0] sm:$0xff] %vm29_vm15, %v1142_v3  ;;  %5669 = vmatmul.msk.f32.gmra.mxu3 %vm29_vm15, %v1592_v18 }
 0x1a1   :  { %v1734_v48 = vpop.f32.mrf.mxu3 }
 0x1a2   :  { %v1830_v33 = vadd.f32 %v1734_v48, %v1481_v5  ;;  %v941_v48 = vpop.permute.xlu2 %940 }
 0x1a4   :  { %v1864_v52 = vadd.f32 %v7091_v44, %v1830_v33  ;;  %v1364_v2 = vpop.f32.mrf.mxu1 }
 0x1a5   :  { %v1484_v20 = vadd.f32 %v1483_v51, %v1364_v2 }
 0x1a6   :  { %v1896_v8 = vmax.f32 %v1864_v52, 0.0  ;;  %v939_v37 = vpop.permute.xlu0 %938  ;;  %v1594_v51 = vld [vmem:[#allocation2 + $0xb8] sm:$0xff] }
 0x1a7   :  { %5594 = vmatmul.msk.f32.gmra.mxu1 %vm29_vm15, %v1591_v60  ;;  %5628 = vmatmul.msk.f32.gmra.mxu2 %vm29_vm15, %v1591_v60  ;;  %v1593_v22 = vld [vmem:[#allocation2 + $0xb0] sm:$0xff]  ;;  %v1111_v27 = vsel %vm1089_vm9, %v6852_v56, %v939_v37 }
 0x1a8   :  { %1928 = vst.msk [vmem:[#allocation3] sm:$0xff] %vm1089_vm9, %v1896_v8  ;;  %5670 = vmatmul.msk.f32.gmra.mxu3 %vm29_vm15, %v1593_v22  ;;  %v1112_v8 = vsel %vm1089_vm9, %v6868_v32, %v941_v48 }
 0x1a9   :  { %v1737_v12 = vpop.f32.mrf.mxu3 }
 0x1aa   :  { %v1831_v7 = vadd.f32 %v1737_v12, %v1484_v20  ;;  %v1489_v0 = vpop.f32.mrf.mxu2 }
 0x1ac   :  { %v1865_v10 = vadd.f32 %v7091_v44, %v1831_v7  ;;  %v1367_v45 = vpop.f32.mrf.mxu1 }
 0x1ad   :  { %v1487_v33 = vadd.f32 %v1486_v26, %v1367_v45 }
 0x1ae   :  { %v1897_v3 = vmax.f32 %v1865_v10, 0.0  ;;  %v1036_v5 = vpop.permute.xlu1 %1035  ;;  %v1040_v10 = vpop.permute.xlu2 %1039 }
 0x1af   :  { %v1144_v60 = vsel %vm1122_vm11, %v1111_v27, %v1036_v5  ;;  %5595 = vmatmul.msk.f32.gmra.mxu1 %vm29_vm15, %v1592_v18  ;;  %5629 = vmatmul.msk.f32.gmra.mxu2 %vm29_vm15, %v1592_v18 }
 0x1b0   :  { %1929 = vst.msk [vmem:[#allocation3 + $0x8] sm:$0xff] %vm1089_vm9, %v1897_v3  ;;  %5671 = vmatmul.msk.f32.gmra.mxu3 %vm29_vm15, %v1594_v51 }
 0x1b1   :  { %1178 = vst.msk [vmem:[#allocation2 + $0xc0] sm:$0xff] %vm29_vm15, %v1144_v60  ;;  %v1740_v52 = vpop.f32.mrf.mxu3 }
 0x1b2   :  { %v1832_v2 = vadd.f32 %v1740_v52, %v1487_v33  ;;  %v1492_v56 = vpop.f32.mrf.mxu2 }
 0x1b4   :  { %v1866_v20 = vadd.f32 %v7091_v44, %v1832_v2  ;;  %v1038_v12 = vpop.permute.xlu0 %1037  ;;  %v1370_v7 = vpop.f32.mrf.mxu1 }
 0x1b5   :  { %v1145_v18 = vsel %vm1122_vm11, %v1112_v8, %v1038_v12  ;;  %v1490_v32 = vadd.f32 %v1489_v0, %v1370_v7 }
 0x1b6   :  { %v1898_v37 = vmax.f32 %v1866_v20, 0.0  ;;  %1179 = vst.msk [vmem:[#allocation2 + $0xc8] sm:$0xff] %vm29_vm15, %v1145_v18  ;;  %v943_v26 = vpop.permute.xlu1 %942 }
 0x1b7   :  { %v1113_v45 = vsel %vm1089_vm9, %v6899_v53, %v943_v26  ;;  %5596 = vmatmul.msk.f32.gmra.mxu1 %vm29_vm15, %v1593_v22  ;;  %5630 = vmatmul.msk.f32.gmra.mxu2 %vm29_vm15, %v1593_v22  ;;  %v1960_v26 = vld [vmem:[#allocation3] ss:$2 sm:$0xff] }
 0x1b8   :  { %1930 = vst.msk [vmem:[#allocation3 + $0x10] sm:$0xff] %vm1089_vm9, %v1898_v37  ;;  %v1146_v27 = vsel %vm1122_vm11, %v1113_v45, %v1040_v10  ;;  %v1595_v3 = vld [vmem:[#allocation2 + $0xc0] sm:$0xff]  ;;  %v1992_v10 = vld [vmem:[#allocation3 + $0x1] ss:$2 sm:$0xff]  ;;  %v947_v45 = vpop.permute.xlu2 %946 }
 0x1b9   :  { %1180 = vst.msk [vmem:[#allocation2 + $0xd0] sm:$0xff] %vm29_vm15, %v1146_v27  ;;  %5672 = vmatmul.msk.f32.gmra.mxu3 %vm29_vm15, %v1595_v3  ;;  %v1743_v5 = vpop.f32.mrf.mxu3 }
 0x1ba   :  { %v1833_v48 = vadd.f32 %v1743_v5, %v1490_v32  ;;  %v1495_v60 = vpop.f32.mrf.mxu2 }
 0x1bc   :  { %v1867_v33 = vadd.f32 %v7091_v44, %v1833_v48  ;;  %v1373_v53 = vpop.f32.mrf.mxu1  ;;  %v945_v2 = vpop.permute.xlu0 %944  ;;  %v2023_v48 = vmax.f32 %v1960_v26, %v1992_v10 }
 0x1bd   :  { %v1493_v22 = vadd.f32 %v1492_v56, %v1373_v53  ;;  %v1596_v0 = vld [vmem:[#allocation2 + $0xc8] sm:$0xff]  ;;  %v1114_v7 = vsel %vm1089_vm9, %v6915_v31, %v945_v2 }
 0x1be   :  { %v1899_v52 = vmax.f32 %v1867_v33, 0.0 }
 0x1bf   :  { %5597 = vmatmul.msk.f32.gmra.mxu1 %vm29_vm15, %v1594_v51  ;;  %5631 = vmatmul.msk.f32.gmra.mxu2 %vm29_vm15, %v1594_v51 }
 0x1c0   :  { %1931 = vst.msk [vmem:[#allocation3 + $0x18] sm:$0xff] %vm1089_vm9, %v1899_v52  ;;  %v1597_v33 = vld [vmem:[#allocation2 + $0xd0] sm:$0xff] }
 0x1c1   :  { %5673 = vmatmul.msk.f32.gmra.mxu3 %vm29_vm15, %v1596_v0  ;;  %v1746_v8 = vpop.f32.mrf.mxu3 }
 0x1c2   :  { %v1834_v20 = vadd.f32 %v1746_v8, %v1493_v22  ;;  %v1498_v12 = vpop.f32.mrf.mxu2 }
 0x1c4   :  { %v1868_v18 = vadd.f32 %v7091_v44, %v1834_v20  ;;  %v1042_v37 = vpop.permute.xlu1 %1041  ;;  %v1376_v32 = vpop.f32.mrf.mxu1 }
 0x1c5   :  { %v1147_v51 = vsel %vm1122_vm11, %v1114_v7, %v1042_v37  ;;  %v1496_v52 = vadd.f32 %v1495_v60, %v1376_v32  ;;  %v1046_v7 = vpop.permute.xlu2 %1045  ;;  %v1115_v37 = vsel %vm1089_vm9, %v6938_v40, %v947_v45 }
 0x1c6   :  { %v1900_v56 = vmax.f32 %v1868_v18, 0.0  ;;  %1181 = vst.msk [vmem:[#allocation2 + $0xd8] sm:$0xff] %vm29_vm15, %v1147_v51 }
 0x1c7   :  { %v1962_v27 = vld [vmem:[#allocation3 + $0x10] ss:$2 sm:$0xff]  ;;  %v1994_v5 = vld [vmem:[#allocation3 + $0x11] ss:$2 sm:$0xff]  ;;  %5598 = vmatmul.msk.f32.gmra.mxu1 %vm29_vm15, %v1595_v3  ;;  %5632 = vmatmul.msk.f32.gmra.mxu2 %vm29_vm15, %v1595_v3 }
 0x1c8   :  { %v2024_v31 = vmax.f32 %v1962_v27, %v1994_v5  ;;  %1932 = vst.msk [vmem:[#allocation3 + $0x20] sm:$0xff] %vm1089_vm9, %v1900_v56 }
 0x1c9   :  { %5674 = vmatmul.msk.f32.gmra.mxu3 %vm29_vm15, %v1597_v33 }
 0x1ca   :  { %v2039_v53 = vmax.f32 %v2023_v48, %v2024_v31  ;;  %v1501_v22 = vpop.f32.mrf.mxu2 }
 0x1cb   :  { %v1749_v2 = vpop.f32.mrf.mxu3 }
 0x1cc   :  { %2040 = vst.msk [vmem:[#allocation4] sm:$0xff] %vm1089_vm9, %v2039_v53  ;;  %v1835_v8 = vadd.f32 %v1749_v2, %v1496_v52  ;;  %v949_v20 = vpop.permute.xlu1 %948  ;;  %v1379_v3 = vpop.f32.mrf.mxu1 }
 0x1cd   :  { %v1116_v18 = vsel %vm1089_vm9, %v6958_v46, %v949_v20  ;;  %v1598_v46 = vld [vmem:[#allocation2 + $0xd8] sm:$0xff]  ;;  %v1499_v40 = vadd.f32 %v1498_v12, %v1379_v3 }
 0x1ce   :  { %v1869_v26 = vadd.f32 %v7091_v44, %v1835_v8  ;;  %v1149_v10 = vsel %vm1122_vm11, %v1116_v18, %v1046_v7  ;;  %v1044_v51 = vpop.permute.xlu0 %1043 }
 0x1cf   :  { %1183 = vst.msk [vmem:[#allocation2 + $0xe8] sm:$0xff] %vm29_vm15, %v1149_v10  ;;  %v1148_v60 = vsel %vm1122_vm11, %v1115_v37, %v1044_v51  ;;  %5599 = vmatmul.msk.f32.gmra.mxu1 %vm29_vm15, %v1596_v0  ;;  %5633 = vmatmul.msk.f32.gmra.mxu2 %vm29_vm15, %v1596_v0 }
 0x1d0   :  { %v1901_v32 = vmax.f32 %v1869_v26, 0.0  ;;  %1182 = vst.msk [vmem:[#allocation2 + $0xe0] sm:$0xff] %vm29_vm15, %v1148_v60  ;;  %v953_v26 = vpop.permute.xlu2 %952 }
 0x1d1   :  { %5675 = vmatmul.msk.f32.gmra.mxu3 %vm29_vm15, %v1598_v46 }
 0x1d2   :  { %1933 = vst.msk [vmem:[#allocation3 + $0x28] sm:$0xff] %vm1089_vm9, %v1901_v32  ;;  %v1504_v45 = vpop.f32.mrf.mxu2  ;;  %v1118_v32 = vsel %vm1089_vm9, %v6994_v50, %v953_v26 }
 0x1d3   :  { %v1752_v56 = vpop.f32.mrf.mxu3  ;;  %v7148_v27 = vld [vmem:[#allocation4] sm:$0xff] }
 0x1d4   :  { %v1836_v5 = vadd.f32 %v1752_v56, %v1499_v40  ;;  %2200 = vrot.lane.b32.xlu0 %v7148_v27, %s6219_s16  ;;  %v1382_v48 = vpop.f32.mrf.mxu1 }
 0x1d5   :  { %v1502_v12 = vadd.f32 %v1501_v22, %v1382_v48 }
 0x1d6   :  { %v1870_v0 = vadd.f32 %v7091_v44, %v1836_v5  ;;  %v951_v2 = vpop.permute.xlu0 %950  ;;  %v1600_v22 = vld [vmem:[#allocation2 + $0xe8] sm:$0xff] }
 0x1d7   :  { %5600 = vmatmul.msk.f32.gmra.mxu1 %vm29_vm15, %v1597_v33  ;;  %5634 = vmatmul.msk.f32.gmra.mxu2 %vm29_vm15, %v1597_v33  ;;  %v1599_v31 = vld [vmem:[#allocation2 + $0xe0] sm:$0xff]  ;;  %v1117_v18 = vsel %vm1089_vm9, %v6978_v57, %v951_v2 }
 0x1d8   :  { %v1902_v53 = vmax.f32 %v1870_v0, 0.0  ;;  %v1052_v2 = vpop.permute.xlu2 %1051 }
 0x1d9   :  { %5676 = vmatmul.msk.f32.gmra.mxu3 %vm29_vm15, %v1599_v31 }
 0x1da   :  { %1934 = vst.msk [vmem:[#allocation3 + $0x30] sm:$0xff] %vm1089_vm9, %v1902_v53  ;;  %v1507_v52 = vpop.f32.mrf.mxu2  ;;  %v1964_v53 = vld [vmem:[#allocation3 + $0x20] ss:$2 sm:$0xff] }
 0x1db   :  { %v1755_v8 = vpop.f32.mrf.mxu3 }
 0x1dc   :  { %v1837_v20 = vadd.f32 %v1755_v8, %v1502_v12  ;;  %v1385_v7 = vpop.f32.mrf.mxu1  ;;  %v1996_v12 = vld [vmem:[#allocation3 + $0x21] ss:$2 sm:$0xff] }
 0x1dd   :  { %v1505_v51 = vadd.f32 %v1504_v45, %v1385_v7  ;;  %v2025_v26 = vmax.f32 %v1964_v53, %v1996_v12 }
 0x1de   :  { %v1871_v3 = vadd.f32 %v7091_v44, %v1837_v20  ;;  %v1048_v37 = vpop.permute.xlu1 %1047 }
 0x1df   :  { %v1150_v33 = vsel %vm1122_vm11, %v1117_v18, %v1048_v37  ;;  %5601 = vmatmul.msk.f32.gmra.mxu1 %vm29_vm15, %v1598_v46  ;;  %5635 = vmatmul.msk.f32.gmra.mxu2 %vm29_vm15, %v1598_v46 }
 0x1e0   :  { %v1903_v10 = vmax.f32 %v1871_v3, 0.0  ;;  %1184 = vst.msk [vmem:[#allocation2 + $0xf0] sm:$0xff] %vm29_vm15, %v1150_v33 }
 0x1e1   :  { %5677 = vmatmul.msk.f32.gmra.mxu3 %vm29_vm15, %v1600_v22 }
 0x1e2   :  { %1935 = vst.msk [vmem:[#allocation3 + $0x38] sm:$0xff] %vm1089_vm9, %v1903_v10  ;;  %v1510_v57 = vpop.f32.mrf.mxu2 }
 0x1e3   :  { %v1758_v60 = vpop.f32.mrf.mxu3 }
 0x1e4   :  { %v1838_v40 = vadd.f32 %v1758_v60, %v1505_v51  ;;  %v1050_v56 = vpop.permute.xlu0 %1049  ;;  %v1388_v48 = vpop.f32.mrf.mxu1  ;;  %v2064_v60 = vand.u32 7, %v6343_v21 }
 0x1e5   :  { %v1151_v5 = vsel %vm1122_vm11, %v1118_v32, %v1050_v56  ;;  %v1508_v3 = vadd.f32 %v1507_v52, %v1388_v48  ;;  %v5752_v52 = vld [vmem:[%s9412_s3 + $0x238] sm:$0xff] }
 0x1e6   :  { %v1872_v46 = vadd.f32 %v7091_v44, %v1838_v40  ;;  %1185 = vst.msk [vmem:[#allocation2 + $0xf8] sm:$0xff] %vm29_vm15, %v1151_v5  ;;  %v955_v0 = vpop.permute.xlu1 %954  ;;  %v2063_v40 = vand.u32 7, %v6335_v19  ;;  %vm2096_vm7 = vcmp.ne.s32.totalorder %v2064_v60, 0  ;;  %2467 = vmatpush.msrb.mxu2 %v5752_v52  ;;  %v5724_v52 = vld [vmem:[%s9412_s3 + $0x1d8] sm:$0xff]  ;;  %vm2072_vm2 = vcmp.ne.s32.totalorder %v2064_v60, 7 }
 0x1e7   :  { %v1119_v45 = vsel %vm1089_vm9, %v7020_v16, %v955_v0  ;;  %5602 = vmatmul.msk.f32.gmra.mxu1 %vm29_vm15, %v1599_v31  ;;  %5636 = vmatmul.msk.f32.gmra.mxu2 %vm29_vm15, %v1599_v31  ;;  %v1601_v50 = vld [vmem:[#allocation2 + $0xf0] sm:$0xff]  ;;  %v959_v0 = vpop.permute.xlu2 %958 }
 0x1e8   :  { %v1904_v8 = vmax.f32 %v1872_v46, 0.0  ;;  %v1152_v20 = vsel %vm1122_vm11, %v1119_v45, %v1052_v2  ;;  %v7190_v46 = vld [vmem:[#allocation2 + $0x118] sm:$0xff]  ;;  %vm2095_vm8 = vcmp.ne.s32.totalorder %v2063_v40, 0  ;;  %v7199_v2 = vsel %vm2096_vm7, 1.0, %v9447_v54  ;;  %2337 = vmatpush.msrb.mxu0 %v5724_v52 }
 0x1e9   :  { %v1966_v7 = vld [vmem:[#allocation3 + $0x30] ss:$2 sm:$0xff]  ;;  %v1998_v18 = vld [vmem:[#allocation3 + $0x31] ss:$2 sm:$0xff]  ;;  %1186 = vst.msk [vmem:[#allocation2 + $0x100] sm:$0xff] %vm29_vm15, %v1152_v20  ;;  %5678 = vmatmul.msk.f32.gmra.mxu3 %vm29_vm15, %v1601_v50  ;;  %v1121_v45 = vsel %vm1089_vm9, %v7053_v63, %v959_v0  ;;  %vm2071_vm14 = vcmp.ne.s32.totalorder %v2063_v40, 7 }
 0x1ea   :  { %1936 = vst.msk [vmem:[#allocation3 + $0x40] sm:$0xff] %vm1089_vm9, %v1904_v8  ;;  %v1513_v37 = vpop.f32.mrf.mxu2  ;;  %v2026_v16 = vmax.f32 %v1966_v7, %v1998_v18  ;;  %v5712_v0 = vld [vmem:[%s9412_s3 + $0x178] sm:$0xff] }
 0x1eb   :  { %v1761_v33 = vpop.f32.mrf.mxu3  ;;  %3810 = vst.msk [vmem:[#allocation2 + $0x118] sm:$0xff] %vm29_vm15, %v9447_v54  ;;  %2381 = vmatpush.msrb.mxu1 %v5712_v0 }
 0x1ec   :  { %v1839_v10 = vadd.f32 %v1761_v33, %v1508_v3  ;;  %v957_v51 = vpop.permute.xlu0 %956  ;;  %v2041_v31 = vmax.f32 %v2025_v26, %v2026_v16  ;;  %v1391_v32 = vpop.f32.mrf.mxu1  ;;  %v7206_v3 = vsel %vm2095_vm8, 1.0, %v9447_v54 }
 0x1ed   :  { %v1602_v48 = vld [vmem:[#allocation2 + $0xf8] sm:$0xff]  ;;  %v1120_v8 = vsel %vm1089_vm9, %v7031_v23, %v957_v51  ;;  %v2159_v63 = vmul.f32 %v7206_v3, %v7148_v27 }
 0x1ee   :  { %v1873_v56 = vadd.f32 %v7091_v44, %v1839_v10  ;;  %2042 = vst.msk [vmem:[#allocation4 + $0x8] sm:$0xff] %vm1089_vm9, %v2041_v31 }
 0x1ef   :  { %5603 = vmatmul.msk.f32.gmra.mxu1 %vm29_vm15, %v1600_v22  ;;  %5637 = vmatmul.msk.f32.gmra.mxu2 %vm29_vm15, %v1600_v22  ;;  %v1511_v22 = vadd.f32 %v1510_v57, %v1391_v32  ;;  %v7225_v32 = vld [vmem:[#allocation2 + $0x120] sm:$0xff] }
 0x1f0   :  { %v1905_v5 = vmax.f32 %v1873_v56, 0.0  ;;  %v1603_v31 = vld [vmem:[#allocation2 + $0x100] sm:$0xff]  ;;  %3811 = vst.msk [vmem:[#allocation2 + $0x120] sm:$0xff] %vm29_vm15, %v9447_v54 }
 0x1f1   :  { %5679 = vmatmul.msk.f32.gmra.mxu3 %vm29_vm15, %v1602_v48 }
 0x1f2   :  { %1937 = vst.msk [vmem:[#allocation3 + $0x48] sm:$0xff] %vm1089_vm9, %v1905_v5  ;;  %v1516_v53 = vpop.f32.mrf.mxu2 }
 0x1f3   :  { %v1764_v12 = vpop.f32.mrf.mxu3 }
 0x1f4   :  { %v1840_v20 = vadd.f32 %v1764_v12, %v1511_v22  ;;  %v1056_v7 = vpop.permute.xlu0 %1055  ;;  %v1054_v18 = vpop.permute.xlu1 %1053  ;;  %v2175_v12 = vrot.slane %v2159_v63, 1 }
 0x1f5   :  { %v1154_v26 = vsel %vm1122_vm11, %v1121_v45, %v1056_v7  ;;  %v1153_v57 = vsel %vm1122_vm11, %v1120_v8, %v1054_v18  ;;  %v1394_v16 = vpop.f32.mrf.mxu1  ;;  %v7210_v33 = vld [vmem:[#allocation4 + $0x8] sm:$0xff] }
 0x1f6   :  { %v1874_v10 = vadd.f32 %v7091_v44, %v1840_v20  ;;  %1188 = vst.msk [vmem:[#allocation2 + $0x110] sm:$0xff] %vm29_vm15, %v1154_v26  ;;  %2202 = vrot.lane.b32.xlu1 %v7210_v33, %s6219_s16  ;;  %v7218_v23 = vmul.f32 %v7199_v2, %v7210_v33 }
 0x1f7   :  { %1187 = vst.msk [vmem:[#allocation2 + $0x108] sm:$0xff] %vm29_vm15, %v1153_v57  ;;  %5604 = vmatmul.msk.f32.gmra.mxu1 %vm29_vm15, %v1601_v50  ;;  %5638 = vmatmul.msk.f32.gmra.mxu2 %vm29_vm15, %v1601_v50  ;;  %v1514_v50 = vadd.f32 %v1513_v37, %v1394_v16 }
 0x1f8   :  { %v1906_v51 = vmax.f32 %v1874_v10, 0.0  ;;  %v2176_v56 = vrot.slane %v7218_v23, 1 }
 0x1f9   :  { %5680 = vmatmul.msk.f32.gmra.mxu3 %vm29_vm15, %v1603_v31  ;;  %v1968_v52 = vld [vmem:[#allocation3 + $0x40] ss:$2 sm:$0xff] }
 0x1fa   :  { %1938 = vst.msk [vmem:[#allocation3 + $0x50] sm:$0xff] %vm1089_vm9, %v1906_v51  ;;  %v1519_v5 = vpop.f32.mrf.mxu2  ;;  %v2177_v20 = vsel %vm798_vm4, %v2175_v12, %v2176_v56 }
 0x1fb   :  { %v1767_v22 = vpop.f32.mrf.mxu3 }
 0x1fc   :  { %v1841_v45 = vadd.f32 %v1767_v22, %v1514_v50  ;;  %v2000_v50 = vld [vmem:[#allocation3 + $0x41] ss:$2 sm:$0xff] }
 0x1fd   :  { %v1397_v8 = vpop.f32.mrf.mxu1  ;;  %v1605_v0 = vld [vmem:[#allocation2 + $0x110] sm:$0xff] }
 0x1fe   :  { %v1875_v7 = vadd.f32 %v7091_v44, %v1841_v45  ;;  %2225 = vrot.lane.b32.xlu1 %v2177_v20, %s6221_s19  ;;  %v1604_v18 = vld [vmem:[#allocation2 + $0x108] sm:$0xff]  ;;  %v1517_v26 = vadd.f32 %v1516_v53, %v1397_v8  ;;  %v5751_v53 = vld [vmem:[%s9412_s3 + $0x230] sm:$0xff]  ;;  %v2027_v45 = vmax.f32 %v1968_v52, %v2000_v50 }
 0x1ff   :  { %5605 = vmatmul.msk.f32.gmra.mxu1 %vm29_vm15, %v1602_v48  ;;  %5639 = vmatmul.msk.f32.gmra.mxu2 %vm29_vm15, %v1602_v48 }
 0x200   :  { %v1907_v37 = vmax.f32 %v1875_v7, 0.0  ;;  %2468 = vmatpush.msrb.mxu2 %v5751_v53 }
 0x201   :  { %5681 = vmatmul.msk.f32.gmra.mxu3 %vm29_vm15, %v1604_v18 }
 0x202   :  { %1939 = vst.msk [vmem:[#allocation3 + $0x58] sm:$0xff] %vm1089_vm9, %v1907_v37  ;;  %v1522_v57 = vpop.f32.mrf.mxu2  ;;  %v5711_v37 = vld [vmem:[%s9412_s3 + $0x170] sm:$0xff] }
 0x203   :  { %v1770_v16 = vpop.f32.mrf.mxu3  ;;  %2382 = vmatpush.msrb.mxu1 %v5711_v37 }
 0x204   :  { %v1842_v10 = vadd.f32 %v1770_v16, %v1517_v26 }
 0x205   :  { %v1400_v63 = vpop.f32.mrf.mxu1 }
 0x206   :  { %v1876_v51 = vadd.f32 %v7091_v44, %v1842_v10  ;;  %v1520_v20 = vadd.f32 %v1519_v5, %v1400_v63 }
 0x207   :  { %5606 = vmatmul.msk.f32.gmra.mxu1 %vm29_vm15, %v1603_v31  ;;  %5640 = vmatmul.msk.f32.gmra.mxu2 %vm29_vm15, %v1603_v31  ;;  %v5723_v31 = vld [vmem:[%s9412_s3 + $0x1d0] sm:$0xff] }
 0x208   :  { %v1908_v48 = vmax.f32 %v1876_v51, 0.0  ;;  %2338 = vmatpush.msrb.mxu0 %v5723_v31  ;;  %v9430_v51 = vand.u32 7, %v6360_v30  ;;  %v5750_v31 = vld [vmem:[%s9412_s3 + $0x228] sm:$0xff] }
 0x209   :  { %v1970_v22 = vld [vmem:[#allocation3 + $0x50] ss:$2 sm:$0xff]  ;;  %v2002_v12 = vld [vmem:[#allocation3 + $0x51] ss:$2 sm:$0xff]  ;;  %5682 = vmatmul.msk.f32.gmra.mxu3 %vm29_vm15, %v1605_v0  ;;  %2469 = vmatpush.msrb.mxu2 %v5750_v31 }
 0x20a   :  { %v2028_v8 = vmax.f32 %v1970_v22, %v2002_v12  ;;  %1940 = vst.msk [vmem:[#allocation3 + $0x60] sm:$0xff] %vm1089_vm9, %v1908_v48  ;;  %v1525_v7 = vpop.f32.mrf.mxu2  ;;  %vm2097_vm10 = vcmp.ne.s32.totalorder %v9430_v51, 0 }
 0x20b   :  { %v1773_v26 = vpop.f32.mrf.mxu3  ;;  %v7271_v12 = vsel %vm2097_vm10, 1.0, %v9447_v54 }
 0x20c   :  { %v2043_v16 = vmax.f32 %v2027_v45, %v2028_v8  ;;  %v1843_v10 = vadd.f32 %v1773_v26, %v1520_v20 }
 0x20d   :  { %v1403_v52 = vpop.f32.mrf.mxu1 }
 0x20e   :  { %2044 = vst.msk [vmem:[#allocation4 + $0x10] sm:$0xff] %vm1089_vm9, %v2043_v16  ;;  %v1877_v5 = vadd.f32 %v7091_v44, %v1843_v10  ;;  %v1523_v50 = vadd.f32 %v1522_v57, %v1403_v52  ;;  %v5722_v16 = vld [vmem:[%s9412_s3 + $0x1c8] sm:$0xff] }
 0x20f   :  { %5607 = vmatmul.msk.f32.gmra.mxu1 %vm29_vm15, %v1604_v18  ;;  %2339 = vmatpush.msrb.mxu0 %v5722_v16 }
 0x210   :  { %v1909_v63 = vmax.f32 %v1877_v5, 0.0 }
 0x211   :  { %5683 = vmatmul.msk.f32.gmra.mxu3 %vm29_vm15, %v7190_v46 }
 0x212   :  { %1941 = vst.msk [vmem:[#allocation3 + $0x68] sm:$0xff] %vm1089_vm9, %v1909_v63  ;;  %v1528_v48 = vpop.f32.mrf.mxu2 }
 0x213   :  { %v1776_v22 = vpop.f32.mrf.mxu3 }
 0x214   :  { %v1844_v53 = vadd.f32 %v1776_v22, %v1523_v50 }
 0x215   :  { %v1406_v45 = vpop.f32.mrf.mxu1  ;;  %v7273_v8 = vld [vmem:[#allocation4 + $0x10] sm:$0xff] }
 0x216   :  { %v1878_v18 = vadd.f32 %v7091_v44, %v1844_v53  ;;  %v7278_v20 = vmul.f32 %v7271_v12, %v7273_v8  ;;  %v1526_v37 = vadd.f32 %v1525_v7, %v1406_v45 }
 0x217   :  { %5608 = vmatmul.msk.f32.gmra.mxu1 %vm29_vm15, %v1605_v0 }
 0x218   :  { %v1910_v46 = vmax.f32 %v1878_v18, 0.0  ;;  %v2178_v57 = vrot.slane %v7278_v20, 1 }
 0x219   :  { %5684 = vmatmul.msk.f32.gmra.mxu3 %vm29_vm15, %v7225_v32  ;;  %v5710_v32 = vld [vmem:[%s9412_s3 + $0x168] sm:$0xff] }
 0x21a   :  { %1942 = vst.msk [vmem:[#allocation3 + $0x70] sm:$0xff] %vm1089_vm9, %v1910_v46  ;;  %v1531_v26 = vpop.f32.mrf.mxu2  ;;  %v2179_v0 = vsel %vm798_vm4, %v2176_v56, %v2178_v57  ;;  %2383 = vmatpush.msrb.mxu1 %v5710_v32  ;;  %v1972_v18 = vld [vmem:[#allocation3 + $0x60] ss:$2 sm:$0xff]  ;;  %v2004_v46 = vld [vmem:[#allocation3 + $0x61] ss:$2 sm:$0xff] }
 0x21b   :  { %v1779_v10 = vpop.f32.mrf.mxu3  ;;  %2227 = vrot.lane.b32.xlu2 %v2179_v0, %s6221_s19 }
 0x21c   :  { %v1845_v7 = vadd.f32 %v1779_v10, %v1526_v37  ;;  %v2029_v10 = vmax.f32 %v1972_v18, %v2004_v46 }
 0x21d   :  { %v1409_v52 = vpop.f32.mrf.mxu1 }
 0x21e   :  { %v1879_v23 = vadd.f32 %v7091_v44, %v1845_v7  ;;  %v1529_v56 = vadd.f32 %v1528_v48, %v1409_v52  ;;  %v5749_v52 = vld [vmem:[%s9412_s3 + $0x220] sm:$0xff] }
 0x21f   :  { %2470 = vmatpush.msrb.mxu2 %v5749_v52 }
 0x220   :  { %v1911_v5 = vmax.f32 %v1879_v23, 0.0 }
 0x222   :  { %1943 = vst.msk [vmem:[#allocation3 + $0x78] sm:$0xff] %vm1089_vm9, %v1911_v5  ;;  %v1534_v63 = vpop.f32.mrf.mxu2 }
 0x223   :  { %v1782_v50 = vpop.f32.mrf.mxu3  ;;  %2204 = vrot.lane.b32.xlu2 %v7273_v8, %s6219_s16 }
 0x224   :  { %v1846_v22 = vadd.f32 %v1782_v50, %v1529_v56  ;;  %v9429_v56 = vand.u32 7, %v6376_v43 }
 0x225   :  { %v1412_v53 = vpop.f32.mrf.mxu1 }
 0x226   :  { %v1880_v45 = vadd.f32 %v7091_v44, %v1846_v22  ;;  %v1532_v16 = vadd.f32 %v1531_v26, %v1412_v53  ;;  %vm2098_vm12 = vcmp.ne.s32.totalorder %v9429_v56, 0 }
 0x227   :  { %v7316_v46 = vsel %vm2098_vm12, 1.0, %v9447_v54  ;;  %vm2625_vm12 = vcmask 781312  }
 0x228   :  { %v1912_v31 = vmax.f32 %v1880_v45, 0.0  ;;  %9448 = vst [vmem:[#allocation18_spill] sm:$0xff] %v7316_v46 }
 0x229   :  { %v1974_v37 = vld [vmem:[#allocation3 + $0x70] ss:$2 sm:$0xff]  ;;  %v2006_v0 = vld [vmem:[#allocation3 + $0x71] ss:$2 sm:$0xff] }
 0x22a   :  { %1944 = vst.msk [vmem:[#allocation3 + $0x80] sm:$0xff] %vm1089_vm9, %v1912_v31  ;;  %v1537_v32 = vpop.f32.mrf.mxu2  ;;  %v2030_v48 = vmax.f32 %v1974_v37, %v2006_v0 }
 0x22b   :  { %v1785_v7 = vpop.f32.mrf.mxu3 }
 0x22c   :  { %v1847_v23 = vadd.f32 %v1785_v7, %v1532_v16  ;;  %v2045_v5 = vmax.f32 %v2029_v10, %v2030_v48 }
 0x22d   :  { %v1415_v50 = vpop.f32.mrf.mxu1 }
 0x22e   :  { %v1881_v22 = vadd.f32 %v7091_v44, %v1847_v23  ;;  %2046 = vst.msk [vmem:[#allocation4 + $0x18] sm:$0xff] %vm1089_vm9, %v2045_v5  ;;  %v1535_v26 = vadd.f32 %v1534_v63, %v1415_v50  ;;  %v5721_v23 = vld [vmem:[%s9412_s3 + $0x1c0] sm:$0xff] }
 0x22f   :  { %v5709_v5 = vld [vmem:[%s9412_s3 + $0x160] sm:$0xff]  ;;  %2340 = vmatpush.msrb.mxu0 %v5721_v23 }
 0x230   :  { %v1913_v45 = vmax.f32 %v1881_v22, 0.0  ;;  %2384 = vmatpush.msrb.mxu1 %v5709_v5  ;;  %v5706_v5 = vld [vmem:[%s9412_s3 + $0x148] sm:$0xff] }
 0x232   :  { %1945 = vst.msk [vmem:[#allocation3 + $0x88] sm:$0xff] %vm1089_vm9, %v1913_v45  ;;  %v1540_v53 = vpop.f32.mrf.mxu2 }
 0x233   :  { %v1788_v18 = vpop.f32.mrf.mxu3 }
 0x234   :  { %v1848_v31 = vadd.f32 %v1788_v18, %v1535_v26 }
 0x235   :  { %v1418_v37 = vpop.f32.mrf.mxu1  ;;  %v7318_v0 = vld [vmem:[#allocation4 + $0x18] sm:$0xff] }
 0x236   :  { %v1882_v16 = vadd.f32 %v7091_v44, %v1848_v31  ;;  %2206 = vrot.lane.b32.xlu1 %v7318_v0, %s6219_s16  ;;  %v7325_v10 = vmul.f32 %v7316_v46, %v7318_v0  ;;  %v1538_v50 = vadd.f32 %v1537_v32, %v1418_v37 }
 0x238   :  { %v1914_v48 = vmax.f32 %v1882_v16, 0.0  ;;  %v2180_v63 = vrot.slane %v7325_v10, 1  ;;  %v5708_v16 = vld [vmem:[%s9412_s3 + $0x158] sm:$0xff] }
 0x239   :  { %2385 = vmatpush.msrb.mxu1 %v5708_v16 }
 0x23a   :  { %1946 = vst.msk [vmem:[#allocation3 + $0x90] sm:$0xff] %vm1089_vm9, %v1914_v48  ;;  %v1543_v7 = vpop.f32.mrf.mxu2  ;;  %v2181_v52 = vsel %vm798_vm4, %v2178_v57, %v2180_v63 }
 0x23b   :  { %2229 = vrot.lane.b32.xlu0 %v2181_v52, %s6221_s19  ;;  %v5707_v52 = vld [vmem:[%s9412_s3 + $0x150] sm:$0xff] }
 0x23c   :  { %v1791_v22 = vpop.f32.mrf.mxu3  ;;  %2386 = vmatpush.msrb.mxu1 %v5707_v52  ;;  %v5705_v52 = vld [vmem:[%s9412_s3 + $0x140] sm:$0xff] }
 0x23d   :  { %v1849_v45 = vadd.f32 %v1791_v22, %v1538_v50  ;;  %v1421_v26 = vpop.f32.mrf.mxu1  ;;  %v2008_v50 = vld [vmem:[#allocation3 + $0x81] ss:$2 sm:$0xff] }
 0x23e   :  { %v1541_v31 = vadd.f32 %v1540_v53, %v1421_v26  ;;  %v1976_v53 = vld [vmem:[#allocation3 + $0x80] ss:$2 sm:$0xff]  ;;  %2387 = vmatpush.msrb.mxu1 %v5706_v5  ;;  %v5704_v5 = vld [vmem:[%s9412_s3 + $0x138] sm:$0xff] }
 0x23f   :  { %v1883_v20 = vadd.f32 %v7091_v44, %v1849_v45  ;;  %v2031_v16 = vmax.f32 %v1976_v53, %v2008_v50  ;;  %v9428_v53 = vand.u32 7, %v6397_v55  ;;  %v5719_v50 = vld [vmem:[%s9412_s3 + $0x1b0] sm:$0xff] }
 0x240   :  { %2388 = vmatpush.msrb.mxu1 %v5705_v52 }
 0x241   :  { %v1915_v18 = vmax.f32 %v1883_v20, 0.0  ;;  %vm2099_vm13 = vcmp.ne.s32.totalorder %v9428_v53, 0 }
 0x242   :  { %v1546_v57 = vpop.f32.mrf.mxu2  ;;  %2389 = vmatpush.msrb.mxu1 %v5704_v5  ;;  %v5747_v5 = vld [vmem:[%s9412_s3 + $0x210] sm:$0xff] }
 0x243   :  { %1947 = vst.msk [vmem:[#allocation3 + $0x98] sm:$0xff] %vm1089_vm9, %v1915_v18  ;;  %v5748_v18 = vld [vmem:[%s9412_s3 + $0x218] sm:$0xff] }
 0x244   :  { %v1794_v48 = vpop.f32.mrf.mxu3  ;;  %2471 = vmatpush.msrb.mxu2 %v5748_v18  ;;  %v5718_v18 = vld [vmem:[%s9412_s3 + $0x1a8] sm:$0xff] }
 0x245   :  { %v1850_v32 = vadd.f32 %v1794_v48, %v1541_v31  ;;  %v1424_v37 = vpop.f32.mrf.mxu1 }
 0x246   :  { %v1544_v31 = vadd.f32 %v1543_v7, %v1424_v37  ;;  %2472 = vmatpush.msrb.mxu2 %v5747_v5  ;;  %v2201_v51 = vpop.permute.xlu0 %2200 }
 0x247   :  { %v1884_v23 = vadd.f32 %v7091_v44, %v1850_v32  ;;  %v5720_v32 = vld [vmem:[%s9412_s3 + $0x1b8] sm:$0xff] }
 0x248   :  { %2341 = vmatpush.msrb.mxu0 %v5720_v32  ;;  %v5701_v32 = vld [vmem:[%s9412_s3 + $0x120] sm:$0xff] }
 0x249   :  { %v1916_v22 = vmax.f32 %v1884_v23, 0.0 }
 0x24a   :  { %v1978_v45 = vld [vmem:[#allocation3 + $0x90] ss:$2 sm:$0xff]  ;;  %v2010_v26 = vld [vmem:[#allocation3 + $0x91] ss:$2 sm:$0xff]  ;;  %v7353_v20 = vpop.f32.mrf.mxu2  ;;  %2342 = vmatpush.msrb.mxu0 %v5719_v50  ;;  %v7396_v50 = vsel %vm2099_vm13, 1.0, %v9447_v54 }
 0x24b   :  { %1948 = vst.msk [vmem:[#allocation3 + $0xa0] sm:$0xff] %vm1089_vm9, %v1916_v22  ;;  %v2032_v48 = vmax.f32 %v1978_v45, %v2010_v26  ;;  %v5703_v45 = vld [vmem:[%s9412_s3 + $0x130] sm:$0xff] }
 0x24c   :  { %v1797_v23 = vpop.f32.mrf.mxu3  ;;  %2390 = vmatpush.msrb.mxu1 %v5703_v45  ;;  %2343 = vmatpush.msrb.mxu0 %v5718_v18  ;;  %9449 = vst [vmem:[#allocation19_spill] sm:$0xff] %v7396_v50  ;;  %v5716_v45 = vld [vmem:[%s9412_s3 + $0x198] sm:$0xff] }
 0x24d   :  { %v1851_v22 = vadd.f32 %v1797_v23, %v1544_v31  ;;  %v1427_v7 = vpop.f32.mrf.mxu1  ;;  %v2047_v37 = vmax.f32 %v2031_v16, %v2032_v48  ;;  %v5702_v31 = vld [vmem:[%s9412_s3 + $0x128] sm:$0xff]  ;;  %v5717_v48 = vld [vmem:[%s9412_s3 + $0x1a0] sm:$0xff]  ;;  %v2274_v23 = vld [vmem:[#allocation2 + $0x10] sm:$0xff] }
 0x24e   :  { %2391 = vmatpush.msrb.mxu1 %v5702_v31  ;;  %v1547_v52 = vadd.f32 %v1546_v57, %v1427_v7  ;;  %2344 = vmatpush.msrb.mxu0 %v5717_v48  ;;  %v5746_v57 = vld [vmem:[%s9412_s3 + $0x208] sm:$0xff]  ;;  %v5715_v31 = vld [vmem:[%s9412_s3 + $0x190] sm:$0xff] }
 0x24f   :  { %v1885_v26 = vadd.f32 %v7091_v44, %v1851_v22  ;;  %2048 = vst.msk [vmem:[#allocation4 + $0x20] sm:$0xff] %vm1089_vm9, %v2047_v37  ;;  %2473 = vmatpush.msrb.mxu2 %v5746_v57 }
 0x250   :  { %2392 = vmatpush.msrb.mxu1 %v5701_v32  ;;  %2345 = vmatpush.msrb.mxu0 %v5716_v45  ;;  %v5745_v32 = vld [vmem:[%s9412_s3 + $0x200] sm:$0xff] }
 0x251   :  { %v1917_v16 = vmax.f32 %v1885_v26, 0.0  ;;  %5733 = vmatmul.msk.f32.vlgmr.msrb.gmra.mxu1 %vm29_vm15, %v2274_v23  ;;  %2474 = vmatpush.msrb.mxu2 %v5745_v32  ;;  %v5713_v45 = vld [vmem:[%s9412_s3 + $0x180] sm:$0xff] }
 0x252   :  { %v1552_v22 = vpop.f32.mrf.mxu2  ;;  %2346 = vmatpush.msrb.mxu0 %v5715_v31  ;;  %v5743_v31 = vld [vmem:[%s9412_s3 + $0x1f0] sm:$0xff] }
 0x253   :  { %1949 = vst.msk [vmem:[#allocation3 + $0xa8] sm:$0xff] %vm1089_vm9, %v1917_v16 }
 0x254   :  { %v1800_v37 = vpop.f32.mrf.mxu3 }
 0x255   :  { %v1852_v26 = vadd.f32 %v1800_v37, %v1547_v52  ;;  %v1430_v18 = vpop.f32.mrf.mxu1  ;;  %v5714_v52 = vld [vmem:[%s9412_s3 + $0x188] sm:$0xff]  ;;  %v5744_v37 = vld [vmem:[%s9412_s3 + $0x1f8] sm:$0xff] }
 0x256   :  { %v7405_v7 = vld [vmem:[#allocation4 + $0x20] sm:$0xff]  ;;  %2347 = vmatpush.msrb.mxu0 %v5714_v52  ;;  %2475 = vmatpush.msrb.mxu2 %v5744_v37 }
 0x257   :  { %v1886_v16 = vadd.f32 %v7091_v44, %v1852_v26  ;;  %2208 = vrot.lane.b32.xlu0 %v7405_v7, %s6219_s16  ;;  %v7415_v48 = vmul.f32 %v7396_v50, %v7405_v7  ;;  %v1550_v26 = vadd.f32 %v7353_v20, %v1430_v18  ;;  %v5742_v20 = vld [vmem:[%s9412_s3 + $0x1e8] sm:$0xff]  ;;  %v9435_v50 = vand.u32 7, %v6417_v4 }
 0x258   :  { %2348 = vmatpush.msrb.mxu0 %v5713_v45  ;;  %2476 = vmatpush.msrb.mxu2 %v5743_v31  ;;  %v7452_v45 = vsel %vm2071_vm14, 1.0, %v9447_v54 }
 0x259   :  { %v1918_v23 = vmax.f32 %v1886_v16, 0.0  ;;  %v9431_v5 = vrot.slane %v7415_v48, 1  ;;  %9450 = vst [vmem:[#allocation20_spill] sm:$0xff] %v7452_v45  ;;  %vm2100_vm3 = vcmp.ne.s32.totalorder %v9435_v50, 0 }
 0x25a   :  { %v1555_v18 = vpop.f32.mrf.mxu2  ;;  %2477 = vmatpush.msrb.mxu2 %v5742_v20  ;;  %v1980_v20 = vld [vmem:[#allocation3 + $0xa0] ss:$2 sm:$0xff]  ;;  %v2012_v40 = vld [vmem:[#allocation3 + $0xa1] ss:$2 sm:$0xff] }
 0x25b   :  { %1950 = vst.msk [vmem:[#allocation3 + $0xb0] sm:$0xff] %vm1089_vm9, %v1918_v23  ;;  %v2183_v57 = vsel %vm798_vm4, %v2180_v63, %v9431_v5  ;;  %v5741_v63 = vld [vmem:[%s9412_s3 + $0x1e0] sm:$0xff]  ;;  %v2033_v60 = vmax.f32 %v1980_v20, %v2012_v40 }
 0x25c   :  { %v1803_v16 = vpop.f32.mrf.mxu3  ;;  %2231 = vrot.lane.b32.xlu2 %v2183_v57, %s6221_s19  ;;  %2478 = vmatpush.msrb.mxu2 %v5741_v63 }
 0x25d   :  { %v1853_v32 = vadd.f32 %v1803_v16, %v1550_v26  ;;  %v1433_v52 = vpop.f32.mrf.mxu1  ;;  %v2119_v16 = vmul.f32 %v7452_v45, %v7148_v27 }
 0x25e   :  { %v1553_v37 = vadd.f32 %v1552_v22, %v1433_v52  ;;  %v7460_v22 = vsel %vm2072_vm2, 1.0, %v9447_v54 }
 0x25f   :  { %v1887_v10 = vadd.f32 %v7091_v44, %v1853_v32  ;;  %v7465_v27 = vmul.f32 %v7460_v22, %v7210_v33 }
 0x261   :  { %v1919_v23 = vmax.f32 %v1887_v10, 0.0 }
 0x262   :  { %v1558_v10 = vpop.f32.mrf.mxu2 }
 0x263   :  { %1951 = vst.msk [vmem:[#allocation3 + $0xb8] sm:$0xff] %vm1089_vm9, %v1919_v23 }
 0x264   :  { %v1806_v26 = vpop.f32.mrf.mxu3 }
 0x265   :  { %v1854_v57 = vadd.f32 %v1806_v26, %v1553_v37  ;;  %v1436_v31 = vpop.f32.mrf.mxu1  ;;  %v2135_v37 = vrot.slane %v2119_v16, 7 }
 0x266   :  { %v1556_v26 = vadd.f32 %v1555_v18, %v1436_v31 }
 0x267   :  { %v1888_v32 = vadd.f32 %v7091_v44, %v1854_v57  ;;  %v2158_v46 = vsel %vm637_vm6, 0.0, %v2135_v37 }
 0x268   :  { %v2203_v63 = vpop.permute.xlu1 %2202  ;;  %v2249_v18 = vsel %vm1089_vm9, %v2158_v46, %v2201_v51  ;;  %v7482_v46 = vsel %vm2100_vm3, 1.0, %v9447_v54 }
 0x269   :  { %v1920_v23 = vmax.f32 %v1888_v32, 0.0 }
 0x26a   :  { %v1982_v52 = vld [vmem:[#allocation3 + $0xb0] ss:$2 sm:$0xff]  ;;  %v2014_v53 = vld [vmem:[#allocation3 + $0xb1] ss:$2 sm:$0xff] }
 0x26b   :  { %1952 = vst.msk [vmem:[#allocation3 + $0xc0] sm:$0xff] %vm1089_vm9, %v1920_v23  ;;  %v2034_v56 = vmax.f32 %v1982_v52, %v2014_v53  ;;  %v2136_v53 = vrot.slane %v7465_v27, 7 }
 0x26c   :  { %v1809_v57 = vpop.f32.mrf.mxu3 }
 0x26d   :  { %v1855_v5 = vadd.f32 %v1809_v57, %v1556_v26  ;;  %v1439_v45 = vpop.f32.mrf.mxu1  ;;  %v2049_v32 = vmax.f32 %v2033_v60, %v2034_v56  ;;  %v1561_v56 = vpop.f32.mrf.mxu2 }
 0x26e   :  { %v1559_v40 = vadd.f32 %v1558_v10, %v1439_v45  ;;  %v7491_v45 = vld [vmem:[%s9413_s4] ss:$0 sm:$0xff] }
 0x26f   :  { %v1889_v16 = vadd.f32 %v7091_v44, %v1855_v5  ;;  %2050 = vst.msk [vmem:[#allocation4 + $0x28] sm:$0xff] %vm1089_vm9, %v2049_v32  ;;  %v2137_v44 = vsel %vm637_vm6, %v2135_v37, %v2136_v53 }
 0x270   :  { %v2226_v31 = vpop.permute.xlu1 %2225  ;;  %v2250_v5 = vsel %vm1089_vm9, %v2137_v44, %v2203_v63 }
 0x271   :  { %v1921_v33 = vmax.f32 %v1889_v16, 0.0  ;;  %v2257_v20 = vsel %vm1122_vm11, %v2249_v18, %v2226_v31  ;;  %v9451_v31 = vrot.slane %v7415_v48, 1 }
 0x272   :  { %2266 = vst.msk [vmem:[#allocation2 + $0x18] sm:$0xff] %vm29_vm15, %v2257_v20 }
 0x273   :  { %1953 = vst.msk [vmem:[#allocation3 + $0xc8] sm:$0xff] %vm1089_vm9, %v1921_v33 }
 0x274   :  { %v1812_v51 = vpop.f32.mrf.mxu3 }
 0x275   :  { %v1856_v23 = vadd.f32 %v1812_v51, %v1559_v40  ;;  %v1442_v52 = vpop.f32.mrf.mxu1  ;;  %v2228_v26 = vpop.permute.xlu2 %2227 }
 0x276   :  { %v2258_v60 = vsel %vm1122_vm11, %v2250_v5, %v2228_v26  ;;  %v7486_v57 = vld [vmem:[#allocation4 + $0x28] sm:$0xff]  ;;  %v1562_v18 = vadd.f32 %v1561_v56, %v1442_v52  ;;  %v1564_v20 = vpop.f32.mrf.mxu2 }
 0x277   :  { %v1890_v10 = vadd.f32 %v7491_v45, %v1856_v23  ;;  %2267 = vst.msk [vmem:[#allocation2 + $0x20] sm:$0xff] %vm29_vm15, %v2258_v60  ;;  %2210 = vrot.lane.b32.xlu2 %v7486_v57, %s6219_s16  ;;  %v7499_v63 = vmul.f32 %v7482_v46, %v7486_v57 }
 0x279   :  { %v1922_v37 = vmax.f32 %v1890_v10, 0.0  ;;  %v2275_v32 = vld [vmem:[#allocation2 + $0x18] sm:$0xff]  ;;  %v2184_v16 = vrot.slane %v7499_v63, 1 }
 0x27a   :  { %5725 = vmatmul.msk.f32.vlgmr.msrb.gmra.mxu0 %vm29_vm15, %v2275_v32  ;;  %5734 = vmatmul.msk.f32.gmra.mxu1 %vm29_vm15, %v2275_v32  ;;  %v2016_v32 = vld [vmem:[#allocation3 + $0xc1] ss:$2 sm:$0xff] }
 0x27b   :  { %1954 = vst.msk [vmem:[#allocation3 + $0xd0] sm:$0xff] %vm1089_vm9, %v1922_v37  ;;  %v2185_v33 = vsel %vm798_vm4, %v9451_v31, %v2184_v16  ;;  %v1984_v37 = vld [vmem:[#allocation3 + $0xc0] ss:$2 sm:$0xff] }
 0x27c   :  { %v1815_v40 = vpop.f32.mrf.mxu3  ;;  %2233 = vrot.lane.b32.xlu1 %v2185_v33, %s6221_s19 }
 0x27d   :  { %v1857_v44 = vadd.f32 %v1815_v40, %v1562_v18  ;;  %v1445_v51 = vpop.f32.mrf.mxu1 }
 0x27e   :  { %v2418_v5 = vld [vmem:[#allocation2 + $0x20] sm:$0xff]  ;;  %v1565_v48 = vadd.f32 %v1564_v20, %v1445_v51  ;;  %v1567_v10 = vpop.f32.mrf.mxu2  ;;  %v2069_v20 = vand.u32 7, %v6434_v15 }
 0x27f   :  { %v1891_v23 = vadd.f32 %v7491_v45, %v1857_v44  ;;  %5753 = vmatmul.msk.f32.vlgmr.msrb.gmra.mxu2 %vm29_vm15, %v2418_v5  ;;  %v2035_v44 = vmax.f32 %v1984_v37, %v2016_v32 }
 0x280   :  { %vm2101_vm5 = vcmp.ne.s32.totalorder %v2069_v20, 0  ;;  %vm2077_vm2 = vcmp.ne.s32.totalorder %v2069_v20, 7 }
 0x281   :  { %v1923_v26 = vmax.f32 %v1891_v23, 0.0 }
 0x282   :  { %5726 = vmatmul.msk.f32.gmra.mxu0 %vm29_vm15, %v2418_v5  ;;  %5735 = vmatmul.msk.f32.gmra.mxu1 %vm29_vm15, %v2418_v5 }
 0x283   :  { %1955 = vst.msk [vmem:[#allocation3 + $0xd8] sm:$0xff] %vm1089_vm9, %v1923_v26 }
 0x284   :  { %v1818_v56 = vpop.f32.mrf.mxu3 }
 0x285   :  { %v1858_v52 = vadd.f32 %v1818_v56, %v1565_v48  ;;  %v1448_v60 = vpop.f32.mrf.mxu1 }
 0x286   :  { %v1568_v40 = vadd.f32 %v1567_v10, %v1448_v60  ;;  %v1570_v56 = vpop.f32.mrf.mxu2 }
 0x287   :  { %v1892_v63 = vadd.f32 %v7491_v45, %v1858_v52 }
 0x289   :  { %v1924_v18 = vmax.f32 %v1892_v63, 0.0  ;;  %v7523_v63 = vsel %vm2101_vm5, 1.0, %v9447_v54  ;;  %vm2554_vm5 = vcmask 257024  }
 0x28a   :  { %v1986_v31 = vld [vmem:[#allocation3 + $0xd0] ss:$2 sm:$0xff]  ;;  %v2018_v33 = vld [vmem:[#allocation3 + $0xd1] ss:$2 sm:$0xff] }
 0x28b   :  { %1956 = vst.msk [vmem:[#allocation3 + $0xe0] sm:$0xff] %vm1089_vm9, %v1924_v18  ;;  %v2036_v23 = vmax.f32 %v1986_v31, %v2018_v33 }
 0x28c   :  { %v1821_v5 = vpop.f32.mrf.mxu3 }
 0x28d   :  { %v1859_v50 = vadd.f32 %v1821_v5, %v1568_v40  ;;  %v2051_v26 = vmax.f32 %v2035_v44, %v2036_v23  ;;  %v1451_v51 = vpop.f32.mrf.mxu1 }
 0x28e   :  { %v1571_v60 = vadd.f32 %v1570_v56, %v1451_v51  ;;  %v1573_v44 = vpop.f32.mrf.mxu2 }
 0x28f   :  { %v1893_v48 = vadd.f32 %v7491_v45, %v1859_v50  ;;  %2052 = vst.msk [vmem:[#allocation4 + $0x30] sm:$0xff] %vm1089_vm9, %v2051_v26 }
 0x291   :  { %v1925_v52 = vmax.f32 %v1893_v48, 0.0  ;;  %v9452_v48 = vand.u32 7, %v6360_v30 }
 0x293   :  { %1957 = vst.msk [vmem:[#allocation3 + $0xe8] sm:$0xff] %vm1089_vm9, %v1925_v52  ;;  %vm2073_vm7 = vcmp.ne.s32.totalorder %v9452_v48, 7 }
 0x294   :  { %v1824_v10 = vpop.f32.mrf.mxu3  ;;  %v7539_v52 = vsel %vm2073_vm7, 1.0, %v9447_v54 }
 0x295   :  { %v1860_v37 = vadd.f32 %v1824_v10, %v1571_v60  ;;  %v1454_v31 = vpop.f32.mrf.mxu1  ;;  %v2121_v10 = vmul.f32 %v7539_v52, %v7273_v8 }
 0x296   :  { %v7525_v32 = vld [vmem:[#allocation4 + $0x30] sm:$0xff]  ;;  %v1574_v23 = vadd.f32 %v1573_v44, %v1454_v31  ;;  %v2205_v31 = vpop.permute.xlu2 %2204 }
 0x297   :  { %v1894_v18 = vadd.f32 %v7491_v45, %v1860_v37  ;;  %2212 = vrot.lane.b32.xlu1 %v7525_v32, %s6219_s16  ;;  %v2165_v50 = vmul.f32 %v7523_v63, %v7525_v32  ;;  %v2138_v37 = vrot.slane %v2121_v10, 7 }
 0x299   :  { %v1926_v33 = vmax.f32 %v1894_v18, 0.0  ;;  %v2186_v40 = vrot.slane %v2165_v50, 1 }
 0x29a   :  { %v1988_v18 = vld [vmem:[#allocation3 + $0xe0] ss:$2 sm:$0xff]  ;;  %v2020_v50 = vld [vmem:[#allocation3 + $0xe1] ss:$2 sm:$0xff] }
 0x29b   :  { %1958 = vst.msk [vmem:[#allocation3 + $0xf0] sm:$0xff] %vm1089_vm9, %v1926_v33  ;;  %v2187_v5 = vsel %vm798_vm4, %v2184_v16, %v2186_v40  ;;  %v9453_v16 = vand.u32 7, %v6376_v43  ;;  %v2037_v44 = vmax.f32 %v1988_v18, %v2020_v50 }
 0x29c   :  { %v1827_v26 = vpop.f32.mrf.mxu3  ;;  %2235 = vrot.lane.b32.xlu0 %v2187_v5, %s6221_s19  ;;  %v2139_v5 = vsel %vm637_vm6, %v2136_v53, %v2138_v37 }
 0x29d   :  { %v1861_v51 = vadd.f32 %v1827_v26, %v1574_v23  ;;  %vm2074_vm8 = vcmp.ne.s32.totalorder %v9453_v16, 7  ;;  %v2251_v43 = vsel %vm1089_vm9, %v2139_v5, %v2205_v31  ;;  %v9454_v5 = vand.u32 7, %v6397_v55 }
 0x29e   :  { %v7547_v30 = vsel %vm2074_vm8, 1.0, %v9447_v54 }
 0x29f   :  { %v1895_v56 = vadd.f32 %v7491_v45, %v1861_v51  ;;  %v2122_v8 = vmul.f32 %v7547_v30, %v7318_v0  ;;  %vm2075_vm13 = vcmp.ne.s32.totalorder %v9454_v5, 7  ;;  %v7617_v5 = vsel %vm2077_vm2, 1.0, %v9447_v54 }
 0x2a0   :  { %vm2778_vm2 = vcmask 254976  }
 0x2a1   :  { %v1927_v60 = vmax.f32 %v1895_v56, 0.0  ;;  %v2070_v56 = vand.u32 7, %v6455_v36 }
 0x2a3   :  { %1959 = vst.msk [vmem:[#allocation3 + $0xf8] sm:$0xff] %vm1089_vm9, %v1927_v60  ;;  %v2140_v60 = vrot.slane %v2122_v8, 7  ;;  %vm2102_vm10 = vcmp.ne.s32.totalorder %v2070_v56, 0  ;;  %v7589_v8 = vsel %vm2075_vm13, 1.0, %v9447_v54  ;;  %vm2078_vm3 = vcmp.ne.s32.totalorder %v2070_v56, 7 }
 0x2a4   :  { %v7563_v53 = vsel %vm2102_vm10, 1.0, %v9447_v54 }
 0x2a5   :  { %v2141_v0 = vsel %vm637_vm6, %v2138_v37, %v2140_v60 }
 0x2a8   :  { %v2207_v27 = vpop.permute.xlu1 %2206 }
 0x2a9   :  { %v2252_v10 = vsel %vm1089_vm9, %v2141_v0, %v2207_v27 }
 0x2aa   :  { %v1990_v45 = vld [vmem:[#allocation3 + $0xf0] ss:$2 sm:$0xff]  ;;  %v2022_v33 = vld [vmem:[#allocation3 + $0xf1] ss:$2 sm:$0xff] }
 0x2ab   :  { %v2038_v23 = vmax.f32 %v1990_v45, %v2022_v33 }
 0x2ad   :  { %v2230_v26 = vpop.permute.xlu0 %2229  ;;  %v2053_v51 = vmax.f32 %v2037_v44, %v2038_v23 }
 0x2ae   :  { %v2259_v48 = vsel %vm1122_vm11, %v2251_v43, %v2230_v26 }
 0x2af   :  { %2268 = vst.msk [vmem:[#allocation2 + $0x28] sm:$0xff] %vm29_vm15, %v2259_v48 }
 0x2b0   :  { %2054 = vst.msk [vmem:[#allocation4 + $0x38] sm:$0xff] %vm1089_vm9, %v2053_v51 }
 0x2b6   :  { %v2232_v16 = vpop.permute.xlu2 %2231  ;;  %v2277_v18 = vld [vmem:[#allocation2 + $0x28] sm:$0xff] }
 0x2b7   :  { %v2260_v50 = vsel %vm1122_vm11, %v2252_v10, %v2232_v16  ;;  %v7567_v31 = vld [vmem:[#allocation4 + $0x38] sm:$0xff]  ;;  %5727 = vmatmul.msk.f32.gmra.mxu0 %vm29_vm15, %v2277_v18  ;;  %5736 = vmatmul.msk.f32.gmra.mxu1 %vm29_vm15, %v2277_v18  ;;  %2626 = vst.msk [vmem:[#allocation2 + $0x28] sm:$0xf] %vm2625_vm12, %v9447_v54 }
 0x2b8   :  { %2269 = vst.msk [vmem:[#allocation2 + $0x30] sm:$0xff] %vm29_vm15, %v2260_v50  ;;  %2214 = vrot.lane.b32.xlu0 %v7567_v31, %s6219_s16  ;;  %5754 = vmatmul.msk.f32.gmra.mxu2 %vm29_vm15, %v2277_v18  ;;  %v2166_v37 = vmul.f32 %v7563_v53, %v7567_v31  ;;  %v7605_v18 = vld [vmem:[%s9413_s4 + $0x1] ss:$0 sm:$0xff] }
 0x2ba   :  { %v2188_v45 = vrot.slane %v2166_v37, 1 }
 0x2bc   :  { %v2189_v33 = vsel %vm798_vm4, %v2186_v40, %v2188_v45  ;;  %v2191_v44 = vsel %vm798_vm4, %v2188_v45, 0.0  ;;  %v2123_v40 = vmul.f32 %v7589_v8, %v7405_v7  ;;  %v9455_v7 = vand.u32 7, %v6417_v4 }
 0x2bd   :  { %2237 = vrot.lane.b32.xlu2 %v2189_v33, %s6221_s19  ;;  %2239 = vrot.lane.b32.xlu1 %v2191_v44, %s6221_s19 }
 0x2be   :  { %v2142_v43 = vrot.slane %v2123_v40, 7  ;;  %vm2076_vm14 = vcmp.ne.s32.totalorder %v9455_v7, 7 }
 0x2bf   :  { %v2278_v23 = vld [vmem:[#allocation2 + $0x30] sm:$0xff]  ;;  %v7608_v50 = vsel %vm2076_vm14, 1.0, %v9447_v54  ;;  %vm2810_vm14 = vcmask 779264  }
 0x2c0   :  { %5728 = vmatmul.msk.f32.gmra.mxu0 %vm29_vm15, %v2278_v23  ;;  %5737 = vmatmul.msk.f32.gmra.mxu1 %vm29_vm15, %v2278_v23  ;;  %v2143_v51 = vsel %vm637_vm6, %v2140_v60, %v2142_v43  ;;  %v2124_v33 = vmul.f32 %v7608_v50, %v7486_v57 }
 0x2c1   :  { %5755 = vmatmul.msk.f32.gmra.mxu2 %vm29_vm15, %v2278_v23 }
 0x2c2   :  { %v2144_v4 = vrot.slane %v2124_v33, 7 }
 0x2c9   :  { %v2209_v26 = vpop.permute.xlu0 %2208 }
 0x2ca   :  { %v2253_v48 = vsel %vm1089_vm9, %v2143_v51, %v2209_v26  ;;  %v2145_v26 = vsel %vm637_vm6, %v2142_v43, %v2144_v4  ;;  %v2125_v51 = vmul.f32 %v7617_v5, %v7525_v32 }
 0x2cc   :  { %v2146_v15 = vrot.slane %v2125_v51, 7 }
 0x2ce   :  { %v2394_v16 = vpop.f32.mrf.mxu1 }
 0x2d1   :  { %v2211_v40 = vpop.permute.xlu2 %2210 }
 0x2d2   :  { %v2254_v57 = vsel %vm1089_vm9, %v2145_v26, %v2211_v40 }
 0x2ee   :  { %v2234_v27 = vpop.permute.xlu1 %2233 }
 0x2ef   :  { %v2261_v0 = vsel %vm1122_vm11, %v2253_v48, %v2234_v27 }
 0x2f0   :  { %2270 = vst.msk [vmem:[#allocation2 + $0x38] sm:$0xff] %vm29_vm15, %v2261_v0  ;;  %v2147_v0 = vsel %vm637_vm6, %v2144_v4, %v2146_v15 }
 0x2f7   :  { %v2279_v10 = vld [vmem:[#allocation2 + $0x38] sm:$0xff]  ;;  %v2350_v55 = vpop.f32.mrf.mxu0  ;;  %v2397_v40 = vpop.f32.mrf.mxu1 }
 0x2f8   :  { %5729 = vmatmul.msk.f32.gmra.mxu0 %vm29_vm15, %v2279_v10  ;;  %5738 = vmatmul.msk.f32.gmra.mxu1 %vm29_vm15, %v2279_v10  ;;  %v2395_v60 = vadd.f32 %v2394_v16, %v2350_v55  ;;  %v7638_v16 = vsel %vm2078_vm3, 1.0, %v9447_v54  ;;  %vm2780_vm3 = vcmask 259076  }
 0x2f9   :  { %5756 = vmatmul.msk.f32.gmra.mxu2 %vm29_vm15, %v2279_v10 }
 0x2ff   :  { %v2353_v4 = vpop.f32.mrf.mxu0 }
 0x302   :  { %v2480_v37 = vpop.f32.mrf.mxu2 }
 0x303   :  { %v2504_v45 = vadd.f32 %v2480_v37, %v2395_v60  ;;  %v2126_v60 = vmul.f32 %v7638_v16, %v7567_v31  ;;  %v2398_v31 = vadd.f32 %v2397_v40, %v2353_v4 }
 0x305   :  { %v2514_v44 = vadd.f32 %v7605_v18, %v2504_v45  ;;  %v2148_v37 = vrot.slane %v2126_v60, 7  ;;  %v5788_v45 = vld [vmem:[%s9412_s3 + $0x2f8] sm:$0xff] }
 0x306   :  { %2669 = vmatpush.msrb.mxu3 %v5788_v45 }
 0x307   :  { %v2522_v23 = vmax.f32 %v2514_v44, 0.0  ;;  %v2149_v56 = vsel %vm637_vm6, %v2146_v15, %v2148_v37 }
 0x309   :  { %2530 = vst.msk [vmem:[#allocation3] sm:$0xff] %vm1089_vm9, %v2522_v23  ;;  %v2213_v20 = vpop.permute.xlu1 %2212 }
 0x30a   :  { %v2255_v10 = vsel %vm1089_vm9, %v2147_v0, %v2213_v20  ;;  %v2400_v0 = vpop.f32.mrf.mxu1 }
 0x30e   :  { %v2236_v48 = vpop.permute.xlu0 %2235 }
 0x30f   :  { %v2262_v27 = vsel %vm1122_vm11, %v2254_v57, %v2236_v48 }
 0x310   :  { %2271 = vst.msk [vmem:[#allocation2 + $0x40] sm:$0xff] %vm29_vm15, %v2262_v27  ;;  %v2425_v27 = vld [vmem:[#allocation2 + $0x58] sm:$0xff] }
 0x317   :  { %v2238_v55 = vpop.permute.xlu2 %2237  ;;  %v2280_v7 = vld [vmem:[#allocation2 + $0x40] sm:$0xff] }
 0x318   :  { %v2263_v43 = vsel %vm1122_vm11, %v2255_v10, %v2238_v55  ;;  %5730 = vmatmul.msk.f32.gmra.mxu0 %vm29_vm15, %v2280_v7  ;;  %5739 = vmatmul.msk.f32.gmra.mxu1 %vm29_vm15, %v2280_v7 }
 0x319   :  { %2272 = vst.msk [vmem:[#allocation2 + $0x48] sm:$0xff] %vm29_vm15, %v2263_v43  ;;  %5757 = vmatmul.msk.f32.gmra.mxu2 %vm29_vm15, %v2280_v7 }
 0x320   :  { %v2281_v32 = vld [vmem:[#allocation2 + $0x48] sm:$0xff] }
 0x321   :  { %5731 = vmatmul.msk.f32.gmra.mxu0 %vm29_vm15, %v2281_v32  ;;  %5740 = vmatmul.msk.f32.gmra.mxu1 %vm29_vm15, %v2281_v32 }
 0x322   :  { %5758 = vmatmul.msk.f32.gmra.mxu2 %vm29_vm15, %v2281_v32 }
 0x32a   :  { %v2215_v36 = vpop.permute.xlu0 %2214 }
 0x32b   :  { %v2256_v33 = vsel %vm1089_vm9, %v2149_v56, %v2215_v36 }
 0x32f   :  { %v2240_v44 = vpop.permute.xlu1 %2239 }
 0x330   :  { %v2264_v23 = vsel %vm1122_vm11, %v2256_v33, %v2240_v44  ;;  %v5787_v33 = vld [vmem:[%s9412_s3 + $0x2f0] sm:$0xff]  ;;  %v5786_v44 = vld [vmem:[%s9412_s3 + $0x2e8] sm:$0xff] }
 0x331   :  { %2273 = vst.msk [vmem:[#allocation2 + $0x50] sm:$0xff] %vm29_vm15, %v2264_v23  ;;  %2670 = vmatpush.msrb.mxu3 %v5787_v33 }
 0x333   :  { %2671 = vmatpush.msrb.mxu3 %v5786_v44 }
 0x334   :  { %v2356_v15 = vpop.f32.mrf.mxu0  ;;  %v2403_v4 = vpop.f32.mrf.mxu1 }
 0x335   :  { %v2401_v10 = vadd.f32 %v2400_v0, %v2356_v15 }
 0x338   :  { %v2295_v26 = vld [vmem:[#allocation2 + $0x50] sm:$0xff] }
 0x339   :  { %5732 = vmatmul.msk.f32.gmra.mxu0 %vm29_vm15, %v2295_v26  ;;  %5759 = vmatmul.msk.f32.gmra.mxu2 %vm29_vm15, %v2295_v26 }
 0x33b   :  { %v2483_v51 = vpop.f32.mrf.mxu2 }
 0x33c   :  { %v2505_v57 = vadd.f32 %v2483_v51, %v2398_v31 }
 0x33d   :  { %v2359_v23 = vpop.f32.mrf.mxu0 }
 0x33e   :  { %v2515_v48 = vadd.f32 %v7605_v18, %v2505_v57  ;;  %v2404_v40 = vadd.f32 %v2403_v4, %v2359_v23 }
 0x340   :  { %v2523_v20 = vmax.f32 %v2515_v48, 0.0  ;;  %v5785_v48 = vld [vmem:[%s9412_s3 + $0x2e0] sm:$0xff] }
 0x341   :  { %5760 = vmatmul.msk.f32.gmra.mxu2 %vm29_vm15, %v2425_v27  ;;  %2672 = vmatpush.msrb.mxu3 %v5785_v48 }
 0x342   :  { %2531 = vst.msk [vmem:[#allocation3 + $0x8] sm:$0xff] %vm1089_vm9, %v2523_v20 }
 0x344   :  { %v2486_v55 = vpop.f32.mrf.mxu2 }
 0x345   :  { %v2506_v7 = vadd.f32 %v2486_v55, %v2401_v10  ;;  %v5784_v55 = vld [vmem:[%s9412_s3 + $0x2d8] sm:$0xff] }
 0x346   :  { %2673 = vmatpush.msrb.mxu3 %v5784_v55 }
 0x347   :  { %v2516_v43 = vadd.f32 %v7605_v18, %v2506_v7 }
 0x349   :  { %v2538_v32 = vld [vmem:[#allocation3] ss:$2 sm:$0xff]  ;;  %v2542_v60 = vld [vmem:[#allocation3 + $0x1] ss:$2 sm:$0xff]  ;;  %v2524_v37 = vmax.f32 %v2516_v43, 0.0 }
 0x34a   :  { %v2546_v45 = vmax.f32 %v2538_v32, %v2542_v60  ;;  %v2406_v32 = vpop.f32.mrf.mxu1 }
 0x34b   :  { %2532 = vst.msk [vmem:[#allocation3 + $0x10] sm:$0xff] %vm1089_vm9, %v2524_v37 }
 0x34c   :  { %v2551_v36 = vrot.slane %v2546_v45, 4 }
 0x34e   :  { %v2553_v56 = vmax.f32 %v2546_v45, %v2551_v36 }
 0x350   :  { %2555 = vst.msk [vmem:[#allocation4] sm:$0xf] %vm2554_vm5, %v2553_v56 }
 0x375   :  { %v2362_v7 = vpop.f32.mrf.mxu0  ;;  %v2409_v44 = vpop.f32.mrf.mxu1 }
 0x376   :  { %v2407_v60 = vadd.f32 %v2406_v32, %v2362_v7 }
 0x37c   :  { %v2489_v26 = vpop.f32.mrf.mxu2 }
 0x37d   :  { %v2507_v31 = vadd.f32 %v2489_v26, %v2404_v40 }
 0x37f   :  { %v2517_v51 = vadd.f32 %v7605_v18, %v2507_v31 }
 0x381   :  { %v2525_v57 = vmax.f32 %v2517_v51, 0.0  ;;  %v5783_v51 = vld [vmem:[%s9412_s3 + $0x2d0] sm:$0xff] }
 0x382   :  { %2674 = vmatpush.msrb.mxu3 %v5783_v51 }
 0x383   :  { %2533 = vst.msk [vmem:[#allocation3 + $0x18] sm:$0xff] %vm1089_vm9, %v2525_v57 }
 0x38a   :  { %v2539_v27 = vld [vmem:[#allocation3 + $0x10] ss:$2 sm:$0xff]  ;;  %v2543_v15 = vld [vmem:[#allocation3 + $0x11] ss:$2 sm:$0xff] }
 0x38b   :  { %v2547_v20 = vmax.f32 %v2539_v27, %v2543_v15 }
 0x38d   :  { %v2557_v0 = vrot.slane %v2547_v20, 4 }
 0x38f   :  { %v2559_v10 = vmax.f32 %v2547_v20, %v2557_v0 }
 0x391   :  { %2560 = vst.msk [vmem:[#allocation4 + $0x4] sm:$0xf] %vm2554_vm5, %v2559_v10 }
 0x395   :  { %v2365_v56 = vpop.f32.mrf.mxu0  ;;  %v2412_v20 = vpop.f32.mrf.mxu1 }
 0x396   :  { %v2410_v23 = vadd.f32 %v2409_v44, %v2365_v56 }
 0x398   :  { %v7672_v43 = vld [vmem:[#allocation4] sm:$0xff] }
 0x399   :  { %2608 = vrot.lane.b32.xlu2 %v7672_v43, %s6219_s16 }
 0x39c   :  { %v2492_v37 = vpop.f32.mrf.mxu2 }
 0x39d   :  { %v2508_v45 = vadd.f32 %v2492_v37, %v2407_v60 }
 0x39e   :  { %v2368_v0 = vpop.f32.mrf.mxu0 }
 0x39f   :  { %v2518_v36 = vadd.f32 %v7605_v18, %v2508_v45  ;;  %v2413_v55 = vadd.f32 %v2412_v20, %v2368_v0  ;;  %v5803_v20 = vld [vmem:[%s9412_s3 + $0x350] sm:$0xff] }
 0x3a0   :  { %v5779_v0 = vld [vmem:[%s9412_s3 + $0x2b0] sm:$0xff] }
 0x3a1   :  { %v2526_v33 = vmax.f32 %v2518_v36, 0.0  ;;  %v2415_v36 = vpop.f32.mrf.mxu1 }
 0x3a3   :  { %2534 = vst.msk [vmem:[#allocation3 + $0x20] sm:$0xff] %vm1089_vm9, %v2526_v33  ;;  %v5782_v33 = vld [vmem:[%s9412_s3 + $0x2c8] sm:$0xff] }
 0x3a4   :  { %2675 = vmatpush.msrb.mxu3 %v5782_v33 }
 0x3a5   :  { %v2495_v4 = vpop.f32.mrf.mxu2 }
 0x3a6   :  { %v2509_v40 = vadd.f32 %v2495_v4, %v2410_v23 }
 0x3a8   :  { %v2519_v26 = vadd.f32 %v7605_v18, %v2509_v40 }
 0x3aa   :  { %v2527_v31 = vmax.f32 %v2519_v26, 0.0 }
 0x3ac   :  { %2535 = vst.msk [vmem:[#allocation3 + $0x28] sm:$0xff] %vm1089_vm9, %v2527_v31 }
 0x3b3   :  { %v2540_v57 = vld [vmem:[#allocation3 + $0x20] ss:$2 sm:$0xff]  ;;  %v2544_v48 = vld [vmem:[#allocation3 + $0x21] ss:$2 sm:$0xff] }
 0x3b4   :  { %v2548_v27 = vmax.f32 %v2540_v57, %v2544_v48  ;;  %v5781_v57 = vld [vmem:[%s9412_s3 + $0x2c0] sm:$0xff]  ;;  %v5780_v48 = vld [vmem:[%s9412_s3 + $0x2b8] sm:$0xff] }
 0x3b5   :  { %2676 = vmatpush.msrb.mxu3 %v5781_v57  ;;  %v5797_v57 = vld [vmem:[%s9412_s3 + $0x320] sm:$0xff] }
 0x3b6   :  { %v2562_v15 = vrot.slane %v2548_v27, 4  ;;  %v2371_v37 = vpop.f32.mrf.mxu0 }
 0x3b7   :  { %v2416_v56 = vadd.f32 %v2415_v36, %v2371_v37  ;;  %2677 = vmatpush.msrb.mxu3 %v5780_v48  ;;  %v5776_v48 = vld [vmem:[%s9412_s3 + $0x298] sm:$0xff] }
 0x3b8   :  { %v2564_v10 = vmax.f32 %v2548_v27, %v2562_v15  ;;  %v2573_v15 = vand.u32 3, %v6335_v19 }
 0x3b9   :  { %2678 = vmatpush.msrb.mxu3 %v5779_v0  ;;  %v5774_v0 = vld [vmem:[%s9412_s3 + $0x288] sm:$0xff] }
 0x3ba   :  { %2565 = vst.msk [vmem:[#allocation4 + $0x8] sm:$0xf] %vm2554_vm5, %v2564_v10  ;;  %vm2581_vm7 = vcmp.ne.s32.totalorder %v2573_v15, 0  ;;  %vm2575_vm13 = vcmp.ne.s32.totalorder %v2573_v15, 3 }
 0x3bc   :  { %v2498_v7 = vpop.f32.mrf.mxu2 }
 0x3bd   :  { %v2510_v32 = vadd.f32 %v2498_v7, %v2413_v55  ;;  %v2574_v55 = vand.u32 3, %v6343_v21  ;;  %v5778_v7 = vld [vmem:[%s9412_s3 + $0x2a8] sm:$0xff] }
 0x3be   :  { %2679 = vmatpush.msrb.mxu3 %v5778_v7  ;;  %v5773_v7 = vld [vmem:[%s9412_s3 + $0x280] sm:$0xff] }
 0x3bf   :  { %v2520_v60 = vadd.f32 %v7605_v18, %v2510_v32  ;;  %vm2582_vm8 = vcmp.ne.s32.totalorder %v2574_v55, 0  ;;  %v7715_v32 = vsel %vm2581_vm7, 1.0, %v9447_v54  ;;  %vm2576_vm10 = vcmp.ne.s32.totalorder %v2574_v55, 3  ;;  %v5768_v55 = vld [vmem:[%s9412_s3 + $0x258] sm:$0xff] }
 0x3c0   :  { %v2597_v21 = vmul.f32 %v7715_v32, %v7672_v43 }
 0x3c1   :  { %v2528_v45 = vmax.f32 %v2520_v60, 0.0  ;;  %v7718_v60 = vsel %vm2582_vm8, 1.0, %v9447_v54 }
 0x3c3   :  { %2536 = vst.msk [vmem:[#allocation3 + $0x30] sm:$0xff] %vm1089_vm9, %v2528_v45 }
 0x3c4   :  { %v2501_v44 = vpop.f32.mrf.mxu2 }
 0x3c5   :  { %v2511_v23 = vadd.f32 %v2501_v44, %v2416_v56  ;;  %v2601_v56 = vrot.slane %v2597_v21, 1  ;;  %v5793_v21 = vld [vmem:[%s9412_s3 + $0x300] sm:$0xff] }
 0x3c7   :  { %v2521_v4 = vadd.f32 %v7605_v18, %v2511_v23  ;;  %v5804_v18 = vld [vmem:[%s9412_s3 + $0x358] sm:$0xff]  ;;  %v5802_v23 = vld [vmem:[%s9412_s3 + $0x348] sm:$0xff] }
 0x3c8   :  { %2742 = vmatpush.msra.mxu0 %v5804_v18  ;;  %v5775_v18 = vld [vmem:[%s9412_s3 + $0x290] sm:$0xff] }
 0x3c9   :  { %v2529_v40 = vmax.f32 %v2521_v4, 0.0  ;;  %v5801_v4 = vld [vmem:[%s9412_s3 + $0x340] sm:$0xff] }
 0x3ca   :  { %2743 = vmatpush.msra.mxu0 %v5803_v20  ;;  %v5795_v20 = vld [vmem:[%s9412_s3 + $0x310] sm:$0xff] }
 0x3cb   :  { %2537 = vst.msk [vmem:[#allocation3 + $0x38] sm:$0xff] %vm1089_vm9, %v2529_v40  ;;  %v5777_v40 = vld [vmem:[%s9412_s3 + $0x2a0] sm:$0xff] }
 0x3cc   :  { %2744 = vmatpush.msra.mxu0 %v5802_v23  ;;  %2680 = vmatpush.msrb.mxu3 %v5777_v40  ;;  %v7791_v23 = vsel %vm2575_vm13, 1.0, %v9447_v54 }
 0x3ce   :  { %2745 = vmatpush.msra.mxu0 %v5801_v4  ;;  %2698 = vmatpush.msra.mxu3 %v5776_v48  ;;  %v5767_v4 = vld [vmem:[%s9412_s3 + $0x250] sm:$0xff] }
 0x3d0   :  { %2699 = vmatpush.msra.mxu3 %v5775_v18 }
 0x3d2   :  { %v2541_v26 = vld [vmem:[#allocation3 + $0x30] ss:$2 sm:$0xff]  ;;  %v2545_v31 = vld [vmem:[#allocation3 + $0x31] ss:$2 sm:$0xff]  ;;  %2700 = vmatpush.msra.mxu3 %v5774_v0 }
 0x3d3   :  { %v2549_v51 = vmax.f32 %v2541_v26, %v2545_v31  ;;  %v5800_v26 = vld [vmem:[%s9412_s3 + $0x338] sm:$0xff]  ;;  %v5799_v31 = vld [vmem:[%s9412_s3 + $0x330] sm:$0xff] }
 0x3d4   :  { %2746 = vmatpush.msra.mxu0 %v5800_v26  ;;  %2701 = vmatpush.msra.mxu3 %v5773_v7  ;;  %v5766_v26 = vld [vmem:[%s9412_s3 + $0x248] sm:$0xff] }
 0x3d5   :  { %v2567_v27 = vrot.slane %v2549_v51, 4 }
 0x3d6   :  { %2747 = vmatpush.msra.mxu0 %v5799_v31  ;;  %v2587_v31 = vmul.f32 %v7791_v23, %v7672_v43 }
 0x3d7   :  { %v2569_v10 = vmax.f32 %v2549_v51, %v2567_v27  ;;  %v5798_v51 = vld [vmem:[%s9412_s3 + $0x328] sm:$0xff]  ;;  %v5796_v27 = vld [vmem:[%s9412_s3 + $0x318] sm:$0xff] }
 0x3d8   :  { %2748 = vmatpush.msra.mxu0 %v5798_v51  ;;  %v5765_v51 = vld [vmem:[%s9412_s3 + $0x240] sm:$0xff]  ;;  %v2591_v48 = vrot.slane %v2587_v31, 7 }
 0x3d9   :  { %2570 = vst.msk [vmem:[#allocation4 + $0xc] sm:$0xf] %vm2554_vm5, %v2569_v10  ;;  %v5794_v10 = vld [vmem:[%s9412_s3 + $0x308] sm:$0xff] }
 0x3da   :  { %2749 = vmatpush.msra.mxu0 %v5797_v57  ;;  %v2596_v43 = vsel %vm637_vm6, 0.0, %v2591_v48 }
 0x3dc   :  { %2750 = vmatpush.msra.mxu0 %v5796_v27 }
 0x3de   :  { %2751 = vmatpush.msra.mxu0 %v5795_v20 }
 0x3e0   :  { %v2572_v37 = vld [vmem:[#allocation4 + $0x8] sm:$0xff]  ;;  %2752 = vmatpush.msra.mxu0 %v5794_v10 }
 0x3e1   :  { %2610 = vrot.lane.b32.xlu1 %v2572_v37, %s6219_s16  ;;  %v2598_v45 = vmul.f32 %v7718_v60, %v2572_v37 }
 0x3e2   :  { %2753 = vmatpush.msra.mxu0 %v5793_v21 }
 0x3e3   :  { %v2602_v36 = vrot.slane %v2598_v45, 1  ;;  %v5772_v45 = vld [vmem:[%s9412_s3 + $0x278] sm:$0xff] }
 0x3e4   :  { %2702 = vmatpush.msra.mxu3 %v5772_v45 }
 0x3e5   :  { %v2605_v33 = vsel %vm798_vm4, %v2602_v36, 0.0  ;;  %v2603_v44 = vsel %vm798_vm4, %v2601_v56, %v2602_v36  ;;  %v5771_v36 = vld [vmem:[%s9412_s3 + $0x270] sm:$0xff]  ;;  %v5770_v56 = vld [vmem:[%s9412_s3 + $0x268] sm:$0xff] }
 0x3e6   :  { %2617 = vrot.lane.b32.xlu2 %v2605_v33, %s6221_s19  ;;  %2615 = vrot.lane.b32.xlu0 %v2603_v44, %s6221_s19  ;;  %v5769_v33 = vld [vmem:[%s9412_s3 + $0x260] sm:$0xff]  ;;  %v7788_v44 = vsel %vm2576_vm10, 1.0, %v9447_v54  ;;  %vm2937_vm10 = vcmask 253952  }
 0x3e7   :  { %2703 = vmatpush.msra.mxu3 %v5771_v36  ;;  %v2588_v40 = vmul.f32 %v7788_v44, %v2572_v37 }
 0x3e9   :  { %2704 = vmatpush.msra.mxu3 %v5770_v56  ;;  %v2592_v57 = vrot.slane %v2588_v40, 7 }
 0x3eb   :  { %2705 = vmatpush.msra.mxu3 %v5769_v33  ;;  %v2593_v37 = vsel %vm637_vm6, %v2591_v48, %v2592_v57 }
 0x3ed   :  { %2706 = vmatpush.msra.mxu3 %v5768_v55 }
 0x3ef   :  { %2707 = vmatpush.msra.mxu3 %v5767_v4 }
 0x3f1   :  { %2708 = vmatpush.msra.mxu3 %v5766_v26 }
 0x3f3   :  { %v2609_v15 = vpop.permute.xlu2 %2608  ;;  %2709 = vmatpush.msra.mxu3 %v5765_v51  ;;  %v6182_v51 = vld [vmem:[%s9413_s4 + $0x2] ss:$0 sm:$0xff] }
 0x3f4   :  { %v2621_v10 = vsel %vm1089_vm9, %v2596_v43, %v2609_v15 }
 0x440   :  { %v2618_v18 = vpop.permute.xlu2 %2617 }
 0x453   :  { %v2611_v27 = vpop.permute.xlu1 %2610 }
 0x454   :  { %v2622_v20 = vsel %vm1089_vm9, %v2593_v37, %v2611_v27 }
 0x455   :  { %v2624_v0 = vsel %vm1122_vm11, %v2622_v20, %v2618_v18 }
 0x456   :  { %2628 = vst.msk [vmem:[#allocation2 + $0x20] sm:$0xff] %vm29_vm15, %v2624_v0 }
 0x458   :  { %v2616_v7 = vpop.permute.xlu0 %2615 }
 0x459   :  { %v2623_v21 = vsel %vm1122_vm11, %v2621_v10, %v2616_v7  ;;  %v5832_v10 = vld [vmem:[%s9412_s3 + $0x418] sm:$0xff] }
 0x45a   :  { %2627 = vst.msk [vmem:[#allocation2 + $0x18] sm:$0xff] %vm29_vm15, %v2623_v21  ;;  %v5820_v7 = vld [vmem:[%s9412_s3 + $0x3b8] sm:$0xff] }
 0x45b   :  { %v5846_v21 = vld [vmem:[%s9412_s3 + $0x478] sm:$0xff]  ;;  %2871 = vmatpush.msra.mxu1 %v5820_v7 }
 0x45c   :  { %2908 = vmatpush.msra.mxu2 %v5846_v21 }
 0x45d   :  { %v2645_v56 = vld [vmem:[#allocation2 + $0x20] sm:$0xff] }
 0x45e   :  { %v2718_v33 = vld [vmem:[#allocation2 + $0x24] sm:$0xff] }
 0x461   :  { %v2630_v45 = vld [vmem:[#allocation2 + $0x1c] sm:$0xff]  ;;  %v2629_v55 = vld [vmem:[#allocation2 + $0x14] sm:$0xff] }
 0x462   :  { %v2644_v36 = vld [vmem:[#allocation2 + $0x18] sm:$0xff]  ;;  %5805 = vmatmul.msk.f32.vlgmr.msra.gmra.mxu0 %vm29_vm15, %v2630_v45 }
 0x463   :  { %5789 = vmatmul.msk.f32.vlgmr.msrb.gmra.mxu3 %vm29_vm15, %v2644_v36  ;;  %2811 = vst.msk [vmem:[#allocation2 + $0x1c] sm:$0x3] %vm2810_vm14, %v9447_v54  ;;  %v5819_v36 = vld [vmem:[%s9412_s3 + $0x3b0] sm:$0xff] }
 0x464   :  { %2848 = vmatpush.msrb.mxu3 %v5832_v10  ;;  %2872 = vmatpush.msra.mxu1 %v5819_v36 }
 0x46a   :  { %5806 = vmatmul.msk.f32.gmra.mxu0 %vm29_vm15, %v2718_v33 }
 0x46b   :  { %5790 = vmatmul.msk.f32.gmra.mxu3 %vm29_vm15, %v2645_v56  ;;  %v5845_v56 = vld [vmem:[%s9412_s3 + $0x470] sm:$0xff] }
 0x46c   :  { %2909 = vmatpush.msra.mxu2 %v5845_v56  ;;  %v5815_v56 = vld [vmem:[%s9412_s3 + $0x390] sm:$0xff] }
 0x473   :  { %5791 = vmatmul.msk.f32.vlgmr.msra.gmra.mxu3 %vm29_vm15, %v2629_v55  ;;  %v5830_v55 = vld [vmem:[%s9412_s3 + $0x408] sm:$0xff] }
 0x47b   :  { %5792 = vmatmul.msk.f32.gmra.mxu3 %vm29_vm15, %v2630_v45  ;;  %v5831_v45 = vld [vmem:[%s9412_s3 + $0x410] sm:$0xff] }
 0x47c   :  { %2849 = vmatpush.msrb.mxu3 %v5831_v45 }
 0x47e   :  { %2850 = vmatpush.msrb.mxu3 %v5830_v55  ;;  %v5826_v55 = vld [vmem:[%s9412_s3 + $0x3e8] sm:$0xff] }
 0x4df   :  { %v2755_v15 = vpop.f32.mrf.mxu0 }
 0x4e6   :  { %v2682_v4 = vpop.f32.mrf.mxu3 }
 0x4e7   :  { %v2758_v20 = vpop.f32.mrf.mxu0 }
 0x4ee   :  { %v2685_v40 = vpop.f32.mrf.mxu3 }
 0x4f6   :  { %v2711_v26 = vpop.f32.mrf.mxu3 }
 0x4f7   :  { %v2712_v31 = vadd.f32 %v2711_v26, %v2682_v4  ;;  %v5818_v4 = vld [vmem:[%s9412_s3 + $0x3a8] sm:$0xff]  ;;  %v5817_v26 = vld [vmem:[%s9412_s3 + $0x3a0] sm:$0xff] }
 0x4f8   :  { %2873 = vmatpush.msra.mxu1 %v5818_v4  ;;  %v5814_v4 = vld [vmem:[%s9412_s3 + $0x388] sm:$0xff] }
 0x4f9   :  { %v2761_v57 = vadd.f32 %v2755_v15, %v2712_v31  ;;  %v5829_v15 = vld [vmem:[%s9412_s3 + $0x400] sm:$0xff] }
 0x4fa   :  { %v5843_v31 = vld [vmem:[%s9412_s3 + $0x460] sm:$0xff]  ;;  %2851 = vmatpush.msrb.mxu3 %v5829_v15  ;;  %2874 = vmatpush.msra.mxu1 %v5817_v26 }
 0x4fb   :  { %v2765_v48 = vadd.f32 %v6182_v51, %v2761_v57  ;;  %v5816_v57 = vld [vmem:[%s9412_s3 + $0x398] sm:$0xff]  ;;  %v5825_v15 = vld [vmem:[%s9412_s3 + $0x3e0] sm:$0xff] }
 0x4fc   :  { %2875 = vmatpush.msra.mxu1 %v5816_v57  ;;  %v5813_v26 = vld [vmem:[%s9412_s3 + $0x380] sm:$0xff]  ;;  %v5812_v57 = vld [vmem:[%s9412_s3 + $0x378] sm:$0xff] }
 0x4fd   :  { %v2767_v27 = vmax.f32 %v2765_v48, 0.0  ;;  %v5842_v48 = vld [vmem:[%s9412_s3 + $0x458] sm:$0xff] }
 0x4fe   :  { %v2714_v37 = vpop.f32.mrf.mxu3  ;;  %2876 = vmatpush.msra.mxu1 %v5815_v56  ;;  %v2983_v56 = vld [vmem:[%s9410_s1] sm:$0x7] }
 0x4ff   :  { %2769 = vst.msk [vmem:[#allocation3] sm:$0xff] %vm1089_vm9, %v2767_v27  ;;  %v2715_v18 = vadd.f32 %v2714_v37, %v2685_v40  ;;  %v5844_v40 = vld [vmem:[%s9412_s3 + $0x468] sm:$0xff] }
 0x500   :  { %2910 = vmatpush.msra.mxu2 %v5844_v40  ;;  %v5840_v40 = vld [vmem:[%s9412_s3 + $0x448] sm:$0xff]  ;;  %2877 = vmatpush.msra.mxu1 %v5814_v4 }
 0x501   :  { %v2762_v0 = vadd.f32 %v2758_v20, %v2715_v18 }
 0x502   :  { %2911 = vmatpush.msra.mxu2 %v5843_v31  ;;  %v5839_v31 = vld [vmem:[%s9412_s3 + $0x440] sm:$0xff]  ;;  %2878 = vmatpush.msra.mxu1 %v5813_v26 }
 0x503   :  { %v2766_v43 = vadd.f32 %v6182_v51, %v2762_v0  ;;  %v5828_v51 = vld [vmem:[%s9412_s3 + $0x3f8] sm:$0xff] }
 0x504   :  { %2852 = vmatpush.msrb.mxu3 %v5828_v51  ;;  %2912 = vmatpush.msra.mxu2 %v5842_v48  ;;  %v5824_v51 = vld [vmem:[%s9412_s3 + $0x3d8] sm:$0xff] }
 0x505   :  { %v2768_v33 = vmax.f32 %v2766_v43, 0.0  ;;  %v2783_v43 = vand.u32 1, %v6335_v19  ;;  %v5827_v19 = vld [vmem:[%s9412_s3 + $0x3f0] sm:$0xff]  ;;  %v5838_v48 = vld [vmem:[%s9412_s3 + $0x438] sm:$0xff]  ;;  %2879 = vmatpush.msra.mxu1 %v5812_v57 }
 0x506   :  { %2853 = vmatpush.msrb.mxu3 %v5827_v19  ;;  %v5835_v19 = vld [vmem:[%s9412_s3 + $0x420] sm:$0xff] }
 0x507   :  { %2770 = vst.msk [vmem:[#allocation3 + $0x8] sm:$0xff] %vm1089_vm9, %v2768_v33  ;;  %vm2787_vm7 = vcmp.ne.s32.totalorder %v2783_v43, 0  ;;  %v5841_v33 = vld [vmem:[%s9412_s3 + $0x450] sm:$0xff]  ;;  %vm2784_vm8 = vcmp.ne.s32.totalorder %v2783_v43, 1  ;;  %v5848_v43 = vld [vmem:[%s9409_s0 + $0x100] sm:$0xff] }
 0x508   :  { %v7878_v10 = vsel %vm2787_vm7, 1.0, %v9447_v54  ;;  %2913 = vmatpush.msra.mxu2 %v5841_v33  ;;  %2854 = vmatpush.msrb.mxu3 %v5826_v55  ;;  %v7952_v33 = vsel %vm2784_vm8, 1.0, %v9447_v54 }
 0x50a   :  { %2914 = vmatpush.msra.mxu2 %v5840_v40  ;;  %2855 = vmatpush.msrb.mxu3 %v5825_v15 }
 0x50c   :  { %2915 = vmatpush.msra.mxu2 %v5839_v31  ;;  %2856 = vmatpush.msrb.mxu3 %v5824_v51 }
 0x50e   :  { %v2771_v27 = vld [vmem:[#allocation3] ss:$2 sm:$0xff]  ;;  %v2772_v37 = vld [vmem:[#allocation3 + $0x1] ss:$2 sm:$0xff]  ;;  %2916 = vmatpush.msra.mxu2 %v5838_v48 }
 0x50f   :  { %v2773_v18 = vmax.f32 %v2771_v27, %v2772_v37  ;;  %v5823_v27 = vld [vmem:[%s9412_s3 + $0x3d0] sm:$0xff] }
 0x510   :  { %v5811_v37 = vld [vmem:[%s9412_s3 + $0x370] sm:$0xff]  ;;  %2857 = vmatpush.msrb.mxu3 %v5823_v27 }
 0x511   :  { %v2775_v20 = vrot.slane %v2773_v18, 2  ;;  %2880 = vmatpush.msra.mxu1 %v5811_v37  ;;  %v5850_v37 = vld [vmem:[%s9409_s0 + $0x110] sm:$0xff] }
 0x513   :  { %v2777_v0 = vmax.f32 %v2773_v18, %v2775_v20  ;;  %v5837_v18 = vld [vmem:[%s9412_s3 + $0x430] sm:$0xff]  ;;  %v5822_v20 = vld [vmem:[%s9412_s3 + $0x3c8] sm:$0xff] }
 0x514   :  { %2917 = vmatpush.msra.mxu2 %v5837_v18  ;;  %2858 = vmatpush.msrb.mxu3 %v5822_v20  ;;  %v5851_v18 = vld [vmem:[%s9409_s0 + $0x118] sm:$0xff]  ;;  %v5852_v20 = vld [vmem:[%s9409_s0 + $0x120] sm:$0xff] }
 0x515   :  { %2779 = vst.msk [vmem:[#allocation4] sm:$0x3] %vm2778_vm2, %v2777_v0 }
 0x516   :  { %2781 = vst.msk [vmem:[#allocation4 - $0x2] sm:$0x30] %vm2780_vm3, %v2777_v0  ;;  %v5810_v0 = vld [vmem:[%s9412_s3 + $0x368] sm:$0xff] }
 0x517   :  { %2881 = vmatpush.msra.mxu1 %v5810_v0  ;;  %v5853_v0 = vld [vmem:[%s9409_s0 + $0x128] sm:$0xff] }
 0x51d   :  { %v2782_v7 = vld [vmem:[#allocation4] sm:$0xf] }
 0x51e   :  { %2801 = vrot.lane.b32.xlu0 %v2782_v7, %s6219_s16  ;;  %v2795_v21 = vmul.f32 %v7878_v10, %v2782_v7  ;;  %v2790_v55 = vmul.f32 %v7952_v33, %v2782_v7  ;;  %v5849_v7 = vld [vmem:[%s9409_s0 + $0x108] sm:$0xff] }
 0x520   :  { %v2797_v45 = vrot.slane %v2795_v21, 1  ;;  %v5836_v21 = vld [vmem:[%s9412_s3 + $0x428] sm:$0xff]  ;;  %v2792_v4 = vrot.slane %v2790_v55, 7  ;;  %v5859_v55 = vld [vmem:[%s9409_s0 + $0x158] sm:$0xff] }
 0x521   :  { %2918 = vmatpush.msra.mxu2 %v5836_v21  ;;  %v5854_v21 = vld [vmem:[%s9409_s0 + $0x130] sm:$0xff] }
 0x522   :  { %v2799_v36 = vsel %vm167_vm0, %v2797_v45, 0.0  ;;  %v5821_v45 = vld [vmem:[%s9412_s3 + $0x3c0] sm:$0xff]  ;;  %v2794_v15 = vsel %vm637_vm6, 0.0, %v2792_v4 }
 0x523   :  { %2805 = vrot.lane.b32.xlu1 %v2799_v36, %s6221_s19  ;;  %v5809_v36 = vld [vmem:[%s9412_s3 + $0x360] sm:$0xff]  ;;  %2859 = vmatpush.msrb.mxu3 %v5821_v45  ;;  %v5855_v45 = vld [vmem:[%s9409_s0 + $0x138] sm:$0xff] }
 0x524   :  { %2882 = vmatpush.msra.mxu1 %v5809_v36  ;;  %2919 = vmatpush.msra.mxu2 %v5835_v19  ;;  %v5856_v36 = vld [vmem:[%s9409_s0 + $0x140] sm:$0xff]  ;;  %v5857_v19 = vld [vmem:[%s9409_s0 + $0x148] sm:$0xff] }
 0x525   :  { %5880 = vmatpush.msk.msra.mxu3 %vm167_vm0, %v2983_v56  ;;  %v5858_v56 = vld [vmem:[%s9409_s0 + $0x150] sm:$0xff]  ;;  %v5860_v4 = vld [vmem:[%s9409_s0 + $0x160] sm:$0xff] }
 0x590   :  { %v2802_v40 = vpop.permute.xlu0 %2801 }
 0x591   :  { %v2808_v26 = vsel %vm1089_vm9, %v2794_v15, %v2802_v40  ;;  %v5861_v40 = vld [vmem:[%s9409_s0 + $0x168] sm:$0xff]  ;;  %v5862_v15 = vld [vmem:[%s9409_s0 + $0x170] sm:$0xff] }
 0x595   :  { %v2806_v31 = vpop.permute.xlu1 %2805 }
 0x596   :  { %v2809_v51 = vsel %vm1122_vm11, %v2808_v26, %v2806_v31  ;;  %v5863_v26 = vld [vmem:[%s9409_s0 + $0x178] sm:$0xff] }
 0x597   :  { %2812 = vst.msk [vmem:[#allocation2 + $0x18] sm:$0xf] %vm2625_vm12, %v2809_v51 }
 0x59e   :  { %v2827_v57 = vld [vmem:[#allocation2 + $0x18] sm:$0xf] }
 0x59f   :  { %v2813_v48 = vld [vmem:[#allocation2 + $0x16] sm:$0xf]  ;;  %v2887_v27 = vld [vmem:[#allocation2 + $0x1a] sm:$0xf]  ;;  %5833 = vmatmul.msk.f32.vlgmr.msrb.gmra.mxu3 %vm29_vm15, %v2827_v57 }
 0x5a0   :  { %5834 = vmatmul.msk.f32.vlgmr.msra.gmra.mxu1 %vm29_vm15, %v2813_v48  ;;  %5847 = vmatmul.msk.f32.vlgmr.msra.gmra.mxu2 %vm29_vm15, %v2887_v27  ;;  %v6183_v48 = vld [vmem:[%s9413_s4 + $0x3] ss:$0 sm:$0xff] }
 0x5a7   :  { %5881 = vmatmul.msk.f32.vlgmr.msra.gmra.mxu3 %vm70_vm1, %v5848_v43  ;;  %v5864_v43 = vld [vmem:[%s9409_s0 + $0x180] sm:$0xff] }
 0x5af   :  { %5882 = vmatmul.msk.f32.gmra.mxu3 %vm70_vm1, %v5849_v7 }
 0x5b7   :  { %5883 = vmatmul.msk.f32.gmra.mxu3 %vm70_vm1, %v5850_v37 }
 0x5bf   :  { %5884 = vmatmul.msk.f32.gmra.mxu3 %vm70_vm1, %v5851_v18  ;;  %v8036_v18 = vld [vmem:[%s9411_s2] ss:$0 sm:$0xff] }
 0x5c7   :  { %5885 = vmatmul.msk.f32.gmra.mxu3 %vm70_vm1, %v5852_v20 }
 0x5cf   :  { %5886 = vmatmul.msk.f32.gmra.mxu3 %vm70_vm1, %v5853_v0 }
 0x5d7   :  { %5887 = vmatmul.msk.f32.gmra.mxu3 %vm70_vm1, %v5854_v21 }
 0x5df   :  { %5888 = vmatmul.msk.f32.gmra.mxu3 %vm70_vm1, %v5855_v45  ;;  %v5865_v45 = vld [vmem:[%s9409_s0 + $0x188] sm:$0xff] }
 0x5e7   :  { %5889 = vmatmul.msk.f32.gmra.mxu3 %vm70_vm1, %v5856_v36 }
 0x5ef   :  { %5890 = vmatmul.msk.f32.gmra.mxu3 %vm70_vm1, %v5857_v19 }
 0x5f7   :  { %5891 = vmatmul.msk.f32.gmra.mxu3 %vm70_vm1, %v5858_v56 }
 0x5ff   :  { %5892 = vmatmul.msk.f32.gmra.mxu3 %vm70_vm1, %v5859_v55 }
 0x607   :  { %5893 = vmatmul.msk.f32.gmra.mxu3 %vm70_vm1, %v5860_v4 }
 0x60f   :  { %5894 = vmatmul.msk.f32.gmra.mxu3 %vm70_vm1, %v5861_v40 }
 0x617   :  { %5895 = vmatmul.msk.f32.gmra.mxu3 %vm70_vm1, %v5862_v15  ;;  %v5866_v15 = vld [vmem:[%s9409_s0 + $0x190] sm:$0xff] }
 0x61d   :  { %v2884_v31 = vpop.f32.mrf.mxu1 }
 0x61f   :  { %5896 = vmatmul.msk.f32.gmra.mxu3 %vm70_vm1, %v5863_v26 }
 0x622   :  { %v2861_v51 = vpop.f32.mrf.mxu3 }
 0x623   :  { %v2885_v57 = vadd.f32 %v2884_v31, %v2861_v51  ;;  %v2921_v27 = vpop.f32.mrf.mxu2 }
 0x625   :  { %v2924_v7 = vadd.f32 %v2921_v27, %v2885_v57 }
 0x627   :  { %v2927_v37 = vadd.f32 %v6183_v48, %v2924_v7  ;;  %5897 = vmatmul.msk.f32.gmra.mxu3 %vm70_vm1, %v5864_v43 }
 0x629   :  { %v2928_v20 = vmax.f32 %v2927_v37, 0.0 }
 0x62a   :  { %v3104_v0 = vpop.f32.mrf.mxu3 }
 0x62b   :  { %2929 = vst.msk [vmem:[#allocation3] sm:$0xf] %vm2554_vm5, %v2928_v20  ;;  %v3105_v21 = vadd.f32 %v8036_v18, %v3104_v0  ;;  %v5867_v20 = vld [vmem:[%s9409_s0 + $0x198] sm:$0xff] }
 0x62d   :  { %v8043_v36 = vmax.f32 %v3105_v21, 0.0 }
 0x62f   :  { %5898 = vmatmul.msk.f32.gmra.mxu3 %vm70_vm1, %v5865_v45  ;;  %3553 = vrot.lane.b32.xlu1 %v8043_v36, %s6219_s16  ;;  %v3296_v27 = vrot.slane %v8043_v36, 7  ;;  %v3392_v21 = vmul.f32 %v6357_v29, %v8043_v36  ;;  %v5990_v36 = vld [vmem:[%s9412_s3 + $0xc8] sm:$0xff] }
 0x632   :  { %v2930_v19 = vld [vmem:[#allocation3] ss:$2 sm:$0x3]  ;;  %v2931_v56 = vld [vmem:[#allocation3 + $0x1] ss:$2 sm:$0x3]  ;;  %v3107_v55 = vpop.f32.mrf.mxu3 }
 0x633   :  { %v2932_v4 = vmax.f32 %v2930_v19, %v2931_v56  ;;  %v3108_v40 = vadd.f32 %v8036_v18, %v3107_v55 }
 0x635   :  { %v2934_v26 = vrot.slane %v2932_v4, 1  ;;  %v3201_v31 = vmax.f32 %v3108_v40, 0.0  ;;  %v5868_v40 = vld [vmem:[%s9409_s0 + $0x1a0] sm:$0xff] }
 0x637   :  { %v2936_v51 = vmax.f32 %v2932_v4, %v2934_v26  ;;  %v3233_v57 = vmul.f32 %v6369_v35, %v3201_v31  ;;  %5899 = vmatmul.msk.f32.gmra.mxu3 %vm70_vm1, %v5866_v15  ;;  %v3457_v56 = vrot.slane %v3201_v31, 1  ;;  %v3456_v15 = vrot.slane %v3392_v21, 1 }
 0x639   :  { %v3297_v48 = vrot.slane %v3233_v57, 7  ;;  %2938 = vst.msk [vmem:[#allocation4] sm:$0x1] %vm2937_vm10, %v2936_v51  ;;  %v3458_v51 = vsel %vm798_vm4, %v3456_v15, %v3457_v56 }
 0x63a   :  { %v3110_v43 = vpop.f32.mrf.mxu3 }
 0x63b   :  { %v3111_v7 = vadd.f32 %v8036_v18, %v3110_v43  ;;  %v8060_v37 = vsel %vm637_vm6, %v3296_v27, %v3297_v48 }
 0x63d   :  { %v3202_v35 = vmax.f32 %v3111_v7, 0.0 }
 0x63f   :  { %v3299_v0 = vrot.slane %v3202_v35, 7  ;;  %5900 = vmatmul.msk.f32.gmra.mxu3 %vm70_vm1, %v5867_v20  ;;  %3557 = vrot.lane.b32.xlu2 %v3202_v35, %s6219_s16  ;;  %v3394_v4 = vmul.f32 %v6390_v49, %v3202_v35 }
 0x641   :  { %v8070_v45 = vsel %vm637_vm6, %v3297_v48, %v3299_v0  ;;  %v3459_v29 = vrot.slane %v3394_v4, 1 }
 0x642   :  { %v3113_v19 = vpop.f32.mrf.mxu3 }
 0x643   :  { %v3114_v55 = vadd.f32 %v8036_v18, %v3113_v19 }
 0x645   :  { %v3203_v26 = vmax.f32 %v3114_v55, 0.0 }
 0x647   :  { %v3235_v57 = vmul.f32 %v6408_v61, %v3203_v26  ;;  %5901 = vmatmul.msk.f32.gmra.mxu3 %vm70_vm1, %v5868_v40  ;;  %3650 = vrot.lane.b32.xlu2 %v3458_v51, %s6221_s19  ;;  %v3461_v48 = vrot.slane %v3203_v26, 1  ;;  %v5869_v61 = vld [vmem:[%s9409_s0 + $0x1a8] sm:$0xff] }
 0x649   :  { %v3301_v43 = vrot.slane %v3235_v57, 7  ;;  %v3462_v7 = vsel %vm798_vm4, %v3459_v29, %v3461_v48  ;;  %v5870_v57 = vld [vmem:[%s9409_s0 + $0x1b0] sm:$0xff] }
 0x64a   :  { %v3116_v49 = vpop.f32.mrf.mxu3  ;;  %3654 = vrot.lane.b32.xlu0 %v3462_v7, %s6221_s19 }
 0x64b   :  { %v3117_v20 = vadd.f32 %v8036_v18, %v3116_v49  ;;  %v8085_v35 = vsel %vm637_vm6, %v3299_v0, %v3301_v43  ;;  %v3460_v49 = vsel %vm798_vm4, %v3457_v56, %v3459_v29 }
 0x64d   :  { %v3204_v21 = vmax.f32 %v3117_v20, 0.0 }
 0x64f   :  { %v3303_v19 = vrot.slane %v3204_v21, 7  ;;  %5902 = vmatmul.msk.f32.gmra.mxu3 %vm70_vm1, %v5869_v61  ;;  %3555 = vrot.lane.b32.xlu2 %v3201_v31, %s6219_s16  ;;  %v3396_v55 = vmul.f32 %v6428_v9, %v3204_v21 }
 0x651   :  { %v3463_v4 = vrot.slane %v3396_v55, 1  ;;  %v8094_v40 = vsel %vm637_vm6, %v3301_v43, %v3303_v19 }
 0x652   :  { %v3119_v15 = vpop.f32.mrf.mxu3  ;;  %3559 = vrot.lane.b32.xlu0 %v3203_v26, %s6219_s16 }
 0x653   :  { %v3120_v0 = vadd.f32 %v8036_v18, %v3119_v15  ;;  %v3464_v51 = vsel %vm798_vm4, %v3461_v48, %v3463_v4 }
 0x654   :  { %3656 = vrot.lane.b32.xlu1 %v3464_v51, %s6221_s19  ;;  %v5872_v51 = vld [vmem:[%s9409_s0 + $0x1c0] sm:$0xff] }
 0x655   :  { %v3205_v31 = vmax.f32 %v3120_v0, 0.0 }
 0x657   :  { %v3237_v9 = vmul.f32 %v6446_v24, %v3205_v31  ;;  %5903 = vmatmul.msk.f32.gmra.mxu3 %vm70_vm1, %v5870_v57  ;;  %v3465_v43 = vrot.slane %v3205_v31, 1  ;;  %v5871_v24 = vld [vmem:[%s9409_s0 + $0x1b8] sm:$0xff] }
 0x658   :  { %v3887_v57 = vld [vmem:[%s9412_s3 + $0x58] sm:$0xff] }
 0x659   :  { %v3305_v7 = vrot.slane %v3237_v9, 7  ;;  %v3466_v26 = vsel %vm798_vm4, %v3463_v4, %v3465_v43  ;;  %4121 = vmatpush.msrb.mxu1 %v3887_v57 }
 0x65a   :  { %v3122_v20 = vpop.f32.mrf.mxu3  ;;  %3652 = vrot.lane.b32.xlu0 %v3460_v49, %s6221_s19  ;;  %3658 = vrot.lane.b32.xlu2 %v3466_v26, %s6221_s19  ;;  %v3885_v26 = vld [vmem:[%s9412_s3 + $0x48] sm:$0xff] }
 0x65b   :  { %v3123_v48 = vadd.f32 %v8036_v18, %v3122_v20  ;;  %v8111_v61 = vsel %vm637_vm6, %v3303_v19, %v3305_v7 }
 0x65c   :  { %3561 = vrot.lane.b32.xlu1 %v3204_v21, %s6219_s16 }
 0x65d   :  { %v3206_v55 = vmax.f32 %v3123_v48, 0.0  ;;  %v3884_v48 = vld [vmem:[%s9412_s3 + $0x40] sm:$0xff] }
 0x65f   :  { %v3307_v56 = vrot.slane %v3206_v55, 7  ;;  %5904 = vmatmul.msk.f32.gmra.mxu3 %vm70_vm1, %v5871_v24  ;;  %v3398_v29 = vmul.f32 %v6467_v41, %v3206_v55 }
 0x661   :  { %v3467_v4 = vrot.slane %v3398_v29, 1  ;;  %v8120_v15 = vsel %vm637_vm6, %v3305_v7, %v3307_v56 }
 0x662   :  { %v3125_v0 = vpop.f32.mrf.mxu3  ;;  %3563 = vrot.lane.b32.xlu0 %v3205_v31, %s6219_s16  ;;  %3565 = vrot.lane.b32.xlu2 %v3206_v55, %s6219_s16  ;;  %v5873_v55 = vld [vmem:[%s9409_s0 + $0x1c8] sm:$0xff] }
 0x663   :  { %v3126_v21 = vadd.f32 %v8036_v18, %v3125_v0  ;;  %v3468_v19 = vsel %vm798_vm4, %v3465_v43, %v3467_v4  ;;  %v3886_v43 = vld [vmem:[%s9412_s3 + $0x50] sm:$0xff] }
 0x664   :  { %3660 = vrot.lane.b32.xlu1 %v3468_v19, %s6221_s19  ;;  %4122 = vmatpush.msrb.mxu1 %v3886_v43  ;;  %v3881_v19 = vld [vmem:[%s9412_s3 + $0x28] sm:$0xff]  ;;  %v3880_v43 = vld [vmem:[%s9412_s3 + $0x20] sm:$0xff] }
 0x665   :  { %v3207_v41 = vmax.f32 %v3126_v21, 0.0 }
 0x666   :  { %4123 = vmatpush.msrb.mxu1 %v3885_v26  ;;  %v5924_v26 = vld [vmem:[%s9412_s3 + $0xb8] sm:$0xff] }
 0x667   :  { %v3239_v31 = vmul.f32 %v6483_v59, %v3207_v41  ;;  %5905 = vmatmul.msk.f32.gmra.mxu3 %vm70_vm1, %v5872_v51  ;;  %v3469_v9 = vrot.slane %v3207_v41, 1  ;;  %4002 = vmatpush.msrb.mxu0 %v5924_v26  ;;  %v5920_v26 = vld [vmem:[%s9412_s3 + $0x98] sm:$0xff] }
 0x668   :  { %4124 = vmatpush.msrb.mxu1 %v3884_v48  ;;  %v5923_v48 = vld [vmem:[%s9412_s3 + $0xb0] sm:$0xff] }
 0x669   :  { %v3309_v7 = vrot.slane %v3239_v31, 7  ;;  %v3470_v49 = vsel %vm798_vm4, %v3467_v4, %v3469_v9  ;;  %v3883_v4 = vld [vmem:[%s9412_s3 + $0x38] sm:$0xff]  ;;  %4003 = vmatpush.msrb.mxu0 %v5923_v48 }
 0x66a   :  { %v3128_v20 = vpop.f32.mrf.mxu3  ;;  %3662 = vrot.lane.b32.xlu0 %v3470_v49, %s6221_s19  ;;  %4125 = vmatpush.msrb.mxu1 %v3883_v4  ;;  %v5874_v49 = vld [vmem:[%s9409_s0 + $0x1d0] sm:$0xff] }
 0x66b   :  { %v3129_v59 = vadd.f32 %v8036_v18, %v3128_v20  ;;  %v8148_v24 = vsel %vm637_vm6, %v3307_v56, %v3309_v7  ;;  %v3882_v56 = vld [vmem:[%s9412_s3 + $0x30] sm:$0xff] }
 0x66c   :  { %3567 = vrot.lane.b32.xlu1 %v3207_v41, %s6219_s16  ;;  %4126 = vmatpush.msrb.mxu1 %v3882_v56 }
 0x66d   :  { %v3208_v29 = vmax.f32 %v3129_v59, 0.0 }
 0x66e   :  { %4127 = vmatpush.msrb.mxu1 %v3881_v19 }
 0x66f   :  { %v3311_v0 = vrot.slane %v3208_v29, 7  ;;  %5906 = vmatmul.msk.f32.gmra.mxu3 %vm70_vm1, %v5873_v55  ;;  %v3400_v21 = vmul.f32 %v6500_v11, %v3208_v29  ;;  %v3878_v55 = vld [vmem:[%s9412_s3 + $0x10] sm:$0xff] }
 0x670   :  { %4128 = vmatpush.msrb.mxu1 %v3880_v43  ;;  %v3844_v43 = vld [vmem:[#allocation2 + $0x8] sm:$0xff] }
 0x671   :  { %v3471_v51 = vrot.slane %v3400_v21, 1  ;;  %v8166_v41 = vsel %vm637_vm6, %v3309_v7, %v3311_v0  ;;  %v3877_v21 = vld [vmem:[%s9412_s3 + $0x8] sm:$0xff] }
 0x672   :  { %v3131_v57 = vpop.f32.mrf.mxu3  ;;  %3569 = vrot.lane.b32.xlu0 %v3208_v29, %s6219_s16 }
 0x673   :  { %v3132_v31 = vadd.f32 %v8036_v18, %v3131_v57  ;;  %v3472_v11 = vsel %vm798_vm4, %v3469_v9, %v3471_v51  ;;  %v3879_v9 = vld [vmem:[%s9412_s3 + $0x18] sm:$0xff]  ;;  %v5921_v57 = vld [vmem:[%s9412_s3 + $0xa0] sm:$0xff] }
 0x674   :  { %3664 = vrot.lane.b32.xlu2 %v3472_v11, %s6221_s19  ;;  %4129 = vmatpush.msrb.mxu1 %v3879_v9  ;;  %v5875_v11 = vld [vmem:[%s9409_s0 + $0x1d8] sm:$0xff] }
 0x675   :  { %v3209_v7 = vmax.f32 %v3132_v31, 0.0 }
 0x676   :  { %4130 = vmatpush.msrb.mxu1 %v3878_v55 }
 0x677   :  { %v3241_v20 = vmul.f32 %v6524_v38, %v3209_v7  ;;  %5907 = vmatmul.msk.f32.gmra.mxu3 %vm70_vm1, %v5874_v49  ;;  %v3473_v59 = vrot.slane %v3209_v7, 1  ;;  %v5922_v38 = vld [vmem:[%s9412_s3 + $0xa8] sm:$0xff] }
 0x678   :  { %4004 = vmatpush.msrb.mxu0 %v5922_v38  ;;  %4131 = vmatpush.msrb.mxu1 %v3877_v21  ;;  %v5917_v21 = vld [vmem:[%s9412_s3 + $0x80] sm:$0xff] }
 0x679   :  { %v3313_v29 = vrot.slane %v3241_v20, 7  ;;  %v3474_v4 = vsel %vm798_vm4, %v3471_v51, %v3473_v59  ;;  %v3876_v51 = vld [vmem:[%s9412_s3] sm:$0xff]  ;;  %v5918_v20 = vld [vmem:[%s9412_s3 + $0x88] sm:$0xff] }
 0x67a   :  { %v3134_v56 = vpop.f32.mrf.mxu3  ;;  %3666 = vrot.lane.b32.xlu1 %v3474_v4, %s6221_s19  ;;  %4005 = vmatpush.msrb.mxu0 %v5921_v57  ;;  %v5916_v57 = vld [vmem:[%s9412_s3 + $0x78] sm:$0xff] }
 0x67b   :  { %v3135_v19 = vadd.f32 %v8036_v18, %v3134_v56  ;;  %v8208_v31 = vsel %vm637_vm6, %v3311_v0, %v3313_v29  ;;  %4132 = vmatpush.msrb.mxu1 %v3876_v51  ;;  %v5876_v56 = vld [vmem:[%s9409_s0 + $0x1e0] sm:$0xff] }
 0x67c   :  { %3571 = vrot.lane.b32.xlu2 %v3209_v7, %s6219_s16  ;;  %5957 = vmatmul.msk.f32.vlgmr.msrb.gmra.mxu1 %vm29_vm15, %v3844_v43  ;;  %v5919_v7 = vld [vmem:[%s9412_s3 + $0x90] sm:$0xff] }
 0x67d   :  { %v3210_v49 = vmax.f32 %v3135_v19, 0.0  ;;  %4006 = vmatpush.msrb.mxu0 %v5920_v26  ;;  %v5914_v26 = vld [vmem:[%s9412_s3 + $0x68] sm:$0xff] }
 0x67f   :  { %v3315_v9 = vrot.slane %v3210_v49, 7  ;;  %5908 = vmatmul.msk.f32.gmra.mxu3 %vm70_vm1, %v5875_v11  ;;  %v3402_v0 = vmul.f32 %v6553_v1, %v3210_v49  ;;  %4007 = vmatpush.msrb.mxu0 %v5919_v7  ;;  %v5915_v11 = vld [vmem:[%s9412_s3 + $0x70] sm:$0xff]  ;;  %v5913_v7 = vld [vmem:[%s9412_s3 + $0x60] sm:$0xff] }
 0x681   :  { %v3475_v48 = vrot.slane %v3402_v0, 1  ;;  %v8227_v55 = vsel %vm637_vm6, %v3313_v29, %v3315_v9  ;;  %4008 = vmatpush.msrb.mxu0 %v5918_v20  ;;  %v3845_v29 = vld [vmem:[#allocation2 + $0x10] sm:$0xff] }
 0x682   :  { %v3137_v4 = vpop.f32.mrf.mxu3  ;;  %3573 = vrot.lane.b32.xlu1 %v3210_v49, %s6219_s16 }
 0x683   :  { %v3138_v38 = vadd.f32 %v8036_v18, %v3137_v4  ;;  %v3476_v1 = vsel %vm798_vm4, %v3473_v59, %v3475_v48  ;;  %4009 = vmatpush.msrb.mxu0 %v5917_v21  ;;  %v6000_v21 = vld [vmem:[%s9412_s3 + $0x118] sm:$0xff] }
 0x684   :  { %3668 = vrot.lane.b32.xlu0 %v3476_v1, %s6221_s19  ;;  %5958 = vmatmul.msk.f32.gmra.mxu1 %vm29_vm15, %v3845_v29 }
 0x685   :  { %v3211_v19 = vmax.f32 %v3138_v38, 0.0  ;;  %4010 = vmatpush.msrb.mxu0 %v5916_v57  ;;  %4374 = vmatpush.msrb.mxu2 %v6000_v21  ;;  %v5994_v21 = vld [vmem:[%s9412_s3 + $0xe8] sm:$0xff] }
 0x687   :  { %v3243_v59 = vmul.f32 %v6603_v42, %v3211_v19  ;;  %5909 = vmatmul.msk.f32.gmra.mxu3 %vm70_vm1, %v5876_v56  ;;  %v3477_v51 = vrot.slane %v3211_v19, 1  ;;  %4011 = vmatpush.msrb.mxu0 %v5915_v11  ;;  %v5878_v11 = vld [vmem:[%s9409_s0 + $0x1f0] sm:$0xff] }
 0x689   :  { %v3317_v43 = vrot.slane %v3243_v59, 7  ;;  %v3478_v49 = vsel %vm798_vm4, %v3475_v48, %v3477_v51  ;;  %4012 = vmatpush.msrb.mxu0 %v5914_v26  ;;  %v5877_v48 = vld [vmem:[%s9409_s0 + $0x1e8] sm:$0xff] }
 0x68a   :  { %v3140_v0 = vpop.f32.mrf.mxu3  ;;  %3670 = vrot.lane.b32.xlu2 %v3478_v49, %s6221_s19  ;;  %v5998_v59 = vld [vmem:[%s9412_s3 + $0x108] sm:$0xff]  ;;  %v5997_v49 = vld [vmem:[%s9412_s3 + $0x100] sm:$0xff] }
 0x68b   :  { %v3141_v42 = vadd.f32 %v8036_v18, %v3140_v0  ;;  %v8258_v20 = vsel %vm637_vm6, %v3315_v9, %v3317_v43  ;;  %4013 = vmatpush.msrb.mxu0 %v5913_v7  ;;  %v5999_v9 = vld [vmem:[%s9412_s3 + $0x110] sm:$0xff]  ;;  %v5996_v0 = vld [vmem:[%s9412_s3 + $0xf8] sm:$0xff] }
 0x68c   :  { %3575 = vrot.lane.b32.xlu0 %v3211_v19, %s6219_s16  ;;  %4375 = vmatpush.msrb.mxu2 %v5999_v9 }
 0x68d   :  { %v3212_v4 = vmax.f32 %v3141_v42, 0.0 }
 0x68e   :  { %4376 = vmatpush.msrb.mxu2 %v5998_v59 }
 0x68f   :  { %v3319_v38 = vrot.slane %v3212_v4, 7  ;;  %5910 = vmatmul.msk.f32.gmra.mxu3 %vm70_vm1, %v5877_v48  ;;  %v3404_v1 = vmul.f32 %v6636_v13, %v3212_v4 }
 0x690   :  { %4377 = vmatpush.msrb.mxu2 %v5997_v49  ;;  %v3391_v49 = vsel %vm637_vm6, 0.0, %v3296_v27 }
 0x691   :  { %v3479_v56 = vrot.slane %v3404_v1, 1  ;;  %v8273_v29 = vsel %vm637_vm6, %v3317_v43, %v3319_v38 }
 0x692   :  { %v3143_v19 = vpop.f32.mrf.mxu3  ;;  %3577 = vrot.lane.b32.xlu2 %v3212_v4, %s6219_s16  ;;  %4378 = vmatpush.msrb.mxu2 %v5996_v0  ;;  %v5995_v4 = vld [vmem:[%s9412_s3 + $0xf0] sm:$0xff] }
 0x693   :  { %v3144_v57 = vadd.f32 %v8036_v18, %v3143_v19  ;;  %v3480_v13 = vsel %vm798_vm4, %v3477_v51, %v3479_v56 }
 0x694   :  { %3672 = vrot.lane.b32.xlu1 %v3480_v13, %s6221_s19  ;;  %4379 = vmatpush.msrb.mxu2 %v5995_v4 }
 0x695   :  { %v3213_v43 = vmax.f32 %v3144_v57, 0.0  ;;  %v5993_v57 = vld [vmem:[%s9412_s3 + $0xe0] sm:$0xff] }
 0x696   :  { %4380 = vmatpush.msrb.mxu2 %v5994_v21 }
 0x697   :  { %v3245_v26 = vmul.f32 %v6673_v58, %v3213_v43  ;;  %5911 = vmatmul.msk.f32.gmra.mxu3 %vm70_vm1, %v5878_v11  ;;  %v3481_v51 = vrot.slane %v3213_v43, 1  ;;  %v5991_v11 = vld [vmem:[%s9412_s3 + $0xd0] sm:$0xff] }
 0x698   :  { %4381 = vmatpush.msrb.mxu2 %v5993_v57 }
 0x699   :  { %v3321_v42 = vrot.slane %v3245_v26, 7  ;;  %v8293_v7 = vpop.permute.xlu2 %3557  ;;  %v3482_v48 = vsel %vm798_vm4, %v3479_v56, %v3481_v51  ;;  %v5879_v56 = vld [vmem:[%s9409_s0 + $0x1f8] sm:$0xff] }
 0x69a   :  { %v3146_v1 = vpop.f32.mrf.mxu3  ;;  %3674 = vrot.lane.b32.xlu0 %v3482_v48, %s6221_s19 }
 0x69b   :  { %v3147_v58 = vadd.f32 %v8036_v18, %v3146_v1  ;;  %v8305_v9 = vsel %vm637_vm6, %v3319_v38, %v3321_v42  ;;  %v5992_v38 = vld [vmem:[%s9412_s3 + $0xd8] sm:$0xff] }
 0x69c   :  { %3579 = vrot.lane.b32.xlu1 %v3213_v43, %s6219_s16  ;;  %4382 = vmatpush.msrb.mxu2 %v5992_v38 }
 0x69d   :  { %v3214_v19 = vmax.f32 %v3147_v58, 0.0 }
 0x69e   :  { %4383 = vmatpush.msrb.mxu2 %v5991_v11 }
 0x69f   :  { %v3323_v13 = vrot.slane %v3214_v19, 7  ;;  %5912 = vmatmul.msk.f32.gmra.mxu3 %vm70_vm1, %v5879_v56  ;;  %v3406_v59 = vmul.f32 %v6705_v34, %v3214_v19  ;;  %vm5482_vm1 = vcmask 8200  }
 0x6a0   :  { %4384 = vmatpush.msrb.mxu2 %v5990_v36 }
 0x6a1   :  { %v3554_v43 = vpop.permute.xlu1 %3553  ;;  %v3651_v26 = vpop.permute.xlu2 %3650  ;;  %v3483_v0 = vrot.slane %v3406_v59, 1  ;;  %v8326_v48 = vsel %vm637_vm6, %v3321_v42, %v3323_v13  ;;  %v5989_v42 = vld [vmem:[%s9412_s3 + $0xc0] sm:$0xff] }
 0x6a2   :  { %v3746_v34 = vsel %vm1089_vm9, %v3391_v49, %v3554_v43  ;;  %v3149_v4 = vpop.f32.mrf.mxu3  ;;  %3581 = vrot.lane.b32.xlu0 %v3214_v19, %s6219_s16  ;;  %4385 = vmatpush.msrb.mxu2 %v5989_v42 }
 0x6a3   :  { %v3778_v1 = vsel %vm1122_vm11, %v3746_v34, %v3651_v26  ;;  %v3150_v58 = vadd.f32 %v8036_v18, %v3149_v4  ;;  %v3484_v21 = vsel %vm798_vm4, %v3481_v51, %v3483_v0 }
 0x6a4   :  { %3812 = vst.msk [vmem:[#allocation2 + $0x18] sm:$0xff] %vm29_vm15, %v3778_v1  ;;  %3676 = vrot.lane.b32.xlu2 %v3484_v21, %s6221_s19 }
 0x6a5   :  { %v3215_v27 = vmax.f32 %v3150_v58, 0.0 }
 0x6a7   :  { %v3247_v56 = vmul.f32 %v6732_v14, %v3215_v27  ;;  %v3485_v19 = vrot.slane %v3215_v27, 1 }
 0x6a9   :  { %v3325_v57 = vrot.slane %v3247_v56, 7  ;;  %v3486_v51 = vsel %vm798_vm4, %v3483_v0, %v3485_v19 }
 0x6aa   :  { %v3152_v59 = vpop.f32.mrf.mxu3  ;;  %3678 = vrot.lane.b32.xlu1 %v3486_v51, %s6221_s19 }
 0x6ab   :  { %v3153_v38 = vadd.f32 %v8036_v18, %v3152_v59  ;;  %v3846_v11 = vld [vmem:[#allocation2 + $0x18] sm:$0xff]  ;;  %v8346_v43 = vsel %vm637_vm6, %v3323_v13, %v3325_v57 }
 0x6ac   :  { %3583 = vrot.lane.b32.xlu2 %v3215_v27, %s6219_s16  ;;  %5925 = vmatmul.msk.f32.vlgmr.msrb.gmra.mxu0 %vm29_vm15, %v3846_v11 }
 0x6ad   :  { %v3216_v49 = vmax.f32 %v3153_v38, 0.0  ;;  %5959 = vmatmul.msk.f32.gmra.mxu1 %vm29_vm15, %v3846_v11 }
 0x6af   :  { %v3327_v14 = vrot.slane %v3216_v49, 7  ;;  %v3408_v26 = vmul.f32 %v6753_v62, %v3216_v49 }
 0x6b1   :  { %v3487_v0 = vrot.slane %v3408_v26, 1  ;;  %v8353_v34 = vsel %vm637_vm6, %v3325_v57, %v3327_v14 }
 0x6b2   :  { %v3155_v4 = vpop.f32.mrf.mxu3  ;;  %3585 = vrot.lane.b32.xlu1 %v3216_v49, %s6219_s16 }
 0x6b3   :  { %v3156_v13 = vadd.f32 %v8036_v18, %v3155_v4  ;;  %v3488_v1 = vsel %vm798_vm4, %v3485_v19, %v3487_v0  ;;  %v3748_v19 = vsel %vm1089_vm9, %v8070_v45, %v8293_v7  ;;  %v3556_v4 = vpop.permute.xlu2 %3555 }
 0x6b4   :  { %3680 = vrot.lane.b32.xlu0 %v3488_v1, %s6221_s19 }
 0x6b5   :  { %v3217_v58 = vmax.f32 %v3156_v13, 0.0 }
 0x6b7   :  { %v3249_v21 = vmul.f32 %v6770_v39, %v3217_v58  ;;  %v3489_v36 = vrot.slane %v3217_v58, 1 }
 0x6b9   :  { %v3329_v27 = vrot.slane %v3249_v21, 7  ;;  %v3490_v62 = vsel %vm798_vm4, %v3487_v0, %v3489_v36  ;;  %v9456_v21 = vld [vmem:[#allocation9_spill] sm:$0xff] }
 0x6ba   :  { %v3158_v42 = vpop.f32.mrf.mxu3  ;;  %3682 = vrot.lane.b32.xlu2 %v3490_v62, %s6221_s19 }
 0x6bb   :  { %v3159_v56 = vadd.f32 %v8036_v18, %v3158_v42  ;;  %v8364_v57 = vsel %vm637_vm6, %v3327_v14, %v3329_v27 }
 0x6bc   :  { %v3655_v51 = vpop.permute.xlu0 %3654  ;;  %3587 = vrot.lane.b32.xlu0 %v3217_v58, %s6219_s16 }
 0x6bd   :  { %v3218_v39 = vmax.f32 %v3159_v56, 0.0  ;;  %v3780_v59 = vsel %vm1122_vm11, %v3748_v19, %v3655_v51 }
 0x6be   :  { %3814 = vst.msk [vmem:[#allocation2 + $0x28] sm:$0xff] %vm29_vm15, %v3780_v59 }
 0x6bf   :  { %v3331_v38 = vrot.slane %v3218_v39, 7  ;;  %v3410_v11 = vmul.f32 %v6787_v6, %v3218_v39 }
 0x6c1   :  { %v3491_v49 = vrot.slane %v3410_v11, 1  ;;  %v8374_v26 = vsel %vm637_vm6, %v3329_v27, %v3331_v38  ;;  %v3659_v11 = vpop.permute.xlu2 %3658 }
 0x6c2   :  { %v3161_v14 = vpop.f32.mrf.mxu3  ;;  %3589 = vrot.lane.b32.xlu2 %v3218_v39, %s6219_s16  ;;  %v3747_v39 = vsel %vm1089_vm9, %v8060_v37, %v3556_v4 }
 0x6c3   :  { %v3162_v45 = vadd.f32 %v8036_v18, %v3161_v14  ;;  %v3492_v7 = vsel %vm798_vm4, %v3489_v36, %v3491_v49 }
 0x6c4   :  { %v3560_v0 = vpop.permute.xlu0 %3559  ;;  %3684 = vrot.lane.b32.xlu1 %v3492_v7, %s6221_s19 }
 0x6c5   :  { %v3219_v13 = vmax.f32 %v3162_v45, 0.0  ;;  %v3749_v1 = vsel %vm1089_vm9, %v8085_v35, %v3560_v0  ;;  %v8382_v6 = vld [vmem:[#allocation2 + $0x28] sm:$0xff]  ;;  %v9457_v0 = vld [vmem:[#allocation10_spill] sm:$0xff] }
 0x6c6   :  { %6001 = vmatmul.msk.f32.vlgmr.msrb.gmra.mxu2 %vm29_vm15, %v8382_v6  ;;  %v3657_v58 = vpop.permute.xlu1 %3656 }
 0x6c7   :  { %v3251_v27 = vmul.f32 %v9456_v21, %v3219_v13  ;;  %v3493_v62 = vrot.slane %v3219_v13, 1  ;;  %v3781_v42 = vsel %vm1122_vm11, %v3749_v1, %v3657_v58 }
 0x6c8   :  { %3815 = vst.msk [vmem:[#allocation2 + $0x30] sm:$0xff] %vm29_vm15, %v3781_v42 }
 0x6c9   :  { %v3333_v36 = vrot.slane %v3251_v27, 7  ;;  %v3494_v56 = vsel %vm798_vm4, %v3491_v49, %v3493_v62 }
 0x6ca   :  { %v3164_v19 = vpop.f32.mrf.mxu3  ;;  %3686 = vrot.lane.b32.xlu0 %v3494_v56, %s6221_s19 }
 0x6cb   :  { %v3165_v35 = vadd.f32 %v8036_v18, %v3164_v19  ;;  %v8393_v51 = vsel %vm637_vm6, %v3331_v38, %v3333_v36 }
 0x6cc   :  { %v3653_v59 = vpop.permute.xlu0 %3652  ;;  %3591 = vrot.lane.b32.xlu1 %v3219_v13, %s6219_s16 }
 0x6cd   :  { %v3220_v14 = vmax.f32 %v3165_v35, 0.0  ;;  %v3779_v45 = vsel %vm1122_vm11, %v3747_v39, %v3653_v59  ;;  %v9458_v59 = vld [vmem:[#allocation11_spill] sm:$0xff] }
 0x6ce   :  { %3813 = vst.msk [vmem:[#allocation2 + $0x20] sm:$0xff] %vm29_vm15, %v3779_v45  ;;  %v3562_v49 = vpop.permute.xlu1 %3561 }
 0x6cf   :  { %v3335_v7 = vrot.slane %v3220_v14, 7  ;;  %v3412_v1 = vmul.f32 %v9457_v0, %v3220_v14  ;;  %v3750_v38 = vsel %vm1089_vm9, %v8094_v40, %v3562_v49  ;;  %v4231_v58 = vld [vmem:[#allocation2 + $0x30] sm:$0xff] }
 0x6d0   :  { %v3782_v21 = vsel %vm1122_vm11, %v3750_v38, %v3659_v11  ;;  %6002 = vmatmul.msk.f32.gmra.mxu2 %vm29_vm15, %v4231_v58 }
 0x6d1   :  { %v3495_v37 = vrot.slane %v3412_v1, 1  ;;  %3816 = vst.msk [vmem:[#allocation2 + $0x38] sm:$0xff] %vm29_vm15, %v3782_v21  ;;  %v8407_v4 = vsel %vm637_vm6, %v3333_v36, %v3335_v7  ;;  %v3566_v36 = vpop.permute.xlu2 %3565 }
 0x6d2   :  { %v3167_v13 = vpop.f32.mrf.mxu3  ;;  %3593 = vrot.lane.b32.xlu0 %v3220_v14, %s6219_s16  ;;  %v3752_v21 = vsel %vm1089_vm9, %v8120_v15, %v3566_v36 }
 0x6d3   :  { %v3168_v27 = vadd.f32 %v8036_v18, %v3167_v13  ;;  %v3496_v42 = vsel %vm798_vm4, %v3493_v62, %v3495_v37 }
 0x6d4   :  { %v3564_v56 = vpop.permute.xlu0 %3563  ;;  %3688 = vrot.lane.b32.xlu2 %v3496_v42, %s6221_s19 }
 0x6d5   :  { %v3221_v40 = vmax.f32 %v3168_v27, 0.0  ;;  %v3751_v19 = vsel %vm1089_vm9, %v8111_v61, %v3564_v56  ;;  %v3847_v35 = vld [vmem:[#allocation2 + $0x20] sm:$0xff] }
 0x6d6   :  { %v3661_v39 = vpop.permute.xlu1 %3660  ;;  %5926 = vmatmul.msk.f32.gmra.mxu0 %vm29_vm15, %v3847_v35  ;;  %5960 = vmatmul.msk.f32.gmra.mxu1 %vm29_vm15, %v3847_v35 }
 0x6d7   :  { %v3253_v11 = vmul.f32 %v9458_v59, %v3221_v40  ;;  %v3497_v14 = vrot.slane %v3221_v40, 1  ;;  %v3783_v45 = vsel %vm1122_vm11, %v3751_v19, %v3661_v39  ;;  %v9459_v19 = vld [vmem:[#allocation12_spill] sm:$0xff] }
 0x6d8   :  { %3817 = vst.msk [vmem:[#allocation2 + $0x40] sm:$0xff] %vm29_vm15, %v3783_v45  ;;  %v4232_v62 = vld [vmem:[#allocation2 + $0x38] sm:$0xff] }
 0x6d9   :  { %v3337_v49 = vrot.slane %v3253_v11, 7  ;;  %6003 = vmatmul.msk.f32.gmra.mxu2 %vm29_vm15, %v4232_v62  ;;  %v3498_v61 = vsel %vm798_vm4, %v3495_v37, %v3497_v14 }
 0x6da   :  { %v3170_v0 = vpop.f32.mrf.mxu3  ;;  %3690 = vrot.lane.b32.xlu1 %v3498_v61, %s6221_s19  ;;  %v9460_v61 = vld [vmem:[#allocation13_spill] sm:$0xff] }
 0x6db   :  { %v3171_v1 = vadd.f32 %v8036_v18, %v3170_v0  ;;  %v8425_v38 = vsel %vm637_vm6, %v3335_v7, %v3337_v49  ;;  %v3665_v7 = vpop.permute.xlu2 %3664 }
 0x6dc   :  { %v3663_v13 = vpop.permute.xlu0 %3662  ;;  %3595 = vrot.lane.b32.xlu2 %v3221_v40, %s6219_s16 }
 0x6dd   :  { %v3222_v27 = vmax.f32 %v3171_v1, 0.0  ;;  %v3784_v42 = vsel %vm1122_vm11, %v3752_v21, %v3663_v13 }
 0x6de   :  { %3818 = vst.msk [vmem:[#allocation2 + $0x48] sm:$0xff] %vm29_vm15, %v3784_v42  ;;  %v3568_v37 = vpop.permute.xlu1 %3567  ;;  %5927 = vmatmul.msk.f32.gmra.mxu0 %vm29_vm15, %v8382_v6  ;;  %5961 = vmatmul.msk.f32.gmra.mxu1 %vm29_vm15, %v8382_v6 }
 0x6df   :  { %v3339_v56 = vrot.slane %v3222_v27, 7  ;;  %v3414_v35 = vmul.f32 %v9459_v19, %v3222_v27  ;;  %v3753_v15 = vsel %vm1089_vm9, %v8148_v24, %v3568_v37  ;;  %v4233_v40 = vld [vmem:[#allocation2 + $0x40] sm:$0xff] }
 0x6e0   :  { %v3785_v39 = vsel %vm1122_vm11, %v3753_v15, %v3665_v7 }
 0x6e1   :  { %v3499_v36 = vrot.slane %v3414_v35, 1  ;;  %3819 = vst.msk [vmem:[#allocation2 + $0x50] sm:$0xff] %vm29_vm15, %v3785_v39  ;;  %6004 = vmatmul.msk.f32.gmra.mxu2 %vm29_vm15, %v4233_v40  ;;  %v8443_v59 = vsel %vm637_vm6, %v3337_v49, %v3339_v56 }
 0x6e2   :  { %v3173_v11 = vpop.f32.mrf.mxu3  ;;  %3597 = vrot.lane.b32.xlu1 %v3222_v27, %s6219_s16 }
 0x6e3   :  { %v3174_v6 = vadd.f32 %v8036_v18, %v3173_v11  ;;  %v3500_v45 = vsel %vm798_vm4, %v3497_v14, %v3499_v36  ;;  %v3572_v19 = vpop.permute.xlu2 %3571 }
 0x6e4   :  { %3692 = vrot.lane.b32.xlu0 %v3500_v45, %s6221_s19  ;;  %v3570_v13 = vpop.permute.xlu0 %3569 }
 0x6e5   :  { %v3223_v24 = vmax.f32 %v3174_v6, 0.0  ;;  %v4234_v21 = vld [vmem:[#allocation2 + $0x48] sm:$0xff] }
 0x6e6   :  { %5928 = vmatmul.msk.f32.gmra.mxu0 %vm29_vm15, %v4231_v58  ;;  %5962 = vmatmul.msk.f32.gmra.mxu1 %vm29_vm15, %v4231_v58  ;;  %v3754_v58 = vsel %vm1089_vm9, %v8166_v41, %v3570_v13 }
 0x6e7   :  { %v3255_v0 = vmul.f32 %v9460_v61, %v3223_v24  ;;  %v3501_v1 = vrot.slane %v3223_v24, 1 }
 0x6e8   :  { %v4235_v11 = vld [vmem:[#allocation2 + $0x50] sm:$0xff] }
 0x6e9   :  { %v3341_v49 = vrot.slane %v3255_v0, 7  ;;  %6005 = vmatmul.msk.f32.gmra.mxu2 %vm29_vm15, %v4234_v21  ;;  %v3502_v27 = vsel %vm798_vm4, %v3499_v36, %v3501_v1  ;;  %v9461_v36 = vld [vmem:[#allocation14_spill] sm:$0xff] }
 0x6ea   :  { %v3176_v42 = vpop.f32.mrf.mxu3  ;;  %3694 = vrot.lane.b32.xlu2 %v3502_v27, %s6221_s19 }
 0x6eb   :  { %v3177_v14 = vadd.f32 %v8036_v18, %v3176_v42  ;;  %v8457_v37 = vsel %vm637_vm6, %v3339_v56, %v3341_v49  ;;  %v3671_v0 = vpop.permute.xlu2 %3670 }
 0x6ec   :  { %3599 = vrot.lane.b32.xlu0 %v3223_v24, %s6219_s16  ;;  %v3667_v7 = vpop.permute.xlu1 %3666 }
 0x6ed   :  { %v3224_v35 = vmax.f32 %v3177_v14, 0.0  ;;  %v3786_v15 = vsel %vm1122_vm11, %v3754_v58, %v3667_v7 }
 0x6ee   :  { %3820 = vst.msk [vmem:[#allocation2 + $0x58] sm:$0xff] %vm29_vm15, %v3786_v15  ;;  %5929 = vmatmul.msk.f32.gmra.mxu0 %vm29_vm15, %v4232_v62  ;;  %5963 = vmatmul.msk.f32.gmra.mxu1 %vm29_vm15, %v4232_v62 }
 0x6ef   :  { %v3343_v39 = vrot.slane %v3224_v35, 7  ;;  %v3416_v56 = vmul.f32 %v9461_v36, %v3224_v35 }
 0x6f1   :  { %v3503_v6 = vrot.slane %v3416_v56, 1  ;;  %6006 = vmatmul.msk.f32.gmra.mxu2 %vm29_vm15, %v4235_v11  ;;  %v8469_v41 = vsel %vm637_vm6, %v3341_v49, %v3343_v39  ;;  %v3755_v49 = vsel %vm1089_vm9, %v8208_v31, %v3572_v19  ;;  %v9462_v56 = vld [vmem:[#allocation15_spill] sm:$0xff] }
 0x6f2   :  { %v3179_v45 = vpop.f32.mrf.mxu3  ;;  %3601 = vrot.lane.b32.xlu2 %v3224_v35, %s6219_s16 }
 0x6f3   :  { %v3180_v24 = vadd.f32 %v8036_v18, %v3179_v45  ;;  %v3504_v61 = vsel %vm798_vm4, %v3501_v1, %v3503_v6 }
 0x6f4   :  { %3696 = vrot.lane.b32.xlu1 %v3504_v61, %s6221_s19  ;;  %v3574_v62 = vpop.permute.xlu1 %3573 }
 0x6f5   :  { %v3225_v13 = vmax.f32 %v3180_v24, 0.0  ;;  %v3756_v27 = vsel %vm1089_vm9, %v8227_v55, %v3574_v62  ;;  %v4236_v42 = vld [vmem:[#allocation2 + $0x58] sm:$0xff] }
 0x6f6   :  { %v3788_v14 = vsel %vm1122_vm11, %v3756_v27, %v3671_v0  ;;  %v3669_v58 = vpop.permute.xlu0 %3668  ;;  %5930 = vmatmul.msk.f32.gmra.mxu0 %vm29_vm15, %v4233_v40  ;;  %5964 = vmatmul.msk.f32.gmra.mxu1 %vm29_vm15, %v4233_v40  ;;  %4831 = vst.msk [vmem:[#allocation2 + $0x58] sm:$0xff] %vm29_vm15, %v9447_v54 }
 0x6f7   :  { %v3257_v1 = vmul.f32 %v6921_v17, %v3225_v13  ;;  %v3505_v7 = vrot.slane %v3225_v13, 1  ;;  %3822 = vst.msk [vmem:[#allocation2 + $0x68] sm:$0xff] %vm29_vm15, %v3788_v14  ;;  %v3787_v55 = vsel %vm1122_vm11, %v3755_v49, %v3669_v58  ;;  %v3578_v14 = vpop.permute.xlu2 %3577  ;;  %v9463_v58 = vld [vmem:[#allocation16_spill] sm:$0xff] }
 0x6f8   :  { %3821 = vst.msk [vmem:[#allocation2 + $0x60] sm:$0xff] %vm29_vm15, %v3787_v55 }
 0x6f9   :  { %v3345_v31 = vrot.slane %v3257_v1, 7  ;;  %6007 = vmatmul.msk.f32.gmra.mxu2 %vm29_vm15, %v4236_v42  ;;  %v3506_v19 = vsel %vm798_vm4, %v3503_v6, %v3505_v7 }
 0x6fa   :  { %v3182_v35 = vpop.f32.mrf.mxu3  ;;  %3698 = vrot.lane.b32.xlu0 %v3506_v19, %s6221_s19 }
 0x6fb   :  { %v3183_v40 = vadd.f32 %v8036_v18, %v3182_v35  ;;  %v8493_v15 = vsel %vm637_vm6, %v3343_v39, %v3345_v31 }
 0x6fc   :  { %3603 = vrot.lane.b32.xlu1 %v3225_v13, %s6219_s16 }
 0x6fd   :  { %v3226_v17 = vmax.f32 %v3183_v40, 0.0 }
 0x6fe   :  { %5931 = vmatmul.msk.f32.gmra.mxu0 %vm29_vm15, %v4234_v21  ;;  %5965 = vmatmul.msk.f32.gmra.mxu1 %vm29_vm15, %v4234_v21  ;;  %v3576_v39 = vpop.permute.xlu0 %3575 }
 0x6ff   :  { %v3347_v36 = vrot.slane %v3226_v17, 7  ;;  %v3418_v45 = vmul.f32 %v9462_v56, %v3226_v17  ;;  %v4237_v24 = vld [vmem:[#allocation2 + $0x60] sm:$0xff]  ;;  %v3757_v27 = vsel %vm1089_vm9, %v8258_v20, %v3576_v39 }
 0x701   :  { %v3507_v6 = vrot.slane %v3418_v45, 1  ;;  %6008 = vmatmul.msk.f32.gmra.mxu2 %vm29_vm15, %v4237_v24  ;;  %v8501_v61 = vsel %vm637_vm6, %v3345_v31, %v3347_v36 }
 0x702   :  { %v3185_v62 = vpop.f32.mrf.mxu3  ;;  %3605 = vrot.lane.b32.xlu0 %v3226_v17, %s6219_s16  ;;  %v3758_v17 = vsel %vm1089_vm9, %v8273_v29, %v3578_v14 }
 0x703   :  { %v3186_v0 = vadd.f32 %v8036_v18, %v3185_v62  ;;  %v3508_v13 = vsel %vm798_vm4, %v3505_v7, %v3507_v6  ;;  %v4238_v7 = vld [vmem:[#allocation2 + $0x68] sm:$0xff] }
 0x704   :  { %3700 = vrot.lane.b32.xlu2 %v3508_v13, %s6221_s19 }
 0x705   :  { %v3227_v21 = vmax.f32 %v3186_v0, 0.0 }
 0x706   :  { %v3673_v49 = vpop.permute.xlu1 %3672  ;;  %5932 = vmatmul.msk.f32.gmra.mxu0 %vm29_vm15, %v4235_v11  ;;  %5966 = vmatmul.msk.f32.gmra.mxu1 %vm29_vm15, %v4235_v11 }
 0x707   :  { %v3259_v1 = vmul.f32 %v9463_v58, %v3227_v21  ;;  %v3509_v55 = vrot.slane %v3227_v21, 1  ;;  %v3789_v31 = vsel %vm1122_vm11, %v3757_v27, %v3673_v49 }
 0x708   :  { %3823 = vst.msk [vmem:[#allocation2 + $0x70] sm:$0xff] %vm29_vm15, %v3789_v31 }
 0x709   :  { %v3349_v19 = vrot.slane %v3259_v1, 7  ;;  %6009 = vmatmul.msk.f32.gmra.mxu2 %vm29_vm15, %v4238_v7  ;;  %v3510_v35 = vsel %vm798_vm4, %v3507_v6, %v3509_v55 }
 0x70a   :  { %v3188_v20 = vpop.f32.mrf.mxu3  ;;  %3702 = vrot.lane.b32.xlu1 %v3510_v35, %s6221_s19 }
 0x70b   :  { %v3189_v40 = vadd.f32 %v8036_v18, %v3188_v20  ;;  %v8519_v11 = vsel %vm637_vm6, %v3347_v36, %v3349_v19  ;;  %v3677_v18 = vpop.permute.xlu2 %3676  ;;  %v9464_v36 = vld [vmem:[#allocation17_spill] sm:$0xff] }
 0x70c   :  { %v3675_v56 = vpop.permute.xlu0 %3674  ;;  %3607 = vrot.lane.b32.xlu2 %v3227_v21, %s6219_s16 }
 0x70d   :  { %v3228_v45 = vmax.f32 %v3189_v40, 0.0  ;;  %v3790_v62 = vsel %vm1122_vm11, %v3758_v17, %v3675_v56 }
 0x70e   :  { %3824 = vst.msk [vmem:[#allocation2 + $0x78] sm:$0xff] %vm29_vm15, %v3790_v62  ;;  %v3580_v6 = vpop.permute.xlu1 %3579  ;;  %5933 = vmatmul.msk.f32.gmra.mxu0 %vm29_vm15, %v4236_v42  ;;  %5967 = vmatmul.msk.f32.gmra.mxu1 %vm29_vm15, %v4236_v42  ;;  %v6191_v42 = vld [vmem:[%s9411_s2] ss:$0 sm:$0xff] }
 0x70f   :  { %v3351_v39 = vrot.slane %v3228_v45, 7  ;;  %v3420_v0 = vmul.f32 %v9464_v36, %v3228_v45  ;;  %v3759_v29 = vsel %vm1089_vm9, %v8305_v9, %v3580_v6  ;;  %v4239_v13 = vld [vmem:[#allocation2 + $0x70] sm:$0xff] }
 0x710   :  { %v3791_v21 = vsel %vm1122_vm11, %v3759_v29, %v3677_v18 }
 0x711   :  { %v3511_v27 = vrot.slane %v3420_v0, 1  ;;  %3825 = vst.msk [vmem:[#allocation2 + $0x80] sm:$0xff] %vm29_vm15, %v3791_v21  ;;  %6010 = vmatmul.msk.f32.gmra.mxu2 %vm29_vm15, %v4239_v13  ;;  %v8535_v49 = vsel %vm637_vm6, %v3349_v19, %v3351_v39 }
 0x712   :  { %v3191_v14 = vpop.f32.mrf.mxu3  ;;  %3609 = vrot.lane.b32.xlu1 %v3228_v45, %s6219_s16 }
 0x713   :  { %v3192_v58 = vadd.f32 %v6191_v42, %v3191_v14  ;;  %v3512_v9 = vsel %vm798_vm4, %v3509_v55, %v3511_v27  ;;  %v3584_v62 = vpop.permute.xlu2 %3583 }
 0x714   :  { %3704 = vrot.lane.b32.xlu0 %v3512_v9, %s6221_s19  ;;  %v3582_v40 = vpop.permute.xlu0 %3581 }
 0x715   :  { %v3229_v1 = vmax.f32 %v3192_v58, 0.0  ;;  %v4240_v35 = vld [vmem:[#allocation2 + $0x78] sm:$0xff] }
 0x716   :  { %5934 = vmatmul.msk.f32.gmra.mxu0 %vm29_vm15, %v4237_v24  ;;  %5968 = vmatmul.msk.f32.gmra.mxu1 %vm29_vm15, %v4237_v24  ;;  %v3760_v24 = vsel %vm1089_vm9, %v8326_v48, %v3582_v40 }
 0x717   :  { %v3261_v31 = vmul.f32 %v7000_v25, %v3229_v1  ;;  %v3513_v19 = vrot.slane %v3229_v1, 1 }
 0x718   :  { %v4241_v0 = vld [vmem:[#allocation2 + $0x80] sm:$0xff] }
 0x719   :  { %v3353_v20 = vrot.slane %v3261_v31, 7  ;;  %6011 = vmatmul.msk.f32.gmra.mxu2 %vm29_vm15, %v4240_v35  ;;  %v3514_v17 = vsel %vm798_vm4, %v3511_v27, %v3513_v19 }
 0x71a   :  { %v3194_v56 = vpop.f32.mrf.mxu3  ;;  %3706 = vrot.lane.b32.xlu2 %v3514_v17, %s6221_s19 }
 0x71b   :  { %v3195_v55 = vadd.f32 %v6191_v42, %v3194_v56  ;;  %v8550_v45 = vsel %vm637_vm6, %v3351_v39, %v3353_v20 }
 0x71c   :  { %3611 = vrot.lane.b32.xlu0 %v3229_v1, %s6219_s16  ;;  %v3679_v25 = vpop.permute.xlu1 %3678  ;;  %v3761_v1 = vsel %vm1089_vm9, %v8346_v43, %v3584_v62  ;;  %v4134_v62 = vpop.f32.mrf.mxu1 }
 0x71d   :  { %v3230_v6 = vmax.f32 %v3195_v55, 0.0  ;;  %v3792_v18 = vsel %vm1122_vm11, %v3760_v24, %v3679_v25 }
 0x71e   :  { %3826 = vst.msk [vmem:[#allocation2 + $0x88] sm:$0xff] %vm29_vm15, %v3792_v18  ;;  %5935 = vmatmul.msk.f32.gmra.mxu0 %vm29_vm15, %v4238_v7  ;;  %5969 = vmatmul.msk.f32.gmra.mxu1 %vm29_vm15, %v4238_v7  ;;  %v3683_v7 = vpop.permute.xlu2 %3682 }
 0x71f   :  { %v3355_v36 = vrot.slane %v3230_v6, 7  ;;  %v3422_v39 = vmul.f32 %v7024_v28, %v3230_v6 }
 0x721   :  { %v3515_v29 = vrot.slane %v3422_v39, 1  ;;  %6012 = vmatmul.msk.f32.gmra.mxu2 %vm29_vm15, %v4241_v0  ;;  %v8562_v48 = vsel %vm637_vm6, %v3353_v20, %v3355_v36 }
 0x722   :  { %v3197_v21 = vpop.f32.mrf.mxu3  ;;  %3613 = vrot.lane.b32.xlu2 %v3230_v6, %s6219_s16 }
 0x723   :  { %v3198_v27 = vadd.f32 %v6191_v42, %v3197_v21  ;;  %v3516_v14 = vsel %vm798_vm4, %v3513_v19, %v3515_v29 }
 0x724   :  { %3708 = vrot.lane.b32.xlu1 %v3516_v14, %s6221_s19  ;;  %v3586_v58 = vpop.permute.xlu1 %3585 }
 0x725   :  { %v3231_v9 = vmax.f32 %v3198_v27, 0.0  ;;  %v3762_v28 = vsel %vm1089_vm9, %v8353_v34, %v3586_v58  ;;  %v4242_v34 = vld [vmem:[#allocation2 + $0x88] sm:$0xff]  ;;  %v4137_v58 = vpop.f32.mrf.mxu1 }
 0x726   :  { %v3794_v31 = vsel %vm1122_vm11, %v3762_v28, %v3683_v7  ;;  %v3681_v20 = vpop.permute.xlu0 %3680  ;;  %5936 = vmatmul.msk.f32.gmra.mxu0 %vm29_vm15, %v4239_v13  ;;  %5970 = vmatmul.msk.f32.gmra.mxu1 %vm29_vm15, %v4239_v13  ;;  %v3590_v6 = vpop.permute.xlu2 %3589 }
 0x727   :  { %v3263_v42 = vmul.f32 %v7037_v47, %v3231_v9  ;;  %v3517_v19 = vrot.slane %v3231_v9, 1  ;;  %3828 = vst.msk [vmem:[#allocation2 + $0x98] sm:$0xff] %vm29_vm15, %v3794_v31  ;;  %v3793_v40 = vsel %vm1122_vm11, %v3761_v1, %v3681_v20 }
 0x728   :  { %3827 = vst.msk [vmem:[#allocation2 + $0x90] sm:$0xff] %vm29_vm15, %v3793_v40 }
 0x729   :  { %v3357_v17 = vrot.slane %v3263_v42, 7  ;;  %6013 = vmatmul.msk.f32.gmra.mxu2 %vm29_vm15, %v4242_v34  ;;  %v3518_v43 = vsel %vm798_vm4, %v3515_v29, %v3517_v19  ;;  %v3520_v56 = vsel %vm798_vm4, %v3517_v19, 0.0 }
 0x72a   :  { %3710 = vrot.lane.b32.xlu0 %v3518_v43, %s6221_s19  ;;  %3712 = vrot.lane.b32.xlu2 %v3520_v56, %s6221_s19 }
 0x72b   :  { %v8584_v47 = vsel %vm637_vm6, %v3355_v36, %v3357_v17 }
 0x72c   :  { %3615 = vrot.lane.b32.xlu1 %v3231_v9, %s6219_s16  ;;  %v8613_v9 = vld [vmem:[%s9413_s4] ss:$0 sm:$0xff] }
 0x72d   :  { %v4140_v20 = vpop.f32.mrf.mxu1 }
 0x72e   :  { %5937 = vmatmul.msk.f32.gmra.mxu0 %vm29_vm15, %v4240_v35  ;;  %5971 = vmatmul.msk.f32.gmra.mxu1 %vm29_vm15, %v4240_v35  ;;  %v3588_v55 = vpop.permute.xlu0 %3587  ;;  %v4244_v36 = vld [vmem:[#allocation2 + $0x98] sm:$0xff]  ;;  %v3764_v35 = vsel %vm1089_vm9, %v8374_v26, %v3590_v6  ;;  %v4015_v26 = vpop.f32.mrf.mxu0 }
 0x72f   :  { %v4243_v13 = vld [vmem:[#allocation2 + $0x90] sm:$0xff]  ;;  %v3763_v24 = vsel %vm1089_vm9, %v8364_v57, %v3588_v55  ;;  %v4135_v7 = vadd.f32 %v4134_v62, %v4015_v26 }
 0x731   :  { %6014 = vmatmul.msk.f32.gmra.mxu2 %vm29_vm15, %v4243_v13 }
 0x736   :  { %v3685_v25 = vpop.permute.xlu1 %3684  ;;  %5938 = vmatmul.msk.f32.gmra.mxu0 %vm29_vm15, %v4241_v0  ;;  %5972 = vmatmul.msk.f32.gmra.mxu1 %vm29_vm15, %v4241_v0  ;;  %v3689_v0 = vpop.permute.xlu2 %3688 }
 0x737   :  { %v3795_v18 = vsel %vm1122_vm11, %v3763_v24, %v3685_v25 }
 0x738   :  { %3829 = vst.msk [vmem:[#allocation2 + $0xa0] sm:$0xff] %vm29_vm15, %v3795_v18 }
 0x739   :  { %6015 = vmatmul.msk.f32.gmra.mxu2 %vm29_vm15, %v4244_v36 }
 0x73c   :  { %v3687_v39 = vpop.permute.xlu0 %3686 }
 0x73d   :  { %v3796_v57 = vsel %vm1122_vm11, %v3764_v35, %v3687_v39 }
 0x73e   :  { %3830 = vst.msk [vmem:[#allocation2 + $0xa8] sm:$0xff] %vm29_vm15, %v3796_v57  ;;  %v3592_v29 = vpop.permute.xlu1 %3591  ;;  %5939 = vmatmul.msk.f32.gmra.mxu0 %vm29_vm15, %v4242_v34  ;;  %5973 = vmatmul.msk.f32.gmra.mxu1 %vm29_vm15, %v4242_v34  ;;  %v3596_v34 = vpop.permute.xlu2 %3595 }
 0x73f   :  { %v3765_v21 = vsel %vm1089_vm9, %v8393_v51, %v3592_v29  ;;  %v4245_v27 = vld [vmem:[#allocation2 + $0xa0] sm:$0xff]  ;;  %v3767_v18 = vsel %vm1089_vm9, %v8425_v38, %v3596_v34 }
 0x740   :  { %v3797_v14 = vsel %vm1122_vm11, %v3765_v21, %v3689_v0 }
 0x741   :  { %3831 = vst.msk [vmem:[#allocation2 + $0xb0] sm:$0xff] %vm29_vm15, %v3797_v14  ;;  %6016 = vmatmul.msk.f32.gmra.mxu2 %vm29_vm15, %v4245_v27 }
 0x744   :  { %v3594_v28 = vpop.permute.xlu0 %3593 }
 0x745   :  { %v4246_v51 = vld [vmem:[#allocation2 + $0xa8] sm:$0xff]  ;;  %v3766_v42 = vsel %vm1089_vm9, %v8407_v4, %v3594_v28 }
 0x746   :  { %5940 = vmatmul.msk.f32.gmra.mxu0 %vm29_vm15, %v4243_v13  ;;  %5974 = vmatmul.msk.f32.gmra.mxu1 %vm29_vm15, %v4243_v13  ;;  %v3695_v62 = vpop.permute.xlu2 %3694 }
 0x748   :  { %v4247_v56 = vld [vmem:[#allocation2 + $0xb0] sm:$0xff] }
 0x749   :  { %v4387_v1 = vpop.f32.mrf.mxu2  ;;  %6017 = vmatmul.msk.f32.gmra.mxu2 %vm29_vm15, %v4246_v51 }
 0x74a   :  { %v4483_v31 = vadd.f32 %v4387_v1, %v4135_v7 }
 0x74c   :  { %v4517_v19 = vadd.f32 %v8613_v9, %v4483_v31  ;;  %v3691_v40 = vpop.permute.xlu1 %3690 }
 0x74d   :  { %v3798_v17 = vsel %vm1122_vm11, %v3766_v42, %v3691_v40 }
 0x74e   :  { %v4549_v43 = vmax.f32 %v4517_v19, 0.0  ;;  %3832 = vst.msk [vmem:[#allocation2 + $0xb8] sm:$0xff] %vm29_vm15, %v3798_v17  ;;  %5941 = vmatmul.msk.f32.gmra.mxu0 %vm29_vm15, %v4244_v36  ;;  %5975 = vmatmul.msk.f32.gmra.mxu1 %vm29_vm15, %v4244_v36 }
 0x750   :  { %4581 = vst.msk [vmem:[#allocation3] sm:$0xff] %vm1089_vm9, %v4549_v43 }
 0x751   :  { %6018 = vmatmul.msk.f32.gmra.mxu2 %vm29_vm15, %v4247_v56 }
 0x753   :  { %v4018_v13 = vpop.f32.mrf.mxu0  ;;  %v4143_v4 = vpop.f32.mrf.mxu1 }
 0x754   :  { %v4138_v55 = vadd.f32 %v4137_v58, %v4018_v13  ;;  %v4390_v24 = vpop.f32.mrf.mxu2  ;;  %v3598_v25 = vpop.permute.xlu1 %3597 }
 0x755   :  { %v3768_v6 = vsel %vm1089_vm9, %v8443_v59, %v3598_v25  ;;  %v4248_v59 = vld [vmem:[#allocation2 + $0xb8] sm:$0xff] }
 0x756   :  { %v4484_v35 = vadd.f32 %v4390_v24, %v4138_v55  ;;  %v3800_v36 = vsel %vm1122_vm11, %v3768_v6, %v3695_v62  ;;  %v3693_v39 = vpop.permute.xlu0 %3692  ;;  %5942 = vmatmul.msk.f32.gmra.mxu0 %vm29_vm15, %v4245_v27  ;;  %5976 = vmatmul.msk.f32.gmra.mxu1 %vm29_vm15, %v4245_v27 }
 0x757   :  { %3834 = vst.msk [vmem:[#allocation2 + $0xc8] sm:$0xff] %vm29_vm15, %v3800_v36  ;;  %v3799_v57 = vsel %vm1122_vm11, %v3767_v18, %v3693_v39 }
 0x758   :  { %v4518_v29 = vadd.f32 %v8613_v9, %v4484_v35  ;;  %3833 = vst.msk [vmem:[#allocation2 + $0xc0] sm:$0xff] %vm29_vm15, %v3799_v57 }
 0x759   :  { %6019 = vmatmul.msk.f32.gmra.mxu2 %vm29_vm15, %v4248_v59 }
 0x75a   :  { %v4550_v38 = vmax.f32 %v4518_v29, 0.0 }
 0x75b   :  { %v4021_v0 = vpop.f32.mrf.mxu0  ;;  %v4146_v21 = vpop.f32.mrf.mxu1 }
 0x75c   :  { %4582 = vst.msk [vmem:[#allocation3 + $0x8] sm:$0xff] %vm1089_vm9, %v4550_v38  ;;  %v4141_v14 = vadd.f32 %v4140_v20, %v4021_v0  ;;  %v4393_v58 = vpop.f32.mrf.mxu2 }
 0x75e   :  { %v4485_v26 = vadd.f32 %v4393_v58, %v4141_v14  ;;  %5943 = vmatmul.msk.f32.gmra.mxu0 %vm29_vm15, %v4246_v51  ;;  %5977 = vmatmul.msk.f32.gmra.mxu1 %vm29_vm15, %v4246_v51  ;;  %v3600_v1 = vpop.permute.xlu0 %3599  ;;  %v3602_v51 = vpop.permute.xlu2 %3601  ;;  %v4250_v55 = vld [vmem:[#allocation2 + $0xc8] sm:$0xff] }
 0x75f   :  { %v4249_v27 = vld [vmem:[#allocation2 + $0xc0] sm:$0xff]  ;;  %v3769_v20 = vsel %vm1089_vm9, %v8457_v37, %v3600_v1  ;;  %v3770_v37 = vsel %vm1089_vm9, %v8469_v41, %v3602_v51 }
 0x760   :  { %v4519_v7 = vadd.f32 %v8613_v9, %v4485_v26 }
 0x761   :  { %6020 = vmatmul.msk.f32.gmra.mxu2 %vm29_vm15, %v4249_v27 }
 0x762   :  { %v4551_v28 = vmax.f32 %v4519_v7, 0.0 }
 0x763   :  { %v4024_v31 = vpop.f32.mrf.mxu0  ;;  %v4149_v42 = vpop.f32.mrf.mxu1  ;;  %v4613_v0 = vld [vmem:[#allocation3] ss:$2 sm:$0xff] }
 0x764   :  { %4583 = vst.msk [vmem:[#allocation3 + $0x10] sm:$0xff] %vm1089_vm9, %v4551_v28  ;;  %v4144_v19 = vadd.f32 %v4143_v4, %v4024_v31  ;;  %v4396_v40 = vpop.f32.mrf.mxu2 }
 0x766   :  { %v4486_v34 = vadd.f32 %v4396_v40, %v4144_v19  ;;  %v3697_v17 = vpop.permute.xlu1 %3696  ;;  %5944 = vmatmul.msk.f32.gmra.mxu0 %vm29_vm15, %v4247_v56  ;;  %5978 = vmatmul.msk.f32.gmra.mxu1 %vm29_vm15, %v4247_v56  ;;  %v3701_v39 = vpop.permute.xlu2 %3700 }
 0x767   :  { %v3801_v43 = vsel %vm1122_vm11, %v3769_v20, %v3697_v17  ;;  %v8667_v20 = vld [vmem:[#allocation4] sm:$0x1] }
 0x768   :  { %v4520_v13 = vadd.f32 %v8613_v9, %v4486_v34  ;;  %3835 = vst.msk [vmem:[#allocation2 + $0xd0] sm:$0xff] %vm29_vm15, %v3801_v43 }
 0x769   :  { %6021 = vmatmul.msk.f32.gmra.mxu2 %vm29_vm15, %v4250_v55 }
 0x76a   :  { %v4552_v4 = vmax.f32 %v4520_v13, 0.0 }
 0x76b   :  { %v4027_v24 = vpop.f32.mrf.mxu0  ;;  %v4152_v25 = vpop.f32.mrf.mxu1 }
 0x76c   :  { %4584 = vst.msk [vmem:[#allocation3 + $0x18] sm:$0xff] %vm1089_vm9, %v4552_v4  ;;  %v4147_v62 = vadd.f32 %v4146_v21, %v4027_v24  ;;  %v3699_v56 = vpop.permute.xlu0 %3698  ;;  %v4399_v6 = vpop.f32.mrf.mxu2  ;;  %v4629_v21 = vld [vmem:[#allocation3 + $0x1] ss:$2 sm:$0xff] }
 0x76d   :  { %v3802_v18 = vsel %vm1122_vm11, %v3770_v37, %v3699_v56  ;;  %v4645_v28 = vmax.f32 %v4613_v0, %v4629_v21 }
 0x76e   :  { %3836 = vst.msk [vmem:[#allocation2 + $0xd8] sm:$0xff] %vm29_vm15, %v3802_v18  ;;  %v4487_v35 = vadd.f32 %v4399_v6, %v4147_v62  ;;  %v3604_v36 = vpop.permute.xlu1 %3603  ;;  %5945 = vmatmul.msk.f32.gmra.mxu0 %vm29_vm15, %v4248_v59  ;;  %5979 = vmatmul.msk.f32.gmra.mxu1 %vm29_vm15, %v4248_v59  ;;  %v3608_v62 = vpop.permute.xlu2 %3607 }
 0x76f   :  { %v3771_v57 = vsel %vm1089_vm9, %v8493_v15, %v3604_v36  ;;  %v4251_v41 = vld [vmem:[#allocation2 + $0xd0] sm:$0xff]  ;;  %v3773_v21 = vsel %vm1089_vm9, %v8519_v11, %v3608_v62 }
 0x770   :  { %v4521_v29 = vadd.f32 %v8613_v9, %v4487_v35  ;;  %v3803_v38 = vsel %vm1122_vm11, %v3771_v57, %v3701_v39 }
 0x771   :  { %3837 = vst.msk [vmem:[#allocation2 + $0xe0] sm:$0xff] %vm29_vm15, %v3803_v38  ;;  %6022 = vmatmul.msk.f32.gmra.mxu2 %vm29_vm15, %v4251_v41 }
 0x772   :  { %v4553_v14 = vmax.f32 %v4521_v29, 0.0 }
 0x773   :  { %v4614_v58 = vld [vmem:[#allocation3 + $0x10] ss:$2 sm:$0xff]  ;;  %v4630_v26 = vld [vmem:[#allocation3 + $0x11] ss:$2 sm:$0xff]  ;;  %v4030_v7 = vpop.f32.mrf.mxu0  ;;  %v4155_v59 = vpop.f32.mrf.mxu1 }
 0x774   :  { %v4646_v1 = vmax.f32 %v4614_v58, %v4630_v26  ;;  %4585 = vst.msk [vmem:[#allocation3 + $0x20] sm:$0xff] %vm1089_vm9, %v4553_v14  ;;  %v4150_v15 = vadd.f32 %v4149_v42, %v4030_v7  ;;  %v4402_v31 = vpop.f32.mrf.mxu2  ;;  %v3606_v51 = vpop.permute.xlu0 %3605 }
 0x775   :  { %v4252_v17 = vld [vmem:[#allocation2 + $0xd8] sm:$0xff]  ;;  %v3772_v4 = vsel %vm1089_vm9, %v8501_v61, %v3606_v51 }
 0x776   :  { %v4661_v19 = vmax.f32 %v4645_v28, %v4646_v1  ;;  %v4488_v40 = vadd.f32 %v4402_v31, %v4150_v15  ;;  %5946 = vmatmul.msk.f32.gmra.mxu0 %vm29_vm15, %v4249_v27  ;;  %5980 = vmatmul.msk.f32.gmra.mxu1 %vm29_vm15, %v4249_v27  ;;  %v3707_v0 = vpop.permute.xlu2 %3706 }
 0x778   :  { %v4522_v34 = vadd.f32 %v8613_v9, %v4488_v40  ;;  %4662 = vst.msk [vmem:[#allocation4] sm:$0xff] %vm1089_vm9, %v4661_v19  ;;  %v4253_v61 = vld [vmem:[#allocation2 + $0xe0] sm:$0xff] }
 0x779   :  { %6023 = vmatmul.msk.f32.gmra.mxu2 %vm29_vm15, %v4252_v17 }
 0x77a   :  { %v4554_v43 = vmax.f32 %v4522_v34, 0.0 }
 0x77b   :  { %v4033_v13 = vpop.f32.mrf.mxu0  ;;  %v4158_v42 = vpop.f32.mrf.mxu1 }
 0x77c   :  { %4586 = vst.msk [vmem:[#allocation3 + $0x28] sm:$0xff] %vm1089_vm9, %v4554_v43  ;;  %v4153_v24 = vadd.f32 %v4152_v25, %v4033_v13  ;;  %v3703_v27 = vpop.permute.xlu1 %3702  ;;  %v4405_v37 = vpop.f32.mrf.mxu2 }
 0x77d   :  { %v3804_v56 = vsel %vm1122_vm11, %v3772_v4, %v3703_v27 }
 0x77e   :  { %3838 = vst.msk [vmem:[#allocation2 + $0xe8] sm:$0xff] %vm29_vm15, %v3804_v56  ;;  %v4489_v6 = vadd.f32 %v4405_v37, %v4153_v24  ;;  %5947 = vmatmul.msk.f32.gmra.mxu0 %vm29_vm15, %v4250_v55  ;;  %5981 = vmatmul.msk.f32.gmra.mxu1 %vm29_vm15, %v4250_v55 }
 0x77f   :  { %v8679_v18 = vld [vmem:[#allocation4] sm:$0xff] }
 0x780   :  { %v4523_v35 = vadd.f32 %v8613_v9, %v4489_v6  ;;  %4766 = vrot.lane.b32.xlu0 %v8679_v18, %s6219_s16  ;;  %v6056_v6 = vld [vmem:[%s9412_s3 + $0x1d8] sm:$0xff] }
 0x781   :  { %6024 = vmatmul.msk.f32.gmra.mxu2 %vm29_vm15, %v4253_v61  ;;  %4901 = vmatpush.msrb.mxu3 %v6056_v6 }
 0x782   :  { %v4555_v25 = vmax.f32 %v4523_v35, 0.0 }
 0x783   :  { %v4036_v36 = vpop.f32.mrf.mxu0  ;;  %v4161_v39 = vpop.f32.mrf.mxu1  ;;  %v4615_v34 = vld [vmem:[#allocation3 + $0x20] ss:$2 sm:$0xff]  ;;  %v4631_v51 = vld [vmem:[#allocation3 + $0x21] ss:$2 sm:$0xff] }
 0x784   :  { %4587 = vst.msk [vmem:[#allocation3 + $0x30] sm:$0xff] %vm1089_vm9, %v4555_v25  ;;  %v4156_v57 = vadd.f32 %v4155_v59, %v4036_v36  ;;  %v3610_v29 = vpop.permute.xlu1 %3609  ;;  %v4408_v38 = vpop.f32.mrf.mxu2 }
 0x785   :  { %v3774_v55 = vsel %vm1089_vm9, %v8535_v49, %v3610_v29  ;;  %v4254_v49 = vld [vmem:[#allocation2 + $0xe8] sm:$0xff]  ;;  %v3614_v29 = vpop.permute.xlu2 %3613 }
 0x786   :  { %v3806_v14 = vsel %vm1122_vm11, %v3774_v55, %v3707_v0  ;;  %v4490_v58 = vadd.f32 %v4408_v38, %v4156_v57  ;;  %v3705_v26 = vpop.permute.xlu0 %3704  ;;  %5948 = vmatmul.msk.f32.gmra.mxu0 %vm29_vm15, %v4251_v41  ;;  %5982 = vmatmul.msk.f32.gmra.mxu1 %vm29_vm15, %v4251_v41 }
 0x787   :  { %3840 = vst.msk [vmem:[#allocation2 + $0xf8] sm:$0xff] %vm29_vm15, %v3806_v14  ;;  %v3805_v7 = vsel %vm1122_vm11, %v3773_v21, %v3705_v26  ;;  %v3776_v14 = vsel %vm1089_vm9, %v8562_v48, %v3614_v29 }
 0x788   :  { %v4524_v59 = vadd.f32 %v8613_v9, %v4490_v58  ;;  %3839 = vst.msk [vmem:[#allocation2 + $0xf0] sm:$0xff] %vm29_vm15, %v3805_v7  ;;  %v6044_v7 = vld [vmem:[%s9412_s3 + $0x178] sm:$0xff] }
 0x789   :  { %6025 = vmatmul.msk.f32.gmra.mxu2 %vm29_vm15, %v4254_v49  ;;  %4945 = vmatpush.msra.mxu0 %v6044_v7 }
 0x78a   :  { %v4556_v11 = vmax.f32 %v4524_v59, 0.0  ;;  %v6084_v59 = vld [vmem:[%s9412_s3 + $0x238] sm:$0xff] }
 0x78b   :  { %v4039_v28 = vpop.f32.mrf.mxu0  ;;  %v4164_v1 = vpop.f32.mrf.mxu1  ;;  %5030 = vmatpush.msra.mxu1 %v6084_v59 }
 0x78c   :  { %4588 = vst.msk [vmem:[#allocation3 + $0x38] sm:$0xff] %vm1089_vm9, %v4556_v11  ;;  %v4159_v15 = vadd.f32 %v4158_v42, %v4039_v28  ;;  %v4411_v31 = vpop.f32.mrf.mxu2 }
 0x78e   :  { %v4491_v19 = vadd.f32 %v4411_v31, %v4159_v15  ;;  %5949 = vmatmul.msk.f32.gmra.mxu0 %vm29_vm15, %v4252_v17  ;;  %5983 = vmatmul.msk.f32.gmra.mxu1 %vm29_vm15, %v4252_v17  ;;  %v3612_v13 = vpop.permute.xlu0 %3611  ;;  %v4647_v17 = vmax.f32 %v4615_v34, %v4631_v51  ;;  %v4256_v0 = vld [vmem:[#allocation2 + $0xf8] sm:$0xff] }
 0x78f   :  { %v8701_v41 = vld [vmem:[#allocation2 + $0xf0] sm:$0xff]  ;;  %v3775_v35 = vsel %vm1089_vm9, %v8550_v45, %v3612_v13 }
 0x790   :  { %v4525_v40 = vadd.f32 %v8613_v9, %v4491_v19  ;;  %v4725_v19 = vmul.f32 %v7206_v3, %v8679_v18 }
 0x791   :  { %6026 = vmatmul.msk.f32.gmra.mxu2 %vm29_vm15, %v8701_v41 }
 0x792   :  { %v4557_v43 = vmax.f32 %v4525_v40, 0.0  ;;  %v4741_v13 = vrot.slane %v4725_v19, 1 }
 0x793   :  { %v4042_v4 = vpop.f32.mrf.mxu0  ;;  %v4167_v24 = vpop.f32.mrf.mxu1  ;;  %v4616_v42 = vld [vmem:[#allocation3 + $0x30] ss:$2 sm:$0xff]  ;;  %v4632_v27 = vld [vmem:[#allocation3 + $0x31] ss:$2 sm:$0xff] }
 0x794   :  { %4589 = vst.msk [vmem:[#allocation3 + $0x40] sm:$0xff] %vm1089_vm9, %v4557_v43  ;;  %v4162_v37 = vadd.f32 %v4161_v39, %v4042_v4  ;;  %v4414_v62 = vpop.f32.mrf.mxu2  ;;  %v4648_v56 = vmax.f32 %v4616_v42, %v4632_v27 }
 0x796   :  { %v4492_v25 = vadd.f32 %v4414_v62, %v4162_v37  ;;  %v3709_v36 = vpop.permute.xlu1 %3708  ;;  %5950 = vmatmul.msk.f32.gmra.mxu0 %vm29_vm15, %v4253_v61  ;;  %5984 = vmatmul.msk.f32.gmra.mxu1 %vm29_vm15, %v4253_v61  ;;  %v4663_v57 = vmax.f32 %v4647_v17, %v4648_v56 }
 0x797   :  { %v3807_v39 = vsel %vm1122_vm11, %v3775_v35, %v3709_v36  ;;  %v6055_v36 = vld [vmem:[%s9412_s3 + $0x1d0] sm:$0xff] }
 0x798   :  { %v4526_v38 = vadd.f32 %v8613_v9, %v4492_v25  ;;  %3841 = vst.msk [vmem:[#allocation2 + $0x100] sm:$0xff] %vm29_vm15, %v3807_v39  ;;  %4902 = vmatpush.msrb.mxu3 %v6055_v36 }
 0x799   :  { %6027 = vmatmul.msk.f32.gmra.mxu2 %vm29_vm15, %v4256_v0  ;;  %4664 = vst.msk [vmem:[#allocation4 + $0x8] sm:$0xff] %vm1089_vm9, %v4663_v57 }
 0x79a   :  { %v4558_v45 = vmax.f32 %v4526_v38, 0.0 }
 0x79b   :  { %v4045_v55 = vpop.f32.mrf.mxu0  ;;  %v4170_v21 = vpop.f32.mrf.mxu1 }
 0x79c   :  { %4590 = vst.msk [vmem:[#allocation3 + $0x48] sm:$0xff] %vm1089_vm9, %v4558_v45  ;;  %v4165_v61 = vadd.f32 %v4164_v1, %v4045_v55  ;;  %v3711_v58 = vpop.permute.xlu0 %3710  ;;  %v4417_v26 = vpop.f32.mrf.mxu2 }
 0x79d   :  { %v3808_v11 = vsel %vm1122_vm11, %v3776_v14, %v3711_v58  ;;  %v3713_v1 = vpop.permute.xlu2 %3712 }
 0x79e   :  { %3842 = vst.msk [vmem:[#allocation2 + $0x108] sm:$0xff] %vm29_vm15, %v3808_v11  ;;  %v4493_v48 = vadd.f32 %v4417_v26, %v4165_v61  ;;  %v3616_v28 = vpop.permute.xlu1 %3615  ;;  %5951 = vmatmul.msk.f32.gmra.mxu0 %vm29_vm15, %v4254_v49  ;;  %5985 = vmatmul.msk.f32.gmra.mxu1 %vm29_vm15, %v4254_v49  ;;  %v6083_v11 = vld [vmem:[%s9412_s3 + $0x230] sm:$0xff] }
 0x79f   :  { %v3777_v15 = vsel %vm1089_vm9, %v8584_v47, %v3616_v28  ;;  %v4257_v31 = vld [vmem:[#allocation2 + $0x100] sm:$0xff]  ;;  %5031 = vmatpush.msra.mxu1 %v6083_v11  ;;  %v4260_v28 = vld [vmem:[#allocation2 + $0x118] sm:$0xff] }
 0x7a0   :  { %v4527_v40 = vadd.f32 %v8613_v9, %v4493_v48  ;;  %v3809_v34 = vsel %vm1122_vm11, %v3777_v15, %v3713_v1  ;;  %v8738_v51 = vld [vmem:[#allocation4 + $0x8] sm:$0xff] }
 0x7a1   :  { %3843 = vst.msk [vmem:[#allocation2 + $0x110] sm:$0xff] %vm29_vm15, %v3809_v34  ;;  %4768 = vrot.lane.b32.xlu2 %v8738_v51, %s6219_s16  ;;  %6028 = vmatmul.msk.f32.gmra.mxu2 %vm29_vm15, %v4257_v31  ;;  %v8746_v47 = vmul.f32 %v7199_v2, %v8738_v51 }
 0x7a2   :  { %v4559_v49 = vmax.f32 %v4527_v40, 0.0 }
 0x7a3   :  { %v4048_v43 = vpop.f32.mrf.mxu0  ;;  %v4173_v3 = vpop.f32.mrf.mxu1  ;;  %v4742_v4 = vrot.slane %v8746_v47, 1  ;;  %v4617_v39 = vld [vmem:[#allocation3 + $0x40] ss:$2 sm:$0xff]  ;;  %v4633_v38 = vld [vmem:[#allocation3 + $0x41] ss:$2 sm:$0xff] }
 0x7a4   :  { %4591 = vst.msk [vmem:[#allocation3 + $0x50] sm:$0xff] %vm1089_vm9, %v4559_v49  ;;  %v4168_v42 = vadd.f32 %v4167_v24, %v4048_v43  ;;  %v4420_v27 = vpop.f32.mrf.mxu2  ;;  %v4649_v7 = vmax.f32 %v4617_v39, %v4633_v38  ;;  %v6082_v38 = vld [vmem:[%s9412_s3 + $0x228] sm:$0xff] }
 0x7a5   :  { %v4743_v37 = vsel %vm798_vm4, %v4741_v13, %v4742_v4  ;;  %v4258_v17 = vld [vmem:[#allocation2 + $0x108] sm:$0xff]  ;;  %v4261_v13 = vld [vmem:[#allocation2 + $0x120] sm:$0xff]  ;;  %5032 = vmatpush.msra.mxu1 %v6082_v38 }
 0x7a6   :  { %v4494_v62 = vadd.f32 %v4420_v27, %v4168_v42  ;;  %4791 = vrot.lane.b32.xlu1 %v4743_v37, %s6221_s19  ;;  %5952 = vmatmul.msk.f32.gmra.mxu0 %vm29_vm15, %v8701_v41 }
 0x7a7   :  { %5986 = vmatmul.msk.f32.gmra.mxu1 %vm29_vm15, %v8701_v41 }
 0x7a8   :  { %v4528_v2 = vadd.f32 %v8613_v9, %v4494_v62  ;;  %v4259_v29 = vld [vmem:[#allocation2 + $0x110] sm:$0xff] }
 0x7a9   :  { %6029 = vmatmul.msk.f32.gmra.mxu2 %vm29_vm15, %v4258_v17 }
 0x7aa   :  { %v4560_v24 = vmax.f32 %v4528_v2, 0.0 }
 0x7ab   :  { %v4051_v56 = vpop.f32.mrf.mxu0  ;;  %v4176_v6 = vpop.f32.mrf.mxu1 }
 0x7ac   :  { %4592 = vst.msk [vmem:[#allocation3 + $0x58] sm:$0xff] %vm1089_vm9, %v4560_v24  ;;  %v4171_v35 = vadd.f32 %v4170_v21, %v4051_v56  ;;  %v4423_v25 = vpop.f32.mrf.mxu2 }
 0x7ae   :  { %v4495_v57 = vadd.f32 %v4423_v25, %v4171_v35  ;;  %5953 = vmatmul.msk.f32.gmra.mxu0 %vm29_vm15, %v4256_v0  ;;  %v6042_v35 = vld [vmem:[%s9412_s3 + $0x168] sm:$0xff] }
 0x7af   :  { %5987 = vmatmul.msk.f32.gmra.mxu1 %vm29_vm15, %v4256_v0  ;;  %v6043_v0 = vld [vmem:[%s9412_s3 + $0x170] sm:$0xff] }
 0x7b0   :  { %v4529_v41 = vadd.f32 %v8613_v9, %v4495_v57  ;;  %4946 = vmatpush.msra.mxu0 %v6043_v0 }
 0x7b1   :  { %6030 = vmatmul.msk.f32.gmra.mxu2 %vm29_vm15, %v4259_v29 }
 0x7b2   :  { %v4561_v45 = vmax.f32 %v4529_v41, 0.0  ;;  %4947 = vmatpush.msra.mxu0 %v6042_v35 }
 0x7b3   :  { %v4054_v55 = vpop.f32.mrf.mxu0  ;;  %v4179_v21 = vpop.f32.mrf.mxu1  ;;  %v4618_v14 = vld [vmem:[#allocation3 + $0x50] ss:$2 sm:$0xff]  ;;  %v4634_v61 = vld [vmem:[#allocation3 + $0x51] ss:$2 sm:$0xff] }
 0x7b4   :  { %4593 = vst.msk [vmem:[#allocation3 + $0x60] sm:$0xff] %vm1089_vm9, %v4561_v45  ;;  %v4174_v58 = vadd.f32 %v4173_v3, %v4054_v55  ;;  %v4426_v26 = vpop.f32.mrf.mxu2  ;;  %v4650_v59 = vmax.f32 %v4618_v14, %v4634_v61 }
 0x7b6   :  { %v4496_v48 = vadd.f32 %v4426_v26, %v4174_v58  ;;  %5954 = vmatmul.msk.f32.gmra.mxu0 %vm29_vm15, %v4257_v31  ;;  %v4665_v1 = vmax.f32 %v4649_v7, %v4650_v59 }
 0x7b7   :  { %5988 = vmatmul.msk.f32.gmra.mxu1 %vm29_vm15, %v4257_v31 }
 0x7b8   :  { %v4530_v15 = vadd.f32 %v8613_v9, %v4496_v48  ;;  %4666 = vst.msk [vmem:[#allocation4 + $0x10] sm:$0xff] %vm1089_vm9, %v4665_v1 }
 0x7b9   :  { %6031 = vmatmul.msk.f32.gmra.mxu2 %vm29_vm15, %v4260_v28  ;;  %v6053_v28 = vld [vmem:[%s9412_s3 + $0x1c0] sm:$0xff] }
 0x7ba   :  { %v4562_v19 = vmax.f32 %v4530_v15, 0.0 }
 0x7bb   :  { %v4057_v40 = vpop.f32.mrf.mxu0  ;;  %v4182_v34 = vpop.f32.mrf.mxu1 }
 0x7bc   :  { %4594 = vst.msk [vmem:[#allocation3 + $0x68] sm:$0xff] %vm1089_vm9, %v4562_v19  ;;  %v4177_v49 = vadd.f32 %v4176_v6, %v4057_v40  ;;  %v4429_v43 = vpop.f32.mrf.mxu2  ;;  %v6054_v6 = vld [vmem:[%s9412_s3 + $0x1c8] sm:$0xff] }
 0x7bd   :  { %4903 = vmatpush.msrb.mxu3 %v6054_v6 }
 0x7be   :  { %v4497_v3 = vadd.f32 %v4429_v43, %v4177_v49  ;;  %5955 = vmatmul.msk.f32.gmra.mxu0 %vm29_vm15, %v4258_v17 }
 0x7bf   :  { %v4679_v42 = vld [vmem:[#allocation4 + $0x10] sm:$0xff]  ;;  %4904 = vmatpush.msrb.mxu3 %v6053_v28 }
 0x7c0   :  { %v4531_v31 = vadd.f32 %v8613_v9, %v4497_v3  ;;  %v8784_v27 = vmul.f32 %v7271_v12, %v4679_v42  ;;  %4770 = vrot.lane.b32.xlu1 %v4679_v42, %s6219_s16  ;;  %v6036_v28 = vld [vmem:[%s9412_s3 + $0x138] sm:$0xff] }
 0x7c1   :  { %6032 = vmatmul.msk.f32.gmra.mxu2 %vm29_vm15, %v4261_v13  ;;  %v6041_v13 = vld [vmem:[%s9412_s3 + $0x160] sm:$0xff] }
 0x7c2   :  { %v4563_v37 = vmax.f32 %v4531_v31, 0.0  ;;  %v4744_v62 = vrot.slane %v8784_v27, 1  ;;  %v6081_v31 = vld [vmem:[%s9412_s3 + $0x220] sm:$0xff]  ;;  %4948 = vmatpush.msra.mxu0 %v6041_v13  ;;  %v6080_v13 = vld [vmem:[%s9412_s3 + $0x218] sm:$0xff] }
 0x7c3   :  { %v4060_v2 = vpop.f32.mrf.mxu0  ;;  %v4185_v24 = vpop.f32.mrf.mxu1  ;;  %5033 = vmatpush.msra.mxu1 %v6081_v31  ;;  %v6051_v31 = vld [vmem:[%s9412_s3 + $0x1b0] sm:$0xff] }
 0x7c4   :  { %4595 = vst.msk [vmem:[#allocation3 + $0x70] sm:$0xff] %vm1089_vm9, %v4563_v37  ;;  %v4180_v56 = vadd.f32 %v4179_v21, %v4060_v2  ;;  %v4432_v17 = vpop.f32.mrf.mxu2  ;;  %v4745_v12 = vsel %vm798_vm4, %v4742_v4, %v4744_v62  ;;  %v4619_v21 = vld [vmem:[#allocation3 + $0x60] ss:$2 sm:$0xff]  ;;  %v8823_v37 = vmul.f32 %v7539_v52, %v4679_v42 }
 0x7c5   :  { %4793 = vrot.lane.b32.xlu0 %v4745_v12, %s6221_s19  ;;  %v9465_v12 = vld [vmem:[#allocation18_spill] sm:$0xff]  ;;  %5034 = vmatpush.msra.mxu1 %v6080_v13 }
 0x7c6   :  { %v4498_v25 = vadd.f32 %v4432_v17, %v4180_v56  ;;  %5956 = vmatmul.msk.f32.gmra.mxu0 %vm29_vm15, %v4259_v29  ;;  %v4635_v29 = vld [vmem:[#allocation3 + $0x61] ss:$2 sm:$0xff]  ;;  %v4704_v35 = vrot.slane %v8823_v37, 7 }
 0x7c7   :  { %v4651_v11 = vmax.f32 %v4619_v21, %v4635_v29 }
 0x7c8   :  { %v4532_v36 = vadd.f32 %v8613_v9, %v4498_v25 }
 0x7ca   :  { %v4564_v47 = vmax.f32 %v4532_v36, 0.0 }
 0x7cb   :  { %v4063_v57 = vpop.f32.mrf.mxu0  ;;  %v4188_v4 = vpop.f32.mrf.mxu1 }
 0x7cc   :  { %4596 = vst.msk [vmem:[#allocation3 + $0x78] sm:$0xff] %vm1089_vm9, %v4564_v47  ;;  %v4183_v41 = vadd.f32 %v4182_v34, %v4063_v57  ;;  %v4435_v39 = vpop.f32.mrf.mxu2 }
 0x7ce   :  { %v4499_v45 = vadd.f32 %v4435_v39, %v4183_v41 }
 0x7d0   :  { %v4533_v55 = vadd.f32 %v8613_v9, %v4499_v45 }
 0x7d2   :  { %v4565_v14 = vmax.f32 %v4533_v55, 0.0  ;;  %v6040_v55 = vld [vmem:[%s9412_s3 + $0x158] sm:$0xff] }
 0x7d3   :  { %v4066_v61 = vpop.f32.mrf.mxu0  ;;  %v4191_v58 = vpop.f32.mrf.mxu1  ;;  %v4620_v26 = vld [vmem:[#allocation3 + $0x70] ss:$2 sm:$0xff]  ;;  %v4636_v7 = vld [vmem:[#allocation3 + $0x71] ss:$2 sm:$0xff]  ;;  %4949 = vmatpush.msra.mxu0 %v6040_v55 }
 0x7d4   :  { %4597 = vst.msk [vmem:[#allocation3 + $0x80] sm:$0xff] %vm1089_vm9, %v4565_v14  ;;  %v4186_v59 = vadd.f32 %v4185_v24, %v4066_v61  ;;  %v4438_v0 = vpop.f32.mrf.mxu2  ;;  %v4652_v48 = vmax.f32 %v4620_v26, %v4636_v7  ;;  %v6052_v14 = vld [vmem:[%s9412_s3 + $0x1b8] sm:$0xff]  ;;  %v6039_v61 = vld [vmem:[%s9412_s3 + $0x150] sm:$0xff]  ;;  %v6038_v26 = vld [vmem:[%s9412_s3 + $0x148] sm:$0xff] }
 0x7d5   :  { %4905 = vmatpush.msrb.mxu3 %v6052_v14  ;;  %4950 = vmatpush.msra.mxu0 %v6039_v61  ;;  %v6046_v14 = vld [vmem:[%s9412_s3 + $0x188] sm:$0xff] }
 0x7d6   :  { %v4500_v1 = vadd.f32 %v4438_v0, %v4186_v59  ;;  %v4667_v15 = vmax.f32 %v4651_v11, %v4652_v48  ;;  %v6037_v59 = vld [vmem:[%s9412_s3 + $0x140] sm:$0xff] }
 0x7d7   :  { %4951 = vmatpush.msra.mxu0 %v6038_v26  ;;  %4906 = vmatpush.msrb.mxu3 %v6051_v31 }
 0x7d8   :  { %v4534_v19 = vadd.f32 %v8613_v9, %v4500_v1  ;;  %4668 = vst.msk [vmem:[#allocation4 + $0x18] sm:$0xff] %vm1089_vm9, %v4667_v15 }
 0x7d9   :  { %4952 = vmatpush.msra.mxu0 %v6037_v59  ;;  %v6045_v59 = vld [vmem:[%s9412_s3 + $0x180] sm:$0xff] }
 0x7da   :  { %v4566_v40 = vmax.f32 %v4534_v19, 0.0 }
 0x7db   :  { %v4069_v34 = vpop.f32.mrf.mxu0  ;;  %v4194_v49 = vpop.f32.mrf.mxu1  ;;  %4953 = vmatpush.msra.mxu0 %v6036_v28 }
 0x7dc   :  { %4598 = vst.msk [vmem:[#allocation3 + $0x88] sm:$0xff] %vm1089_vm9, %v4566_v40  ;;  %v4189_v43 = vadd.f32 %v4188_v4, %v4069_v34  ;;  %v4441_v3 = vpop.f32.mrf.mxu2 }
 0x7de   :  { %v4501_v2 = vadd.f32 %v4441_v3, %v4189_v43 }
 0x7df   :  { %v4680_v24 = vld [vmem:[#allocation4 + $0x18] sm:$0xff] }
 0x7e0   :  { %v4535_v56 = vadd.f32 %v8613_v9, %v4501_v2  ;;  %v8827_v17 = vmul.f32 %v7547_v30, %v4680_v24  ;;  %v8830_v6 = vmul.f32 %v9465_v12, %v4680_v24  ;;  %4772 = vrot.lane.b32.xlu0 %v4680_v24, %s6219_s16  ;;  %v6035_v2 = vld [vmem:[%s9412_s3 + $0x130] sm:$0xff]  ;;  %v6050_v12 = vld [vmem:[%s9412_s3 + $0x1a8] sm:$0xff] }
 0x7e1   :  { %4954 = vmatpush.msra.mxu0 %v6035_v2  ;;  %4907 = vmatpush.msrb.mxu3 %v6050_v12 }
 0x7e2   :  { %v4567_v25 = vmax.f32 %v4535_v56, 0.0  ;;  %v4706_v36 = vrot.slane %v8827_v17, 7  ;;  %v4746_v52 = vrot.slane %v8830_v6, 1 }
 0x7e3   :  { %v4072_v42 = vpop.f32.mrf.mxu0  ;;  %v4197_v47 = vpop.f32.mrf.mxu1  ;;  %v4621_v0 = vld [vmem:[#allocation3 + $0x80] ss:$2 sm:$0xff]  ;;  %v4637_v11 = vld [vmem:[#allocation3 + $0x81] ss:$2 sm:$0xff] }
 0x7e4   :  { %4599 = vst.msk [vmem:[#allocation3 + $0x90] sm:$0xff] %vm1089_vm9, %v4567_v25  ;;  %v4192_v57 = vadd.f32 %v4191_v58, %v4072_v42  ;;  %v4444_v4 = vpop.f32.mrf.mxu2  ;;  %v4747_v30 = vsel %vm798_vm4, %v4744_v62, %v4746_v52  ;;  %v8847_v41 = vsel %vm637_vm6, %v4704_v35, %v4706_v36  ;;  %v4653_v43 = vmax.f32 %v4621_v0, %v4637_v11  ;;  %v6034_v25 = vld [vmem:[%s9412_s3 + $0x128] sm:$0xff] }
 0x7e5   :  { %4795 = vrot.lane.b32.xlu2 %v4747_v30, %s6221_s19  ;;  %4955 = vmatpush.msra.mxu0 %v6034_v25 }
 0x7e6   :  { %v4502_v39 = vadd.f32 %v4444_v4, %v4192_v57  ;;  %v6033_v57 = vld [vmem:[%s9412_s3 + $0x120] sm:$0xff]  ;;  %v4840_v4 = vld [vmem:[#allocation2 + $0x10] sm:$0xff] }
 0x7e7   :  { %4956 = vmatpush.msra.mxu0 %v6033_v57 }
 0x7e8   :  { %v4536_v38 = vadd.f32 %v8613_v9, %v4502_v39  ;;  %v6048_v39 = vld [vmem:[%s9412_s3 + $0x198] sm:$0xff]  ;;  %6065 = vmatmul.msk.f32.vlgmr.msra.gmra.mxu0 %vm29_vm15, %v4840_v4 }
 0x7ea   :  { %v4568_v45 = vmax.f32 %v4536_v38, 0.0 }
 0x7eb   :  { %v4075_v27 = vpop.f32.mrf.mxu0  ;;  %v4200_v21 = vpop.f32.mrf.mxu1 }
 0x7ec   :  { %4600 = vst.msk [vmem:[#allocation3 + $0x98] sm:$0xff] %vm1089_vm9, %v4568_v45  ;;  %v4195_v62 = vadd.f32 %v4194_v49, %v4075_v27  ;;  %v4447_v29 = vpop.f32.mrf.mxu2  ;;  %v6047_v27 = vld [vmem:[%s9412_s3 + $0x190] sm:$0xff] }
 0x7ee   :  { %v4503_v58 = vadd.f32 %v4447_v29, %v4195_v62 }
 0x7f0   :  { %v4537_v7 = vadd.f32 %v8613_v9, %v4503_v58 }
 0x7f2   :  { %v4569_v48 = vmax.f32 %v4537_v7, 0.0 }
 0x7f3   :  { %v4078_v1 = vpop.f32.mrf.mxu0  ;;  %v4203_v15 = vpop.f32.mrf.mxu1  ;;  %v4622_v19 = vld [vmem:[#allocation3 + $0x90] ss:$2 sm:$0xff]  ;;  %v4638_v40 = vld [vmem:[#allocation3 + $0x91] ss:$2 sm:$0xff] }
 0x7f4   :  { %4601 = vst.msk [vmem:[#allocation3 + $0xa0] sm:$0xff] %vm1089_vm9, %v4569_v48  ;;  %v4198_v34 = vadd.f32 %v4197_v47, %v4078_v1  ;;  %v4450_v49 = vpop.f32.mrf.mxu2  ;;  %v4654_v3 = vmax.f32 %v4622_v19, %v4638_v40  ;;  %v6049_v47 = vld [vmem:[%s9412_s3 + $0x1a0] sm:$0xff] }
 0x7f5   :  { %4908 = vmatpush.msrb.mxu3 %v6049_v47 }
 0x7f6   :  { %v4504_v24 = vadd.f32 %v4450_v49, %v4198_v34  ;;  %v4669_v56 = vmax.f32 %v4653_v43, %v4654_v3 }
 0x7f7   :  { %4909 = vmatpush.msrb.mxu3 %v6048_v39 }
 0x7f8   :  { %v4538_v42 = vadd.f32 %v8613_v9, %v4504_v24  ;;  %4670 = vst.msk [vmem:[#allocation4 + $0x20] sm:$0xff] %vm1089_vm9, %v4669_v56 }
 0x7f9   :  { %4910 = vmatpush.msrb.mxu3 %v6047_v27 }
 0x7fa   :  { %v4570_v30 = vmax.f32 %v4538_v42, 0.0 }
 0x7fb   :  { %v4081_v38 = vpop.f32.mrf.mxu0  ;;  %v4206_v62 = vpop.f32.mrf.mxu1  ;;  %4911 = vmatpush.msrb.mxu3 %v6046_v14 }
 0x7fc   :  { %4602 = vst.msk [vmem:[#allocation3 + $0xa8] sm:$0xff] %vm1089_vm9, %v4570_v30  ;;  %v4201_v45 = vadd.f32 %v4200_v21, %v4081_v38  ;;  %v4453_v55 = vpop.f32.mrf.mxu2  ;;  %v9466_v21 = vld [vmem:[#allocation19_spill] sm:$0xff] }
 0x7fd   :  { %4912 = vmatpush.msrb.mxu3 %v6045_v59 }
 0x7fe   :  { %v4505_v29 = vadd.f32 %v4453_v55, %v4201_v45  ;;  %v4767_v55 = vpop.permute.xlu0 %4766 }
 0x7ff   :  { %v4681_v61 = vld [vmem:[#allocation4 + $0x20] sm:$0xff] }
 0x800   :  { %v4539_v58 = vadd.f32 %v8613_v9, %v4505_v29  ;;  %v8908_v26 = vmul.f32 %v7589_v8, %v4681_v61  ;;  %v8911_v7 = vmul.f32 %v9466_v21, %v4681_v61  ;;  %4774 = vrot.lane.b32.xlu2 %v4681_v61, %s6219_s16  ;;  %v6077_v21 = vld [vmem:[%s9412_s3 + $0x200] sm:$0xff] }
 0x802   :  { %v4571_v0 = vmax.f32 %v4539_v58, 0.0  ;;  %v4708_v11 = vrot.slane %v8908_v26, 7  ;;  %v4748_v48 = vrot.slane %v8911_v7, 1 }
 0x803   :  { %v4084_v28 = vpop.f32.mrf.mxu0  ;;  %v4209_v49 = vpop.f32.mrf.mxu1  ;;  %v4623_v56 = vld [vmem:[#allocation3 + $0xa0] ss:$2 sm:$0xff]  ;;  %v4639_v12 = vld [vmem:[#allocation3 + $0xa1] ss:$2 sm:$0xff] }
 0x804   :  { %4603 = vst.msk [vmem:[#allocation3 + $0xb0] sm:$0xff] %vm1089_vm9, %v4571_v0  ;;  %v4204_v8 = vadd.f32 %v4203_v15, %v4084_v28  ;;  %v4456_v1 = vpop.f32.mrf.mxu2  ;;  %v4749_v19 = vsel %vm798_vm4, %v4746_v52, %v4748_v48  ;;  %v8930_v40 = vsel %vm637_vm6, %v4706_v36, %v4708_v11  ;;  %v6079_v52 = vld [vmem:[%s9412_s3 + $0x210] sm:$0xff]  ;;  %v9467_v36 = vld [vmem:[#allocation20_spill] sm:$0xff]  ;;  %v4655_v38 = vmax.f32 %v4623_v56, %v4639_v12  ;;  %v6076_v28 = vld [vmem:[%s9412_s3 + $0x1f8] sm:$0xff] }
 0x805   :  { %4797 = vrot.lane.b32.xlu1 %v4749_v19, %s6221_s19  ;;  %5035 = vmatpush.msra.mxu1 %v6079_v52  ;;  %v8940_v31 = vmul.f32 %v9467_v36, %v8679_v18 }
 0x806   :  { %v4506_v34 = vadd.f32 %v4456_v1, %v4204_v8 }
 0x807   :  { %v4701_v42 = vrot.slane %v8940_v31, 7 }
 0x808   :  { %v4540_v15 = vadd.f32 %v8613_v9, %v4506_v34 }
 0x809   :  { %v4724_v29 = vsel %vm637_vm6, 0.0, %v4701_v42 }
 0x80a   :  { %v4572_v43 = vmax.f32 %v4540_v15, 0.0  ;;  %v4815_v14 = vsel %vm1089_vm9, %v4724_v29, %v4767_v55 }
 0x80b   :  { %v4087_v3 = vpop.f32.mrf.mxu0  ;;  %v4212_v24 = vpop.f32.mrf.mxu1 }
 0x80c   :  { %4604 = vst.msk [vmem:[#allocation3 + $0xb8] sm:$0xff] %vm1089_vm9, %v4572_v43  ;;  %v4207_v6 = vadd.f32 %v4206_v62, %v4087_v3  ;;  %v4459_v13 = vpop.f32.mrf.mxu2  ;;  %v6078_v62 = vld [vmem:[%s9412_s3 + $0x208] sm:$0xff] }
 0x80d   :  { %5036 = vmatpush.msra.mxu1 %v6078_v62  ;;  %v6074_v43 = vld [vmem:[%s9412_s3 + $0x1e8] sm:$0xff] }
 0x80e   :  { %v4507_v17 = vadd.f32 %v4459_v13, %v4207_v6 }
 0x80f   :  { %5037 = vmatpush.msra.mxu1 %v6077_v21  ;;  %v4769_v21 = vpop.permute.xlu2 %4768 }
 0x810   :  { %v4541_v2 = vadd.f32 %v8613_v9, %v4507_v17  ;;  %v6073_v17 = vld [vmem:[%s9412_s3 + $0x1e0] sm:$0xff] }
 0x811   :  { %5038 = vmatpush.msra.mxu1 %v6076_v28 }
 0x812   :  { %v4573_v25 = vmax.f32 %v4541_v2, 0.0 }
 0x813   :  { %v4090_v47 = vpop.f32.mrf.mxu0  ;;  %v4624_v57 = vld [vmem:[#allocation3 + $0xb0] ss:$2 sm:$0xff]  ;;  %v4640_v4 = vld [vmem:[#allocation3 + $0xb1] ss:$2 sm:$0xff]  ;;  %v4215_v8 = vpop.f32.mrf.mxu1 }
 0x814   :  { %4605 = vst.msk [vmem:[#allocation3 + $0xc0] sm:$0xff] %vm1089_vm9, %v4573_v25  ;;  %v4210_v30 = vadd.f32 %v4209_v49, %v4090_v47  ;;  %v4462_v39 = vpop.f32.mrf.mxu2  ;;  %v4656_v45 = vmax.f32 %v4624_v57, %v4640_v4  ;;  %v6075_v49 = vld [vmem:[%s9412_s3 + $0x1f0] sm:$0xff]  ;;  %v9001_v4 = vld [vmem:[%s9413_s4] ss:$0 sm:$0xff] }
 0x815   :  { %5039 = vmatpush.msra.mxu1 %v6075_v49 }
 0x816   :  { %v4508_v18 = vadd.f32 %v4462_v39, %v4210_v30  ;;  %v4671_v27 = vmax.f32 %v4655_v38, %v4656_v45 }
 0x817   :  { %5040 = vmatpush.msra.mxu1 %v6074_v43 }
 0x818   :  { %v4542_v61 = vadd.f32 %v8613_v9, %v4508_v18  ;;  %v4792_v58 = vpop.permute.xlu1 %4791  ;;  %4672 = vst.msk [vmem:[#allocation4 + $0x28] sm:$0xff] %vm1089_vm9, %v4671_v27 }
 0x819   :  { %v4823_v59 = vsel %vm1122_vm11, %v4815_v14, %v4792_v58  ;;  %5041 = vmatpush.msra.mxu1 %v6073_v17 }
 0x81a   :  { %v4574_v0 = vmax.f32 %v4542_v61, 0.0  ;;  %4832 = vst.msk [vmem:[#allocation2 + $0x18] sm:$0xff] %vm29_vm15, %v4823_v59 }
 0x81b   :  { %v4093_v1 = vpop.f32.mrf.mxu0  ;;  %v4218_v47 = vpop.f32.mrf.mxu1 }
 0x81c   :  { %4606 = vst.msk [vmem:[#allocation3 + $0xc8] sm:$0xff] %vm1089_vm9, %v4574_v0  ;;  %v4213_v19 = vadd.f32 %v4212_v24, %v4093_v1  ;;  %v4465_v34 = vpop.f32.mrf.mxu2 }
 0x81e   :  { %v4509_v15 = vadd.f32 %v4465_v34, %v4213_v19 }
 0x81f   :  { %v4682_v3 = vld [vmem:[#allocation4 + $0x28] sm:$0xff] }
 0x820   :  { %v4543_v6 = vadd.f32 %v8613_v9, %v4509_v15  ;;  %v8971_v13 = vmul.f32 %v7608_v50, %v4682_v3  ;;  %v8974_v52 = vmul.f32 %v7482_v46, %v4682_v3  ;;  %4776 = vrot.lane.b32.xlu1 %v4682_v3, %s6219_s16 }
 0x821   :  { %v4841_v36 = vld [vmem:[#allocation2 + $0x18] sm:$0xff] }
 0x822   :  { %v4575_v2 = vmax.f32 %v4543_v6, 0.0  ;;  %v4710_v24 = vrot.slane %v8971_v13, 7  ;;  %v4750_v56 = vrot.slane %v8974_v52, 1  ;;  %6057 = vmatmul.msk.f32.vlgmr.msrb.gmra.mxu3 %vm29_vm15, %v4841_v36  ;;  %6066 = vmatmul.msk.f32.gmra.mxu0 %vm29_vm15, %v4841_v36 }
 0x823   :  { %v4096_v50 = vpop.f32.mrf.mxu0  ;;  %v4625_v18 = vld [vmem:[#allocation3 + $0xc0] ss:$2 sm:$0xff]  ;;  %v4641_v27 = vld [vmem:[#allocation3 + $0xc1] ss:$2 sm:$0xff] }
 0x824   :  { %4607 = vst.msk [vmem:[#allocation3 + $0xd0] sm:$0xff] %vm1089_vm9, %v4575_v2  ;;  %v4216_v46 = vadd.f32 %v4215_v8, %v4096_v50  ;;  %v4468_v9 = vpop.f32.mrf.mxu2  ;;  %v4751_v12 = vsel %vm798_vm4, %v4748_v48, %v4750_v56  ;;  %v8995_v25 = vsel %vm637_vm6, %v4708_v11, %v4710_v24  ;;  %v4686_v11 = vmul.f32 %v7460_v22, %v8738_v51  ;;  %v4221_v45 = vpop.f32.mrf.mxu1 }
 0x825   :  { %4799 = vrot.lane.b32.xlu0 %v4751_v12, %s6221_s19  ;;  %v4657_v28 = vmax.f32 %v4625_v18, %v4641_v27 }
 0x826   :  { %v4510_v57 = vadd.f32 %v4468_v9, %v4216_v46  ;;  %v4702_v62 = vrot.slane %v4686_v11, 7 }
 0x828   :  { %v4544_v7 = vadd.f32 %v9001_v4, %v4510_v57  ;;  %v4703_v22 = vsel %vm637_vm6, %v4701_v42, %v4702_v62  ;;  %v4705_v36 = vsel %vm637_vm6, %v4702_v62, %v4704_v35 }
 0x829   :  { %v4816_v19 = vsel %vm1089_vm9, %v4703_v22, %v4769_v21 }
 0x82a   :  { %v4576_v30 = vmax.f32 %v4544_v7, 0.0 }
 0x82b   :  { %v4099_v48 = vpop.f32.mrf.mxu0 }
 0x82c   :  { %4608 = vst.msk [vmem:[#allocation3 + $0xd8] sm:$0xff] %vm1089_vm9, %v4576_v30  ;;  %v4219_v39 = vadd.f32 %v4218_v47, %v4099_v48  ;;  %v4471_v26 = vpop.f32.mrf.mxu2  ;;  %v4224_v43 = vpop.f32.mrf.mxu1 }
 0x82e   :  { %v4511_v38 = vadd.f32 %v4471_v26, %v4219_v39 }
 0x830   :  { %v4545_v55 = vadd.f32 %v9001_v4, %v4511_v38 }
 0x832   :  { %v4577_v29 = vmax.f32 %v4545_v55, 0.0  ;;  %v4771_v17 = vpop.permute.xlu1 %4770 }
 0x833   :  { %v4102_v14 = vpop.f32.mrf.mxu0  ;;  %v4626_v61 = vld [vmem:[#allocation3 + $0xd0] ss:$2 sm:$0xff]  ;;  %v4642_v58 = vld [vmem:[#allocation3 + $0xd1] ss:$2 sm:$0xff]  ;;  %v4817_v50 = vsel %vm1089_vm9, %v4705_v36, %v4771_v17 }
 0x834   :  { %4609 = vst.msk [vmem:[#allocation3 + $0xe0] sm:$0xff] %vm1089_vm9, %v4577_v29  ;;  %v4222_v59 = vadd.f32 %v4221_v45, %v4102_v14  ;;  %v4474_v0 = vpop.f32.mrf.mxu2  ;;  %v4658_v8 = vmax.f32 %v4626_v61, %v4642_v58  ;;  %v4227_v39 = vpop.f32.mrf.mxu1  ;;  %v9081_v36 = vld [vmem:[%s9413_s4 + $0x1] ss:$0 sm:$0xff] }
 0x836   :  { %v4512_v51 = vadd.f32 %v4474_v0, %v4222_v59  ;;  %v4673_v1 = vmax.f32 %v4657_v28, %v4658_v8 }
 0x837   :  { %v4794_v34 = vpop.permute.xlu0 %4793 }
 0x838   :  { %v4546_v49 = vadd.f32 %v9001_v4, %v4512_v51  ;;  %v4824_v15 = vsel %vm1122_vm11, %v4816_v19, %v4794_v34  ;;  %4674 = vst.msk [vmem:[#allocation4 + $0x30] sm:$0xff] %vm1089_vm9, %v4673_v1 }
 0x839   :  { %4833 = vst.msk [vmem:[#allocation2 + $0x20] sm:$0xff] %vm29_vm15, %v4824_v15 }
 0x83a   :  { %v4578_v3 = vmax.f32 %v4546_v49, 0.0 }
 0x83b   :  { %v4105_v6 = vpop.f32.mrf.mxu0 }
 0x83c   :  { %4610 = vst.msk [vmem:[#allocation3 + $0xe8] sm:$0xff] %vm1089_vm9, %v4578_v3  ;;  %v4225_v31 = vadd.f32 %v4224_v43, %v4105_v6  ;;  %v4477_v42 = vpop.f32.mrf.mxu2 }
 0x83e   :  { %v4513_v2 = vadd.f32 %v4477_v42, %v4225_v31 }
 0x83f   :  { %v4796_v46 = vpop.permute.xlu2 %4795  ;;  %v4683_v9 = vld [vmem:[#allocation4 + $0x30] sm:$0xff] }
 0x840   :  { %v4547_v12 = vadd.f32 %v9001_v4, %v4513_v2  ;;  %v4825_v47 = vsel %vm1122_vm11, %v4817_v50, %v4796_v46  ;;  %v4691_v57 = vmul.f32 %v7617_v5, %v4683_v9  ;;  %v4731_v7 = vmul.f32 %v7523_v63, %v4683_v9  ;;  %4778 = vrot.lane.b32.xlu0 %v4683_v9, %s6219_s16  ;;  %v4842_v30 = vld [vmem:[#allocation2 + $0x20] sm:$0xff] }
 0x841   :  { %4834 = vst.msk [vmem:[#allocation2 + $0x28] sm:$0xff] %vm29_vm15, %v4825_v47  ;;  %6058 = vmatmul.msk.f32.gmra.mxu3 %vm29_vm15, %v4842_v30  ;;  %6067 = vmatmul.msk.f32.gmra.mxu0 %vm29_vm15, %v4842_v30 }
 0x842   :  { %v4579_v37 = vmax.f32 %v4547_v12, 0.0  ;;  %v4712_v35 = vrot.slane %v4691_v57, 7  ;;  %v4752_v48 = vrot.slane %v4731_v7, 1  ;;  %6085 = vmatmul.msk.f32.vlgmr.msra.gmra.mxu1 %vm29_vm15, %v4842_v30 }
 0x843   :  { %v4108_v26 = vpop.f32.mrf.mxu0  ;;  %v4627_v13 = vld [vmem:[#allocation3 + $0xe0] ss:$2 sm:$0xff] }
 0x844   :  { %4611 = vst.msk [vmem:[#allocation3 + $0xf0] sm:$0xff] %vm1089_vm9, %v4579_v37  ;;  %v4228_v5 = vadd.f32 %v4227_v39, %v4108_v26  ;;  %v4480_v63 = vpop.f32.mrf.mxu2  ;;  %v4753_v11 = vsel %vm798_vm4, %v4750_v56, %v4752_v48  ;;  %v9038_v38 = vsel %vm637_vm6, %v4710_v24, %v4712_v35  ;;  %v4643_v24 = vld [vmem:[#allocation3 + $0xe1] ss:$2 sm:$0xff] }
 0x845   :  { %4801 = vrot.lane.b32.xlu2 %v4753_v11, %s6221_s19  ;;  %v4659_v62 = vmax.f32 %v4627_v13, %v4643_v24 }
 0x846   :  { %v4514_v45 = vadd.f32 %v4480_v63, %v4228_v5 }
 0x848   :  { %v4548_v55 = vadd.f32 %v9001_v4, %v4514_v45  ;;  %v4843_v18 = vld [vmem:[#allocation2 + $0x28] sm:$0xff] }
 0x849   :  { %6059 = vmatmul.msk.f32.gmra.mxu3 %vm29_vm15, %v4843_v18  ;;  %6068 = vmatmul.msk.f32.gmra.mxu0 %vm29_vm15, %v4843_v18  ;;  %5173 = vst.msk [vmem:[#allocation2 + $0x28] sm:$0xf] %vm2625_vm12, %v9447_v54 }
 0x84a   :  { %v4580_v52 = vmax.f32 %v4548_v55, 0.0  ;;  %6086 = vmatmul.msk.f32.gmra.mxu1 %vm29_vm15, %v4843_v18 }
 0x84c   :  { %4612 = vst.msk [vmem:[#allocation3 + $0xf8] sm:$0xff] %vm1089_vm9, %v4580_v52 }
 0x852   :  { %v4773_v22 = vpop.permute.xlu0 %4772 }
 0x853   :  { %v4628_v56 = vld [vmem:[#allocation3 + $0xf0] ss:$2 sm:$0xff]  ;;  %v4644_v27 = vld [vmem:[#allocation3 + $0xf1] ss:$2 sm:$0xff] }
 0x854   :  { %v4660_v29 = vmax.f32 %v4628_v56, %v4644_v27 }
 0x856   :  { %v4675_v4 = vmax.f32 %v4659_v62, %v4660_v29  ;;  %v6115_v62 = vld [vmem:[%s9412_s3 + $0x2f0] sm:$0xff] }
 0x858   :  { %4676 = vst.msk [vmem:[#allocation4 + $0x38] sm:$0xff] %vm1089_vm9, %v4675_v4  ;;  %v4989_v4 = vld [vmem:[#allocation2 + $0x58] sm:$0xff] }
 0x85a   :  { %v4775_v19 = vpop.permute.xlu2 %4774 }
 0x85b   :  { %v4819_v34 = vsel %vm1089_vm9, %v8930_v40, %v4775_v19 }
 0x85f   :  { %v4684_v14 = vld [vmem:[#allocation4 + $0x38] sm:$0xff] }
 0x860   :  { %v4692_v61 = vmul.f32 %v7638_v16, %v4684_v14  ;;  %v4732_v58 = vmul.f32 %v7563_v53, %v4684_v14  ;;  %4780 = vrot.lane.b32.xlu2 %v4684_v14, %s6219_s16  ;;  %v4818_v16 = vsel %vm1089_vm9, %v8847_v41, %v4773_v22 }
 0x862   :  { %v4714_v21 = vrot.slane %v4692_v61, 7  ;;  %v4754_v59 = vrot.slane %v4732_v58, 1 }
 0x864   :  { %v4757_v0 = vsel %vm798_vm4, %v4754_v59, 0.0  ;;  %v4755_v28 = vsel %vm798_vm4, %v4752_v48, %v4754_v59  ;;  %v4715_v8 = vsel %vm637_vm6, %v4712_v35, %v4714_v21 }
 0x865   :  { %4805 = vrot.lane.b32.xlu0 %v4757_v0, %s6221_s19  ;;  %4803 = vrot.lane.b32.xlu1 %v4755_v28, %s6221_s19 }
 0x877   :  { %v4798_v51 = vpop.permute.xlu1 %4797 }
 0x878   :  { %v4826_v53 = vsel %vm1122_vm11, %v4818_v16, %v4798_v51  ;;  %v6113_v51 = vld [vmem:[%s9412_s3 + $0x2e0] sm:$0xff] }
 0x879   :  { %4835 = vst.msk [vmem:[#allocation2 + $0x30] sm:$0xff] %vm29_vm15, %v4826_v53  ;;  %v6112_v53 = vld [vmem:[%s9412_s3 + $0x2d8] sm:$0xff] }
 0x880   :  { %v4844_v1 = vld [vmem:[#allocation2 + $0x30] sm:$0xff] }
 0x881   :  { %6060 = vmatmul.msk.f32.gmra.mxu3 %vm29_vm15, %v4844_v1  ;;  %6069 = vmatmul.msk.f32.gmra.mxu0 %vm29_vm15, %v4844_v1 }
 0x882   :  { %6087 = vmatmul.msk.f32.gmra.mxu1 %vm29_vm15, %v4844_v1 }
 0x892   :  { %v4777_v41 = vpop.permute.xlu1 %4776 }
 0x893   :  { %v4820_v43 = vsel %vm1089_vm9, %v8995_v25, %v4777_v41  ;;  %v4958_v25 = vpop.f32.mrf.mxu0 }
 0x897   :  { %v4800_v49 = vpop.permute.xlu0 %4799 }
 0x898   :  { %v4827_v15 = vsel %vm1122_vm11, %v4819_v34, %v4800_v49 }
 0x899   :  { %4836 = vst.msk [vmem:[#allocation2 + $0x38] sm:$0xff] %vm29_vm15, %v4827_v15 }
 0x89f   :  { %v4802_v3 = vpop.permute.xlu2 %4801  ;;  %v4961_v9 = vpop.f32.mrf.mxu0 }
 0x8a0   :  { %v4828_v6 = vsel %vm1122_vm11, %v4820_v43, %v4802_v3  ;;  %v4845_v17 = vld [vmem:[#allocation2 + $0x38] sm:$0xff] }
 0x8a1   :  { %4837 = vst.msk [vmem:[#allocation2 + $0x40] sm:$0xff] %vm29_vm15, %v4828_v6  ;;  %6061 = vmatmul.msk.f32.gmra.mxu3 %vm29_vm15, %v4845_v17  ;;  %6070 = vmatmul.msk.f32.gmra.mxu0 %vm29_vm15, %v4845_v17 }
 0x8a2   :  { %6088 = vmatmul.msk.f32.gmra.mxu1 %vm29_vm15, %v4845_v17 }
 0x8a5   :  { %v4914_v31 = vpop.f32.mrf.mxu3 }
 0x8a6   :  { %v4959_v42 = vadd.f32 %v4958_v25, %v4914_v31 }
 0x8a8   :  { %v4846_v40 = vld [vmem:[#allocation2 + $0x40] sm:$0xff] }
 0x8a9   :  { %6062 = vmatmul.msk.f32.gmra.mxu3 %vm29_vm15, %v4846_v40  ;;  %6071 = vmatmul.msk.f32.gmra.mxu0 %vm29_vm15, %v4846_v40 }
 0x8aa   :  { %6089 = vmatmul.msk.f32.gmra.mxu1 %vm29_vm15, %v4846_v40 }
 0x8b2   :  { %v4779_v48 = vpop.permute.xlu0 %4778 }
 0x8b3   :  { %v4821_v11 = vsel %vm1089_vm9, %v9038_v38, %v4779_v48  ;;  %v6116_v38 = vld [vmem:[%s9412_s3 + $0x2f8] sm:$0xff] }
 0x8b4   :  { %5214 = vmatpush.msra.mxu2 %v6116_v38 }
 0x8b6   :  { %5215 = vmatpush.msra.mxu2 %v6115_v62 }
 0x8ba   :  { %v4781_v39 = vpop.permute.xlu2 %4780 }
 0x8bb   :  { %v4822_v45 = vsel %vm1089_vm9, %v4715_v8, %v4781_v39  ;;  %v6114_v8 = vld [vmem:[%s9412_s3 + $0x2e8] sm:$0xff] }
 0x8bc   :  { %5216 = vmatpush.msra.mxu2 %v6114_v8 }
 0x8be   :  { %v4964_v61 = vpop.f32.mrf.mxu0  ;;  %5217 = vmatpush.msra.mxu2 %v6113_v51 }
 0x8bf   :  { %v5043_v2 = vpop.f32.mrf.mxu1 }
 0x8c0   :  { %v5067_v50 = vadd.f32 %v5043_v2, %v4959_v42  ;;  %5218 = vmatpush.msra.mxu2 %v6112_v53 }
 0x8c2   :  { %v5077_v46 = vadd.f32 %v9081_v36, %v5067_v50 }
 0x8c4   :  { %v5085_v12 = vmax.f32 %v5077_v46, 0.0  ;;  %v4917_v47 = vpop.f32.mrf.mxu3 }
 0x8c5   :  { %v4962_v57 = vadd.f32 %v4961_v9, %v4917_v47  ;;  %v6110_v47 = vld [vmem:[%s9412_s3 + $0x2c8] sm:$0xff] }
 0x8c6   :  { %5093 = vst.msk [vmem:[#allocation3] sm:$0xff] %vm1089_vm9, %v5085_v12  ;;  %v4967_v16 = vpop.f32.mrf.mxu0  ;;  %v6111_v12 = vld [vmem:[%s9412_s3 + $0x2d0] sm:$0xff] }
 0x8c7   :  { %v5046_v7 = vpop.f32.mrf.mxu1  ;;  %5219 = vmatpush.msra.mxu2 %v6111_v12 }
 0x8c8   :  { %v5068_v30 = vadd.f32 %v5046_v7, %v4962_v57 }
 0x8c9   :  { %5220 = vmatpush.msra.mxu2 %v6110_v47  ;;  %v6101_v47 = vld [vmem:[%s9412_s3 + $0x280] sm:$0xff] }
 0x8ca   :  { %v5078_v37 = vadd.f32 %v9081_v36, %v5068_v30 }
 0x8cc   :  { %v5086_v35 = vmax.f32 %v5078_v37, 0.0  ;;  %v4920_v14 = vpop.f32.mrf.mxu3 }
 0x8cd   :  { %v4965_v58 = vadd.f32 %v4964_v61, %v4920_v14  ;;  %v6109_v14 = vld [vmem:[%s9412_s3 + $0x2c0] sm:$0xff] }
 0x8ce   :  { %5094 = vst.msk [vmem:[#allocation3 + $0x8] sm:$0xff] %vm1089_vm9, %v5086_v35  ;;  %5221 = vmatpush.msra.mxu2 %v6109_v14 }
 0x8d5   :  { %v5101_v26 = vld [vmem:[#allocation3] ss:$2 sm:$0xff]  ;;  %v5105_v5 = vld [vmem:[#allocation3 + $0x1] ss:$2 sm:$0xff] }
 0x8d6   :  { %v5109_v63 = vmax.f32 %v5101_v26, %v5105_v5 }
 0x8d7   :  { %v4806_v55 = vpop.permute.xlu0 %4805  ;;  %v4804_v18 = vpop.permute.xlu1 %4803 }
 0x8d8   :  { %v4830_v52 = vsel %vm1122_vm11, %v4822_v45, %v4806_v55  ;;  %v4829_v13 = vsel %vm1122_vm11, %v4821_v11, %v4804_v18  ;;  %v5114_v24 = vrot.slane %v5109_v63, 4 }
 0x8d9   :  { %4839 = vst.msk [vmem:[#allocation2 + $0x50] sm:$0xff] %vm29_vm15, %v4830_v52 }
 0x8da   :  { %4838 = vst.msk [vmem:[#allocation2 + $0x48] sm:$0xff] %vm29_vm15, %v4829_v13  ;;  %v5116_v56 = vmax.f32 %v5109_v63, %v5114_v24 }
 0x8dc   :  { %5117 = vst.msk [vmem:[#allocation4] sm:$0xf] %vm2554_vm5, %v5116_v56 }
 0x8e0   :  { %v4860_v29 = vld [vmem:[#allocation2 + $0x50] sm:$0xff] }
 0x8e1   :  { %v4847_v27 = vld [vmem:[#allocation2 + $0x48] sm:$0xff] }
 0x8e2   :  { %6063 = vmatmul.msk.f32.gmra.mxu3 %vm29_vm15, %v4847_v27  ;;  %6072 = vmatmul.msk.f32.gmra.mxu0 %vm29_vm15, %v4847_v27 }
 0x8e3   :  { %6090 = vmatmul.msk.f32.gmra.mxu1 %vm29_vm15, %v4847_v27 }
 0x8ea   :  { %6064 = vmatmul.msk.f32.gmra.mxu3 %vm29_vm15, %v4860_v29 }
 0x8eb   :  { %6091 = vmatmul.msk.f32.gmra.mxu1 %vm29_vm15, %v4860_v29 }
 0x8f3   :  { %6092 = vmatmul.msk.f32.gmra.mxu1 %vm29_vm15, %v4989_v4 }
 0x8fe   :  { %v4970_v15 = vpop.f32.mrf.mxu0 }
 0x8ff   :  { %v5049_v21 = vpop.f32.mrf.mxu1 }
 0x900   :  { %v5069_v59 = vadd.f32 %v5049_v21, %v4965_v58 }
 0x902   :  { %v5079_v0 = vadd.f32 %v9081_v36, %v5069_v59 }
 0x904   :  { %v5087_v28 = vmax.f32 %v5079_v0, 0.0  ;;  %v4923_v22 = vpop.f32.mrf.mxu3 }
 0x905   :  { %v4968_v1 = vadd.f32 %v4967_v16, %v4923_v22 }
 0x906   :  { %5095 = vst.msk [vmem:[#allocation3 + $0x10] sm:$0xff] %vm1089_vm9, %v5087_v28 }
 0x91e   :  { %v4973_v57 = vpop.f32.mrf.mxu0 }
 0x91f   :  { %v5052_v19 = vpop.f32.mrf.mxu1 }
 0x920   :  { %v5070_v34 = vadd.f32 %v5052_v19, %v4968_v1  ;;  %v6108_v19 = vld [vmem:[%s9412_s3 + $0x2b8] sm:$0xff] }
 0x921   :  { %5222 = vmatpush.msra.mxu2 %v6108_v19 }
 0x922   :  { %v5080_v49 = vadd.f32 %v9081_v36, %v5070_v34  ;;  %v6132_v34 = vld [vmem:[%s9412_s3 + $0x358] sm:$0xff] }
 0x923   :  { %5286 = vmatpush.msra.mxu3 %v6132_v34 }
 0x924   :  { %v5088_v41 = vmax.f32 %v5080_v49, 0.0  ;;  %v4926_v43 = vpop.f32.mrf.mxu3 }
 0x925   :  { %v4971_v3 = vadd.f32 %v4970_v15, %v4926_v43  ;;  %v6130_v43 = vld [vmem:[%s9412_s3 + $0x348] sm:$0xff] }
 0x926   :  { %5096 = vst.msk [vmem:[#allocation3 + $0x18] sm:$0xff] %vm1089_vm9, %v5088_v41  ;;  %v4976_v39 = vpop.f32.mrf.mxu0  ;;  %v6106_v41 = vld [vmem:[%s9412_s3 + $0x2a8] sm:$0xff] }
 0x927   :  { %v5055_v6 = vpop.f32.mrf.mxu1 }
 0x928   :  { %v5071_v17 = vadd.f32 %v5055_v6, %v4971_v3  ;;  %v6129_v3 = vld [vmem:[%s9412_s3 + $0x340] sm:$0xff]  ;;  %v6128_v6 = vld [vmem:[%s9412_s3 + $0x338] sm:$0xff] }
 0x92a   :  { %v5081_v40 = vadd.f32 %v9081_v36, %v5071_v17  ;;  %v6105_v17 = vld [vmem:[%s9412_s3 + $0x2a0] sm:$0xff] }
 0x92c   :  { %v5089_v25 = vmax.f32 %v5081_v40, 0.0  ;;  %v4929_v7 = vpop.f32.mrf.mxu3  ;;  %v6127_v40 = vld [vmem:[%s9412_s3 + $0x330] sm:$0xff] }
 0x92d   :  { %v5102_v31 = vld [vmem:[#allocation3 + $0x10] ss:$2 sm:$0xff]  ;;  %v5106_v42 = vld [vmem:[#allocation3 + $0x11] ss:$2 sm:$0xff]  ;;  %v4974_v30 = vadd.f32 %v4973_v57, %v4929_v7  ;;  %v6123_v7 = vld [vmem:[%s9412_s3 + $0x310] sm:$0xff] }
 0x92e   :  { %5097 = vst.msk [vmem:[#allocation3 + $0x20] sm:$0xff] %vm1089_vm9, %v5089_v25  ;;  %v5110_v2 = vmax.f32 %v5102_v31, %v5106_v42  ;;  %v6126_v25 = vld [vmem:[%s9412_s3 + $0x328] sm:$0xff]  ;;  %v6125_v31 = vld [vmem:[%s9412_s3 + $0x320] sm:$0xff]  ;;  %v6104_v42 = vld [vmem:[%s9412_s3 + $0x298] sm:$0xff] }
 0x92f   :  { %v6100_v57 = vld [vmem:[%s9412_s3 + $0x278] sm:$0xff] }
 0x930   :  { %v5119_v50 = vrot.slane %v5110_v2, 4 }
 0x932   :  { %v5121_v46 = vmax.f32 %v5110_v2, %v5119_v50  ;;  %v6103_v2 = vld [vmem:[%s9412_s3 + $0x290] sm:$0xff]  ;;  %v6102_v50 = vld [vmem:[%s9412_s3 + $0x288] sm:$0xff] }
 0x934   :  { %5122 = vst.msk [vmem:[#allocation4 + $0x4] sm:$0xf] %vm2554_vm5, %v5121_v46  ;;  %v6124_v46 = vld [vmem:[%s9412_s3 + $0x318] sm:$0xff] }
 0x93b   :  { %v9123_v9 = vld [vmem:[#allocation4] sm:$0xff] }
 0x93c   :  { %5156 = vrot.lane.b32.xlu1 %v9123_v9, %s6219_s16  ;;  %v5145_v16 = vmul.f32 %v7715_v32, %v9123_v9  ;;  %v6107_v32 = vld [vmem:[%s9412_s3 + $0x2b0] sm:$0xff]  ;;  %v5135_v12 = vmul.f32 %v7791_v23, %v9123_v9  ;;  %v6122_v23 = vld [vmem:[%s9412_s3 + $0x308] sm:$0xff] }
 0x93d   :  { %5223 = vmatpush.msra.mxu2 %v6107_v32  ;;  %v6098_v9 = vld [vmem:[%s9412_s3 + $0x268] sm:$0xff] }
 0x93e   :  { %v5149_v1 = vrot.slane %v5145_v16, 1 }
 0x93f   :  { %5224 = vmatpush.msra.mxu2 %v6106_v41 }
 0x941   :  { %5225 = vmatpush.msra.mxu2 %v6105_v17 }
 0x943   :  { %5243 = vmatpush.msrb.mxu2 %v6104_v42  ;;  %v6156_v42 = vld [vmem:[%s9412_s3 + $0x408] sm:$0xff] }
 0x945   :  { %5244 = vmatpush.msrb.mxu2 %v6103_v2  ;;  %v2941_v2 = vld [vmem:[%s9414_s5] sm:$0x1] }
 0x947   :  { %5245 = vmatpush.msrb.mxu2 %v6102_v50  ;;  %v2942_v50 = vmul.f32 %v2941_v2, %v8667_v20  ;;  %v6172_v20 = vld [vmem:[%s9412_s3 + $0x478] sm:$0xff] }
 0x949   :  { %5246 = vmatpush.msrb.mxu2 %v6101_v47  ;;  %v6153_v47 = vld [vmem:[%s9412_s3 + $0x3f0] sm:$0xff] }
 0x94b   :  { %5247 = vmatpush.msrb.mxu2 %v6100_v57  ;;  %v6146_v57 = vld [vmem:[%s9412_s3 + $0x3b8] sm:$0xff] }
 0x95f   :  { %v4979_v18 = vpop.f32.mrf.mxu0 }
 0x960   :  { %v5058_v37 = vpop.f32.mrf.mxu1 }
 0x961   :  { %v5072_v35 = vadd.f32 %v5058_v37, %v4974_v30  ;;  %v6099_v30 = vld [vmem:[%s9412_s3 + $0x270] sm:$0xff]  ;;  %v5139_v37 = vrot.slane %v5135_v12, 7  ;;  %v6154_v12 = vld [vmem:[%s9412_s3 + $0x3f8] sm:$0xff] }
 0x962   :  { %5248 = vmatpush.msrb.mxu2 %v6099_v30  ;;  %v6152_v30 = vld [vmem:[%s9412_s3 + $0x3e8] sm:$0xff] }
 0x963   :  { %v5082_v48 = vadd.f32 %v9081_v36, %v5072_v35  ;;  %v6121_v35 = vld [vmem:[%s9412_s3 + $0x300] sm:$0xff] }
 0x964   :  { %5249 = vmatpush.msrb.mxu2 %v6098_v9  ;;  %v6170_v9 = vld [vmem:[%s9412_s3 + $0x468] sm:$0xff] }
 0x965   :  { %v5090_v26 = vmax.f32 %v5082_v48, 0.0  ;;  %v4932_v5 = vpop.f32.mrf.mxu3 }
 0x966   :  { %v4977_v63 = vadd.f32 %v4976_v39, %v4932_v5  ;;  %v6097_v39 = vld [vmem:[%s9412_s3 + $0x260] sm:$0xff] }
 0x967   :  { %5098 = vst.msk [vmem:[#allocation3 + $0x28] sm:$0xff] %vm1089_vm9, %v5090_v26  ;;  %v5144_v26 = vsel %vm637_vm6, 0.0, %v5139_v37  ;;  %5250 = vmatpush.msrb.mxu2 %v6097_v39  ;;  %v6169_v39 = vld [vmem:[%s9412_s3 + $0x460] sm:$0xff] }
 0x968   :  { %v5061_v11 = vpop.f32.mrf.mxu1 }
 0x969   :  { %v5073_v45 = vadd.f32 %v5061_v11, %v4977_v63 }
 0x96b   :  { %v5083_v55 = vadd.f32 %v9081_v36, %v5073_v45  ;;  %v6096_v45 = vld [vmem:[%s9412_s3 + $0x258] sm:$0xff] }
 0x96c   :  { %5251 = vmatpush.msrb.mxu2 %v6096_v45  ;;  %v6141_v45 = vld [vmem:[%s9412_s3 + $0x390] sm:$0xff] }
 0x96d   :  { %v5091_v52 = vmax.f32 %v5083_v55, 0.0  ;;  %v4935_v13 = vpop.f32.mrf.mxu3  ;;  %v6095_v55 = vld [vmem:[%s9412_s3 + $0x250] sm:$0xff] }
 0x96e   :  { %v4980_v24 = vadd.f32 %v4979_v18, %v4935_v13  ;;  %v5103_v56 = vld [vmem:[#allocation3 + $0x20] ss:$2 sm:$0xff]  ;;  %v5107_v27 = vld [vmem:[#allocation3 + $0x21] ss:$2 sm:$0xff]  ;;  %5252 = vmatpush.msrb.mxu2 %v6095_v55 }
 0x96f   :  { %5099 = vst.msk [vmem:[#allocation3 + $0x30] sm:$0xff] %vm1089_vm9, %v5091_v52  ;;  %v5111_v38 = vmax.f32 %v5103_v56, %v5107_v27  ;;  %v6094_v18 = vld [vmem:[%s9412_s3 + $0x248] sm:$0xff]  ;;  %v6093_v52 = vld [vmem:[%s9412_s3 + $0x240] sm:$0xff]  ;;  %v6167_v55 = vld [vmem:[%s9412_s3 + $0x450] sm:$0xff] }
 0x970   :  { %v5064_v62 = vpop.f32.mrf.mxu1  ;;  %5253 = vmatpush.msrb.mxu2 %v6094_v18  ;;  %v6140_v18 = vld [vmem:[%s9412_s3 + $0x388] sm:$0xff] }
 0x971   :  { %v5074_v29 = vadd.f32 %v5064_v62, %v4980_v24  ;;  %v5124_v4 = vrot.slane %v5111_v38, 4 }
 0x972   :  { %5254 = vmatpush.msrb.mxu2 %v6093_v52  ;;  %v6166_v52 = vld [vmem:[%s9412_s3 + $0x448] sm:$0xff] }
 0x973   :  { %v5084_v61 = vadd.f32 %v9081_v36, %v5074_v29  ;;  %v5126_v58 = vmax.f32 %v5111_v38, %v5124_v4 }
 0x975   :  { %v5092_v21 = vmax.f32 %v5084_v61, 0.0  ;;  %5127 = vst.msk [vmem:[#allocation4 + $0x8] sm:$0xf] %vm2554_vm5, %v5126_v58 }
 0x977   :  { %5100 = vst.msk [vmem:[#allocation3 + $0x38] sm:$0xff] %vm1089_vm9, %v5092_v21 }
 0x97e   :  { %v5104_v59 = vld [vmem:[#allocation3 + $0x30] ss:$2 sm:$0xff]  ;;  %v5108_v0 = vld [vmem:[#allocation3 + $0x31] ss:$2 sm:$0xff] }
 0x97f   :  { %v5112_v28 = vmax.f32 %v5104_v59, %v5108_v0 }
 0x981   :  { %v5129_v8 = vrot.slane %v5112_v28, 4 }
 0x983   :  { %v5131_v22 = vmax.f32 %v5112_v28, %v5129_v8 }
 0x985   :  { %5132 = vst.msk [vmem:[#allocation4 + $0xc] sm:$0xf] %vm2554_vm5, %v5131_v22  ;;  %v6187_v22 = vld [vmem:[%s9413_s4 + $0x2] ss:$0 sm:$0xff] }
 0x98c   :  { %v9146_v51 = vld [vmem:[#allocation4 + $0x8] sm:$0xff] }
 0x98d   :  { %5158 = vrot.lane.b32.xlu0 %v9146_v51, %s6219_s16  ;;  %v5146_v36 = vmul.f32 %v7718_v60, %v9146_v51  ;;  %v6131_v60 = vld [vmem:[%s9412_s3 + $0x350] sm:$0xff]  ;;  %v5136_v24 = vmul.f32 %v7788_v44, %v9146_v51 }
 0x98e   :  { %5287 = vmatpush.msra.mxu3 %v6131_v60 }
 0x98f   :  { %v5150_v53 = vrot.slane %v5146_v36, 1  ;;  %v5140_v56 = vrot.slane %v5136_v24, 7  ;;  %v6165_v24 = vld [vmem:[%s9412_s3 + $0x440] sm:$0xff] }
 0x990   :  { %5288 = vmatpush.msra.mxu3 %v6130_v43 }
 0x991   :  { %v5153_v49 = vsel %vm798_vm4, %v5150_v53, 0.0  ;;  %v5151_v15 = vsel %vm798_vm4, %v5149_v1, %v5150_v53  ;;  %v5141_v38 = vsel %vm637_vm6, %v5139_v37, %v5140_v56  ;;  %v6171_v37 = vld [vmem:[%s9412_s3 + $0x470] sm:$0xff]  ;;  %v6138_v56 = vld [vmem:[%s9412_s3 + $0x378] sm:$0xff] }
 0x992   :  { %5165 = vrot.lane.b32.xlu1 %v5153_v49, %s6221_s19  ;;  %5163 = vrot.lane.b32.xlu2 %v5151_v15, %s6221_s19 }
 0x993   :  { %5289 = vmatpush.msra.mxu3 %v6129_v3 }
 0x995   :  { %5290 = vmatpush.msra.mxu3 %v6128_v6 }
 0x997   :  { %5291 = vmatpush.msra.mxu3 %v6127_v40 }
 0x999   :  { %5292 = vmatpush.msra.mxu3 %v6126_v25  ;;  %v6158_v25 = vld [vmem:[%s9412_s3 + $0x418] sm:$0xff] }
 0x99a   :  { %5380 = vmatpush.msrb.mxu0 %v6158_v25 }
 0x99b   :  { %5293 = vmatpush.msra.mxu3 %v6125_v31  ;;  %v6157_v31 = vld [vmem:[%s9412_s3 + $0x410] sm:$0xff] }
 0x99c   :  { %5381 = vmatpush.msrb.mxu0 %v6157_v31  ;;  %v5471_v31 = vld [vmem:[%s9414_s5] sm:$0x1] }
 0x99d   :  { %5294 = vmatpush.msra.mxu3 %v6124_v46  ;;  %v2943_v46 = vsel %vm2937_vm10, %v2942_v50, 0.0  ;;  %v5476_v50 = vld [vmem:[#allocation5] sm:$0x1] }
 0x99e   :  { %5382 = vmatpush.msrb.mxu0 %v6156_v42 }
 0x99f   :  { %5295 = vmatpush.msra.mxu3 %v6123_v7  ;;  %v6145_v7 = vld [vmem:[%s9412_s3 + $0x3b0] sm:$0xff] }
 0x9a1   :  { %5296 = vmatpush.msra.mxu3 %v6122_v23  ;;  %v6144_v23 = vld [vmem:[%s9412_s3 + $0x3a8] sm:$0xff] }
 0x9a3   :  { %5297 = vmatpush.msra.mxu3 %v6121_v35  ;;  %v6151_v35 = vld [vmem:[%s9412_s3 + $0x3e0] sm:$0xff] }
 0x9a5   :  { %5439 = vmatpush.msrb.mxu3 %v6172_v20 }
 0x9a7   :  { %5440 = vmatpush.msrb.mxu3 %v6171_v37 }
 0x9a9   :  { %5441 = vmatpush.msrb.mxu3 %v6170_v9 }
 0x9ab   :  { %5442 = vmatpush.msrb.mxu3 %v6169_v39 }
 0x9ae   :  { %v5157_v48 = vpop.permute.xlu1 %5156 }
 0x9af   :  { %v5169_v5 = vsel %vm1089_vm9, %v5144_v26, %v5157_v48  ;;  %v6143_v48 = vld [vmem:[%s9412_s3 + $0x3a0] sm:$0xff]  ;;  %v6150_v26 = vld [vmem:[%s9412_s3 + $0x3d8] sm:$0xff] }
 0x9ec   :  { %v5164_v63 = vpop.permute.xlu2 %5163 }
 0x9ed   :  { %v5171_v11 = vsel %vm1122_vm11, %v5169_v5, %v5164_v63  ;;  %v6142_v5 = vld [vmem:[%s9412_s3 + $0x398] sm:$0xff] }
 0x9ee   :  { %5174 = vst.msk [vmem:[#allocation2 + $0x18] sm:$0xff] %vm29_vm15, %v5171_v11  ;;  %v6168_v63 = vld [vmem:[%s9412_s3 + $0x458] sm:$0xff]  ;;  %v6149_v11 = vld [vmem:[%s9412_s3 + $0x3d0] sm:$0xff] }
 0x9ef   :  { %5443 = vmatpush.msrb.mxu3 %v6168_v63 }
 0x9f1   :  { %5444 = vmatpush.msrb.mxu3 %v6167_v55 }
 0x9f3   :  { %5445 = vmatpush.msrb.mxu3 %v6166_v52 }
 0x9f5   :  { %v5190_v13 = vld [vmem:[#allocation2 + $0x18] sm:$0xff]  ;;  %5446 = vmatpush.msrb.mxu3 %v6165_v24 }
 0x9f6   :  { %6117 = vmatmul.msk.f32.vlgmr.msra.gmra.mxu2 %vm29_vm15, %v5190_v13  ;;  %v5176_v44 = vld [vmem:[#allocation2 + $0x14] sm:$0xff]  ;;  %v6139_v13 = vld [vmem:[%s9412_s3 + $0x380] sm:$0xff] }
 0x9f7   :  { %5403 = vmatpush.msra.mxu2 %v6146_v57 }
 0x9f9   :  { %5404 = vmatpush.msra.mxu2 %v6145_v7 }
 0x9fb   :  { %5405 = vmatpush.msra.mxu2 %v6144_v23 }
 0x9fd   :  { %5406 = vmatpush.msra.mxu2 %v6143_v48 }
 0x9ff   :  { %v5159_v27 = vpop.permute.xlu0 %5158  ;;  %5407 = vmatpush.msra.mxu2 %v6142_v5 }
 0xa00   :  { %v5170_v62 = vsel %vm1089_vm9, %v5141_v38, %v5159_v27  ;;  %v6164_v27 = vld [vmem:[%s9412_s3 + $0x438] sm:$0xff]  ;;  %v6137_v38 = vld [vmem:[%s9412_s3 + $0x370] sm:$0xff] }
 0xa01   :  { %5408 = vmatpush.msra.mxu2 %v6141_v45  ;;  %5447 = vmatpush.msrb.mxu3 %v6164_v27 }
 0xa03   :  { %5409 = vmatpush.msra.mxu2 %v6140_v18 }
 0xa04   :  { %v5166_v29 = vpop.permute.xlu1 %5165 }
 0xa05   :  { %v5172_v4 = vsel %vm1122_vm11, %v5170_v62, %v5166_v29  ;;  %5410 = vmatpush.msra.mxu2 %v6139_v13  ;;  %v6163_v62 = vld [vmem:[%s9412_s3 + $0x430] sm:$0xff]  ;;  %v6148_v29 = vld [vmem:[%s9412_s3 + $0x3c8] sm:$0xff] }
 0xa06   :  { %5175 = vst.msk [vmem:[#allocation2 + $0x20] sm:$0xff] %vm29_vm15, %v5172_v4  ;;  %v6136_v4 = vld [vmem:[%s9412_s3 + $0x368] sm:$0xff]  ;;  %5448 = vmatpush.msrb.mxu3 %v6163_v62 }
 0xa07   :  { %5411 = vmatpush.msra.mxu2 %v6138_v56 }
 0xa09   :  { %5412 = vmatpush.msra.mxu2 %v6137_v38 }
 0xa0b   :  { %5413 = vmatpush.msra.mxu2 %v6136_v4 }
 0xa0d   :  { %v5191_v14 = vld [vmem:[#allocation2 + $0x20] sm:$0xff] }
 0xa0e   :  { %v5262_v61 = vld [vmem:[#allocation2 + $0x1c] sm:$0xff]  ;;  %6118 = vmatmul.msk.f32.gmra.mxu2 %vm29_vm15, %v5191_v14  ;;  %v5263_v58 = vld [vmem:[#allocation2 + $0x24] sm:$0xff] }
 0xa0f   :  { %6133 = vmatmul.msk.f32.vlgmr.msra.gmra.mxu3 %vm29_vm15, %v5262_v61  ;;  %5345 = vst.msk [vmem:[#allocation2 + $0x1c] sm:$0x3] %vm2810_vm14, %v9447_v54  ;;  %v6162_v14 = vld [vmem:[%s9412_s3 + $0x428] sm:$0xff] }
 0xa10   :  { %5449 = vmatpush.msrb.mxu3 %v6162_v14 }
 0xa16   :  { %6119 = vmatmul.msk.f32.vlgmr.msrb.gmra.mxu2 %vm29_vm15, %v5176_v44  ;;  %v6135_v44 = vld [vmem:[%s9412_s3 + $0x360] sm:$0xff] }
 0xa17   :  { %6134 = vmatmul.msk.f32.gmra.mxu3 %vm29_vm15, %v5263_v58  ;;  %v6161_v58 = vld [vmem:[%s9412_s3 + $0x420] sm:$0xff]  ;;  %5414 = vmatpush.msra.mxu2 %v6135_v44 }
 0xa18   :  { %5450 = vmatpush.msrb.mxu3 %v6161_v58 }
 0xa1e   :  { %6120 = vmatmul.msk.f32.gmra.mxu2 %vm29_vm15, %v5262_v61  ;;  %v6147_v61 = vld [vmem:[%s9412_s3 + $0x3c0] sm:$0xff] }
 0xa79   :  { %v5227_v21 = vpop.f32.mrf.mxu2 }
 0xa91   :  { %v5230_v59 = vpop.f32.mrf.mxu2 }
 0xa92   :  { %v5299_v0 = vpop.f32.mrf.mxu3 }
 0xa99   :  { %v5256_v28 = vpop.f32.mrf.mxu2 }
 0xa9a   :  { %v5257_v8 = vadd.f32 %v5256_v28, %v5227_v21  ;;  %v5302_v1 = vpop.f32.mrf.mxu3 }
 0xa9c   :  { %v5305_v16 = vadd.f32 %v5299_v0, %v5257_v8 }
 0xa9e   :  { %v5309_v51 = vadd.f32 %v6187_v22, %v5305_v16 }
 0xaa0   :  { %v5311_v54 = vmax.f32 %v5309_v51, 0.0 }
 0xaa1   :  { %v5259_v36 = vpop.f32.mrf.mxu2 }
 0xaa2   :  { %5313 = vst.msk [vmem:[#allocation3] sm:$0xff] %vm1089_vm9, %v5311_v54  ;;  %v5260_v53 = vadd.f32 %v5259_v36, %v5230_v59 }
 0xaa4   :  { %v5306_v19 = vadd.f32 %v5302_v1, %v5260_v53 }
 0xaa6   :  { %v5310_v34 = vadd.f32 %v6187_v22, %v5306_v19 }
 0xaa8   :  { %v5312_v32 = vmax.f32 %v5310_v34, 0.0 }
 0xaaa   :  { %5314 = vst.msk [vmem:[#allocation3 + $0x8] sm:$0xff] %vm1089_vm9, %v5312_v32 }
 0xab1   :  { %v5315_v60 = vld [vmem:[#allocation3] ss:$2 sm:$0xff]  ;;  %v5316_v49 = vld [vmem:[#allocation3 + $0x1] ss:$2 sm:$0xff] }
 0xab2   :  { %v5317_v15 = vmax.f32 %v5315_v60, %v5316_v49  ;;  %v6188_v60 = vld [vmem:[%s9413_s4 + $0x3] ss:$0 sm:$0xff]  ;;  %s6222_s4 = smov 1  }
 0xab4   :  { %v5319_v41 = vrot.slane %v5317_v15, 2 }
 0xab6   :  { %v5321_v43 = vmax.f32 %v5317_v15, %v5319_v41 }
 0xab8   :  { %5322 = vst.msk [vmem:[#allocation4] sm:$0x3] %vm2778_vm2, %v5321_v43 }
 0xab9   :  { %5323 = vst.msk [vmem:[#allocation4 - $0x2] sm:$0x30] %vm2780_vm3, %v5321_v43 }
 0xac0   :  { %v9267_v3 = vld [vmem:[#allocation4] sm:$0xf] }
 0xac1   :  { %5336 = vrot.lane.b32.xlu2 %v9267_v3, %s6219_s16  ;;  %v5330_v6 = vmul.f32 %v7878_v10, %v9267_v3  ;;  %v6155_v10 = vld [vmem:[%s9412_s3 + $0x400] sm:$0xff]  ;;  %v5325_v21 = vmul.f32 %v7952_v33, %v9267_v3  ;;  %v2946_v33 = vld [vmem:[#allocation5] sm:$0x1] }
 0xac2   :  { %5383 = vmatpush.msrb.mxu0 %v6155_v10 }
 0xac3   :  { %v5332_v17 = vrot.slane %v5330_v6, 1  ;;  %v5327_v59 = vrot.slane %v5325_v21, 7 }
 0xac4   :  { %5384 = vmatpush.msrb.mxu0 %v6154_v12 }
 0xac5   :  { %v5334_v40 = vsel %vm167_vm0, %v5332_v17, 0.0  ;;  %v5329_v28 = vsel %vm637_vm6, 0.0, %v5327_v59  ;;  %vm2948_vm0 = vcmask 0  }
 0xac6   :  { %5340 = vrot.lane.b32.xlu0 %v5334_v40, %s6221_s19  ;;  %5385 = vmatpush.msrb.mxu0 %v6153_v47 }
 0xac8   :  { %5386 = vmatpush.msrb.mxu0 %v6152_v30 }
 0xaca   :  { %5387 = vmatpush.msrb.mxu0 %v6151_v35 }
 0xacc   :  { %5388 = vmatpush.msrb.mxu0 %v6150_v26 }
 0xace   :  { %5389 = vmatpush.msrb.mxu0 %v6149_v11 }
 0xad0   :  { %5390 = vmatpush.msrb.mxu0 %v6148_v29 }
 0xad2   :  { %5391 = vmatpush.msrb.mxu0 %v6147_v61 }
 0xaea   :  { %2944 = vadd.xlane.f32.xlu2 %v2943_v46 }
 0xb1b   :  { %v5337_v0 = vpop.permute.xlu2 %5336 }
 0xb1c   :  { %v5343_v8 = vsel %vm1089_vm9, %v5329_v28, %v5337_v0 }
 0xb38   :  { %v5341_v22 = vpop.permute.xlu0 %5340 }
 0xb39   :  { %v5344_v16 = vsel %vm1122_vm11, %v5343_v8, %v5341_v22 }
 0xb3a   :  { %5346 = vst.msk [vmem:[#allocation2 + $0x18] sm:$0xf] %vm2625_vm12, %v5344_v16 }
 0xb41   :  { %v5360_v51 = vld [vmem:[#allocation2 + $0x18] sm:$0xf] }
 0xb42   :  { %v5347_v54 = vld [vmem:[#allocation2 + $0x16] sm:$0xf]  ;;  %v5419_v36 = vld [vmem:[#allocation2 + $0x1a] sm:$0xf]  ;;  %6159 = vmatmul.msk.f32.vlgmr.msrb.gmra.mxu0 %vm29_vm15, %v5360_v51 }
 0xb43   :  { %6160 = vmatmul.msk.f32.vlgmr.msra.gmra.mxu2 %vm29_vm15, %v5347_v54  ;;  %6173 = vmatmul.msk.f32.vlgmr.msrb.gmra.mxu3 %vm29_vm15, %v5419_v36 }
 0xb5d   :  { %v2945_v53 = vpop.xlane.xlu2 %2944 }
 0xb5e   :  { %v2947_v1 = vadd.f32 %v2946_v33, %v2945_v53 }
 0xb60   :  { %2949 = vst.msk [vmem:[#allocation6] sm:$0x1] %vm2948_vm0, %v2947_v1 }
 0xbbf   :  { %v5393_v19 = vpop.f32.mrf.mxu0 }
 0xbc6   :  { %v5416_v34 = vpop.f32.mrf.mxu2  ;;  %v5452_v49 = vpop.f32.mrf.mxu3 }
 0xbc7   :  { %v5417_v32 = vadd.f32 %v5416_v34, %v5393_v19 }
 0xbc9   :  { %v5455_v15 = vadd.f32 %v5452_v49, %v5417_v32 }
 0xbcb   :  { %v5458_v41 = vadd.f32 %v6188_v60, %v5455_v15 }
 0xbcd   :  { %v5459_v43 = vmax.f32 %v5458_v41, 0.0 }
 0xbcf   :  { %5460 = vst.msk [vmem:[#allocation3] sm:$0xf] %vm2554_vm5, %v5459_v43 }
 0xbd6   :  { %v5461_v3 = vld [vmem:[#allocation3] ss:$2 sm:$0x3]  ;;  %v5462_v6 = vld [vmem:[#allocation3 + $0x1] ss:$2 sm:$0x3] }
 0xbd7   :  { %v5463_v17 = vmax.f32 %v5461_v3, %v5462_v6 }
 0xbd9   :  { %v5465_v40 = vrot.slane %v5463_v17, 1 }
 0xbdb   :  { %v5467_v25 = vmax.f32 %v5463_v17, %v5465_v40 }
 0xbdd   :  { %5468 = vst.msk [vmem:[#allocation4] sm:$0x1] %vm2937_vm10, %v5467_v25 }
 0xbe4   :  { %v5469_v42 = vld [vmem:[#allocation4] sm:$0x1] }
 0xbe5   :  { %v5472_v10 = vmul.f32 %v5471_v31, %v5469_v42 }
 0xbe7   :  { %v5473_v2 = vsel %vm2937_vm10, %v5472_v10, 0.0 }
 0xbe8   :  { %5474 = vadd.xlane.f32.xlu1 %v5473_v2 }
 0xc5b   :  { %v5475_v46 = vpop.xlane.xlu1 %5474 }
 0xc5c   :  { %v5477_v12 = vadd.f32 %v5476_v50, %v5475_v46 }
 0xc5e   :  { %5479 = vrot.lane.b32.xlu0 %v5477_v12, %s6222_s4 }
 0xcd0   :  { %v5480_v47 = vpop.permute.xlu0 %5479 }
 0xcd1   :  { %5483 = vst.msk [vmem:[#allocation6] sm:$0x1] %vm5482_vm1, %v5480_v47 }
 0xcd2   :  { %5494 = dma.vmem_to_hbm [thread:$0]  %s5490_s18, 16, %s5492_s21, [#allocation7]  }
 0xcd3   :  { %6217 = dma.done.wait [#allocation7], 16  }
 0xcd4   :  { %6218 = vsyncadd [#allocation7], 4294967280 }
 0xcd5   :  { %5499 = vsyncpa [#allocation7], 1 }

</bundles_post_ra>
